<compile_context>
chip_gen: v7x
topology: tpu7x:2x2x1
jax: 0.10.0
libtpu: 0.0.40
codegen_flags: <defaults>
</compile_context>

<pallas_src>
import functools

import jax
import jax.numpy as jnp
from jax.experimental import pallas as pl
from jax.experimental.pallas import tpu as pltpu


def _round_up(x, m):
    return ((x + m - 1) // m) * m


def _cdiv(a, b):
    return -(-a // b)


def _tensorcores_per_chip():
    # v7x has 2 TensorCores per chip (work sharded across them via "parallel"
    # grid axes); v5e / v6e have 1.  Conservative fallback: 1.
    try:
        kind = jax.devices()[0].device_kind.lower()
    except Exception:
        return 1
    return 2 if ("v7" in kind or "7x" in kind) else 1


_TC_PER_CHIP = _tensorcores_per_chip()

# (cin, cin_padded, cout, cout_padded, stride).  Padded counts are the
# 128-lane-aligned channel widths the activations actually carry.
_CONV_CFG = [
    (3,   3,   96,  128, (2, 2)),
    (96,  128, 256, 256, (2, 2)),
    (256, 256, 384, 384, (1, 1)),
    (384, 384, 384, 384, (1, 1)),
    (384, 384, 256, 256, (1, 1)),
]


# ----------------------------- Pallas kernel -------------------------------

def _mm_bias_relu_kernel(x_ref, w_ref, b_ref, o_ref, *, relu):
    # bf16 (tm, K) @ bf16 (K, tn) on the MXU with f32 accumulation, fused
    # f32 bias (folded BatchNorm shift) + ReLU epilogue, cast to out dtype.
    # NOTE: edge M blocks contain unspecified rows (non-divisible grid); do
    # not add any cross-row reduction here or the junk rows would leak.
    acc = jnp.dot(x_ref[...], w_ref[...], preferred_element_type=jnp.float32)
    y = acc + b_ref[...]
    if relu:
        y = jnp.maximum(y, 0.0)
    o_ref[...] = y.astype(o_ref.dtype)


def matmul_bias_relu(x2d, wp, bp, *, relu=True, out_dtype=jnp.bfloat16,
                     tm_max=512):
    """relu(x2d @ wp + bp) as one Pallas MXU kernel.

    x2d: (M, K) activations (cast to bf16 here).
    wp : (K, Np) bf16 weights with BN scale pre-folded, Np % 128 == 0.
    bp : (1, Np) f32 bias (folded BN shift).
    Returns (M, Np) — no M padding, no channel slicing.
    """
    M, K = x2d.shape
    Kw, Np = wp.shape
    assert Kw == K and Np % 128 == 0

    # Tile-count-aware tm: choose the number of M tiles first, then the tile
    # size, so edge-block waste is minimal (M=546 -> tm=288, not 512).
    n_m = _cdiv(M, tm_max)
    tm = _round_up(_cdiv(M, n_m), 16)
    m_tiles = _cdiv(M, tm)

    # Full-N tiles (fewest grid steps) unless this layer's M axis cannot feed
    # every TensorCore; then split N into 128-wide tiles (v7x: 2 TCs/chip).
    tn = Np if m_tiles >= _TC_PER_CHIP else 128
    n_tiles = Np // tn

    x = x2d.astype(jnp.bfloat16)
    kernel = functools.partial(_mm_bias_relu_kernel, relu=relu)

    # Put the axis with more tiles first so megacore sharding sees it.
    if m_tiles >= n_tiles:
        grid = (m_tiles, n_tiles)
        x_map, w_map = (lambda i, j: (i, 0)), (lambda i, j: (0, j))
        b_map, o_map = (lambda i, j: (0, j)), (lambda i, j: (i, j))
    else:
        grid = (n_tiles, m_tiles)
        x_map, w_map = (lambda j, i: (i, 0)), (lambda j, i: (0, j))
        b_map, o_map = (lambda j, i: (0, j)), (lambda j, i: (i, j))

    return pl.pallas_call(
        kernel,
        out_shape=jax.ShapeDtypeStruct((M, Np), out_dtype),
        grid=grid,
        in_specs=[
            pl.BlockSpec((tm, K), x_map),   # K = full (unpadded) dim
            pl.BlockSpec((K, tn), w_map),
            pl.BlockSpec((1, tn), b_map),
        ],
        out_specs=pl.BlockSpec((tm, tn), o_map),
        compiler_params=pltpu.CompilerParams(
            dimension_semantics=("parallel", "parallel")),
    )(x, wp, bp)


# ------------------------------ im2col glue --------------------------------

def _im2col(x, stride):
    """3x3 / pad-0 im2col for lane-dense inputs (C a multiple of 128).
    Returns (N*OH*OW, 9*C) with K-order (dy, dx, c), plus (OH, OW)."""
    N, H, W, C = x.shape
    sh, sw = stride
    OH = (H - 3) // sh + 1
    OW = (W - 3) // sw + 1
    cols = [x[:, dy:dy + sh * OH:sh, dx:dx + sw * OW:sw, :]
            for dy in range(3) for dx in range(3)]
    patches = jnp.stack(cols, axis=-2).reshape(N * OH * OW, 9 * C)
    return patches, OH, OW


def _im2col_rgb_s2(x):
    """3x3 / stride-2 / pad-0 im2col for the 3-channel input layer.

    Works on a channel-flattened (N, H, W*3) view so every slice / reshape is
    lane-dense instead of nine 3/128-lane-sparse strided copies.
    K-order is (dy, dx, c), identical to _im2col."""
    N, H, W, C = x.shape
    sh, sw = 2, 2
    OH = (H - 3) // sh + 1
    OW = (W - 3) // sw + 1
    win, step = 3 * C, sw * C                       # window 9, stride 6
    xr = x.reshape(N, H, W * C)
    taps = []
    for dy in range(3):
        rows = xr[:, dy:dy + sh * OH:sh, :]         # (N, OH, W*C)
        need = step * (OW + 1)
        if need > W * C:                            # over-read guard (values
            rows = jnp.pad(rows, ((0, 0), (0, 0), (0, need - W * C)))  # unused)
        a = rows[:, :, :step * OW].reshape(N, OH, OW, step)          # dx = 0,1
        b = rows[:, :, step:step * (OW + 1)].reshape(N, OH, OW, step)
        taps.append(jnp.concatenate([a, b[..., :win - step]], -1))   # + dx = 2
    patches = jnp.concatenate(taps, axis=-1)        # (N, OH, OW, 27)
    return patches.reshape(N * OH * OW, 9 * C), OH, OW


# ------------------------------- layers ------------------------------------

def conv_bn_relu(x, wp, bp, cout_pad, stride, *, rgb=False):
    """SpatioConv: Conv2d(3x3, stride, pad=0, bias=False) + folded BN + ReLU."""
    N = x.shape[0]
    if rgb:
        patches, OH, OW = _im2col_rgb_s2(x)
    else:
        patches, OH, OW = _im2col(x, stride)
    out = matmul_bias_relu(patches, wp, bp, relu=True)
    return out.reshape(N, OH, OW, cout_pad)


def maxpool_3x3_s2_p1(x):
    """MaxPool2d(kernel=3, stride=2, padding=1) on NHWC bf16 input.
    Fused XLA max-tree over the 9 shifted views — no (9,M,C) stack, no extra
    kernel launch (perf review)."""
    N, H, W, C = x.shape
    OH = (H - 1) // 2 + 1
    OW = (W - 1) // 2 + 1
    xp = jnp.pad(x, ((0, 0), (1, 1), (1, 1), (0, 0)), constant_values=-jnp.inf)
    out = None
    for dy in range(3):
        for dx in range(3):
            v = xp[:, dy:dy + 2 * OH:2, dx:dx + 2 * OW:2, :]
            out = v if out is None else jnp.maximum(out, v)
    return out


# ------------------------------ parameters ----------------------------------

def init_params(key):
    """Deterministic synthetic parameters, pre-folded / pre-padded for TPU.

    Porting caveat: weights are generated in (kh, kw, cin, cout) to match the
    (dy, dx, cin) im2col K-order; real PyTorch weights (cout, cin, kh, kw)
    must be permuted with transpose(2, 3, 1, 0) before this packing."""
    eps = 1e-5
    convs = []
    for cin, cin_pad, cout, cout_pad, _ in _CONV_CFG:
        key, k1, k2, k3, k4, k5 = jax.random.split(key, 6)
        fan_in = 9 * cin
        w = jax.random.normal(k1, (3, 3, cin, cout), jnp.float32) * (2.0 / fan_in) ** 0.5
        gamma = 1.0 + 0.1 * jax.random.normal(k2, (cout,), jnp.float32)
        beta = 0.1 * jax.random.normal(k3, (cout,), jnp.float32)
        mean = 0.1 * jax.random.normal(k4, (cout,), jnp.float32)
        var = 1.0 + 0.1 * jax.random.uniform(k5, (cout,), jnp.float32)
        # Fold inference-mode BatchNorm: scale into the weight columns (bf16),
        # shift kept as an f32 bias.
        scale = gamma / jnp.sqrt(var + eps)
        bias = beta - mean * scale
        w = w * scale[None, None, None, :]
        wp = jnp.zeros((3, 3, cin_pad, cout_pad), jnp.float32)
        wp = wp.at[:, :, :cin, :cout].set(w)
        wp = wp.reshape(9 * cin_pad, cout_pad).astype(jnp.bfloat16)
        bp = jnp.zeros((1, cout_pad), jnp.float32).at[0, :cout].set(bias)
        convs.append((wp, bp))
    key, kw, kb = jax.random.split(key, 3)
    lin_w = (jax.random.normal(kw, (768, 256), jnp.float32)
             * (1.0 / 768) ** 0.5).astype(jnp.bfloat16)
    lin_b = 0.01 * jax.random.normal(kb, (256,), jnp.float32)
    return convs, lin_w, lin_b


# ------------------------------- forward ------------------------------------

@jax.jit
def base_model_forward(x_nchw, params):
    convs, lin_w, lin_b = params
    # NCHW (PyTorch boundary) -> NHWC (kernel layout), bf16 activations.
    x = jnp.transpose(x_nchw, (0, 2, 3, 1)).astype(jnp.bfloat16)

    def conv(i, x):
        _, _, _, cout_pad, stride = _CONV_CFG[i]
        wp, bp = convs[i]
        return conv_bn_relu(x, wp, bp, cout_pad, stride, rgb=(i == 0))

    x = conv(0, x)              # (N, 55, 87, 128)  (96 real ch + 32 exact zeros)
    x = maxpool_3x3_s2_p1(x)    # (N, 28, 44, 128)
    x = conv(1, x)              # (N, 13, 21, 256)
    x = maxpool_3x3_s2_p1(x)    # (N,  7, 11, 256)
    x = conv(2, x)              # (N,  5,  9, 384)
    x = conv(3, x)              # (N,  3,  7, 384)
    x = conv(4, x)              # (N,  1,  5, 256)
    x = maxpool_3x3_s2_p1(x)    # (N,  1,  3, 256)

    # Flatten in PyTorch's NCHW order: x.view(N, -1) over (C, H, W).
    N = x.shape[0]
    x = jnp.transpose(x, (0, 3, 1, 2)).reshape(N, -1)
    assert x.shape[1] == 768, f"flattened features = {x.shape[1]}, expected 768"

    # Final Linear(768, 256) at M=2: a standalone pallas_call is pure
    # launch/DMA overhead (perf review) — plain XLA dot, f32 accumulation.
    y = jnp.dot(x, lin_w, preferred_element_type=jnp.float32) + lin_b
    return y


if __name__ == "__main__":
    key = jax.random.PRNGKey(0)
    kx, kp = jax.random.split(key)
    # (2, 3, 112, 176) is the natural input implied by the module: the
    # conv/pool stack maps it to 256 x 1 x 3 = 768 features = Linear(768, 256).
    x = jax.random.normal(kx, (2, 3, 112, 176), jnp.float32)
    params = init_params(kp)

    y = jax.block_until_ready(base_model_forward(x, params))
    assert y.shape == (2, 256) and y.dtype == jnp.float32
    print("KERNEL_OK")
</pallas_src>

<mosaic_0001>
module attributes {stable_mosaic.version = 11 : i64} {
  func.func @_mm_bias_relu_kernel(%arg0: i32, %arg1: i32, %arg2: memref<512x27xbf16, #tpu.memory_space<vmem>>, %arg3: memref<27x128xbf16, #tpu.memory_space<vmem>>, %arg4: memref<1x128xf32, #tpu.memory_space<vmem>>, %arg5: memref<512x128xbf16, #tpu.memory_space<vmem>>) attributes {dimension_semantics = [#tpu.dimension_semantics<parallel>, #tpu.dimension_semantics<parallel>], iteration_bounds = array<i64: 19, 1>, scalar_prefetch = 0 : i64, scratch_operands = 0 : i64, tpu.core_type = #tpu.core_type<tc>, window_params = [{transform_indices = @transform_0, window_bounds = array<i64: 512, 27>}, {transform_indices = @transform_1, window_bounds = array<i64: 27, 128>}, {transform_indices = @transform_2, window_bounds = array<i64: 1, 128>}, {transform_indices = @transform_3, window_bounds = array<i64: 512, 128>}]} {
    %c0 = arith.constant 0 : index
    %c0_0 = arith.constant 0 : index
    %0 = vector.load %arg2[%c0, %c0_0] : memref<512x27xbf16, #tpu.memory_space<vmem>>, vector<512x27xbf16>
    %c0_1 = arith.constant 0 : index
    %c0_2 = arith.constant 0 : index
    %1 = vector.load %arg3[%c0_1, %c0_2] : memref<27x128xbf16, #tpu.memory_space<vmem>>, vector<27x128xbf16>
    %cst = arith.constant dense<0.000000e+00> : vector<512x128xf32>
    %2 = tpu.matmul %0, %1, %cst {dimension_numbers = #tpu.dot_dimension_numbers<[1], [0], [0], [1], [0, 0, 1, 1], [], []>} : vector<512x27xbf16>, vector<27x128xbf16>, vector<512x128xf32> -> vector<512x128xf32>
    %c0_3 = arith.constant 0 : index
    %c0_4 = arith.constant 0 : index
    %3 = vector.load %arg4[%c0_3, %c0_4] : memref<1x128xf32, #tpu.memory_space<vmem>>, vector<1x128xf32>
    %4 = vector.broadcast %3 : vector<1x128xf32> to vector<512x128xf32>
    %5 = arith.addf %2, %4 : vector<512x128xf32>
    %cst_5 = arith.constant 0.000000e+00 : f32
    %6 = vector.broadcast %cst_5 : f32 to vector<512x128xf32>
    %7 = arith.maximumf %5, %6 : vector<512x128xf32>
    %8 = arith.truncf %7 : vector<512x128xf32> to vector<512x128xbf16>
    %c0_6 = arith.constant 0 : index
    %c0_7 = arith.constant 0 : index
    %9 = vector.load %arg5[%c0_6, %c0_7] : memref<512x128xbf16, #tpu.memory_space<vmem>>, vector<512x128xbf16>
    tpu.vector_store %arg5[%c0_6, %c0_7], %8 {strides = array<i32>} : memref<512x128xbf16, #tpu.memory_space<vmem>>, vector<512x128xbf16>,
    return
  }
  func.func @transform_0(%arg0: i32, %arg1: i32) -> (i32, i32) {
    %c0_i32 = arith.constant 0 : i32
    %c0_i32_0 = arith.constant 0 : i32
    return %arg0, %c0_i32 : i32, i32
  }
  func.func @transform_1(%arg0: i32, %arg1: i32) -> (i32, i32) {
    %c0_i32 = arith.constant 0 : i32
    %c0_i32_0 = arith.constant 0 : i32
    return %c0_i32, %arg1 : i32, i32
  }
  func.func @transform_2(%arg0: i32, %arg1: i32) -> (i32, i32) {
    %c0_i32 = arith.constant 0 : i32
    %c0_i32_0 = arith.constant 0 : i32
    return %c0_i32, %arg1 : i32, i32
  }
  func.func @transform_3(%arg0: i32, %arg1: i32) -> (i32, i32) {
    %c0_i32 = arith.constant 0 : i32
    return %arg0, %arg1 : i32, i32
  }
}

module attributes {stable_mosaic.version = 11 : i64} {
  func.func @_mm_bias_relu_kernel(%arg0: i32, %arg1: i32, %arg2: memref<288x1152xbf16, #tpu.memory_space<vmem>>, %arg3: memref<1152x256xbf16, #tpu.memory_space<vmem>>, %arg4: memref<1x256xf32, #tpu.memory_space<vmem>>, %arg5: memref<288x256xbf16, #tpu.memory_space<vmem>>) attributes {dimension_semantics = [#tpu.dimension_semantics<parallel>, #tpu.dimension_semantics<parallel>], iteration_bounds = array<i64: 2, 1>, scalar_prefetch = 0 : i64, scratch_operands = 0 : i64, tpu.core_type = #tpu.core_type<tc>, window_params = [{transform_indices = @transform_0, window_bounds = array<i64: 288, 1152>}, {transform_indices = @transform_1, window_bounds = array<i64: 1152, 256>}, {transform_indices = @transform_2, window_bounds = array<i64: 1, 256>}, {transform_indices = @transform_3, window_bounds = array<i64: 288, 256>}]} {
    %c0 = arith.constant 0 : index
    %c0_0 = arith.constant 0 : index
    %0 = vector.load %arg2[%c0, %c0_0] : memref<288x1152xbf16, #tpu.memory_space<vmem>>, vector<288x1152xbf16>
    %c0_1 = arith.constant 0 : index
    %c0_2 = arith.constant 0 : index
    %1 = vector.load %arg3[%c0_1, %c0_2] : memref<1152x256xbf16, #tpu.memory_space<vmem>>, vector<1152x256xbf16>
    %cst = arith.constant dense<0.000000e+00> : vector<288x256xf32>
    %2 = tpu.matmul %0, %1, %cst {dimension_numbers = #tpu.dot_dimension_numbers<[1], [0], [0], [1], [0, 0, 1, 1], [], []>} : vector<288x1152xbf16>, vector<1152x256xbf16>, vector<288x256xf32> -> vector<288x256xf32>
    %c0_3 = arith.constant 0 : index
    %c0_4 = arith.constant 0 : index
    %3 = vector.load %arg4[%c0_3, %c0_4] : memref<1x256xf32, #tpu.memory_space<vmem>>, vector<1x256xf32>
    %4 = vector.broadcast %3 : vector<1x256xf32> to vector<288x256xf32>
    %5 = arith.addf %2, %4 : vector<288x256xf32>
    %cst_5 = arith.constant 0.000000e+00 : f32
    %6 = vector.broadcast %cst_5 : f32 to vector<288x256xf32>
    %7 = arith.maximumf %5, %6 : vector<288x256xf32>
    %8 = arith.truncf %7 : vector<288x256xf32> to vector<288x256xbf16>
    %c0_6 = arith.constant 0 : index
    %c0_7 = arith.constant 0 : index
    %9 = vector.load %arg5[%c0_6, %c0_7] : memref<288x256xbf16, #tpu.memory_space<vmem>>, vector<288x256xbf16>
    tpu.vector_store %arg5[%c0_6, %c0_7], %8 {strides = array<i32>} : memref<288x256xbf16, #tpu.memory_space<vmem>>, vector<288x256xbf16>,
    return
  }
  func.func @transform_0(%arg0: i32, %arg1: i32) -> (i32, i32) {
    %c0_i32 = arith.constant 0 : i32
    %c0_i32_0 = arith.constant 0 : i32
    return %arg0, %c0_i32 : i32, i32
  }
  func.func @transform_1(%arg0: i32, %arg1: i32) -> (i32, i32) {
    %c0_i32 = arith.constant 0 : i32
    %c0_i32_0 = arith.constant 0 : i32
    return %c0_i32, %arg1 : i32, i32
  }
  func.func @transform_2(%arg0: i32, %arg1: i32) -> (i32, i32) {
    %c0_i32 = arith.constant 0 : i32
    %c0_i32_0 = arith.constant 0 : i32
    return %c0_i32, %arg1 : i32, i32
  }
  func.func @transform_3(%arg0: i32, %arg1: i32) -> (i32, i32) {
    %c0_i32 = arith.constant 0 : i32
    return %arg0, %arg1 : i32, i32
  }
}

module attributes {stable_mosaic.version = 11 : i64} {
  func.func @_mm_bias_relu_kernel(%arg0: i32, %arg1: i32, %arg2: memref<96x2304xbf16, #tpu.memory_space<vmem>>, %arg3: memref<2304x384xbf16, #tpu.memory_space<vmem>>, %arg4: memref<1x384xf32, #tpu.memory_space<vmem>>, %arg5: memref<96x384xbf16, #tpu.memory_space<vmem>>) attributes {dimension_semantics = [#tpu.dimension_semantics<parallel>, #tpu.dimension_semantics<parallel>], iteration_bounds = array<i64: 1, 1>, scalar_prefetch = 0 : i64, scratch_operands = 0 : i64, tpu.core_type = #tpu.core_type<tc>, window_params = [{transform_indices = @transform_0, window_bounds = array<i64: 96, 2304>}, {transform_indices = @transform_1, window_bounds = array<i64: 2304, 384>}, {transform_indices = @transform_2, window_bounds = array<i64: 1, 384>}, {transform_indices = @transform_3, window_bounds = array<i64: 96, 384>}]} {
    %c0 = arith.constant 0 : index
    %c0_0 = arith.constant 0 : index
    %0 = vector.load %arg2[%c0, %c0_0] : memref<96x2304xbf16, #tpu.memory_space<vmem>>, vector<96x2304xbf16>
    %c0_1 = arith.constant 0 : index
    %c0_2 = arith.constant 0 : index
    %1 = vector.load %arg3[%c0_1, %c0_2] : memref<2304x384xbf16, #tpu.memory_space<vmem>>, vector<2304x384xbf16>
    %cst = arith.constant dense<0.000000e+00> : vector<96x384xf32>
    %2 = tpu.matmul %0, %1, %cst {dimension_numbers = #tpu.dot_dimension_numbers<[1], [0], [0], [1], [0, 0, 1, 1], [], []>} : vector<96x2304xbf16>, vector<2304x384xbf16>, vector<96x384xf32> -> vector<96x384xf32>
    %c0_3 = arith.constant 0 : index
    %c0_4 = arith.constant 0 : index
    %3 = vector.load %arg4[%c0_3, %c0_4] : memref<1x384xf32, #tpu.memory_space<vmem>>, vector<1x384xf32>
    %4 = vector.broadcast %3 : vector<1x384xf32> to vector<96x384xf32>
    %5 = arith.addf %2, %4 : vector<96x384xf32>
    %cst_5 = arith.constant 0.000000e+00 : f32
    %6 = vector.broadcast %cst_5 : f32 to vector<96x384xf32>
    %7 = arith.maximumf %5, %6 : vector<96x384xf32>
    %8 = arith.truncf %7 : vector<96x384xf32> to vector<96x384xbf16>
    %c0_6 = arith.constant 0 : index
    %c0_7 = arith.constant 0 : index
    %9 = vector.load %arg5[%c0_6, %c0_7] : memref<96x384xbf16, #tpu.memory_space<vmem>>, vector<96x384xbf16>
    tpu.vector_store %arg5[%c0_6, %c0_7], %8 {strides = array<i32>} : memref<96x384xbf16, #tpu.memory_space<vmem>>, vector<96x384xbf16>,
    return
  }
  func.func @transform_0(%arg0: i32, %arg1: i32) -> (i32, i32) {
    %c0_i32 = arith.constant 0 : i32
    %c0_i32_0 = arith.constant 0 : i32
    return %arg0, %c0_i32 : i32, i32
  }
  func.func @transform_1(%arg0: i32, %arg1: i32) -> (i32, i32) {
    %c0_i32 = arith.constant 0 : i32
    %c0_i32_0 = arith.constant 0 : i32
    return %c0_i32, %arg1 : i32, i32
  }
  func.func @transform_2(%arg0: i32, %arg1: i32) -> (i32, i32) {
    %c0_i32 = arith.constant 0 : i32
    %c0_i32_0 = arith.constant 0 : i32
    return %c0_i32, %arg1 : i32, i32
  }
  func.func @transform_3(%arg0: i32, %arg1: i32) -> (i32, i32) {
    %c0_i32 = arith.constant 0 : i32
    return %arg0, %arg1 : i32, i32
  }
}

module attributes {stable_mosaic.version = 11 : i64} {
  func.func @_mm_bias_relu_kernel(%arg0: i32, %arg1: i32, %arg2: memref<48x3456xbf16, #tpu.memory_space<vmem>>, %arg3: memref<3456x384xbf16, #tpu.memory_space<vmem>>, %arg4: memref<1x384xf32, #tpu.memory_space<vmem>>, %arg5: memref<48x384xbf16, #tpu.memory_space<vmem>>) attributes {dimension_semantics = [#tpu.dimension_semantics<parallel>, #tpu.dimension_semantics<parallel>], iteration_bounds = array<i64: 1, 1>, scalar_prefetch = 0 : i64, scratch_operands = 0 : i64, tpu.core_type = #tpu.core_type<tc>, window_params = [{transform_indices = @transform_0, window_bounds = array<i64: 48, 3456>}, {transform_indices = @transform_1, window_bounds = array<i64: 3456, 384>}, {transform_indices = @transform_2, window_bounds = array<i64: 1, 384>}, {transform_indices = @transform_3, window_bounds = array<i64: 48, 384>}]} {
    %c0 = arith.constant 0 : index
    %c0_0 = arith.constant 0 : index
    %0 = vector.load %arg2[%c0, %c0_0] : memref<48x3456xbf16, #tpu.memory_space<vmem>>, vector<48x3456xbf16>
    %c0_1 = arith.constant 0 : index
    %c0_2 = arith.constant 0 : index
    %1 = vector.load %arg3[%c0_1, %c0_2] : memref<3456x384xbf16, #tpu.memory_space<vmem>>, vector<3456x384xbf16>
    %cst = arith.constant dense<0.000000e+00> : vector<48x384xf32>
    %2 = tpu.matmul %0, %1, %cst {dimension_numbers = #tpu.dot_dimension_numbers<[1], [0], [0], [1], [0, 0, 1, 1], [], []>} : vector<48x3456xbf16>, vector<3456x384xbf16>, vector<48x384xf32> -> vector<48x384xf32>
    %c0_3 = arith.constant 0 : index
    %c0_4 = arith.constant 0 : index
    %3 = vector.load %arg4[%c0_3, %c0_4] : memref<1x384xf32, #tpu.memory_space<vmem>>, vector<1x384xf32>
    %4 = vector.broadcast %3 : vector<1x384xf32> to vector<48x384xf32>
    %5 = arith.addf %2, %4 : vector<48x384xf32>
    %cst_5 = arith.constant 0.000000e+00 : f32
    %6 = vector.broadcast %cst_5 : f32 to vector<48x384xf32>
    %7 = arith.maximumf %5, %6 : vector<48x384xf32>
    %8 = arith.truncf %7 : vector<48x384xf32> to vector<48x384xbf16>
    %c0_6 = arith.constant 0 : index
    %c0_7 = arith.constant 0 : index
    %9 = vector.load %arg5[%c0_6, %c0_7] : memref<48x384xbf16, #tpu.memory_space<vmem>>, vector<48x384xbf16>
    tpu.vector_store %arg5[%c0_6, %c0_7], %8 {strides = array<i32>} : memref<48x384xbf16, #tpu.memory_space<vmem>>, vector<48x384xbf16>,
    return
  }
  func.func @transform_0(%arg0: i32, %arg1: i32) -> (i32, i32) {
    %c0_i32 = arith.constant 0 : i32
    %c0_i32_0 = arith.constant 0 : i32
    return %arg0, %c0_i32 : i32, i32
  }
  func.func @transform_1(%arg0: i32, %arg1: i32) -> (i32, i32) {
    %c0_i32 = arith.constant 0 : i32
    %c0_i32_0 = arith.constant 0 : i32
    return %c0_i32, %arg1 : i32, i32
  }
  func.func @transform_2(%arg0: i32, %arg1: i32) -> (i32, i32) {
    %c0_i32 = arith.constant 0 : i32
    %c0_i32_0 = arith.constant 0 : i32
    return %c0_i32, %arg1 : i32, i32
  }
  func.func @transform_3(%arg0: i32, %arg1: i32) -> (i32, i32) {
    %c0_i32 = arith.constant 0 : i32
    return %arg0, %arg1 : i32, i32
  }
}

module attributes {stable_mosaic.version = 11 : i64} {
  func.func @_mm_bias_relu_kernel(%arg0: i32, %arg1: i32, %arg2: memref<16x3456xbf16, #tpu.memory_space<vmem>>, %arg3: memref<3456x256xbf16, #tpu.memory_space<vmem>>, %arg4: memref<1x256xf32, #tpu.memory_space<vmem>>, %arg5: memref<16x256xbf16, #tpu.memory_space<vmem>>) attributes {dimension_semantics = [#tpu.dimension_semantics<parallel>, #tpu.dimension_semantics<parallel>], iteration_bounds = array<i64: 1, 1>, scalar_prefetch = 0 : i64, scratch_operands = 0 : i64, tpu.core_type = #tpu.core_type<tc>, window_params = [{transform_indices = @transform_0, window_bounds = array<i64: 16, 3456>}, {transform_indices = @transform_1, window_bounds = array<i64: 3456, 256>}, {transform_indices = @transform_2, window_bounds = array<i64: 1, 256>}, {transform_indices = @transform_3, window_bounds = array<i64: 16, 256>}]} {
    %c0 = arith.constant 0 : index
    %c0_0 = arith.constant 0 : index
    %0 = vector.load %arg2[%c0, %c0_0] : memref<16x3456xbf16, #tpu.memory_space<vmem>>, vector<16x3456xbf16>
    %c0_1 = arith.constant 0 : index
    %c0_2 = arith.constant 0 : index
    %1 = vector.load %arg3[%c0_1, %c0_2] : memref<3456x256xbf16, #tpu.memory_space<vmem>>, vector<3456x256xbf16>
    %cst = arith.constant dense<0.000000e+00> : vector<16x256xf32>
    %2 = tpu.matmul %0, %1, %cst {dimension_numbers = #tpu.dot_dimension_numbers<[1], [0], [0], [1], [0, 0, 1, 1], [], []>} : vector<16x3456xbf16>, vector<3456x256xbf16>, vector<16x256xf32> -> vector<16x256xf32>
    %c0_3 = arith.constant 0 : index
    %c0_4 = arith.constant 0 : index
    %3 = vector.load %arg4[%c0_3, %c0_4] : memref<1x256xf32, #tpu.memory_space<vmem>>, vector<1x256xf32>
    %4 = vector.broadcast %3 : vector<1x256xf32> to vector<16x256xf32>
    %5 = arith.addf %2, %4 : vector<16x256xf32>
    %cst_5 = arith.constant 0.000000e+00 : f32
    %6 = vector.broadcast %cst_5 : f32 to vector<16x256xf32>
    %7 = arith.maximumf %5, %6 : vector<16x256xf32>
    %8 = arith.truncf %7 : vector<16x256xf32> to vector<16x256xbf16>
    %c0_6 = arith.constant 0 : index
    %c0_7 = arith.constant 0 : index
    %9 = vector.load %arg5[%c0_6, %c0_7] : memref<16x256xbf16, #tpu.memory_space<vmem>>, vector<16x256xbf16>
    tpu.vector_store %arg5[%c0_6, %c0_7], %8 {strides = array<i32>} : memref<16x256xbf16, #tpu.memory_space<vmem>>, vector<16x256xbf16>,
    return
  }
  func.func @transform_0(%arg0: i32, %arg1: i32) -> (i32, i32) {
    %c0_i32 = arith.constant 0 : i32
    %c0_i32_0 = arith.constant 0 : i32
    return %arg0, %c0_i32 : i32, i32
  }
  func.func @transform_1(%arg0: i32, %arg1: i32) -> (i32, i32) {
    %c0_i32 = arith.constant 0 : i32
    %c0_i32_0 = arith.constant 0 : i32
    return %c0_i32, %arg1 : i32, i32
  }
  func.func @transform_2(%arg0: i32, %arg1: i32) -> (i32, i32) {
    %c0_i32 = arith.constant 0 : i32
    %c0_i32_0 = arith.constant 0 : i32
    return %c0_i32, %arg1 : i32, i32
  }
  func.func @transform_3(%arg0: i32, %arg1: i32) -> (i32, i32) {
    %c0_i32 = arith.constant 0 : i32
    return %arg0, %arg1 : i32, i32
  }
}

</mosaic_0001>

<bundles_post_ra>
// kernel: base_model_forward.5
= control target key start
LH: loop header
LB: loop body
LE: loop exit
PB: predicated region body
PF: predicated region fallthrough
CT: control target
= control target key end

     0   :  { %s2551_s12 = smov 0   ;;  %s2553_s13 = smov 0   ;;  %s2982_s0 = inlined_call_operand.vmem [shape: bf16[9570,27], index: 0, kind: input, shape index: {}]   ;;  %s2983_s1 = inlined_call_operand.vmem [shape: bf16[27,128], index: 1, kind: input, shape index: {}]   ;;  %s2984_s2 = inlined_call_operand.vmem [shape: f32[1,128], index: 2, kind: input, shape index: {}]   ;;  %s2985_s3 = inlined_call_operand.vmem [shape: bf16[9570,128], index: 3, kind: output, shape index: {}]  }
   0x1   :  { %s2555_s14 = smov 0   ;;  %s2557_s15 = smov 0  }
   0x2   :  { %s2559_s16 = smov 0  }
   0x3 LB: > { %s1765_s17 = sadd.s32 4294967295, %s2496_s16   ;;  %s25_s18 = sadd.s32 1, %s2492_s15  ;;  %s2496_s16 = sphi %s2559_s16, %s13_s16   ;;  %s2492_s15 = sphi %s2557_s15, %s2993_s15   ;;  %s2488_s14 = sphi %s2555_s14, %s2992_s14   ;;  %s2484_s13 = sphi %s2553_s13, %s2991_s13   ;;  %s2480_s12 = sphi %s2551_s12, %s2990_s12  }
   0x4   : > { %p27_p0 = scmp.ge.s32.totalorder %s25_s18, 19  ;;  %s112_s19 = sadd.s32 1, %s2484_s13 }
   0x5   : > { %p122_p1 = scmp.ne.s32.totalorder %s2484_s13, %s2480_s12  ;;  %p123_p2 = scmp.eq.s32.totalorder %s1765_s17, 18 }
   0x6   : > { %s2995_s18 = smov (%p27_p0, %s25_s18), 0  ;;  %p1771_p4 = scmp.ge.s32.totalorder %s2496_s16, 1 }
   0x7   : > { %p2583_p3 = por %p123_p2, %p122_p1  ;;  %s107_s21 = ssub.s32 %s2492_s15, %s2995_s18 }
   0x8   : > { %p177_p5 = scmp.lt.s32.totalorder %s2496_s16, 20  ;;  %p110_p6 = scmp.eq.s32.totalorder %s107_s21, 0 }
   0xa   : > { %p178_p7 = pnand %p1771_p4, %p177_p5 }
   0xb   : > { %s2592_s22 = scalar_select %p110_p6, %s2484_s13, %s112_s19  }
   0xc   : > { %181 = sbr.rel (%p178_p7) target bundleno = 395 (0x18b), region = 32  ;;  %v2392_v0 = vld [vmem:[%s2983_s1] sm:$0xff] (!%p178_p7)   ;;  %vm581_vm0 = vcmask (!%p178_p7), 1044480   ;;  %v2393_v1 = vld [vmem:[%s2983_s1 + $0x8] sm:$0x3f] (!%p178_p7)   ;;  %vm582_vm1 = vcmask (!%p178_p7), 1045504  }
   0xd   : > { %2215 = vmatprep.subr.bf16.mxu0 (!%p178_p7), %v2392_v0  ;;  %2283 = vmatprep.subr.bf16.mxu1 (!%p178_p7), %v2392_v0  ;;  %s2601_s27 = sshll.u32 (!%p178_p7), %s2488_s14, 6  ;;  %v2530_v2 = vmov (!%p178_p7), 65535   ;;  %vm484_vm2 = vcmask (!%p178_p7), 220160   ;;  %v2677_v38 = vld [vmem:[%s2984_s2] ss:$0 sm:$0xff] (!%p178_p7)  ;;  %s208_s8 = sand.u32 (!%p178_p7), 1, %s2480_s12  }
   0xe   : > { %2216 = vmatpush3.bf16.msra.mxu0 (!%p178_p7), %v2392_v0  ;;  %2285 = vmatpush3.bf16.msra.mxu1 (!%p178_p7), %v2392_v0  ;;  %v583_v3 = vsel (!%p178_p7), %vm581_vm0, 4294967295, %v2530_v2  ;;  %p216_p8 = scmp.lt.s32.totalorder (!%p178_p7), %s2601_s27, 1196  ;;  %s1772_s9 = sshll.u32 (!%p178_p7), %s208_s8, 8 }
   0xf   : > { %v584_v4 = vsel (!%p178_p7), %vm582_vm1, %v583_v3, 0  ;;  %s2688_s10 = scalar_lea.vmem (!%p178_p7), [#allocation2], %s1772_s9  }
  0x10   : > { %v586_v5 = vand.u32 (!%p178_p7), %v2393_v1, %v584_v4 }
  0x12   : > { %2217 = vmatprep.subr.bf16.mxu0 (!%p178_p7), %v586_v5  ;;  %2284 = vmatprep.subr.bf16.mxu1 (!%p178_p7), %v586_v5 }
  0x13   : > { %s217_s28 = scalar_select %p216_p8, %s2601_s27, 1196  ;;  %2218 = vmatpush3.bf16.msra.mxu0 %v586_v5  ;;  %2286 = vmatpush3.bf16.msra.mxu1 %v586_v5 }
  0x14   : > { %s1269_s11 = ssub.s32 (%p2583_p3), 1197, %s2601_s27  ;;  %s1987_s12 = sshll.u32 (%p2583_p3), %s2488_s14, 8 }
  0x15   : > { %s1774_s29 = sshll.u32 %s217_s28, 2  ;;  %p1270_p9 = scmp.lt.s32.totalorder (%p2583_p3), %s1269_s11, 64 }
  0x16   : > { %s2608_s5 = scalar_lea.vmem %s2982_s0, %s1774_s29  ;;  %s2785_s21 = scalar_lea.vmem (%p2583_p3), %s2985_s3, %s1987_s12  }
  0x17   : > { %v2394_v6 = vld [vmem:[%s2608_s5] sm:$0xff]   ;;  %v2396_v8 = vld [vmem:[%s2608_s5 + $0x8] sm:$0xff]   ;;  %v2398_v10 = vld [vmem:[%s2608_s5 + $0x10] sm:$0xff]  }
  0x18   : > { %v2395_v7 = vld [vmem:[%s2608_s5 + $0x80] sm:$0xff]   ;;  %2219 = vmatprep.mubr.msk.bf16.mxu0 %vm484_vm2, %v2394_v6  ;;  %v2397_v9 = vld [vmem:[%s2608_s5 + $0x88] sm:$0xff]   ;;  %v2399_v11 = vld [vmem:[%s2608_s5 + $0x90] sm:$0xff]  }
  0x19   : > { %2251 = vmatprep.mubr.msk.bf16.mxu1 %vm484_vm2, %v2395_v7  ;;  %2220 = vmatmul.mubr.msk.bf16.vlgmr.msra.gmra.mrb[0].mxu0 %vm484_vm2, %v2396_v8  ;;  %v2400_v12 = vld [vmem:[%s2608_s5 + $0x18] sm:$0xff]   ;;  %v2402_v14 = vld [vmem:[%s2608_s5 + $0x20] sm:$0xff]   ;;  %v2404_v16 = vld [vmem:[%s2608_s5 + $0x28] sm:$0xff]  }
  0x1a   : > { %2252 = vmatmul.mubr.msk.bf16.vlgmr.msra.gmra.mrb[0].mxu1 %vm484_vm2, %v2397_v9  ;;  %2223 = vmatprep.mubr.msk.bf16.mxu0 %vm484_vm2, %v2398_v10  ;;  %v2401_v13 = vld [vmem:[%s2608_s5 + $0x98] sm:$0xff]   ;;  %v2403_v15 = vld [vmem:[%s2608_s5 + $0xa0] sm:$0xff]   ;;  %v2405_v17 = vld [vmem:[%s2608_s5 + $0xa8] sm:$0xff]  }
  0x1b   : > { %2255 = vmatprep.mubr.msk.bf16.mxu1 %vm484_vm2, %v2399_v11  ;;  %v2406_v18 = vld [vmem:[%s2608_s5 + $0x30] sm:$0xff]   ;;  %v2408_v20 = vld [vmem:[%s2608_s5 + $0x38] sm:$0xff]   ;;  %v2410_v22 = vld [vmem:[%s2608_s5 + $0x40] sm:$0xff]  }
  0x1c   : > { %v2407_v19 = vld [vmem:[%s2608_s5 + $0xb0] sm:$0xff]   ;;  %v2409_v21 = vld [vmem:[%s2608_s5 + $0xb8] sm:$0xff]   ;;  %v2411_v23 = vld [vmem:[%s2608_s5 + $0xc0] sm:$0xff]  }
  0x1d   : > { %v2412_v24 = vld [vmem:[%s2608_s5 + $0x48] sm:$0xff]   ;;  %v2414_v26 = vld [vmem:[%s2608_s5 + $0x50] sm:$0xff]   ;;  %v2416_v28 = vld [vmem:[%s2608_s5 + $0x58] sm:$0xff]  }
  0x1e   : > { %v2413_v25 = vld [vmem:[%s2608_s5 + $0xc8] sm:$0xff]   ;;  %v2415_v27 = vld [vmem:[%s2608_s5 + $0xd0] sm:$0xff]   ;;  %v2417_v29 = vld [vmem:[%s2608_s5 + $0xd8] sm:$0xff]  }
  0x1f   : > { %v2418_v30 = vld [vmem:[%s2608_s5 + $0x60] sm:$0xff]   ;;  %v2420_v32 = vld [vmem:[%s2608_s5 + $0x68] sm:$0xff]   ;;  %v2422_v34 = vld [vmem:[%s2608_s5 + $0x70] sm:$0xff]  }
  0x20   : > { %v2419_v31 = vld [vmem:[%s2608_s5 + $0xe0] sm:$0xff]   ;;  %v2421_v33 = vld [vmem:[%s2608_s5 + $0xe8] sm:$0xff]   ;;  %v2423_v35 = vld [vmem:[%s2608_s5 + $0xf0] sm:$0xff]  }
  0x21   : > { %2224 = vmatmul.mubr.msk.bf16.gmra.mrb[4].mxu0 %vm484_vm2, %v2400_v12  ;;  %v2424_v36 = vld [vmem:[%s2608_s5 + $0x78] sm:$0xff]  }
  0x22   : > { %2256 = vmatmul.mubr.msk.bf16.gmra.mrb[4].mxu1 %vm484_vm2, %v2401_v13  ;;  %2227 = vmatprep.mubr.msk.bf16.mxu0 %vm484_vm2, %v2402_v14  ;;  %v2425_v37 = vld [vmem:[%s2608_s5 + $0xf8] sm:$0xff]  }
  0x23   : > { %2259 = vmatprep.mubr.msk.bf16.mxu1 %vm484_vm2, %v2403_v15 }
  0x29   : > { %2228 = vmatmul.mubr.msk.bf16.gmra.mrb[8].mxu0 %vm484_vm2, %v2404_v16 }
  0x2a   : > { %2260 = vmatmul.mubr.msk.bf16.gmra.mrb[8].mxu1 %vm484_vm2, %v2405_v17  ;;  %2231 = vmatprep.mubr.msk.bf16.mxu0 %vm484_vm2, %v2406_v18 }
  0x2b   : > { %2263 = vmatprep.mubr.msk.bf16.mxu1 %vm484_vm2, %v2407_v19 }
  0x31   : > { %2232 = vmatmul.mubr.msk.bf16.gmra.mrb[12].mxu0 %vm484_vm2, %v2408_v20 }
  0x32   : > { %2264 = vmatmul.mubr.msk.bf16.gmra.mrb[12].mxu1 %vm484_vm2, %v2409_v21  ;;  %2235 = vmatprep.mubr.msk.bf16.mxu0 %vm484_vm2, %v2410_v22 }
  0x33   : > { %2267 = vmatprep.mubr.msk.bf16.mxu1 %vm484_vm2, %v2411_v23 }
  0x39   : > { %2236 = vmatmul.mubr.msk.bf16.gmra.mrb[16].mxu0 %vm484_vm2, %v2412_v24 }
  0x3a   : > { %2268 = vmatmul.mubr.msk.bf16.gmra.mrb[16].mxu1 %vm484_vm2, %v2413_v25  ;;  %2239 = vmatprep.mubr.msk.bf16.mxu0 %vm484_vm2, %v2414_v26 }
  0x3b   : > { %2271 = vmatprep.mubr.msk.bf16.mxu1 %vm484_vm2, %v2415_v27 }
  0x41   : > { %2240 = vmatmul.mubr.msk.bf16.gmra.mrb[20].mxu0 %vm484_vm2, %v2416_v28 }
  0x42   : > { %2272 = vmatmul.mubr.msk.bf16.gmra.mrb[20].mxu1 %vm484_vm2, %v2417_v29  ;;  %2243 = vmatprep.mubr.msk.bf16.mxu0 %vm484_vm2, %v2418_v30 }
  0x43   : > { %2275 = vmatprep.mubr.msk.bf16.mxu1 %vm484_vm2, %v2419_v31 }
  0x49   : > { %2244 = vmatmul.mubr.msk.bf16.gmra.mrb[24].mxu0 %vm484_vm2, %v2420_v32 }
  0x4a   : > { %2276 = vmatmul.mubr.msk.bf16.gmra.mrb[24].mxu1 %vm484_vm2, %v2421_v33  ;;  %2247 = vmatprep.mubr.msk.bf16.mxu0 %vm484_vm2, %v2422_v34 }
  0x4b   : > { %2279 = vmatprep.mubr.msk.bf16.mxu1 %vm484_vm2, %v2423_v35 }
  0x51   : > { %2248 = vmatmul.mubr.msk.bf16.gmra.mrb[28].mxu0 %vm484_vm2, %v2424_v36 }
  0x52   : > { %2280 = vmatmul.mubr.msk.bf16.gmra.mrb[28].mxu1 %vm484_vm2, %v2425_v37 }
  0xec   : > { %v2221_v39 = vpop.f32.mrb[0].mxu0 }
  0xed   : > { %v631_v40 = vadd.f32 %v2221_v39, %v2677_v38  ;;  %v2253_v41 = vpop.f32.mrb[0].mxu1  ;;  %v622_v42 = vpop.f32.mrb[1].mxu0 }
  0xee   : > { %v759_v43 = vadd.f32 %v2253_v41, %v2677_v38  ;;  %v623_v44 = vadd.f32 %v2677_v38, %v622_v42  ;;  %v750_v45 = vpop.f32.mrb[1].mxu1  ;;  %v2222_v46 = vpop.f32.mrb[2].mxu0 }
  0xef   : > { %v751_v47 = vadd.f32 %v2677_v38, %v750_v45  ;;  %v634_v48 = vadd.f32 %v2222_v46, %v2677_v38  ;;  %v2254_v49 = vpop.f32.mrb[2].mxu1  ;;  %v625_v50 = vpop.f32.mrb[3].mxu0  ;;  %v879_v54 = vmax.f32 %v631_v40, 0.0 }
  0xf0   : > { %v762_v51 = vadd.f32 %v2254_v49, %v2677_v38  ;;  %v626_v52 = vadd.f32 %v2677_v38, %v625_v50  ;;  %v753_v53 = vpop.f32.mrb[3].mxu1  ;;  %v911_v57 = vmax.f32 %v759_v43, 0.0  ;;  %v877_v58 = vmax.f32 %v623_v44, 0.0 }
  0xf1   : > { %v880_v55 = vmax.f32 %v634_v48, 0.0  ;;  %v754_v56 = vadd.f32 %v2677_v38, %v753_v53  ;;  %v909_v61 = vmax.f32 %v751_v47, 0.0 }
  0xf2   : > { %v912_v59 = vmax.f32 %v762_v51, 0.0  ;;  %v878_v60 = vmax.f32 %v626_v52, 0.0 }
  0xf3   : > { %v1998_v62 = vpack.c.bf16 %v880_v55, %v879_v54  ;;  %v910_v63 = vmax.f32 %v754_v56, 0.0 }
  0xf4   : > { %v2078_v0 = vpack.c.bf16 %v912_v59, %v911_v57  ;;  %v1993_v1 = vpack.c.bf16 %v878_v60, %v877_v58  ;;  %v2225_v2 = vpop.f32.mrb[4].mxu0 }
  0xf5   : > { %2150 = vst [vmem:[%s2688_s10 + $0x8] sm:$0xff] %v1998_v62   ;;  %v2073_v3 = vpack.c.bf16 %v910_v63, %v909_v61  ;;  %v647_v4 = vadd.f32 %v2225_v2, %v2677_v38  ;;  %v2257_v5 = vpop.f32.mrb[4].mxu1  ;;  %v638_v6 = vpop.f32.mrb[5].mxu0 }
  0xf6   : > { %2166 = vst [vmem:[%s2688_s10 + $0x88] sm:$0xff] %v2078_v0   ;;  %1994 = vst [vmem:[%s2688_s10] sm:$0xff] %v1993_v1   ;;  %v775_v7 = vadd.f32 %v2257_v5, %v2677_v38  ;;  %v639_v8 = vadd.f32 %v2677_v38, %v638_v6  ;;  %v766_v9 = vpop.f32.mrb[5].mxu1  ;;  %v2226_v10 = vpop.f32.mrb[6].mxu0 }
  0xf7   : > { %2165 = vst [vmem:[%s2688_s10 + $0x80] sm:$0xff] %v2073_v3   ;;  %v767_v11 = vadd.f32 %v2677_v38, %v766_v9  ;;  %v650_v12 = vadd.f32 %v2226_v10, %v2677_v38  ;;  %v2258_v13 = vpop.f32.mrb[6].mxu1  ;;  %v641_v14 = vpop.f32.mrb[7].mxu0  ;;  %v883_v18 = vmax.f32 %v647_v4, 0.0 }
  0xf8   : > { %v778_v15 = vadd.f32 %v2258_v13, %v2677_v38  ;;  %v642_v16 = vadd.f32 %v2677_v38, %v641_v14  ;;  %v769_v17 = vpop.f32.mrb[7].mxu1  ;;  %v915_v21 = vmax.f32 %v775_v7, 0.0  ;;  %v881_v22 = vmax.f32 %v639_v8, 0.0 }
  0xf9   : > { %v884_v19 = vmax.f32 %v650_v12, 0.0  ;;  %v770_v20 = vadd.f32 %v2677_v38, %v769_v17  ;;  %v913_v25 = vmax.f32 %v767_v11, 0.0 }
  0xfa   : > { %v916_v23 = vmax.f32 %v778_v15, 0.0  ;;  %v882_v24 = vmax.f32 %v642_v16, 0.0 }
  0xfb   : > { %v2008_v26 = vpack.c.bf16 %v884_v19, %v883_v18  ;;  %v914_v27 = vmax.f32 %v770_v20, 0.0 }
  0xfc   : > { %v2088_v28 = vpack.c.bf16 %v916_v23, %v915_v21  ;;  %v2003_v29 = vpack.c.bf16 %v882_v24, %v881_v22  ;;  %v2229_v30 = vpop.f32.mrb[8].mxu0 }
  0xfd   : > { %2152 = vst [vmem:[%s2688_s10 + $0x18] sm:$0xff] %v2008_v26   ;;  %v2083_v31 = vpack.c.bf16 %v914_v27, %v913_v25  ;;  %v663_v32 = vadd.f32 %v2229_v30, %v2677_v38  ;;  %v2261_v33 = vpop.f32.mrb[8].mxu1  ;;  %v654_v34 = vpop.f32.mrb[9].mxu0 }
  0xfe   : > { %2168 = vst [vmem:[%s2688_s10 + $0x98] sm:$0xff] %v2088_v28   ;;  %2151 = vst [vmem:[%s2688_s10 + $0x10] sm:$0xff] %v2003_v29   ;;  %v791_v35 = vadd.f32 %v2261_v33, %v2677_v38  ;;  %v655_v36 = vadd.f32 %v2677_v38, %v654_v34  ;;  %v782_v37 = vpop.f32.mrb[9].mxu1  ;;  %v2230_v39 = vpop.f32.mrb[10].mxu0 }
  0xff   : > { %2167 = vst [vmem:[%s2688_s10 + $0x90] sm:$0xff] %v2083_v31   ;;  %v783_v40 = vadd.f32 %v2677_v38, %v782_v37  ;;  %v666_v41 = vadd.f32 %v2230_v39, %v2677_v38  ;;  %v2262_v42 = vpop.f32.mrb[10].mxu1  ;;  %v657_v43 = vpop.f32.mrb[11].mxu0  ;;  %v887_v47 = vmax.f32 %v663_v32, 0.0 }
 0x100   : > { %v794_v44 = vadd.f32 %v2262_v42, %v2677_v38  ;;  %v658_v45 = vadd.f32 %v2677_v38, %v657_v43  ;;  %v785_v46 = vpop.f32.mrb[11].mxu1  ;;  %v919_v50 = vmax.f32 %v791_v35, 0.0  ;;  %v885_v51 = vmax.f32 %v655_v36, 0.0 }
 0x101   : > { %v888_v48 = vmax.f32 %v666_v41, 0.0  ;;  %v786_v49 = vadd.f32 %v2677_v38, %v785_v46  ;;  %v917_v54 = vmax.f32 %v783_v40, 0.0 }
 0x102   : > { %v920_v52 = vmax.f32 %v794_v44, 0.0  ;;  %v886_v53 = vmax.f32 %v658_v45, 0.0 }
 0x103   : > { %v2018_v55 = vpack.c.bf16 %v888_v48, %v887_v47  ;;  %v918_v56 = vmax.f32 %v786_v49, 0.0 }
 0x104   : > { %v2098_v57 = vpack.c.bf16 %v920_v52, %v919_v50  ;;  %v2013_v58 = vpack.c.bf16 %v886_v53, %v885_v51  ;;  %v2233_v59 = vpop.f32.mrb[12].mxu0 }
 0x105   : > { %2154 = vst [vmem:[%s2688_s10 + $0x28] sm:$0xff] %v2018_v55   ;;  %v2093_v60 = vpack.c.bf16 %v918_v56, %v917_v54  ;;  %v679_v61 = vadd.f32 %v2233_v59, %v2677_v38  ;;  %v2265_v62 = vpop.f32.mrb[12].mxu1  ;;  %v670_v63 = vpop.f32.mrb[13].mxu0 }
 0x106   : > { %2170 = vst [vmem:[%s2688_s10 + $0xa8] sm:$0xff] %v2098_v57   ;;  %2153 = vst [vmem:[%s2688_s10 + $0x20] sm:$0xff] %v2013_v58   ;;  %v807_v0 = vadd.f32 %v2265_v62, %v2677_v38  ;;  %v671_v1 = vadd.f32 %v2677_v38, %v670_v63  ;;  %v798_v2 = vpop.f32.mrb[13].mxu1  ;;  %v2234_v3 = vpop.f32.mrb[14].mxu0 }
 0x107   : > { %2169 = vst [vmem:[%s2688_s10 + $0xa0] sm:$0xff] %v2093_v60   ;;  %v799_v4 = vadd.f32 %v2677_v38, %v798_v2  ;;  %v682_v5 = vadd.f32 %v2234_v3, %v2677_v38  ;;  %v2266_v6 = vpop.f32.mrb[14].mxu1  ;;  %v673_v7 = vpop.f32.mrb[15].mxu0  ;;  %v891_v11 = vmax.f32 %v679_v61, 0.0 }
 0x108   : > { %v810_v8 = vadd.f32 %v2266_v6, %v2677_v38  ;;  %v674_v9 = vadd.f32 %v2677_v38, %v673_v7  ;;  %v801_v10 = vpop.f32.mrb[15].mxu1  ;;  %v923_v14 = vmax.f32 %v807_v0, 0.0  ;;  %v889_v15 = vmax.f32 %v671_v1, 0.0 }
 0x109   : > { %v892_v12 = vmax.f32 %v682_v5, 0.0  ;;  %v802_v13 = vadd.f32 %v2677_v38, %v801_v10  ;;  %v921_v18 = vmax.f32 %v799_v4, 0.0 }
 0x10a   : > { %v924_v16 = vmax.f32 %v810_v8, 0.0  ;;  %v890_v17 = vmax.f32 %v674_v9, 0.0 }
 0x10b   : > { %v2028_v19 = vpack.c.bf16 %v892_v12, %v891_v11  ;;  %v922_v20 = vmax.f32 %v802_v13, 0.0 }
 0x10c   : > { %v2108_v21 = vpack.c.bf16 %v924_v16, %v923_v14  ;;  %v2023_v22 = vpack.c.bf16 %v890_v17, %v889_v15  ;;  %v2237_v23 = vpop.f32.mrb[16].mxu0 }
 0x10d   : > { %2156 = vst [vmem:[%s2688_s10 + $0x38] sm:$0xff] %v2028_v19   ;;  %v2103_v24 = vpack.c.bf16 %v922_v20, %v921_v18  ;;  %v695_v25 = vadd.f32 %v2237_v23, %v2677_v38  ;;  %v2269_v26 = vpop.f32.mrb[16].mxu1  ;;  %v686_v27 = vpop.f32.mrb[17].mxu0 }
 0x10e   : > { %2172 = vst [vmem:[%s2688_s10 + $0xb8] sm:$0xff] %v2108_v21   ;;  %2155 = vst [vmem:[%s2688_s10 + $0x30] sm:$0xff] %v2023_v22   ;;  %v823_v28 = vadd.f32 %v2269_v26, %v2677_v38  ;;  %v687_v29 = vadd.f32 %v2677_v38, %v686_v27  ;;  %v814_v30 = vpop.f32.mrb[17].mxu1  ;;  %v2238_v31 = vpop.f32.mrb[18].mxu0 }
 0x10f   : > { %2171 = vst [vmem:[%s2688_s10 + $0xb0] sm:$0xff] %v2103_v24   ;;  %v815_v32 = vadd.f32 %v2677_v38, %v814_v30  ;;  %v698_v33 = vadd.f32 %v2238_v31, %v2677_v38  ;;  %v2270_v34 = vpop.f32.mrb[18].mxu1  ;;  %v689_v35 = vpop.f32.mrb[19].mxu0  ;;  %v895_v40 = vmax.f32 %v695_v25, 0.0 }
 0x110   : > { %v826_v36 = vadd.f32 %v2270_v34, %v2677_v38  ;;  %v690_v37 = vadd.f32 %v2677_v38, %v689_v35  ;;  %v817_v39 = vpop.f32.mrb[19].mxu1  ;;  %v927_v43 = vmax.f32 %v823_v28, 0.0  ;;  %v893_v44 = vmax.f32 %v687_v29, 0.0 }
 0x111   : > { %v896_v41 = vmax.f32 %v698_v33, 0.0  ;;  %v818_v42 = vadd.f32 %v2677_v38, %v817_v39  ;;  %v925_v47 = vmax.f32 %v815_v32, 0.0 }
 0x112   : > { %v928_v45 = vmax.f32 %v826_v36, 0.0  ;;  %v894_v46 = vmax.f32 %v690_v37, 0.0 }
 0x113   : > { %v2038_v48 = vpack.c.bf16 %v896_v41, %v895_v40  ;;  %v926_v49 = vmax.f32 %v818_v42, 0.0 }
 0x114   : > { %v2118_v50 = vpack.c.bf16 %v928_v45, %v927_v43  ;;  %v2033_v51 = vpack.c.bf16 %v894_v46, %v893_v44  ;;  %v2241_v52 = vpop.f32.mrb[20].mxu0 }
 0x115   : > { %2158 = vst [vmem:[%s2688_s10 + $0x48] sm:$0xff] %v2038_v48   ;;  %v2113_v53 = vpack.c.bf16 %v926_v49, %v925_v47  ;;  %v711_v54 = vadd.f32 %v2241_v52, %v2677_v38  ;;  %v2273_v55 = vpop.f32.mrb[20].mxu1  ;;  %v702_v56 = vpop.f32.mrb[21].mxu0 }
 0x116   : > { %2174 = vst [vmem:[%s2688_s10 + $0xc8] sm:$0xff] %v2118_v50   ;;  %2157 = vst [vmem:[%s2688_s10 + $0x40] sm:$0xff] %v2033_v51   ;;  %v839_v57 = vadd.f32 %v2273_v55, %v2677_v38  ;;  %v703_v58 = vadd.f32 %v2677_v38, %v702_v56  ;;  %v830_v59 = vpop.f32.mrb[21].mxu1  ;;  %v2242_v60 = vpop.f32.mrb[22].mxu0 }
 0x117   : > { %2173 = vst [vmem:[%s2688_s10 + $0xc0] sm:$0xff] %v2113_v53   ;;  %v831_v61 = vadd.f32 %v2677_v38, %v830_v59  ;;  %v714_v62 = vadd.f32 %v2242_v60, %v2677_v38  ;;  %v2274_v63 = vpop.f32.mrb[22].mxu1  ;;  %v705_v0 = vpop.f32.mrb[23].mxu0  ;;  %v899_v4 = vmax.f32 %v711_v54, 0.0 }
 0x118   : > { %v842_v1 = vadd.f32 %v2274_v63, %v2677_v38  ;;  %v706_v2 = vadd.f32 %v2677_v38, %v705_v0  ;;  %v833_v3 = vpop.f32.mrb[23].mxu1  ;;  %v931_v7 = vmax.f32 %v839_v57, 0.0  ;;  %v897_v8 = vmax.f32 %v703_v58, 0.0 }
 0x119   : > { %v900_v5 = vmax.f32 %v714_v62, 0.0  ;;  %v834_v6 = vadd.f32 %v2677_v38, %v833_v3  ;;  %v929_v11 = vmax.f32 %v831_v61, 0.0 }
 0x11a   : > { %v932_v9 = vmax.f32 %v842_v1, 0.0  ;;  %v898_v10 = vmax.f32 %v706_v2, 0.0 }
 0x11b   : > { %v2048_v12 = vpack.c.bf16 %v900_v5, %v899_v4  ;;  %v930_v13 = vmax.f32 %v834_v6, 0.0 }
 0x11c   : > { %v2128_v14 = vpack.c.bf16 %v932_v9, %v931_v7  ;;  %v2043_v15 = vpack.c.bf16 %v898_v10, %v897_v8  ;;  %v2245_v16 = vpop.f32.mrb[24].mxu0 }
 0x11d   : > { %2160 = vst [vmem:[%s2688_s10 + $0x58] sm:$0xff] %v2048_v12   ;;  %v2123_v17 = vpack.c.bf16 %v930_v13, %v929_v11  ;;  %v727_v18 = vadd.f32 %v2245_v16, %v2677_v38  ;;  %v2277_v19 = vpop.f32.mrb[24].mxu1  ;;  %v718_v20 = vpop.f32.mrb[25].mxu0 }
 0x11e   : > { %2176 = vst [vmem:[%s2688_s10 + $0xd8] sm:$0xff] %v2128_v14   ;;  %2159 = vst [vmem:[%s2688_s10 + $0x50] sm:$0xff] %v2043_v15   ;;  %v855_v21 = vadd.f32 %v2277_v19, %v2677_v38  ;;  %v719_v22 = vadd.f32 %v2677_v38, %v718_v20  ;;  %v846_v23 = vpop.f32.mrb[25].mxu1  ;;  %v2246_v24 = vpop.f32.mrb[26].mxu0 }
 0x11f   : > { %2175 = vst [vmem:[%s2688_s10 + $0xd0] sm:$0xff] %v2123_v17   ;;  %v847_v25 = vadd.f32 %v2677_v38, %v846_v23  ;;  %v730_v26 = vadd.f32 %v2246_v24, %v2677_v38  ;;  %v2278_v27 = vpop.f32.mrb[26].mxu1  ;;  %v721_v28 = vpop.f32.mrb[27].mxu0  ;;  %v903_v32 = vmax.f32 %v727_v18, 0.0 }
 0x120   : > { %v858_v29 = vadd.f32 %v2278_v27, %v2677_v38  ;;  %v722_v30 = vadd.f32 %v2677_v38, %v721_v28  ;;  %v849_v31 = vpop.f32.mrb[27].mxu1  ;;  %v935_v35 = vmax.f32 %v855_v21, 0.0  ;;  %v901_v36 = vmax.f32 %v719_v22, 0.0 }
 0x121   : > { %v904_v33 = vmax.f32 %v730_v26, 0.0  ;;  %v850_v34 = vadd.f32 %v2677_v38, %v849_v31  ;;  %v933_v40 = vmax.f32 %v847_v25, 0.0 }
 0x122   : > { %v936_v37 = vmax.f32 %v858_v29, 0.0  ;;  %v902_v39 = vmax.f32 %v722_v30, 0.0 }
 0x123   : > { %v2058_v41 = vpack.c.bf16 %v904_v33, %v903_v32  ;;  %v934_v42 = vmax.f32 %v850_v34, 0.0 }
 0x124   : > { %v2138_v43 = vpack.c.bf16 %v936_v37, %v935_v35  ;;  %v2053_v44 = vpack.c.bf16 %v902_v39, %v901_v36  ;;  %v2249_v45 = vpop.f32.mrb[28].mxu0 }
 0x125   : > { %2162 = vst [vmem:[%s2688_s10 + $0x68] sm:$0xff] %v2058_v41   ;;  %v2133_v46 = vpack.c.bf16 %v934_v42, %v933_v40  ;;  %v743_v47 = vadd.f32 %v2249_v45, %v2677_v38  ;;  %v2281_v48 = vpop.f32.mrb[28].mxu1  ;;  %v734_v49 = vpop.f32.mrb[29].mxu0 }
 0x126   : > { %2178 = vst [vmem:[%s2688_s10 + $0xe8] sm:$0xff] %v2138_v43   ;;  %2161 = vst [vmem:[%s2688_s10 + $0x60] sm:$0xff] %v2053_v44   ;;  %v871_v50 = vadd.f32 %v2281_v48, %v2677_v38  ;;  %v735_v51 = vadd.f32 %v2677_v38, %v734_v49  ;;  %v862_v52 = vpop.f32.mrb[29].mxu1  ;;  %v2250_v53 = vpop.f32.mrb[30].mxu0 }
 0x127   : > { %2177 = vst [vmem:[%s2688_s10 + $0xe0] sm:$0xff] %v2133_v46   ;;  %v863_v54 = vadd.f32 %v2677_v38, %v862_v52  ;;  %v746_v55 = vadd.f32 %v2250_v53, %v2677_v38  ;;  %v2282_v56 = vpop.f32.mrb[30].mxu1  ;;  %v737_v57 = vpop.f32.mrb[31].mxu0  ;;  %v907_v61 = vmax.f32 %v743_v47, 0.0 }
 0x128   : > { %v874_v58 = vadd.f32 %v2282_v56, %v2677_v38  ;;  %v738_v59 = vadd.f32 %v2677_v38, %v737_v57  ;;  %v865_v60 = vpop.f32.mrb[31].mxu1  ;;  %v939_v0 = vmax.f32 %v871_v50, 0.0  ;;  %v905_v1 = vmax.f32 %v735_v51, 0.0 }
 0x129   : > { %v908_v62 = vmax.f32 %v746_v55, 0.0  ;;  %v866_v63 = vadd.f32 %v2677_v38, %v865_v60  ;;  %v937_v4 = vmax.f32 %v863_v54, 0.0  ;;  %1267 = sbr.rel (!%p2583_p3) target bundleno = 395 (0x18b), region = 36 }
 0x12a   : > { %v940_v2 = vmax.f32 %v874_v58, 0.0  ;;  %v906_v3 = vmax.f32 %v738_v59, 0.0 }
 0x12b   : > { %v2068_v5 = vpack.c.bf16 %v908_v62, %v907_v61  ;;  %v938_v6 = vmax.f32 %v866_v63, 0.0 }
 0x12c   : > { %v2148_v7 = vpack.c.bf16 %v940_v2, %v939_v0  ;;  %v2063_v8 = vpack.c.bf16 %v906_v3, %v905_v1 }
 0x12d   : > { %2164 = vst [vmem:[%s2688_s10 + $0x78] sm:$0xff] %v2068_v5   ;;  %v2143_v9 = vpack.c.bf16 %v938_v6, %v937_v4 }
 0x12e   : > { %2180 = vst [vmem:[%s2688_s10 + $0xf8] sm:$0xff] %v2148_v7   ;;  %2163 = vst [vmem:[%s2688_s10 + $0x70] sm:$0xff] %v2063_v8  }
 0x12f   : > { %2179 = vst [vmem:[%s2688_s10 + $0xf0] sm:$0xff] %v2143_v9  }
 0x130   : > { %s2997_s11 = smov (!%p1270_p9, %s1269_s11), 64 }
 0x131   : > { %s1908_s23 = sshll.u32 %s2997_s11, 6 }
 0x132   : > { %p1911_p10 = scmp.eq.s32.totalorder %s1908_s23, 0 }
 0x133   : > { %s2791_s24 = sshrl.u32 (!%p1911_p10), %s2997_s11, 6 }
 0x134   : > { %1279 = sbr.rel (%p1911_p10) target bundleno = 395 (0x18b), region = 40  ;;  %p1912_p11 = scmp.le.s32.totalorder (!%p1911_p10), %s2791_s24, 0 }
 0x13b   : > { %1695 = sbr.rel (%p1912_p11) target bundleno = 374 (0x176), region = 118  ;;  %s2987_s14 = smov (!%p1912_p11), %s2785_s21 }
 0x13c   : > { %s2988_s20 = smov (!%p1912_p11), %s2688_s10  ;;  %s2800_s25 = smov (!%p1912_p11), 0  }
 0x13d   : > { %s2802_s26 = smov (!%p1912_p11), 0  }
 0x142 LB: >> { %v1295_v38 = vld [vmem:[%s2504_s20] sm:$0xf]  ;;  %v1297_v10 = vld [vmem:[%s2504_s20 + $0x4] sm:$0xf]  ;;  %v1299_v11 = vld [vmem:[%s2504_s20 + $0x8] sm:$0xf]  ;;  %s2512_s26 = sphi %s2802_s26, %s1289_s26   ;;  %s2508_s25 = sphi %s2800_s25, %s2989_s25   ;;  %s2504_s20 = sphi %s2988_s20, %s1428_s20   ;;  %s2500_s14 = sphi %s2987_s14, %s1429_s14  }
 0x143   : >> { %1296 = vst [vmem:[%s2500_s14] sm:$0xf] %v1295_v38  ;;  %1298 = vst [vmem:[%s2500_s14 + $0x4] sm:$0xf] %v1297_v10  ;;  %v1301_v12 = vld [vmem:[%s2504_s20 + $0xc] sm:$0xf]  ;;  %s1423_s27 = sadd.s32 1, %s2508_s25 }
 0x144   : >> { %1300 = vst [vmem:[%s2500_s14 + $0x8] sm:$0xf] %v1299_v11  ;;  %v1303_v13 = vld [vmem:[%s2504_s20 + $0x10] sm:$0xf]  ;;  %v1305_v14 = vld [vmem:[%s2504_s20 + $0x14] sm:$0xf]  ;;  %p1424_p12 = scmp.ge.s32.totalorder %s1423_s27, %s2791_s24 }
 0x145   : >> { %1302 = vst [vmem:[%s2500_s14 + $0xc] sm:$0xf] %v1301_v12  ;;  %1304 = vst [vmem:[%s2500_s14 + $0x10] sm:$0xf] %v1303_v13  ;;  %v1307_v15 = vld [vmem:[%s2504_s20 + $0x18] sm:$0xf] }
 0x146   : >> { %1306 = vst [vmem:[%s2500_s14 + $0x14] sm:$0xf] %v1305_v14  ;;  %v1309_v16 = vld [vmem:[%s2504_s20 + $0x1c] sm:$0xf]  ;;  %v1311_v17 = vld [vmem:[%s2504_s20 + $0x20] sm:$0xf] }
 0x147   : >> { %1308 = vst [vmem:[%s2500_s14 + $0x18] sm:$0xf] %v1307_v15  ;;  %1310 = vst [vmem:[%s2500_s14 + $0x1c] sm:$0xf] %v1309_v16  ;;  %v1313_v18 = vld [vmem:[%s2504_s20 + $0x24] sm:$0xf] }
 0x148   : >> { %1312 = vst [vmem:[%s2500_s14 + $0x20] sm:$0xf] %v1311_v17  ;;  %v1315_v19 = vld [vmem:[%s2504_s20 + $0x28] sm:$0xf]  ;;  %v1317_v20 = vld [vmem:[%s2504_s20 + $0x2c] sm:$0xf] }
 0x149   : >> { %1314 = vst [vmem:[%s2500_s14 + $0x24] sm:$0xf] %v1313_v18  ;;  %1316 = vst [vmem:[%s2500_s14 + $0x28] sm:$0xf] %v1315_v19  ;;  %v1319_v21 = vld [vmem:[%s2504_s20 + $0x30] sm:$0xf] }
 0x14a   : >> { %1318 = vst [vmem:[%s2500_s14 + $0x2c] sm:$0xf] %v1317_v20  ;;  %v1321_v22 = vld [vmem:[%s2504_s20 + $0x34] sm:$0xf]  ;;  %v1323_v23 = vld [vmem:[%s2504_s20 + $0x38] sm:$0xf] }
 0x14b   : >> { %1320 = vst [vmem:[%s2500_s14 + $0x30] sm:$0xf] %v1319_v21  ;;  %1322 = vst [vmem:[%s2500_s14 + $0x34] sm:$0xf] %v1321_v22  ;;  %v1325_v24 = vld [vmem:[%s2504_s20 + $0x3c] sm:$0xf] }
 0x14c   : >> { %1324 = vst [vmem:[%s2500_s14 + $0x38] sm:$0xf] %v1323_v23  ;;  %v1327_v25 = vld [vmem:[%s2504_s20 + $0x40] sm:$0xf]  ;;  %v1329_v26 = vld [vmem:[%s2504_s20 + $0x44] sm:$0xf] }
 0x14d   : >> { %1326 = vst [vmem:[%s2500_s14 + $0x3c] sm:$0xf] %v1325_v24  ;;  %1328 = vst [vmem:[%s2500_s14 + $0x40] sm:$0xf] %v1327_v25  ;;  %v1331_v27 = vld [vmem:[%s2504_s20 + $0x48] sm:$0xf] }
 0x14e   : >> { %1330 = vst [vmem:[%s2500_s14 + $0x44] sm:$0xf] %v1329_v26  ;;  %v1333_v28 = vld [vmem:[%s2504_s20 + $0x4c] sm:$0xf]  ;;  %v1335_v29 = vld [vmem:[%s2504_s20 + $0x50] sm:$0xf] }
 0x14f   : >> { %1332 = vst [vmem:[%s2500_s14 + $0x48] sm:$0xf] %v1331_v27  ;;  %1334 = vst [vmem:[%s2500_s14 + $0x4c] sm:$0xf] %v1333_v28  ;;  %v1337_v30 = vld [vmem:[%s2504_s20 + $0x54] sm:$0xf] }
 0x150   : >> { %1336 = vst [vmem:[%s2500_s14 + $0x50] sm:$0xf] %v1335_v29  ;;  %v1339_v31 = vld [vmem:[%s2504_s20 + $0x58] sm:$0xf]  ;;  %v1341_v32 = vld [vmem:[%s2504_s20 + $0x5c] sm:$0xf] }
 0x151   : >> { %1338 = vst [vmem:[%s2500_s14 + $0x54] sm:$0xf] %v1337_v30  ;;  %1340 = vst [vmem:[%s2500_s14 + $0x58] sm:$0xf] %v1339_v31  ;;  %v1343_v33 = vld [vmem:[%s2504_s20 + $0x60] sm:$0xf] }
 0x152   : >> { %1342 = vst [vmem:[%s2500_s14 + $0x5c] sm:$0xf] %v1341_v32  ;;  %v1345_v34 = vld [vmem:[%s2504_s20 + $0x64] sm:$0xf]  ;;  %v1347_v35 = vld [vmem:[%s2504_s20 + $0x68] sm:$0xf] }
 0x153   : >> { %1344 = vst [vmem:[%s2500_s14 + $0x60] sm:$0xf] %v1343_v33  ;;  %1346 = vst [vmem:[%s2500_s14 + $0x64] sm:$0xf] %v1345_v34  ;;  %v1349_v36 = vld [vmem:[%s2504_s20 + $0x6c] sm:$0xf] }
 0x154   : >> { %1348 = vst [vmem:[%s2500_s14 + $0x68] sm:$0xf] %v1347_v35  ;;  %v1351_v37 = vld [vmem:[%s2504_s20 + $0x70] sm:$0xf]  ;;  %v1353_v39 = vld [vmem:[%s2504_s20 + $0x74] sm:$0xf] }
 0x155   : >> { %1350 = vst [vmem:[%s2500_s14 + $0x6c] sm:$0xf] %v1349_v36  ;;  %1352 = vst [vmem:[%s2500_s14 + $0x70] sm:$0xf] %v1351_v37  ;;  %v1355_v40 = vld [vmem:[%s2504_s20 + $0x78] sm:$0xf] }
 0x156   : >> { %1354 = vst [vmem:[%s2500_s14 + $0x74] sm:$0xf] %v1353_v39  ;;  %v1357_v41 = vld [vmem:[%s2504_s20 + $0x7c] sm:$0xf]  ;;  %v1359_v42 = vld [vmem:[%s2504_s20 + $0x80] sm:$0xf] }
 0x157   : >> { %1356 = vst [vmem:[%s2500_s14 + $0x78] sm:$0xf] %v1355_v40  ;;  %1358 = vst [vmem:[%s2500_s14 + $0x7c] sm:$0xf] %v1357_v41  ;;  %v1361_v43 = vld [vmem:[%s2504_s20 + $0x84] sm:$0xf] }
 0x158   : >> { %1360 = vst [vmem:[%s2500_s14 + $0x80] sm:$0xf] %v1359_v42  ;;  %v1363_v44 = vld [vmem:[%s2504_s20 + $0x88] sm:$0xf]  ;;  %v1365_v45 = vld [vmem:[%s2504_s20 + $0x8c] sm:$0xf] }
 0x159   : >> { %1362 = vst [vmem:[%s2500_s14 + $0x84] sm:$0xf] %v1361_v43  ;;  %1364 = vst [vmem:[%s2500_s14 + $0x88] sm:$0xf] %v1363_v44  ;;  %v1367_v46 = vld [vmem:[%s2504_s20 + $0x90] sm:$0xf] }
 0x15a   : >> { %1366 = vst [vmem:[%s2500_s14 + $0x8c] sm:$0xf] %v1365_v45  ;;  %v1369_v47 = vld [vmem:[%s2504_s20 + $0x94] sm:$0xf]  ;;  %v1371_v48 = vld [vmem:[%s2504_s20 + $0x98] sm:$0xf] }
 0x15b   : >> { %1368 = vst [vmem:[%s2500_s14 + $0x90] sm:$0xf] %v1367_v46  ;;  %1370 = vst [vmem:[%s2500_s14 + $0x94] sm:$0xf] %v1369_v47  ;;  %v1373_v49 = vld [vmem:[%s2504_s20 + $0x9c] sm:$0xf] }
 0x15c   : >> { %1372 = vst [vmem:[%s2500_s14 + $0x98] sm:$0xf] %v1371_v48  ;;  %v1375_v50 = vld [vmem:[%s2504_s20 + $0xa0] sm:$0xf]  ;;  %v1377_v51 = vld [vmem:[%s2504_s20 + $0xa4] sm:$0xf] }
 0x15d   : >> { %1374 = vst [vmem:[%s2500_s14 + $0x9c] sm:$0xf] %v1373_v49  ;;  %1376 = vst [vmem:[%s2500_s14 + $0xa0] sm:$0xf] %v1375_v50  ;;  %v1379_v52 = vld [vmem:[%s2504_s20 + $0xa8] sm:$0xf] }
 0x15e   : >> { %1378 = vst [vmem:[%s2500_s14 + $0xa4] sm:$0xf] %v1377_v51  ;;  %v1381_v53 = vld [vmem:[%s2504_s20 + $0xac] sm:$0xf]  ;;  %v1383_v54 = vld [vmem:[%s2504_s20 + $0xb0] sm:$0xf] }
 0x15f   : >> { %1380 = vst [vmem:[%s2500_s14 + $0xa8] sm:$0xf] %v1379_v52  ;;  %1382 = vst [vmem:[%s2500_s14 + $0xac] sm:$0xf] %v1381_v53  ;;  %v1385_v55 = vld [vmem:[%s2504_s20 + $0xb4] sm:$0xf] }
 0x160   : >> { %1384 = vst [vmem:[%s2500_s14 + $0xb0] sm:$0xf] %v1383_v54  ;;  %v1387_v56 = vld [vmem:[%s2504_s20 + $0xb8] sm:$0xf]  ;;  %v1389_v57 = vld [vmem:[%s2504_s20 + $0xbc] sm:$0xf] }
 0x161   : >> { %1386 = vst [vmem:[%s2500_s14 + $0xb4] sm:$0xf] %v1385_v55  ;;  %1388 = vst [vmem:[%s2500_s14 + $0xb8] sm:$0xf] %v1387_v56  ;;  %v1391_v58 = vld [vmem:[%s2504_s20 + $0xc0] sm:$0xf] }
 0x162   : >> { %1390 = vst [vmem:[%s2500_s14 + $0xbc] sm:$0xf] %v1389_v57  ;;  %v1393_v59 = vld [vmem:[%s2504_s20 + $0xc4] sm:$0xf]  ;;  %v1395_v60 = vld [vmem:[%s2504_s20 + $0xc8] sm:$0xf] }
 0x163   : >> { %1392 = vst [vmem:[%s2500_s14 + $0xc0] sm:$0xf] %v1391_v58  ;;  %1394 = vst [vmem:[%s2500_s14 + $0xc4] sm:$0xf] %v1393_v59  ;;  %v1397_v61 = vld [vmem:[%s2504_s20 + $0xcc] sm:$0xf] }
 0x164   : >> { %1396 = vst [vmem:[%s2500_s14 + $0xc8] sm:$0xf] %v1395_v60  ;;  %v1399_v62 = vld [vmem:[%s2504_s20 + $0xd0] sm:$0xf]  ;;  %v1401_v63 = vld [vmem:[%s2504_s20 + $0xd4] sm:$0xf] }
 0x165   : >> { %1398 = vst [vmem:[%s2500_s14 + $0xcc] sm:$0xf] %v1397_v61  ;;  %1400 = vst [vmem:[%s2500_s14 + $0xd0] sm:$0xf] %v1399_v62  ;;  %v1403_v0 = vld [vmem:[%s2504_s20 + $0xd8] sm:$0xf] }
 0x166   : >> { %1402 = vst [vmem:[%s2500_s14 + $0xd4] sm:$0xf] %v1401_v63  ;;  %v1405_v1 = vld [vmem:[%s2504_s20 + $0xdc] sm:$0xf]  ;;  %v1407_v2 = vld [vmem:[%s2504_s20 + $0xe0] sm:$0xf] }
 0x167   : >> { %1404 = vst [vmem:[%s2500_s14 + $0xd8] sm:$0xf] %v1403_v0  ;;  %1406 = vst [vmem:[%s2500_s14 + $0xdc] sm:$0xf] %v1405_v1  ;;  %v1409_v3 = vld [vmem:[%s2504_s20 + $0xe4] sm:$0xf] }
 0x168   : >> { %1408 = vst [vmem:[%s2500_s14 + $0xe0] sm:$0xf] %v1407_v2  ;;  %v1411_v4 = vld [vmem:[%s2504_s20 + $0xe8] sm:$0xf]  ;;  %v1413_v5 = vld [vmem:[%s2504_s20 + $0xec] sm:$0xf] }
 0x169   : >> { %1410 = vst [vmem:[%s2500_s14 + $0xe4] sm:$0xf] %v1409_v3  ;;  %1412 = vst [vmem:[%s2500_s14 + $0xe8] sm:$0xf] %v1411_v4  ;;  %v1415_v6 = vld [vmem:[%s2504_s20 + $0xf0] sm:$0xf] }
 0x16a   : >> { %1414 = vst [vmem:[%s2500_s14 + $0xec] sm:$0xf] %v1413_v5  ;;  %v1417_v7 = vld [vmem:[%s2504_s20 + $0xf4] sm:$0xf]  ;;  %v1419_v8 = vld [vmem:[%s2504_s20 + $0xf8] sm:$0xf] }
 0x16b   : >> { %1416 = vst [vmem:[%s2500_s14 + $0xf0] sm:$0xf] %v1415_v6  ;;  %1418 = vst [vmem:[%s2500_s14 + $0xf4] sm:$0xf] %v1417_v7  ;;  %v1421_v9 = vld [vmem:[%s2504_s20 + $0xfc] sm:$0xf] }
 0x16c   : >> { %1420 = vst [vmem:[%s2500_s14 + $0xf8] sm:$0xf] %v1419_v8  ;;  %1422 = vst [vmem:[%s2500_s14 + $0xfc] sm:$0xf] %v1421_v9  ;;  %s2999_s27 = smov (%p1424_p12, %s1423_s27), 0  ;;  %s1289_s26 = sadd.s32 1, %s2512_s26  }
 0x16d   : >> { %s1913_s28 = sshll.u32 %s2999_s27, 8  ;;  %p1288_p13 = scmp.ge.s32.totalorder %s1289_s26, %s2791_s24 }
 0x16e   : >> { %s1428_s20 = scalar_lea.vmem %s2688_s10, %s1913_s28 [#allocation2]   ;;  %s1429_s14 = scalar_lea.vmem %s2785_s21, %s1913_s28  }
 0x16f   : >> { %s2989_s25 = smov %s2999_s27  ;;  %1291 = sbr.rel (!%p1288_p13) target bundleno = 322 (0x142), region = 124 }
 0x176 PF: > { %s2959_s29 = sand.u32 63, %s2997_s11   ;;  %s1988_s30 = sshll.u32 %s2791_s24, 8 }
 0x177   : > { %s1434_s4 = scalar_lea.vmem %s2688_s10, %s1988_s30 [#allocation2]   ;;  %s1436_s5 = scalar_lea.vmem %s2785_s21, %s1988_s30  }
 0x178   : > { %p1918_p0 = scmp.le.s32.totalorder %s2959_s29, 0 }
 0x179   : > { %s2514_s6 = smov (!%p1918_p0), %s1436_s5   ;;  %s2518_s7 = smov (!%p1918_p0), %s1434_s4  }
 0x17a   : > { %1709 = sbr.rel (%p1918_p0) target bundleno = 395 (0x18b), region = 129  ;;  %s2522_s8 = smov (!%p1918_p0), 0  }
 0x17b   : > { %s2526_s9 = smov (!%p1918_p0), 0  }
 0x181 LB: >> { %v1446_v38 = vld [vmem:[%s2520_s7] sm:$0xf]  ;;  %s1448_s11 = sadd.s32 1, %s2524_s8  ;;  %s1440_s9 = sadd.s32 1, %s2528_s9   ;;  %s2528_s9 = sphi %s2526_s9, %s1440_s9   ;;  %s2524_s8 = sphi %s2522_s8, %s2523_s8   ;;  %s2520_s7 = sphi %s2518_s7, %s1453_s7   ;;  %s2516_s6 = sphi %s2514_s6, %s1454_s6  }
 0x182   : >> { %1447 = vst [vmem:[%s2516_s6] sm:$0xf] %v1446_v38  ;;  %p1449_p1 = scmp.ge.s32.totalorder %s1448_s11, %s2959_s29  ;;  %p1439_p2 = scmp.ge.s32.totalorder %s1440_s9, %s2959_s29 }
 0x184   : >> { %s3001_s11 = smov (%p1449_p1, %s1448_s11), 0  ;;  %1442 = sbr.rel (!%p1439_p2) target bundleno = 385 (0x181), region = 135 }
 0x185   : >> { %s1919_s10 = sshll.u32 %s3001_s11, 2  ;;  %s2523_s8 = smov %s3001_s11  }
 0x186   : >> { %s1453_s7 = scalar_lea.vmem %s1434_s4, %s1919_s10 [#allocation2]   ;;  %s1454_s6 = scalar_lea.vmem %s1436_s5, %s1919_s10  }
 0x18b PF: > { %s13_s16 = sadd.s32 1, %s2496_s16   ;;  %s2990_s12 = smov %s2484_s13 }
 0x18c   : > { %p10_p3 = scmp.ge.s32.totalorder %s13_s16, 21   ;;  %s2991_s13 = smov %s2592_s22 }
 0x18d   : > { %s2992_s14 = smov %s2492_s15  ;;  %s2993_s15 = smov %s2995_s18 }
 0x18e   :  { %12 = sbr.rel (!%p10_p3) target bundleno = 3 (0x3), region = 146 }

// kernel: base_model_forward.6
= control target key start
LH: loop header
LB: loop body
LE: loop exit
PB: predicated region body
PF: predicated region fallthrough
CT: control target
= control target key end

     0   :  { %s5445_s12 = smov 0   ;;  %s5447_s13 = smov 0   ;;  %s6561_s0 = inlined_call_operand.vmem [shape: bf16[546,1152], index: 0, kind: input, shape index: {}]   ;;  %s6562_s1 = inlined_call_operand.vmem [shape: bf16[1152,256], index: 1, kind: input, shape index: {}]   ;;  %s6563_s2 = inlined_call_operand.vmem [shape: f32[1,256], index: 2, kind: input, shape index: {}]   ;;  %s6564_s3 = inlined_call_operand.vmem [shape: bf16[546,256], index: 3, kind: output, shape index: {}]  }
   0x1   :  { %s5449_s14 = smov 0   ;;  %s5451_s15 = smov 0  }
   0x2   :  { %s5453_s16 = smov 0  }
   0x3 LB: > { %s3930_s17 = sadd.s32 4294967295, %s5390_s16   ;;  %s25_s18 = sadd.s32 1, %s5386_s15  ;;  %s5390_s16 = sphi %s5453_s16, %s13_s16   ;;  %s5386_s15 = sphi %s5451_s15, %s6574_s15   ;;  %s5382_s14 = sphi %s5449_s14, %s6573_s14   ;;  %s5378_s13 = sphi %s5447_s13, %s6572_s13   ;;  %s5374_s12 = sphi %s5445_s12, %s6571_s12  }
   0x4   : > { %p27_p0 = scmp.ge.s32.totalorder %s25_s18, 2  ;;  %s112_s19 = sadd.s32 1, %s5378_s13 }
   0x5   : > { %p122_p1 = scmp.ne.s32.totalorder %s5378_s13, %s5374_s12  ;;  %p123_p2 = scmp.eq.s32.totalorder %s3930_s17, 1 }
   0x6   : > { %s6576_s18 = smov (%p27_p0, %s25_s18), 0  ;;  %p3936_p4 = scmp.ge.s32.totalorder %s5390_s16, 1 }
   0x7   : > { %p5477_p3 = por %p123_p2, %p122_p1  ;;  %s107_s21 = ssub.s32 %s5386_s15, %s6576_s18 }
   0x8   : > { %p184_p5 = scmp.lt.s32.totalorder %s5390_s16, 3  ;;  %p110_p6 = scmp.eq.s32.totalorder %s107_s21, 0 }
   0xa   : > { %p185_p7 = pnand %p3936_p4, %p184_p5 }
   0xb   : > { %s5486_s22 = scalar_select %p110_p6, %s5378_s13, %s112_s19  }
   0xc   : > { %188 = sbr.rel (%p185_p7) target bundleno = 723 (0x2d3), region = 32  ;;  %v4834_v0 = vld [vmem:[%s6562_s1 + $0x4] ss:$8 sps:$4 sm:$0xff] (!%p185_p7)   ;;  %v4838_v2 = vld [vmem:[%s6562_s1] ss:$8 sps:$4 sm:$0xff] (!%p185_p7)  }
   0xd   : > { %v4836_v1 = vld [vmem:[%s6562_s1 + $0x204] ss:$8 sps:$4 sm:$0xff] (!%p185_p7)   ;;  %2142 = vmatprep.subr.bf16.mxu1 (!%p185_p7), %v4834_v0  ;;  %v4839_v3 = vld [vmem:[%s6562_s1 + $0x200] ss:$8 sps:$4 sm:$0xff] (!%p185_p7)   ;;  %v4840_v4 = vld [vmem:[%s6562_s1 + $0x14] ss:$8 sps:$4 sm:$0xff] (!%p185_p7)  }
   0xe   : > { %2568 = vmatprep.subr.bf16.mxu0 (!%p185_p7), %v4836_v1  ;;  %2143 = vmatpush1.bf16.msra.mxu1 (!%p185_p7), %v4838_v2  ;;  %v4842_v5 = vld [vmem:[%s6562_s1 + $0x214] ss:$8 sps:$4 sm:$0xff] (!%p185_p7)   ;;  %v4844_v6 = vld [vmem:[%s6562_s1 + $0x10] ss:$8 sps:$4 sm:$0xff] (!%p185_p7)   ;;  %v4846_v8 = vld [vmem:[%s6562_s1 + $0x24] ss:$8 sps:$4 sm:$0xff] (!%p185_p7)  }
   0xf   : > { %2569 = vmatpush1.bf16.msra.mxu0 (!%p185_p7), %v4839_v3  ;;  %2144 = vmatprep.subr.bf16.mxu1 (!%p185_p7), %v4840_v4  ;;  %v4845_v7 = vld [vmem:[%s6562_s1 + $0x210] ss:$8 sps:$4 sm:$0xff] (!%p185_p7)   ;;  %v4848_v9 = vld [vmem:[%s6562_s1 + $0x224] ss:$8 sps:$4 sm:$0xff] (!%p185_p7)   ;;  %v4850_v10 = vld [vmem:[%s6562_s1 + $0x20] ss:$8 sps:$4 sm:$0xff] (!%p185_p7)  }
  0x10   : > { %2570 = vmatprep.subr.bf16.mxu0 (!%p185_p7), %v4842_v5  ;;  %v4851_v11 = vld [vmem:[%s6562_s1 + $0x220] ss:$8 sps:$4 sm:$0xff] (!%p185_p7)   ;;  %v4852_v12 = vld [vmem:[%s6562_s1 + $0x34] ss:$8 sps:$4 sm:$0xff] (!%p185_p7)   ;;  %v4856_v14 = vld [vmem:[%s6562_s1 + $0x30] ss:$8 sps:$4 sm:$0xff] (!%p185_p7)  }
  0x11   : > { %v4854_v13 = vld [vmem:[%s6562_s1 + $0x234] ss:$8 sps:$4 sm:$0xff] (!%p185_p7)   ;;  %v4857_v15 = vld [vmem:[%s6562_s1 + $0x230] ss:$8 sps:$4 sm:$0xff] (!%p185_p7)   ;;  %v4858_v16 = vld [vmem:[%s6562_s1 + $0x44] ss:$8 sps:$4 sm:$0xff] (!%p185_p7)  }
  0x12   : > { %2145 = vmatpush1.bf16.msra.mxu1 (!%p185_p7), %v4844_v6  ;;  %v4860_v17 = vld [vmem:[%s6562_s1 + $0x244] ss:$8 sps:$4 sm:$0xff] (!%p185_p7)   ;;  %v4862_v18 = vld [vmem:[%s6562_s1 + $0x40] ss:$8 sps:$4 sm:$0xff] (!%p185_p7)   ;;  %v4864_v20 = vld [vmem:[%s6562_s1 + $0x54] ss:$8 sps:$4 sm:$0xff] (!%p185_p7)  }
  0x13   : > { %2571 = vmatpush1.bf16.msra.mxu0 %v4845_v7  ;;  %2146 = vmatprep.subr.bf16.mxu1 %v4846_v8  ;;  %v4863_v19 = vld [vmem:[%s6562_s1 + $0x240] ss:$8 sps:$4 sm:$0xff]   ;;  %v4866_v21 = vld [vmem:[%s6562_s1 + $0x254] ss:$8 sps:$4 sm:$0xff]   ;;  %v4868_v22 = vld [vmem:[%s6562_s1 + $0x50] ss:$8 sps:$4 sm:$0xff]  }
  0x14   : > { %2572 = vmatprep.subr.bf16.mxu0 %v4848_v9  ;;  %v4869_v23 = vld [vmem:[%s6562_s1 + $0x250] ss:$8 sps:$4 sm:$0xff]   ;;  %v4870_v24 = vld [vmem:[%s6562_s1 + $0x64] ss:$8 sps:$4 sm:$0xff]   ;;  %v4874_v26 = vld [vmem:[%s6562_s1 + $0x60] ss:$8 sps:$4 sm:$0xff]  }
  0x15   : > { %v4872_v25 = vld [vmem:[%s6562_s1 + $0x264] ss:$8 sps:$4 sm:$0xff]   ;;  %v4875_v27 = vld [vmem:[%s6562_s1 + $0x260] ss:$8 sps:$4 sm:$0xff]   ;;  %v4876_v28 = vld [vmem:[%s6562_s1 + $0x74] ss:$8 sps:$4 sm:$0xff]  }
  0x16   : > { %2147 = vmatpush1.bf16.msra.mxu1 %v4850_v10  ;;  %s5576_s24 = smul.u32 36, %s5382_s14  ;;  %v4878_v29 = vld [vmem:[%s6562_s1 + $0x274] ss:$8 sps:$4 sm:$0xff]   ;;  %v4880_v30 = vld [vmem:[%s6562_s1 + $0x70] ss:$8 sps:$4 sm:$0xff]  }
  0x17   : > { %2573 = vmatpush1.bf16.msra.mxu0 %v4851_v11  ;;  %2148 = vmatprep.subr.bf16.mxu1 %v4852_v12  ;;  %v4881_v31 = vld [vmem:[%s6562_s1 + $0x270] ss:$8 sps:$4 sm:$0xff]   ;;  %v4882_v32 = vld [vmem:[%s6562_s1 + $0x84] ss:$8 sps:$4 sm:$0xff]   ;;  %v4886_v34 = vld [vmem:[%s6562_s1 + $0x80] ss:$8 sps:$4 sm:$0xff]  }
  0x18   : > { %2574 = vmatprep.subr.bf16.mxu0 %v4854_v13  ;;  %p228_p8 = scmp.lt.s32.totalorder %s5576_s24, 68  ;;  %v4884_v33 = vld [vmem:[%s6562_s1 + $0x284] ss:$8 sps:$4 sm:$0xff]   ;;  %v4887_v35 = vld [vmem:[%s6562_s1 + $0x280] ss:$8 sps:$4 sm:$0xff]   ;;  %s3540_s9 = ssub.s32 (%p5477_p3), 69, %s5576_s24 }
  0x19   : > { %v4888_v36 = vld [vmem:[%s6562_s1 + $0x94] ss:$8 sps:$4 sm:$0xff]   ;;  %v4892_v38 = vld [vmem:[%s6562_s1 + $0x90] ss:$8 sps:$4 sm:$0xff]   ;;  %v4894_v40 = vld [vmem:[%s6562_s1 + $0xa4] ss:$8 sps:$4 sm:$0xff]  }
  0x1a   : > { %2149 = vmatpush1.bf16.msra.mxu1 %v4856_v14  ;;  %s229_s21 = scalar_select %p228_p8, %s5576_s24, 68  ;;  %v4890_v37 = vld [vmem:[%s6562_s1 + $0x294] ss:$8 sps:$4 sm:$0xff]   ;;  %v4893_v39 = vld [vmem:[%s6562_s1 + $0x290] ss:$8 sps:$4 sm:$0xff]  }
  0x1b   : > { %2575 = vmatpush1.bf16.msra.mxu0 %v4857_v15  ;;  %2150 = vmatprep.subr.bf16.mxu1 %v4858_v16  ;;  %v4896_v41 = vld [vmem:[%s6562_s1 + $0x2a4] ss:$8 sps:$4 sm:$0xff]   ;;  %v4898_v42 = vld [vmem:[%s6562_s1 + $0xa0] ss:$8 sps:$4 sm:$0xff]   ;;  %v4900_v44 = vld [vmem:[%s6562_s1 + $0xb4] ss:$8 sps:$4 sm:$0xff]  }
  0x1c   : > { %2576 = vmatprep.subr.bf16.mxu0 %v4860_v17  ;;  %s4727_s5 = smul.u32 36, %s229_s21  ;;  %v4899_v43 = vld [vmem:[%s6562_s1 + $0x2a0] ss:$8 sps:$4 sm:$0xff]   ;;  %v4902_v45 = vld [vmem:[%s6562_s1 + $0x2b4] ss:$8 sps:$4 sm:$0xff]   ;;  %p3541_p9 = scmp.lt.s32.totalorder (%p5477_p3), %s3540_s9, 36 }
  0x1d   : > { %v4904_v46 = vld [vmem:[%s6562_s1 + $0xb0] ss:$8 sps:$4 sm:$0xff]   ;;  %v4906_v48 = vld [vmem:[%s6562_s1 + $0xc4] ss:$8 sps:$4 sm:$0xff]   ;;  %v4910_v52 = vld [vmem:[%s6562_s1 + $0xc0] ss:$8 sps:$4 sm:$0xff]  }
  0x1e   : > { %2151 = vmatpush1.bf16.msra.mxu1 %v4862_v18  ;;  %s5631_s25 = scalar_lea.vmem %s6561_s0, %s4727_s5  ;;  %v4905_v47 = vld [vmem:[%s6562_s1 + $0x2b0] ss:$8 sps:$4 sm:$0xff]   ;;  %v4908_v50 = vld [vmem:[%s6562_s1 + $0x2c4] ss:$8 sps:$4 sm:$0xff]   ;;  %v4911_v53 = vld [vmem:[%s6562_s1 + $0x2c0] ss:$8 sps:$4 sm:$0xff]  }
  0x1f   : > { %2577 = vmatpush1.bf16.msra.mxu0 %v4863_v19  ;;  %2152 = vmatprep.subr.bf16.mxu1 %v4864_v20  ;;  %v4932_v49 = vld [vmem:[%s5631_s25 + $0x4] ss:$36 sps:$4 sm:$0xff]   ;;  %v4935_v51 = vld [vmem:[%s5631_s25 + $0x14] ss:$36 sps:$4 sm:$0xff]   ;;  %v4942_v8 = vld [vmem:[%s5631_s25 + $0x4c] ss:$36 sps:$4 sm:$0xff]  }
  0x20   : > { %2578 = vmatprep.subr.bf16.mxu0 %v4866_v21  ;;  %2174 = vmatprep.mubr.bf16.mxu1 %v4932_v49  ;;  %v4912_v54 = vld [vmem:[%s6562_s1 + $0xd4] ss:$8 sps:$4 sm:$0xff]   ;;  %v4916_v56 = vld [vmem:[%s6562_s1 + $0xd0] ss:$8 sps:$4 sm:$0xff]   ;;  %v4918_v58 = vld [vmem:[%s6562_s1 + $0xe4] ss:$8 sps:$4 sm:$0xff]  }
  0x21   : > { %2600 = vmatprep.mubr.bf16.mxu0 %v4935_v51  ;;  %v4914_v55 = vld [vmem:[%s6562_s1 + $0x2d4] ss:$8 sps:$4 sm:$0xff]   ;;  %v4917_v57 = vld [vmem:[%s6562_s1 + $0x2d0] ss:$8 sps:$4 sm:$0xff]   ;;  %v4920_v59 = vld [vmem:[%s6562_s1 + $0x2e4] ss:$8 sps:$4 sm:$0xff]  }
  0x22   : > { %2153 = vmatpush1.bf16.msra.mxu1 %v4868_v22  ;;  %v4922_v60 = vld [vmem:[%s6562_s1 + $0xe0] ss:$8 sps:$4 sm:$0xff]   ;;  %v4924_v62 = vld [vmem:[%s6562_s1 + $0xf4] ss:$8 sps:$4 sm:$0xff]   ;;  %v4928_v0 = vld [vmem:[%s6562_s1 + $0xf0] ss:$8 sps:$4 sm:$0xff]  }
  0x23   : > { %2579 = vmatpush1.bf16.msra.mxu0 %v4869_v23  ;;  %2154 = vmatprep.subr.bf16.mxu1 %v4870_v24  ;;  %v4923_v61 = vld [vmem:[%s6562_s1 + $0x2e0] ss:$8 sps:$4 sm:$0xff]   ;;  %v4926_v63 = vld [vmem:[%s6562_s1 + $0x2f4] ss:$8 sps:$4 sm:$0xff]   ;;  %v4929_v1 = vld [vmem:[%s6562_s1 + $0x2f0] ss:$8 sps:$4 sm:$0xff]  }
  0x24   : > { %2580 = vmatprep.subr.bf16.mxu0 %v4872_v25  ;;  %v4938_v2 = vld [vmem:[%s6562_s1 + $0x104] ss:$8 sps:$4 sm:$0xff]   ;;  %v4933_v5 = vld [vmem:[%s5631_s25 + $0x10] ss:$36 sps:$4 sm:$0xff]   ;;  %v4936_v6 = vld [vmem:[%s6562_s1 + $0x100] ss:$8 sps:$4 sm:$0xff]  }
  0x25   : > { %v4941_v3 = vld [vmem:[%s6562_s1 + $0x304] ss:$8 sps:$4 sm:$0xff]   ;;  %v4939_v7 = vld [vmem:[%s6562_s1 + $0x300] ss:$8 sps:$4 sm:$0xff]   ;;  %v4948_v10 = vld [vmem:[%s6562_s1 + $0x314] ss:$8 sps:$4 sm:$0xff]  }
  0x26   : > { %2155 = vmatpush1.bf16.msra.mxu1 %v4874_v26  ;;  %v4930_v4 = vld [vmem:[%s5631_s25] ss:$36 sps:$4 sm:$0xff]   ;;  %v4953_v11 = vld [vmem:[%s6562_s1 + $0x114] ss:$8 sps:$4 sm:$0xff]   ;;  %v4946_v12 = vld [vmem:[%s6562_s1 + $0x310] ss:$8 sps:$4 sm:$0xff]  }
  0x27   : > { %2581 = vmatpush1.bf16.msra.mxu0 %v4875_v27  ;;  %2156 = vmatprep.subr.bf16.mxu1 %v4876_v28  ;;  %v4944_v9 = vld [vmem:[%s5631_s25 + $0x5c] ss:$36 sps:$4 sm:$0xff]   ;;  %v4951_v13 = vld [vmem:[%s6562_s1 + $0x110] ss:$8 sps:$4 sm:$0xff]   ;;  %v4956_v14 = vld [vmem:[%s6562_s1 + $0x324] ss:$8 sps:$4 sm:$0xff]  }
  0x28   : > { %2582 = vmatprep.subr.bf16.mxu0 %v4878_v29  ;;  %v4968_v15 = vld [vmem:[%s6562_s1 + $0x124] ss:$8 sps:$4 sm:$0xff]   ;;  %v4950_v17 = vld [vmem:[%s5631_s25 + $0x58] ss:$36 sps:$4 sm:$0xff]   ;;  %v4954_v18 = vld [vmem:[%s6562_s1 + $0x320] ss:$8 sps:$4 sm:$0xff]  }
  0x29   : > { %v4949_v16 = vld [vmem:[%s5631_s25 + $0x48] ss:$36 sps:$4 sm:$0xff]   ;;  %v4957_v19 = vld [vmem:[%s5631_s25 + $0x94] ss:$36 sps:$4 sm:$0xff]   ;;  %v4962_v27 = vld [vmem:[%s5631_s25 + $0xa0] ss:$36 sps:$4 sm:$0xff]  }
  0x2a   : > { %2157 = vmatpush1.bf16.msra.mxu1 %v4880_v30  ;;  %v4959_v20 = vld [vmem:[%s5631_s25 + $0xa4] ss:$36 sps:$4 sm:$0xff]   ;;  %v4965_v21 = vld [vmem:[%s6562_s1 + $0x334] ss:$8 sps:$4 sm:$0xff]   ;;  %v4963_v24 = vld [vmem:[%s6562_s1 + $0x330] ss:$8 sps:$4 sm:$0xff]  }
  0x2b   : > { %2583 = vmatpush1.bf16.msra.mxu0 %v4881_v31  ;;  %2158 = vmatprep.subr.bf16.mxu1 %v4882_v32  ;;  %v4966_v22 = vld [vmem:[%s6562_s1 + $0x120] ss:$8 sps:$4 sm:$0xff]   ;;  %v4983_v23 = vld [vmem:[%s6562_s1 + $0x134] ss:$8 sps:$4 sm:$0xff]   ;;  %v4971_v26 = vld [vmem:[%s6562_s1 + $0x344] ss:$8 sps:$4 sm:$0xff]  }
  0x2c   : > { %2584 = vmatprep.subr.bf16.mxu0 %v4884_v33  ;;  %v4961_v25 = vld [vmem:[%s5631_s25 + $0x90] ss:$36 sps:$4 sm:$0xff]   ;;  %v4969_v29 = vld [vmem:[%s6562_s1 + $0x340] ss:$8 sps:$4 sm:$0xff]   ;;  %v4998_v33 = vld [vmem:[%s6562_s1 + $0x144] ss:$8 sps:$4 sm:$0xff]  }
  0x2d   : > { %v4981_v28 = vld [vmem:[%s6562_s1 + $0x130] ss:$8 sps:$4 sm:$0xff]   ;;  %v4972_v30 = vld [vmem:[%s5631_s25 + $0xdc] ss:$36 sps:$4 sm:$0xff]   ;;  %s219_s5 = sand.u32 1, %s5374_s12   ;;  %s4333_s10 = smul.u32 (%p5477_p3), 288, %s5382_s14 }
  0x2e   : > { %2159 = vmatpush1.bf16.msra.mxu1 %v4886_v34  ;;  %v4974_v31 = vld [vmem:[%s5631_s25 + $0xec] ss:$36 sps:$4 sm:$0xff]   ;;  %v4980_v32 = vld [vmem:[%s6562_s1 + $0x354] ss:$8 sps:$4 sm:$0xff]   ;;  %v5026_v49 = vld [vmem:[%s6562_s1 + $0x160] ss:$8 sps:$4 sm:$0xff]  }
  0x2f   : > { %2585 = vmatpush1.bf16.msra.mxu0 %v4887_v35  ;;  %2160 = vmatprep.subr.bf16.mxu1 %v4888_v36  ;;  %v4978_v34 = vld [vmem:[%s6562_s1 + $0x350] ss:$8 sps:$4 sm:$0xff]   ;;  %v4996_v35 = vld [vmem:[%s6562_s1 + $0x140] ss:$8 sps:$4 sm:$0xff]   ;;  %v5013_v36 = vld [vmem:[%s6562_s1 + $0x154] ss:$8 sps:$4 sm:$0xff]   ;;  %s6418_s19 = scalar_lea.vmem (%p5477_p3), %s6564_s3, %s4333_s10  }
  0x30   : > { %2586 = vmatprep.subr.bf16.mxu0 %v4890_v37  ;;  %v4986_v37 = vld [vmem:[%s6562_s1 + $0x364] ss:$8 sps:$4 sm:$0xff]   ;;  %v4999_v51 = vld [vmem:[%s6562_s1 + $0x380] ss:$8 sps:$4 sm:$0xff]   ;;  %s4726_s8 = smul.u32 288, %s219_s5 }
  0x32   : > { %2161 = vmatpush1.bf16.msra.mxu1 %v4892_v38  ;;  %v4976_v38 = vld [vmem:[%s5631_s25 + $0xd8] ss:$36 sps:$4 sm:$0xff]   ;;  %s6278_s12 = scalar_lea.vmem [#allocation2], %s4726_s8  }
  0x33   : > { %2587 = vmatpush1.bf16.msra.mxu0 %v4893_v39  ;;  %2162 = vmatprep.subr.bf16.mxu1 %v4894_v40  ;;  %v4977_v39 = vld [vmem:[%s5631_s25 + $0xe8] ss:$36 sps:$4 sm:$0xff]  }
  0x34   : > { %2588 = vmatprep.subr.bf16.mxu0 %v4896_v41  ;;  %v4984_v40 = vld [vmem:[%s6562_s1 + $0x360] ss:$8 sps:$4 sm:$0xff]  }
  0x35   : > { %v4987_v41 = vld [vmem:[%s5631_s25 + $0x124] ss:$36 sps:$4 sm:$0xff]  }
  0x36   : > { %2163 = vmatpush1.bf16.msra.mxu1 %v4898_v42  ;;  %v4989_v42 = vld [vmem:[%s5631_s25 + $0x134] ss:$36 sps:$4 sm:$0xff]  }
  0x37   : > { %2589 = vmatpush1.bf16.msra.mxu0 %v4899_v43  ;;  %2164 = vmatprep.subr.bf16.mxu1 %v4900_v44  ;;  %v4995_v43 = vld [vmem:[%s6562_s1 + $0x374] ss:$8 sps:$4 sm:$0xff]   ;;  %v5011_v44 = vld [vmem:[%s6562_s1 + $0x150] ss:$8 sps:$4 sm:$0xff]  }
  0x38   : > { %2590 = vmatprep.subr.bf16.mxu0 %v4902_v45  ;;  %v5028_v45 = vld [vmem:[%s6562_s1 + $0x164] ss:$8 sps:$4 sm:$0xff]  }
  0x3a   : > { %2165 = vmatpush1.bf16.msra.mxu1 %v4904_v46  ;;  %v4993_v46 = vld [vmem:[%s6562_s1 + $0x370] ss:$8 sps:$4 sm:$0xff]  }
  0x3b   : > { %2591 = vmatpush1.bf16.msra.mxu0 %v4905_v47  ;;  %2166 = vmatprep.subr.bf16.mxu1 %v4906_v48  ;;  %v4991_v47 = vld [vmem:[%s5631_s25 + $0x120] ss:$36 sps:$4 sm:$0xff]  }
  0x3c   : > { %2592 = vmatprep.subr.bf16.mxu0 %v4908_v50  ;;  %v5001_v48 = vld [vmem:[%s6562_s1 + $0x384] ss:$8 sps:$4 sm:$0xff]   ;;  %v4992_v50 = vld [vmem:[%s5631_s25 + $0x130] ss:$36 sps:$4 sm:$0xff]  }
  0x3e   : > { %2167 = vmatpush1.bf16.msra.mxu1 %v4910_v52  ;;  %v5002_v52 = vld [vmem:[%s5631_s25 + $0x16c] ss:$36 sps:$4 sm:$0xff]  }
  0x3f   : > { %2593 = vmatpush1.bf16.msra.mxu0 %v4911_v53  ;;  %2168 = vmatprep.subr.bf16.mxu1 %v4912_v54  ;;  %v5004_v53 = vld [vmem:[%s5631_s25 + $0x17c] ss:$36 sps:$4 sm:$0xff]  }
  0x40   : > { %2594 = vmatprep.subr.bf16.mxu0 %v4914_v55  ;;  %v5045_v54 = vld [vmem:[%s6562_s1 + $0x174] ss:$8 sps:$4 sm:$0xff]  }
  0x41   : > { %v5010_v55 = vld [vmem:[%s6562_s1 + $0x394] ss:$8 sps:$4 sm:$0xff]  }
  0x42   : > { %2169 = vmatpush1.bf16.msra.mxu1 %v4916_v56  ;;  %v5043_v56 = vld [vmem:[%s6562_s1 + $0x170] ss:$8 sps:$4 sm:$0xff]  }
  0x43   : > { %2595 = vmatpush1.bf16.msra.mxu0 %v4917_v57  ;;  %2170 = vmatprep.subr.bf16.mxu1 %v4918_v58  ;;  %v5008_v57 = vld [vmem:[%s6562_s1 + $0x390] ss:$8 sps:$4 sm:$0xff]   ;;  %v5006_v58 = vld [vmem:[%s5631_s25 + $0x168] ss:$36 sps:$4 sm:$0xff]  }
  0x44   : > { %2596 = vmatprep.subr.bf16.mxu0 %v4920_v59  ;;  %v5020_v59 = vld [vmem:[%s6562_s1 + $0x3a4] ss:$8 sps:$4 sm:$0xff]  }
  0x46   : > { %2171 = vmatpush1.bf16.msra.mxu1 %v4922_v60  ;;  %v5062_v60 = vld [vmem:[%s6562_s1 + $0x180] ss:$8 sps:$4 sm:$0xff]  }
  0x47   : > { %2597 = vmatpush1.bf16.msra.mxu0 %v4923_v61  ;;  %2172 = vmatprep.subr.bf16.mxu1 %v4924_v62  ;;  %v5064_v61 = vld [vmem:[%s6562_s1 + $0x184] ss:$8 sps:$4 sm:$0xff]   ;;  %v5007_v62 = vld [vmem:[%s5631_s25 + $0x178] ss:$36 sps:$4 sm:$0xff]  }
  0x48   : > { %2598 = vmatprep.subr.bf16.mxu0 %v4926_v63  ;;  %v5014_v63 = vld [vmem:[%s5631_s25 + $0x1b4] ss:$36 sps:$4 sm:$0xff]  }
  0x4a   : > { %2173 = vmatpush1.bf16.msra.mxu1 %v4928_v0  ;;  %v5016_v0 = vld [vmem:[%s5631_s25 + $0x1c4] ss:$36 sps:$4 sm:$0xff]  }
  0x4b   : > { %2599 = vmatpush1.bf16.msra.mxu0 %v4929_v1  ;;  %2355 = vmatprep.subr.bf16.mxu1 %v4938_v2  ;;  %v5018_v1 = vld [vmem:[%s6562_s1 + $0x3a0] ss:$8 sps:$4 sm:$0xff]   ;;  %v5025_v2 = vld [vmem:[%s6562_s1 + $0x3b4] ss:$8 sps:$4 sm:$0xff]  }
  0x4c   : > { %2781 = vmatprep.subr.bf16.mxu0 %v4941_v3  ;;  %v5074_v3 = vld [vmem:[%s6562_s1 + $0x190] ss:$8 sps:$4 sm:$0xff]  }
  0x4d   : > { %2175 = vmatmul.mubr.bf16.vlgmr.msra.gmra.mrb[0].mxu1 %v4930_v4  ;;  %v5076_v4 = vld [vmem:[%s6562_s1 + $0x194] ss:$8 sps:$4 sm:$0xff]  }
  0x4e   : > { %2601 = vmatmul.mubr.bf16.vlgmr.msra.gmra.mrb[0].mxu0 %v4933_v5  ;;  %2356 = vmatpush1.bf16.msra.mxu1 %v4936_v6  ;;  %v5021_v5 = vld [vmem:[%s5631_s25 + $0x1b0] ss:$36 sps:$4 sm:$0xff]   ;;  %v5022_v6 = vld [vmem:[%s5631_s25 + $0x1c0] ss:$36 sps:$4 sm:$0xff]  }
  0x4f   : > { %2782 = vmatpush1.bf16.msra.mxu0 %v4939_v7  ;;  %2184 = vmatprep.mubr.bf16.mxu1 %v4942_v8  ;;  %v5023_v7 = vld [vmem:[%s6562_s1 + $0x3b0] ss:$8 sps:$4 sm:$0xff]   ;;  %v5029_v8 = vld [vmem:[%s5631_s25 + $0x1fc] ss:$36 sps:$4 sm:$0xff]  }
  0x50   : > { %2610 = vmatprep.mubr.bf16.mxu0 %v4944_v9  ;;  %2783 = vmatprep.subr.bf16.mxu0 %v4948_v10  ;;  %v5037_v9 = vld [vmem:[%s6562_s1 + $0x3c4] ss:$8 sps:$4 sm:$0xff]   ;;  %v5083_v10 = vld [vmem:[%s6562_s1 + $0x1a0] ss:$8 sps:$4 sm:$0xff]  }
  0x51   : > { %2357 = vmatprep.subr.bf16.mxu1 %v4953_v11  ;;  %v5085_v11 = vld [vmem:[%s6562_s1 + $0x1a4] ss:$8 sps:$4 sm:$0xff]  }
  0x52   : > { %2358 = vmatpush1.bf16.msra.mxu1 %v4951_v13  ;;  %v5035_v13 = vld [vmem:[%s6562_s1 + $0x3c0] ss:$8 sps:$4 sm:$0xff]  }
  0x53   : > { %2784 = vmatpush1.bf16.msra.mxu0 %v4946_v12  ;;  %2359 = vmatprep.subr.bf16.mxu1 %v4968_v15  ;;  %v5031_v12 = vld [vmem:[%s5631_s25 + $0x20c] ss:$36 sps:$4 sm:$0xff]  }
  0x54   : > { %2785 = vmatprep.subr.bf16.mxu0 %v4956_v14  ;;  %v5040_v14 = vld [vmem:[%s6562_s1 + $0x3d4] ss:$8 sps:$4 sm:$0xff]   ;;  %v5038_v15 = vld [vmem:[%s6562_s1 + $0x3d0] ss:$8 sps:$4 sm:$0xff]  }
  0x55   : > { %2185 = vmatmul.mubr.bf16.gmra.mrb[4].mxu1 %v4949_v16  ;;  %v5095_v16 = vld [vmem:[%s6562_s1 + $0x1b0] ss:$8 sps:$4 sm:$0xff]  }
  0x56   : > { %2611 = vmatmul.mubr.bf16.gmra.mrb[4].mxu0 %v4950_v17  ;;  %2194 = vmatprep.mubr.bf16.mxu1 %v4957_v19  ;;  %v5033_v17 = vld [vmem:[%s5631_s25 + $0x1f8] ss:$36 sps:$4 sm:$0xff]   ;;  %v5052_v19 = vld [vmem:[%s6562_s1 + $0x3e4] ss:$8 sps:$4 sm:$0xff]  }
  0x57   : > { %2786 = vmatpush1.bf16.msra.mxu0 %v4954_v18  ;;  %2620 = vmatprep.mubr.bf16.mxu0 %v4959_v20  ;;  %v5097_v18 = vld [vmem:[%s6562_s1 + $0x1b4] ss:$8 sps:$4 sm:$0xff]   ;;  %v5034_v20 = vld [vmem:[%s5631_s25 + $0x208] ss:$36 sps:$4 sm:$0xff]  }
  0x58   : > { %2787 = vmatprep.subr.bf16.mxu0 %v4965_v21  ;;  %2360 = vmatpush1.bf16.msra.mxu1 %v4966_v22  ;;  %v5041_v21 = vld [vmem:[%s5631_s25 + $0x244] ss:$36 sps:$4 sm:$0xff]   ;;  %v5046_v22 = vld [vmem:[%s5631_s25 + $0x254] ss:$36 sps:$4 sm:$0xff]  }
  0x59   : > { %2361 = vmatprep.subr.bf16.mxu1 %v4983_v23  ;;  %v5050_v23 = vld [vmem:[%s6562_s1 + $0x3e0] ss:$8 sps:$4 sm:$0xff]  }
  0x5b   : > { %2788 = vmatpush1.bf16.msra.mxu0 %v4963_v24  ;;  %v5106_v24 = vld [vmem:[%s6562_s1 + $0x1c4] ss:$8 sps:$4 sm:$0xff]  }
  0x5c   : > { %2789 = vmatprep.subr.bf16.mxu0 %v4971_v26  ;;  %2362 = vmatpush1.bf16.msra.mxu1 %v4981_v28  ;;  %v5104_v26 = vld [vmem:[%s6562_s1 + $0x1c0] ss:$8 sps:$4 sm:$0xff]  }
  0x5d   : > { %2195 = vmatmul.mubr.bf16.gmra.mrb[8].mxu1 %v4961_v25  ;;  %2363 = vmatprep.subr.bf16.mxu1 %v4998_v33  ;;  %v5055_v25 = vld [vmem:[%s6562_s1 + $0x3f4] ss:$8 sps:$4 sm:$0xff]   ;;  %v5048_v28 = vld [vmem:[%s5631_s25 + $0x240] ss:$36 sps:$4 sm:$0xff]   ;;  %v5056_v33 = vld [vmem:[%s5631_s25 + $0x28c] ss:$36 sps:$4 sm:$0xff]  }
  0x5e   : > { %2621 = vmatmul.mubr.bf16.gmra.mrb[8].mxu0 %v4962_v27  ;;  %2204 = vmatprep.mubr.bf16.mxu1 %v4972_v30  ;;  %v5053_v27 = vld [vmem:[%s6562_s1 + $0x3f0] ss:$8 sps:$4 sm:$0xff]  }
  0x5f   : > { %2790 = vmatpush1.bf16.msra.mxu0 %v4969_v29  ;;  %2630 = vmatprep.mubr.bf16.mxu0 %v4974_v31  ;;  %v5067_v29 = vld [vmem:[%s6562_s1 + $0x404] ss:$8 sps:$4 sm:$0xff]   ;;  %v5116_v30 = vld [vmem:[%s6562_s1 + $0x1d0] ss:$8 sps:$4 sm:$0xff]   ;;  %v5118_v31 = vld [vmem:[%s6562_s1 + $0x1d4] ss:$8 sps:$4 sm:$0xff]  }
  0x60   : > { %2791 = vmatprep.subr.bf16.mxu0 %v4980_v32  ;;  %2364 = vmatpush1.bf16.msra.mxu1 %v4996_v35  ;;  %v5049_v32 = vld [vmem:[%s5631_s25 + $0x250] ss:$36 sps:$4 sm:$0xff]   ;;  %v5125_v35 = vld [vmem:[%s6562_s1 + $0x1e0] ss:$8 sps:$4 sm:$0xff]  }
  0x61   : > { %2365 = vmatprep.subr.bf16.mxu1 %v5013_v36  ;;  %v5127_v36 = vld [vmem:[%s6562_s1 + $0x1e4] ss:$8 sps:$4 sm:$0xff]  }
  0x63   : > { %2792 = vmatpush1.bf16.msra.mxu0 %v4978_v34  ;;  %v5060_v34 = vld [vmem:[%s5631_s25 + $0x1c] ss:$36 sps:$4 sm:$0xff]  }
  0x64   : > { %2793 = vmatprep.subr.bf16.mxu0 %v4986_v37  ;;  %2366 = vmatpush1.bf16.msra.mxu1 %v5011_v44  ;;  %v5058_v37 = vld [vmem:[%s5631_s25 + $0x18] ss:$36 sps:$4 sm:$0xff]  }
  0x65   : > { %2205 = vmatmul.mubr.bf16.gmra.mrb[12].mxu1 %v4976_v38  ;;  %2367 = vmatprep.subr.bf16.mxu1 %v5028_v45  ;;  %v5061_v38 = vld [vmem:[%s5631_s25 + $0x288] ss:$36 sps:$4 sm:$0xff]   ;;  %v5139_v44 = vld [vmem:[%s6562_s1 + $0x1f0] ss:$8 sps:$4 sm:$0xff]  }
  0x66   : > { %2631 = vmatmul.mubr.bf16.gmra.mrb[12].mxu0 %v4977_v39  ;;  %2214 = vmatprep.mubr.bf16.mxu1 %v4987_v41  ;;  %v5065_v39 = vld [vmem:[%s6562_s1 + $0x400] ss:$8 sps:$4 sm:$0xff]   ;;  %v5086_v45 = vld [vmem:[%s6562_s1 + $0x410] ss:$8 sps:$4 sm:$0xff]  }
  0x67   : > { %2794 = vmatpush1.bf16.msra.mxu0 %v4984_v40  ;;  %2640 = vmatprep.mubr.bf16.mxu0 %v4989_v42  ;;  %v5068_v40 = vld [vmem:[%s5631_s25 + $0x2d4] ss:$36 sps:$4 sm:$0xff]   ;;  %v5070_v41 = vld [vmem:[%s5631_s25 + $0x64] ss:$36 sps:$4 sm:$0xff]  }
  0x68   : > { %2795 = vmatprep.subr.bf16.mxu0 %v4995_v43  ;;  %2368 = vmatpush1.bf16.msra.mxu1 %v5026_v49  ;;  %v5141_v42 = vld [vmem:[%s6562_s1 + $0x1f4] ss:$8 sps:$4 sm:$0xff]   ;;  %v5284_v49 = vld [vmem:[%s6562_s1 + $0x204] ss:$8 sps:$4 sm:$0xff]  }
  0x69   : > { %2369 = vmatprep.subr.bf16.mxu1 %v5045_v54  ;;  %v5088_v43 = vld [vmem:[%s6562_s1 + $0x414] ss:$8 sps:$4 sm:$0xff]   ;;  %v5134_v54 = vld [vmem:[%s6562_s1 + $0x430] ss:$8 sps:$4 sm:$0xff]  }
  0x6b   : > { %2796 = vmatpush1.bf16.msra.mxu0 %v4993_v46  ;;  %v5109_v46 = vld [vmem:[%s6562_s1 + $0x424] ss:$8 sps:$4 sm:$0xff]  }
  0x6c   : > { %2797 = vmatprep.subr.bf16.mxu0 %v5001_v48  ;;  %2370 = vmatpush1.bf16.msra.mxu1 %v5043_v56  ;;  %v5073_v48 = vld [vmem:[%s5631_s25 + $0x60] ss:$36 sps:$4 sm:$0xff]   ;;  %v5081_v56 = vld [vmem:[%s5631_s25 + $0x318] ss:$36 sps:$4 sm:$0xff]  }
  0x6d   : > { %2215 = vmatmul.mubr.bf16.gmra.mrb[16].mxu1 %v4991_v47  ;;  %2371 = vmatprep.subr.bf16.mxu1 %v5064_v61  ;;  %v5072_v47 = vld [vmem:[%s5631_s25 + $0x2d0] ss:$36 sps:$4 sm:$0xff]  }
  0x6e   : > { %2641 = vmatmul.mubr.bf16.gmra.mrb[16].mxu0 %v4992_v50  ;;  %2224 = vmatprep.mubr.bf16.mxu1 %v5002_v52  ;;  %v5077_v50 = vld [vmem:[%s5631_s25 + $0x31c] ss:$36 sps:$4 sm:$0xff]  }
  0x6f   : > { %2650 = vmatprep.mubr.bf16.mxu0 %v5004_v53  ;;  %2798 = vmatpush1.bf16.msra.mxu0 %v4999_v51  ;;  %v5079_v51 = vld [vmem:[%s5631_s25 + $0xac] ss:$36 sps:$4 sm:$0xff]   ;;  %v5107_v52 = vld [vmem:[%s6562_s1 + $0x420] ss:$8 sps:$4 sm:$0xff]   ;;  %v5136_v53 = vld [vmem:[%s6562_s1 + $0x434] ss:$8 sps:$4 sm:$0xff]  }
  0x70   : > { %2799 = vmatprep.subr.bf16.mxu0 %v5010_v55  ;;  %2372 = vmatpush1.bf16.msra.mxu1 %v5062_v60  ;;  %v5154_v55 = vld [vmem:[%s6562_s1 + $0x444] ss:$8 sps:$4 sm:$0xff]   ;;  %v5152_v60 = vld [vmem:[%s6562_s1 + $0x440] ss:$8 sps:$4 sm:$0xff]   ;;  %v5169_v61 = vld [vmem:[%s6562_s1 + $0x454] ss:$8 sps:$4 sm:$0xff]  }
  0x71   : > { %2373 = vmatprep.subr.bf16.mxu1 %v5076_v4  ;;  %v5182_v4 = vld [vmem:[%s6562_s1 + $0x460] ss:$8 sps:$4 sm:$0xff]  }
  0x73   : > { %2800 = vmatpush1.bf16.msra.mxu0 %v5008_v57  ;;  %v5082_v57 = vld [vmem:[%s5631_s25 + $0xa8] ss:$36 sps:$4 sm:$0xff]  }
  0x74   : > { %2801 = vmatprep.subr.bf16.mxu0 %v5020_v59  ;;  %2374 = vmatpush1.bf16.msra.mxu1 %v5074_v3  ;;  %v5091_v59 = vld [vmem:[%s5631_s25 + $0xf4] ss:$36 sps:$4 sm:$0xff]   ;;  %v5100_v3 = vld [vmem:[%s5631_s25 + $0x13c] ss:$36 sps:$4 sm:$0xff]  }
  0x75   : > { %2225 = vmatmul.mubr.bf16.gmra.mrb[20].mxu1 %v5006_v58  ;;  %2375 = vmatprep.subr.bf16.mxu1 %v5085_v11  ;;  %v5089_v58 = vld [vmem:[%s5631_s25 + $0x364] ss:$36 sps:$4 sm:$0xff]   ;;  %v5114_v11 = vld [vmem:[%s5631_s25 + $0x3f0] ss:$36 sps:$4 sm:$0xff]  }
  0x76   : > { %2651 = vmatmul.mubr.bf16.gmra.mrb[20].mxu0 %v5007_v62  ;;  %2234 = vmatprep.mubr.bf16.mxu1 %v5014_v63  ;;  %v5167_v62 = vld [vmem:[%s6562_s1 + $0x450] ss:$8 sps:$4 sm:$0xff]   ;;  %v5093_v63 = vld [vmem:[%s5631_s25 + $0x360] ss:$36 sps:$4 sm:$0xff]  }
  0x77   : > { %2660 = vmatprep.mubr.bf16.mxu0 %v5016_v0  ;;  %2802 = vmatpush1.bf16.msra.mxu0 %v5018_v1  ;;  %v5184_v0 = vld [vmem:[%s6562_s1 + $0x464] ss:$8 sps:$4 sm:$0xff]   ;;  %v5094_v1 = vld [vmem:[%s5631_s25 + $0xf0] ss:$36 sps:$4 sm:$0xff]  }
  0x78   : > { %2803 = vmatprep.subr.bf16.mxu0 %v5025_v2  ;;  %2376 = vmatpush1.bf16.msra.mxu1 %v5083_v10  ;;  %v5098_v2 = vld [vmem:[%s5631_s25 + $0x3ac] ss:$36 sps:$4 sm:$0xff]   ;;  %v5112_v10 = vld [vmem:[%s5631_s25 + $0x184] ss:$36 sps:$4 sm:$0xff]  }
  0x79   : > { %2377 = vmatprep.subr.bf16.mxu1 %v5097_v18  ;;  %v5130_v18 = vld [vmem:[%s5631_s25 + $0x214] ss:$36 sps:$4 sm:$0xff]  }
  0x7b   : > { %2804 = vmatpush1.bf16.msra.mxu0 %v5023_v7  ;;  %v5102_v7 = vld [vmem:[%s5631_s25 + $0x3a8] ss:$36 sps:$4 sm:$0xff]  }
  0x7c   : > { %2805 = vmatprep.subr.bf16.mxu0 %v5037_v9  ;;  %2378 = vmatpush1.bf16.msra.mxu1 %v5095_v16  ;;  %v5110_v9 = vld [vmem:[%s5631_s25 + $0x3f4] ss:$36 sps:$4 sm:$0xff]   ;;  %v5124_v16 = vld [vmem:[%s5631_s25 + $0x1c8] ss:$36 sps:$4 sm:$0xff]  }
  0x7d   : > { %2235 = vmatmul.mubr.bf16.gmra.mrb[24].mxu1 %v5021_v5  ;;  %2379 = vmatprep.subr.bf16.mxu1 %v5106_v24  ;;  %v5203_v5 = vld [vmem:[%s6562_s1 + $0x470] ss:$8 sps:$4 sm:$0xff]  }
  0x7e   : > { %2661 = vmatmul.mubr.bf16.gmra.mrb[24].mxu0 %v5022_v6  ;;  %2244 = vmatprep.mubr.bf16.mxu1 %v5029_v8  ;;  %v5205_v6 = vld [vmem:[%s6562_s1 + $0x474] ss:$8 sps:$4 sm:$0xff]  }
  0x7f   : > { %2670 = vmatprep.mubr.bf16.mxu0 %v5031_v12  ;;  %2806 = vmatpush1.bf16.msra.mxu0 %v5035_v13  ;;  %v5103_v8 = vld [vmem:[%s5631_s25 + $0x138] ss:$36 sps:$4 sm:$0xff]   ;;  %v5115_v12 = vld [vmem:[%s5631_s25 + $0x180] ss:$36 sps:$4 sm:$0xff]  }
  0x80   : > { %2807 = vmatprep.subr.bf16.mxu0 %v5040_v14  ;;  %2380 = vmatpush1.bf16.msra.mxu1 %v5104_v26  ;;  %v5119_v13 = vld [vmem:[%s5631_s25 + $0x43c] ss:$36 sps:$4 sm:$0xff]   ;;  %v5121_v14 = vld [vmem:[%s5631_s25 + $0x1cc] ss:$36 sps:$4 sm:$0xff]   ;;  %v5149_v26 = vld [vmem:[%s5631_s25 + $0x2a4] ss:$36 sps:$4 sm:$0xff]  }
  0x81   : > { %2381 = vmatprep.subr.bf16.mxu1 %v5118_v31  ;;  %v5145_v24 = vld [vmem:[%s5631_s25 + $0x258] ss:$36 sps:$4 sm:$0xff]   ;;  %v5285_v31 = vld [vmem:[%s6562_s1 + $0x200] ss:$8 sps:$4 sm:$0xff]  }
  0x83   : > { %2808 = vmatpush1.bf16.msra.mxu0 %v5038_v15  ;;  %v5123_v15 = vld [vmem:[%s5631_s25 + $0x438] ss:$36 sps:$4 sm:$0xff]  }
  0x84   : > { %2809 = vmatprep.subr.bf16.mxu0 %v5052_v19  ;;  %2382 = vmatpush1.bf16.msra.mxu1 %v5116_v30  ;;  %v5132_v19 = vld [vmem:[%s5631_s25 + $0x480] ss:$36 sps:$4 sm:$0xff]   ;;  %v5157_v30 = vld [vmem:[%s5631_s25 + $0x2ec] ss:$36 sps:$4 sm:$0xff]  }
  0x85   : > { %2245 = vmatmul.mubr.bf16.gmra.mrb[28].mxu1 %v5033_v17  ;;  %2383 = vmatprep.subr.bf16.mxu1 %v5127_v36  ;;  %v5128_v17 = vld [vmem:[%s5631_s25 + $0x484] ss:$36 sps:$4 sm:$0xff]   ;;  %v5161_v36 = vld [vmem:[%s5631_s25 + $0x9c] ss:$36 sps:$4 sm:$0xff]  }
  0x86   : > { %2671 = vmatmul.mubr.bf16.gmra.mrb[28].mxu0 %v5034_v20  ;;  %2254 = vmatprep.mubr.bf16.mxu1 %v5041_v21  ;;  %v5133_v20 = vld [vmem:[%s5631_s25 + $0x210] ss:$36 sps:$4 sm:$0xff]  }
  0x87   : > { %2680 = vmatprep.mubr.bf16.mxu0 %v5046_v22  ;;  %2810 = vmatpush1.bf16.msra.mxu0 %v5050_v23  ;;  %v5137_v21 = vld [vmem:[%s5631_s25 + $0x4cc] ss:$36 sps:$4 sm:$0xff]   ;;  %v5142_v22 = vld [vmem:[%s5631_s25 + $0x25c] ss:$36 sps:$4 sm:$0xff]  }
  0x88   : > { %2811 = vmatprep.subr.bf16.mxu0 %v5055_v25  ;;  %2384 = vmatpush1.bf16.msra.mxu1 %v5125_v35  ;;  %v5144_v23 = vld [vmem:[%s5631_s25 + $0x4c8] ss:$36 sps:$4 sm:$0xff]   ;;  %v5287_v35 = vld [vmem:[%s6562_s1 + $0x210] ss:$8 sps:$4 sm:$0xff]  }
  0x89   : > { %2385 = vmatprep.subr.bf16.mxu1 %v5141_v42  ;;  %v5148_v25 = vld [vmem:[%s5631_s25 + $0xc] ss:$36 sps:$4 sm:$0xff]  }
  0x8a   : > { %v5166_v42 = vld [vmem:[%s5631_s25 + $0x330] ss:$36 sps:$4 sm:$0xff]  }
  0x8b   : > { %2812 = vmatpush1.bf16.msra.mxu0 %v5053_v27  ;;  %v5146_v27 = vld [vmem:[%s5631_s25 + $0x8] ss:$36 sps:$4 sm:$0xff]  }
  0x8c   : > { %2994 = vmatprep.subr.bf16.mxu0 %v5067_v29  ;;  %2386 = vmatpush1.bf16.msra.mxu1 %v5139_v44  ;;  %v5155_v29 = vld [vmem:[%s5631_s25 + $0x54] ss:$36 sps:$4 sm:$0xff]   ;;  %v5172_v44 = vld [vmem:[%s5631_s25 + $0x37c] ss:$36 sps:$4 sm:$0xff]  }
  0x8d   : > { %2255 = vmatmul.mubr.bf16.gmra.mrb[32].mxu1 %v5048_v28  ;;  %4334 = vmatprep.subr.bf16.mxu1 %v5284_v49  ;;  %v5151_v28 = vld [vmem:[%s5631_s25 + $0x2a0] ss:$36 sps:$4 sm:$0xff]  }
  0x8e   : > { %2681 = vmatmul.mubr.bf16.gmra.mrb[32].mxu0 %v5049_v32  ;;  %2264 = vmatprep.mubr.bf16.mxu1 %v5056_v33  ;;  %v5286_v32 = vld [vmem:[%s6562_s1 + $0x214] ss:$8 sps:$4 sm:$0xff]   ;;  %v5174_v49 = vld [vmem:[%s5631_s25 + $0xe0] ss:$36 sps:$4 sm:$0xff]  }
  0x8f   : > { %2813 = vmatprep.mubr.bf16.mxu0 %v5060_v34  ;;  %v5159_v33 = vld [vmem:[%s5631_s25 + $0x50] ss:$36 sps:$4 sm:$0xff]   ;;  %v5160_v34 = vld [vmem:[%s5631_s25 + $0x2e8] ss:$36 sps:$4 sm:$0xff]  }
  0x95   : > { %2265 = vmatmul.mubr.bf16.gmra.mrb[36].mxu1 %v5061_v38  ;;  %v5288_v38 = vld [vmem:[%s6562_s1 + $0x224] ss:$8 sps:$4 sm:$0xff]  }
  0x96   : > { %2814 = vmatmul.mubr.bf16.vlgmr.msra.gmra.mrb[0].mxu0 %v5058_v37  ;;  %2274 = vmatprep.mubr.bf16.mxu1 %v5068_v40  ;;  %v5163_v37 = vld [vmem:[%s5631_s25 + $0x334] ss:$36 sps:$4 sm:$0xff]  }
  0x97   : > { %2995 = vmatpush1.bf16.msra.mxu0 %v5065_v39  ;;  %2823 = vmatprep.mubr.bf16.mxu0 %v5070_v41  ;;  %v5289_v39 = vld [vmem:[%s6562_s1 + $0x220] ss:$8 sps:$4 sm:$0xff]   ;;  %v5290_v40 = vld [vmem:[%s6562_s1 + $0x234] ss:$8 sps:$4 sm:$0xff]  }
  0x98   : > { %2996 = vmatprep.subr.bf16.mxu0 %v5088_v43  ;;  %v5165_v41 = vld [vmem:[%s5631_s25 + $0x98] ss:$36 sps:$4 sm:$0xff]   ;;  %v5170_v43 = vld [vmem:[%s5631_s25 + $0xe4] ss:$36 sps:$4 sm:$0xff]  }
  0x9b   : > { %2997 = vmatpush1.bf16.msra.mxu0 %v5086_v45  ;;  %v5291_v45 = vld [vmem:[%s6562_s1 + $0x230] ss:$8 sps:$4 sm:$0xff]  }
  0x9c   : > { %2998 = vmatprep.subr.bf16.mxu0 %v5109_v46  ;;  %v5292_v46 = vld [vmem:[%s6562_s1 + $0x244] ss:$8 sps:$4 sm:$0xff]  }
  0x9d   : > { %2275 = vmatmul.mubr.bf16.gmra.mrb[40].mxu1 %v5072_v47  ;;  %v5293_v47 = vld [vmem:[%s6562_s1 + $0x240] ss:$8 sps:$4 sm:$0xff]  }
  0x9e   : > { %2824 = vmatmul.mubr.bf16.gmra.mrb[4].mxu0 %v5073_v48  ;;  %2284 = vmatprep.mubr.bf16.mxu1 %v5077_v50  ;;  %v5294_v48 = vld [vmem:[%s6562_s1 + $0x254] ss:$8 sps:$4 sm:$0xff]  }
  0x9f   : > { %2833 = vmatprep.mubr.bf16.mxu0 %v5079_v51  ;;  %2999 = vmatpush1.bf16.msra.mxu0 %v5107_v52  ;;  %v5175_v50 = vld [vmem:[%s5631_s25 + $0x378] ss:$36 sps:$4 sm:$0xff]   ;;  %v5176_v51 = vld [vmem:[%s5631_s25 + $0x12c] ss:$36 sps:$4 sm:$0xff]   ;;  %v5178_v52 = vld [vmem:[%s5631_s25 + $0x3c4] ss:$36 sps:$4 sm:$0xff]  }
  0xa0   : > { %3000 = vmatprep.subr.bf16.mxu0 %v5136_v53  ;;  %v5295_v53 = vld [vmem:[%s6562_s1 + $0x250] ss:$8 sps:$4 sm:$0xff]  }
  0xa3   : > { %3001 = vmatpush1.bf16.msra.mxu0 %v5134_v54  ;;  %v5296_v54 = vld [vmem:[%s6562_s1 + $0x264] ss:$8 sps:$4 sm:$0xff]  }
  0xa4   : > { %3002 = vmatprep.subr.bf16.mxu0 %v5154_v55  ;;  %v5297_v55 = vld [vmem:[%s6562_s1 + $0x260] ss:$8 sps:$4 sm:$0xff]  }
  0xa5   : > { %2285 = vmatmul.mubr.bf16.gmra.mrb[44].mxu1 %v5081_v56  ;;  %v5298_v56 = vld [vmem:[%s6562_s1 + $0x274] ss:$8 sps:$4 sm:$0xff]  }
  0xa6   : > { %2834 = vmatmul.mubr.bf16.gmra.mrb[8].mxu0 %v5082_v57  ;;  %2294 = vmatprep.mubr.bf16.mxu1 %v5089_v58  ;;  %v5180_v57 = vld [vmem:[%s5631_s25 + $0x128] ss:$36 sps:$4 sm:$0xff]   ;;  %v5181_v58 = vld [vmem:[%s5631_s25 + $0x3c0] ss:$36 sps:$4 sm:$0xff]  }
  0xa7   : > { %2843 = vmatprep.mubr.bf16.mxu0 %v5091_v59  ;;  %3003 = vmatpush1.bf16.msra.mxu0 %v5152_v60  ;;  %v5185_v59 = vld [vmem:[%s5631_s25 + $0x174] ss:$36 sps:$4 sm:$0xff]   ;;  %v5187_v60 = vld [vmem:[%s5631_s25 + $0x40c] ss:$36 sps:$4 sm:$0xff]  }
  0xa8   : > { %3004 = vmatprep.subr.bf16.mxu0 %v5169_v61  ;;  %v5299_v61 = vld [vmem:[%s6562_s1 + $0x270] ss:$8 sps:$4 sm:$0xff]  }
  0xab   : > { %3005 = vmatpush1.bf16.msra.mxu0 %v5167_v62  ;;  %v5300_v62 = vld [vmem:[%s6562_s1 + $0x284] ss:$8 sps:$4 sm:$0xff]  }
  0xac   : > { %3006 = vmatprep.subr.bf16.mxu0 %v5184_v0  ;;  %v5302_v0 = vld [vmem:[%s6562_s1 + $0x294] ss:$8 sps:$4 sm:$0xff]  }
  0xad   : > { %2295 = vmatmul.mubr.bf16.gmra.mrb[48].mxu1 %v5093_v63  ;;  %v5301_v63 = vld [vmem:[%s6562_s1 + $0x280] ss:$8 sps:$4 sm:$0xff]  }
  0xae   : > { %2844 = vmatmul.mubr.bf16.gmra.mrb[12].mxu0 %v5094_v1  ;;  %2304 = vmatprep.mubr.bf16.mxu1 %v5098_v2  ;;  %v5189_v1 = vld [vmem:[%s5631_s25 + $0x170] ss:$36 sps:$4 sm:$0xff]   ;;  %v5190_v2 = vld [vmem:[%s5631_s25 + $0x408] ss:$36 sps:$4 sm:$0xff]  }
  0xaf   : > { %2853 = vmatprep.mubr.bf16.mxu0 %v5100_v3  ;;  %3007 = vmatpush1.bf16.msra.mxu0 %v5182_v4  ;;  %v5191_v3 = vld [vmem:[%s5631_s25 + $0x1bc] ss:$36 sps:$4 sm:$0xff]   ;;  %v5193_v4 = vld [vmem:[%s5631_s25 + $0x454] ss:$36 sps:$4 sm:$0xff]  }
  0xb0   : > { %3008 = vmatprep.subr.bf16.mxu0 %v5205_v6  ;;  %v5304_v6 = vld [vmem:[%s6562_s1 + $0x2a4] ss:$8 sps:$4 sm:$0xff]  }
  0xb3   : > { %3009 = vmatpush1.bf16.msra.mxu0 %v5203_v5  ;;  %v5303_v5 = vld [vmem:[%s6562_s1 + $0x290] ss:$8 sps:$4 sm:$0xff]  }
  0xb5   : > { %2305 = vmatmul.mubr.bf16.gmra.mrb[52].mxu1 %v5102_v7  ;;  %v5305_v7 = vld [vmem:[%s6562_s1 + $0x2a0] ss:$8 sps:$4 sm:$0xff]  }
  0xb6   : > { %2854 = vmatmul.mubr.bf16.gmra.mrb[16].mxu0 %v5103_v8  ;;  %2314 = vmatprep.mubr.bf16.mxu1 %v5110_v9  ;;  %v5306_v8 = vld [vmem:[%s6562_s1 + $0x2b4] ss:$8 sps:$4 sm:$0xff]  }
  0xb7   : > { %2863 = vmatprep.mubr.bf16.mxu0 %v5112_v10  ;;  %v5195_v9 = vld [vmem:[%s5631_s25 + $0x1b8] ss:$36 sps:$4 sm:$0xff]   ;;  %v5196_v10 = vld [vmem:[%s5631_s25 + $0x450] ss:$36 sps:$4 sm:$0xff]  }
  0xbd   : > { %2315 = vmatmul.mubr.bf16.gmra.mrb[56].mxu1 %v5114_v11  ;;  %v5197_v11 = vld [vmem:[%s5631_s25 + $0x204] ss:$36 sps:$4 sm:$0xff]  }
  0xbe   : > { %2864 = vmatmul.mubr.bf16.gmra.mrb[20].mxu0 %v5115_v12  ;;  %2324 = vmatprep.mubr.bf16.mxu1 %v5119_v13  ;;  %v5199_v12 = vld [vmem:[%s5631_s25 + $0x49c] ss:$36 sps:$4 sm:$0xff]   ;;  %v5307_v13 = vld [vmem:[%s6562_s1 + $0x2b0] ss:$8 sps:$4 sm:$0xff]  }
  0xbf   : > { %2873 = vmatprep.mubr.bf16.mxu0 %v5121_v14  ;;  %v5308_v14 = vld [vmem:[%s6562_s1 + $0x2c4] ss:$8 sps:$4 sm:$0xff]  }
  0xc5   : > { %2325 = vmatmul.mubr.bf16.gmra.mrb[60].mxu1 %v5123_v15  ;;  %v5309_v15 = vld [vmem:[%s6562_s1 + $0x2c0] ss:$8 sps:$4 sm:$0xff]  }
  0xc6   : > { %2874 = vmatmul.mubr.bf16.gmra.mrb[24].mxu0 %v5124_v16  ;;  %2334 = vmatprep.mubr.bf16.mxu1 %v5128_v17  ;;  %v5310_v16 = vld [vmem:[%s6562_s1 + $0x2d4] ss:$8 sps:$4 sm:$0xff]   ;;  %v5201_v17 = vld [vmem:[%s5631_s25 + $0x200] ss:$36 sps:$4 sm:$0xff]  }
  0xc7   : > { %2883 = vmatprep.mubr.bf16.mxu0 %v5130_v18  ;;  %v5202_v18 = vld [vmem:[%s5631_s25 + $0x498] ss:$36 sps:$4 sm:$0xff]  }
  0xcd   : > { %2335 = vmatmul.mubr.bf16.gmra.mrb[64].mxu1 %v5132_v19  ;;  %v5206_v19 = vld [vmem:[%s5631_s25 + $0x24c] ss:$36 sps:$4 sm:$0xff]  }
  0xce   : > { %2884 = vmatmul.mubr.bf16.gmra.mrb[28].mxu0 %v5133_v20  ;;  %2344 = vmatprep.mubr.bf16.mxu1 %v5137_v21  ;;  %v5208_v20 = vld [vmem:[%s5631_s25 + $0x4e4] ss:$36 sps:$4 sm:$0xff]   ;;  %v5311_v21 = vld [vmem:[%s6562_s1 + $0x2d0] ss:$8 sps:$4 sm:$0xff]  }
  0xcf   : > { %2893 = vmatprep.mubr.bf16.mxu0 %v5142_v22  ;;  %v5312_v22 = vld [vmem:[%s6562_s1 + $0x2e4] ss:$8 sps:$4 sm:$0xff]  }
  0xd5   : > { %2345 = vmatmul.mubr.bf16.gmra.mrb[68].mxu1 %v5144_v23  ;;  %v5313_v23 = vld [vmem:[%s6562_s1 + $0x2e0] ss:$8 sps:$4 sm:$0xff]  }
  0xd6   : > { %2894 = vmatmul.mubr.bf16.gmra.mrb[32].mxu0 %v5145_v24  ;;  %2387 = vmatprep.mubr.bf16.mxu1 %v5148_v25  ;;  %v5314_v24 = vld [vmem:[%s6562_s1 + $0x2f4] ss:$8 sps:$4 sm:$0xff]   ;;  %v5210_v25 = vld [vmem:[%s5631_s25 + $0x248] ss:$36 sps:$4 sm:$0xff]  }
  0xd7   : > { %2903 = vmatprep.mubr.bf16.mxu0 %v5149_v26  ;;  %v5211_v26 = vld [vmem:[%s5631_s25 + $0x4e0] ss:$36 sps:$4 sm:$0xff]  }
  0xdd   : > { %2388 = vmatmul.mubr.bf16.vlgmr.msra.gmra.mrb[0].mxu1 %v5146_v27  ;;  %v5212_v27 = vld [vmem:[%s5631_s25 + $0x294] ss:$36 sps:$4 sm:$0xff]  }
  0xde   : > { %2904 = vmatmul.mubr.bf16.gmra.mrb[36].mxu0 %v5151_v28  ;;  %4350 = vmatpush1.bf16.msra.mxu1 %v5285_v31  ;;  %v5315_v28 = vld [vmem:[%s6562_s1 + $0x2f0] ss:$8 sps:$4 sm:$0xff]   ;;  %v5215_v31 = vld [vmem:[%s5631_s25 + $0x20] ss:$36 sps:$4 sm:$0xff]  }
  0xdf   : > { %2397 = vmatprep.mubr.bf16.mxu1 %v5155_v29  ;;  %2913 = vmatprep.mubr.bf16.mxu0 %v5157_v30  ;;  %v5424_v29 = vmov 0   ;;  %v5214_v30 = vld [vmem:[%s5631_s25 + $0x290] ss:$36 sps:$4 sm:$0xff]  }
  0xe0   : > { %4335 = vmatprep.subr.bf16.mxu1 %v5286_v32  ;;  %v5216_v32 = vld [vmem:[%s5631_s25 + $0x2dc] ss:$36 sps:$4 sm:$0xff]  }
  0xe2   : > { %4351 = vmatpush1.bf16.msra.mxu1 %v5287_v35  ;;  %v5220_v35 = vld [vmem:[%s5631_s25 + $0x324] ss:$36 sps:$4 sm:$0xff]  }
  0xe3   : > { %4336 = vmatprep.subr.bf16.mxu1 %v5288_v38  ;;  %v5224_v38 = vld [vmem:[%s5631_s25 + $0x36c] ss:$36 sps:$4 sm:$0xff]  }
  0xe5   : > { %2398 = vmatmul.mubr.bf16.gmra.mrb[4].mxu1 %v5159_v33  ;;  %v5218_v33 = vld [vmem:[%s5631_s25 + $0x2d8] ss:$36 sps:$4 sm:$0xff]  }
  0xe6   : > { %2914 = vmatmul.mubr.bf16.gmra.mrb[40].mxu0 %v5160_v34  ;;  %2407 = vmatprep.mubr.bf16.mxu1 %v5161_v36  ;;  %v5219_v34 = vld [vmem:[%s5631_s25 + $0x68] ss:$36 sps:$4 sm:$0xff]   ;;  %v5222_v36 = vld [vmem:[%s5631_s25 + $0x320] ss:$36 sps:$4 sm:$0xff]  }
  0xe7   : > { %2923 = vmatprep.mubr.bf16.mxu0 %v5163_v37  ;;  %4352 = vmatpush1.bf16.msra.mxu1 %v5289_v39  ;;  %v5223_v37 = vld [vmem:[%s5631_s25 + $0xb0] ss:$36 sps:$4 sm:$0xff]   ;;  %v5226_v39 = vld [vmem:[%s5631_s25 + $0x368] ss:$36 sps:$4 sm:$0xff]  }
  0xe8   : > { %4337 = vmatprep.subr.bf16.mxu1 %v5290_v40  ;;  %v5227_v40 = vld [vmem:[%s5631_s25 + $0xf8] ss:$36 sps:$4 sm:$0xff]  }
  0xeb   : > { %4353 = vmatpush1.bf16.msra.mxu1 %v5291_v45  ;;  %v5234_v45 = vld [vmem:[%s5631_s25 + $0x3f8] ss:$36 sps:$4 sm:$0xff]  }
  0xec   : > { %4338 = vmatprep.subr.bf16.mxu1 %v5292_v46  ;;  %v5235_v46 = vld [vmem:[%s5631_s25 + $0x188] ss:$36 sps:$4 sm:$0xff]  }
  0xed   : > { %2408 = vmatmul.mubr.bf16.gmra.mrb[8].mxu1 %v5165_v41  ;;  %v5228_v41 = vld [vmem:[%s5631_s25 + $0x3b4] ss:$36 sps:$4 sm:$0xff]  }
  0xee   : > { %2924 = vmatmul.mubr.bf16.gmra.mrb[44].mxu0 %v5166_v42  ;;  %2417 = vmatprep.mubr.bf16.mxu1 %v5170_v43  ;;  %v5230_v42 = vld [vmem:[%s5631_s25 + $0x3b0] ss:$36 sps:$4 sm:$0xff]   ;;  %v5231_v43 = vld [vmem:[%s5631_s25 + $0x140] ss:$36 sps:$4 sm:$0xff]  }
  0xef   : > { %2933 = vmatprep.mubr.bf16.mxu0 %v5172_v44  ;;  %4354 = vmatpush1.bf16.msra.mxu1 %v5293_v47  ;;  %v5232_v44 = vld [vmem:[%s5631_s25 + $0x3fc] ss:$36 sps:$4 sm:$0xff]   ;;  %v5236_v47 = vld [vmem:[%s5631_s25 + $0x444] ss:$36 sps:$4 sm:$0xff]  }
  0xf0   : > { %4339 = vmatprep.subr.bf16.mxu1 %v5294_v48  ;;  %v5238_v48 = vld [vmem:[%s5631_s25 + $0x440] ss:$36 sps:$4 sm:$0xff]  }
  0xf3   : > { %4355 = vmatpush1.bf16.msra.mxu1 %v5295_v53  ;;  %v5244_v53 = vld [vmem:[%s5631_s25 + $0x4d4] ss:$36 sps:$4 sm:$0xff]  }
  0xf4   : > { %4340 = vmatprep.subr.bf16.mxu1 %v5296_v54  ;;  %v5246_v54 = vld [vmem:[%s5631_s25 + $0x4d0] ss:$36 sps:$4 sm:$0xff]  }
  0xf5   : > { %2418 = vmatmul.mubr.bf16.gmra.mrb[12].mxu1 %v5174_v49  ;;  %v5239_v49 = vld [vmem:[%s5631_s25 + $0x1d0] ss:$36 sps:$4 sm:$0xff]  }
  0xf6   : > { %2934 = vmatmul.mubr.bf16.gmra.mrb[48].mxu0 %v5175_v50  ;;  %2427 = vmatprep.mubr.bf16.mxu1 %v5176_v51  ;;  %v5240_v50 = vld [vmem:[%s5631_s25 + $0x48c] ss:$36 sps:$4 sm:$0xff]  }
  0xf7   : > { %2943 = vmatprep.mubr.bf16.mxu0 %v5178_v52  ;;  %4356 = vmatpush1.bf16.msra.mxu1 %v5297_v55  ;;  %v5242_v51 = vld [vmem:[%s5631_s25 + $0x488] ss:$36 sps:$4 sm:$0xff]   ;;  %v5243_v52 = vld [vmem:[%s5631_s25 + $0x218] ss:$36 sps:$4 sm:$0xff]   ;;  %v5247_v55 = vld [vmem:[%s5631_s25 + $0x260] ss:$36 sps:$4 sm:$0xff]  }
  0xf8   : > { %4341 = vmatprep.subr.bf16.mxu1 %v5298_v56  ;;  %v5250_v56 = vld [vmem:[%s5631_s25 + $0x29c] ss:$36 sps:$4 sm:$0xff]  }
  0xfb   : > { %4357 = vmatpush1.bf16.msra.mxu1 %v5299_v61  ;;  %v5255_v61 = vld [vmem:[%s5631_s25 + $0x2f0] ss:$36 sps:$4 sm:$0xff]  }
  0xfc   : > { %4342 = vmatprep.subr.bf16.mxu1 %v5300_v62  ;;  %v5256_v62 = vld [vmem:[%s5631_s25 + $0x32c] ss:$36 sps:$4 sm:$0xff]  }
  0xfd   : > { %2428 = vmatmul.mubr.bf16.gmra.mrb[16].mxu1 %v5180_v57  ;;  %v5248_v57 = vld [vmem:[%s5631_s25 + $0x298] ss:$36 sps:$4 sm:$0xff]  }
  0xfe   : > { %2944 = vmatmul.mubr.bf16.gmra.mrb[52].mxu0 %v5181_v58  ;;  %2437 = vmatprep.mubr.bf16.mxu1 %v5185_v59  ;;  %v5251_v58 = vld [vmem:[%s5631_s25 + $0x2a8] ss:$36 sps:$4 sm:$0xff]  }
  0xff   : > { %2953 = vmatprep.mubr.bf16.mxu0 %v5187_v60  ;;  %4358 = vmatpush1.bf16.msra.mxu1 %v5301_v63  ;;  %v5252_v59 = vld [vmem:[%s5631_s25 + $0x2e4] ss:$36 sps:$4 sm:$0xff]  }
 0x100   : > { %4343 = vmatprep.subr.bf16.mxu1 %v5302_v0  ;;  %v5254_v60 = vld [vmem:[%s5631_s25 + $0x2e0] ss:$36 sps:$4 sm:$0xff]   ;;  %v5258_v63 = vld [vmem:[%s5631_s25 + $0x328] ss:$36 sps:$4 sm:$0xff]   ;;  %v5259_v0 = vld [vmem:[%s5631_s25 + $0x338] ss:$36 sps:$4 sm:$0xff]  }
 0x103   : > { %4359 = vmatpush1.bf16.msra.mxu1 %v5303_v5  ;;  %v5266_v5 = vld [vmem:[%s5631_s25 + $0x3b8] ss:$36 sps:$4 sm:$0xff]  }
 0x104   : > { %4344 = vmatprep.subr.bf16.mxu1 %v5304_v6  ;;  %v5267_v6 = vld [vmem:[%s5631_s25 + $0x3c8] ss:$36 sps:$4 sm:$0xff]  }
 0x105   : > { %2438 = vmatmul.mubr.bf16.gmra.mrb[20].mxu1 %v5189_v1  ;;  %v5260_v1 = vld [vmem:[%s5631_s25 + $0x374] ss:$36 sps:$4 sm:$0xff]  }
 0x106   : > { %2954 = vmatmul.mubr.bf16.gmra.mrb[56].mxu0 %v5190_v2  ;;  %2447 = vmatprep.mubr.bf16.mxu1 %v5191_v3  ;;  %v5262_v2 = vld [vmem:[%s5631_s25 + $0x370] ss:$36 sps:$4 sm:$0xff]   ;;  %v5263_v3 = vld [vmem:[%s5631_s25 + $0x380] ss:$36 sps:$4 sm:$0xff]  }
 0x107   : > { %2963 = vmatprep.mubr.bf16.mxu0 %v5193_v4  ;;  %4360 = vmatpush1.bf16.msra.mxu1 %v5305_v7  ;;  %v5264_v4 = vld [vmem:[%s5631_s25 + $0x3bc] ss:$36 sps:$4 sm:$0xff]   ;;  %v5268_v7 = vld [vmem:[%s5631_s25 + $0x404] ss:$36 sps:$4 sm:$0xff]  }
 0x108   : > { %4345 = vmatprep.subr.bf16.mxu1 %v5306_v8  ;;  %v5270_v8 = vld [vmem:[%s5631_s25 + $0x400] ss:$36 sps:$4 sm:$0xff]  }
 0x10b   : > { %4361 = vmatpush1.bf16.msra.mxu1 %v5307_v13  ;;  %v5276_v13 = vld [vmem:[%s5631_s25 + $0x494] ss:$36 sps:$4 sm:$0xff]  }
 0x10c   : > { %4346 = vmatprep.subr.bf16.mxu1 %v5308_v14  ;;  %v5278_v14 = vld [vmem:[%s5631_s25 + $0x490] ss:$36 sps:$4 sm:$0xff]  }
 0x10d   : > { %2448 = vmatmul.mubr.bf16.gmra.mrb[24].mxu1 %v5195_v9  ;;  %v5271_v9 = vld [vmem:[%s5631_s25 + $0x410] ss:$36 sps:$4 sm:$0xff]  }
 0x10e   : > { %2964 = vmatmul.mubr.bf16.gmra.mrb[60].mxu0 %v5196_v10  ;;  %2457 = vmatprep.mubr.bf16.mxu1 %v5197_v11  ;;  %v5272_v10 = vld [vmem:[%s5631_s25 + $0x44c] ss:$36 sps:$4 sm:$0xff]  }
 0x10f   : > { %2973 = vmatprep.mubr.bf16.mxu0 %v5199_v12  ;;  %4362 = vmatpush1.bf16.msra.mxu1 %v5309_v15  ;;  %v5274_v11 = vld [vmem:[%s5631_s25 + $0x448] ss:$36 sps:$4 sm:$0xff]   ;;  %v5275_v12 = vld [vmem:[%s5631_s25 + $0x458] ss:$36 sps:$4 sm:$0xff]   ;;  %v5279_v15 = vld [vmem:[%s5631_s25 + $0x4a0] ss:$36 sps:$4 sm:$0xff]  }
 0x110   : > { %4347 = vmatprep.subr.bf16.mxu1 %v5310_v16  ;;  %v5280_v16 = vld [vmem:[%s5631_s25 + $0x4dc] ss:$36 sps:$4 sm:$0xff]  }
 0x113   : > { %4363 = vmatpush1.bf16.msra.mxu1 %v5311_v21 }
 0x114   : > { %4348 = vmatprep.subr.bf16.mxu1 %v5312_v22 }
 0x115   : > { %2458 = vmatmul.mubr.bf16.gmra.mrb[28].mxu1 %v5201_v17  ;;  %v5282_v17 = vld [vmem:[%s5631_s25 + $0x4d8] ss:$36 sps:$4 sm:$0xff]  }
 0x116   : > { %2974 = vmatmul.mubr.bf16.gmra.mrb[64].mxu0 %v5202_v18  ;;  %2467 = vmatprep.mubr.bf16.mxu1 %v5206_v19  ;;  %v5283_v18 = vld [vmem:[%s5631_s25 + $0x4e8] ss:$36 sps:$4 sm:$0xff]  }
 0x117   : > { %2983 = vmatprep.mubr.bf16.mxu0 %v5208_v20  ;;  %4364 = vmatpush1.bf16.msra.mxu1 %v5313_v23 }
 0x118   : > { %4349 = vmatprep.subr.bf16.mxu1 %v5314_v24 }
 0x11b   : > { %4365 = vmatpush1.bf16.msra.mxu1 %v5315_v28 }
 0x11d   : > { %2468 = vmatmul.mubr.bf16.gmra.mrb[32].mxu1 %v5210_v25 }
 0x11e   : > { %2984 = vmatmul.mubr.bf16.gmra.mrb[68].mxu0 %v5211_v26  ;;  %2477 = vmatprep.mubr.bf16.mxu1 %v5212_v27 }
 0x11f   : > { %3026 = vmatprep.mubr.bf16.mxu0 %v5424_v29 }
 0x125   : > { %2478 = vmatmul.mubr.bf16.gmra.mrb[36].mxu1 %v5214_v30 }
 0x126   : > { %3027 = vmatmul.mubr.bf16.vlgmr.msra.gmra.mrb[0].mxu0 %v5215_v31  ;;  %2487 = vmatprep.mubr.bf16.mxu1 %v5216_v32 }
 0x127   : > { %3036 = vmatprep.mubr.bf16.mxu0 %v5424_v29 }
 0x12d   : > { %2488 = vmatmul.mubr.bf16.gmra.mrb[40].mxu1 %v5218_v33 }
 0x12e   : > { %3037 = vmatmul.mubr.bf16.gmra.mrb[4].mxu0 %v5219_v34  ;;  %2497 = vmatprep.mubr.bf16.mxu1 %v5220_v35 }
 0x12f   : > { %3046 = vmatprep.mubr.bf16.mxu0 %v5424_v29 }
 0x135   : > { %2498 = vmatmul.mubr.bf16.gmra.mrb[44].mxu1 %v5222_v36 }
 0x136   : > { %3047 = vmatmul.mubr.bf16.gmra.mrb[8].mxu0 %v5223_v37  ;;  %2507 = vmatprep.mubr.bf16.mxu1 %v5224_v38 }
 0x137   : > { %3056 = vmatprep.mubr.bf16.mxu0 %v5424_v29 }
 0x13d   : > { %2508 = vmatmul.mubr.bf16.gmra.mrb[48].mxu1 %v5226_v39 }
 0x13e   : > { %3057 = vmatmul.mubr.bf16.gmra.mrb[12].mxu0 %v5227_v40  ;;  %2517 = vmatprep.mubr.bf16.mxu1 %v5228_v41 }
 0x13f   : > { %3066 = vmatprep.mubr.bf16.mxu0 %v5424_v29 }
 0x145   : > { %2518 = vmatmul.mubr.bf16.gmra.mrb[52].mxu1 %v5230_v42 }
 0x146   : > { %3067 = vmatmul.mubr.bf16.gmra.mrb[16].mxu0 %v5231_v43  ;;  %2527 = vmatprep.mubr.bf16.mxu1 %v5232_v44 }
 0x147   : > { %3076 = vmatprep.mubr.bf16.mxu0 %v5424_v29 }
 0x14d   : > { %2528 = vmatmul.mubr.bf16.gmra.mrb[56].mxu1 %v5234_v45 }
 0x14e   : > { %3077 = vmatmul.mubr.bf16.gmra.mrb[20].mxu0 %v5235_v46  ;;  %2537 = vmatprep.mubr.bf16.mxu1 %v5236_v47  ;;  %v584_v47 = vlaneseq }
 0x14f   : > { %3086 = vmatprep.mubr.bf16.mxu0 %v5424_v29 }
 0x155   : > { %2538 = vmatmul.mubr.bf16.gmra.mrb[60].mxu1 %v5238_v48 }
 0x156   : > { %3087 = vmatmul.mubr.bf16.gmra.mrb[24].mxu0 %v5239_v49  ;;  %2547 = vmatprep.mubr.bf16.mxu1 %v5240_v50 }
 0x157   : > { %3096 = vmatprep.mubr.bf16.mxu0 %v5424_v29 }
 0x15d   : > { %2548 = vmatmul.mubr.bf16.gmra.mrb[64].mxu1 %v5242_v51  ;;  %v585_v51 = vshrl.u32 %v584_v47, 7 }
 0x15e   : > { %3097 = vmatmul.mubr.bf16.gmra.mrb[28].mxu0 %v5243_v52  ;;  %2557 = vmatprep.mubr.bf16.mxu1 %v5244_v53 }
 0x15f   : > { %3106 = vmatprep.mubr.bf16.mxu0 %v5424_v29  ;;  %v586_v53 = vsub.s32 0, %v585_v51 }
 0x165   : > { %2558 = vmatmul.mubr.bf16.gmra.mrb[68].mxu1 %v5246_v54  ;;  %v582_v54 = vld [vmem:[%s6563_s2] sm:$0x3] }
 0x166   : > { %3107 = vmatmul.mubr.bf16.gmra.mrb[32].mxu0 %v5247_v55  ;;  %2690 = vmatprep.mubr.bf16.mxu1 %v5250_v56  ;;  %v590_v55 = vsub.s32 1, %v585_v51 }
 0x167   : > { %3116 = vmatprep.mubr.bf16.mxu0 %v5424_v29 }
 0x16d   : > { %2691 = vmatmul.mubr.bf16.vlgmr.msra.gmra.mrb[36].mxu1 %v5248_v57 }
 0x16e   : > { %3117 = vmatmul.mubr.bf16.gmra.mrb[36].mxu0 %v5251_v58  ;;  %2700 = vmatprep.mubr.bf16.mxu1 %v5252_v59  ;;  %v6265_v59 = vrot.slane %v582_v54, %v586_v53 }
 0x16f   : > { %3126 = vmatprep.mubr.bf16.mxu0 %v5424_v29 }
 0x175   : > { %2701 = vmatmul.mubr.bf16.gmra.mrb[40].mxu1 %v5254_v60 }
 0x176   : > { %3127 = vmatmul.mubr.bf16.gmra.mrb[40].mxu0 %v5255_v61  ;;  %2710 = vmatprep.mubr.bf16.mxu1 %v5256_v62  ;;  %v6269_v61 = vrot.slane %v582_v54, %v590_v55 }
 0x177   : > { %3136 = vmatprep.mubr.bf16.mxu0 %v5424_v29 }
 0x17d   : > { %2711 = vmatmul.mubr.bf16.gmra.mrb[44].mxu1 %v5258_v63 }
 0x17e   : > { %3137 = vmatmul.mubr.bf16.gmra.mrb[44].mxu0 %v5259_v0  ;;  %2720 = vmatprep.mubr.bf16.mxu1 %v5260_v1 }
 0x17f   : > { %3146 = vmatprep.mubr.bf16.mxu0 %v5424_v29 }
 0x185   : > { %2721 = vmatmul.mubr.bf16.gmra.mrb[48].mxu1 %v5262_v2 }
 0x186   : > { %3147 = vmatmul.mubr.bf16.gmra.mrb[48].mxu0 %v5263_v3  ;;  %2730 = vmatprep.mubr.bf16.mxu1 %v5264_v4 }
 0x187   : > { %3156 = vmatprep.mubr.bf16.mxu0 %v5424_v29 }
 0x18d   : > { %2731 = vmatmul.mubr.bf16.gmra.mrb[52].mxu1 %v5266_v5 }
 0x18e   : > { %3157 = vmatmul.mubr.bf16.gmra.mrb[52].mxu0 %v5267_v6  ;;  %2740 = vmatprep.mubr.bf16.mxu1 %v5268_v7 }
 0x18f   : > { %3166 = vmatprep.mubr.bf16.mxu0 %v5424_v29 }
 0x195   : > { %2741 = vmatmul.mubr.bf16.gmra.mrb[56].mxu1 %v5270_v8 }
 0x196   : > { %3167 = vmatmul.mubr.bf16.gmra.mrb[56].mxu0 %v5271_v9  ;;  %2750 = vmatprep.mubr.bf16.mxu1 %v5272_v10 }
 0x197   : > { %3176 = vmatprep.mubr.bf16.mxu0 %v5424_v29 }
 0x19d   : > { %2751 = vmatmul.mubr.bf16.gmra.mrb[60].mxu1 %v5274_v11 }
 0x19e   : > { %3177 = vmatmul.mubr.bf16.gmra.mrb[60].mxu0 %v5275_v12  ;;  %2760 = vmatprep.mubr.bf16.mxu1 %v5276_v13 }
 0x19f   : > { %3186 = vmatprep.mubr.bf16.mxu0 %v5424_v29 }
 0x1a5   : > { %2761 = vmatmul.mubr.bf16.gmra.mrb[64].mxu1 %v5278_v14 }
 0x1a6   : > { %3187 = vmatmul.mubr.bf16.gmra.mrb[64].mxu0 %v5279_v15  ;;  %2770 = vmatprep.mubr.bf16.mxu1 %v5280_v16 }
 0x1a7   : > { %3196 = vmatprep.mubr.bf16.mxu0 %v5424_v29 }
 0x1ad   : > { %2771 = vmatmul.mubr.bf16.gmra.mrb[68].mxu1 %v5282_v17 }
 0x1ae   : > { %3197 = vmatmul.mubr.bf16.gmra.mrb[68].mxu0 %v5283_v18 }
 0x1b0   : > { %v2389_v19 = vpop.f32.mrb[0].mxu1 }
 0x1b1   : > { %v2391_v20 = vpop.f32.mrb[1].mxu1  ;;  %v4366_v62 = vadd.f32 %v2389_v19, %v6265_v59 }
 0x1b2   : > { %v2393_v21 = vpop.f32.mrb[2].mxu1  ;;  %v4368_v63 = vadd.f32 %v2391_v20, %v6269_v61 }
 0x1b3   : > { %v2395_v22 = vpop.f32.mrb[3].mxu1  ;;  %v4370_v1 = vadd.f32 %v2393_v21, %v6265_v59 }
 0x1b4   : > { %v4372_v4 = vadd.f32 %v2395_v22, %v6269_v61 }
 0x1b8   : > { %v2399_v23 = vpop.f32.mrb[4].mxu1 }
 0x1b9   : > { %v2401_v24 = vpop.f32.mrb[5].mxu1  ;;  %v4374_v15 = vadd.f32 %v2399_v23, %v6265_v59 }
 0x1ba   : > { %v2403_v25 = vpop.f32.mrb[6].mxu1  ;;  %v4376_v16 = vadd.f32 %v2401_v24, %v6269_v61 }
 0x1bb   : > { %v6206_v26 = vpop.f32.mrb[7].mxu1  ;;  %v4378_v19 = vadd.f32 %v2403_v25, %v6265_v59 }
 0x1bc   : > { %v4380_v22 = vadd.f32 %v6206_v26, %v6269_v61 }
 0x1c0   : > { %v6208_v27 = vpop.f32.mrb[8].mxu1 }
 0x1c1   : > { %v6210_v28 = vpop.f32.mrb[9].mxu1  ;;  %v4382_v25 = vadd.f32 %v6208_v27, %v6265_v59 }
 0x1c2   : > { %v6212_v30 = vpop.f32.mrb[10].mxu1 }
 0x1c3   : > { %v6214_v29 = vpop.f32.mrb[11].mxu1 }
 0x1c8   : > { %v6216_v31 = vpop.f32.mrb[12].mxu1 }
 0x1c9   : > { %v6218_v32 = vpop.f32.mrb[13].mxu1 }
 0x1ca   : > { %v6220_v33 = vpop.f32.mrb[14].mxu1 }
 0x1cb   : > { %v6222_v34 = vpop.f32.mrb[15].mxu1 }
 0x1d0   : > { %v6224_v35 = vpop.f32.mrb[16].mxu1 }
 0x1d1   : > { %v6226_v36 = vpop.f32.mrb[17].mxu1 }
 0x1d2   : > { %v6228_v37 = vpop.f32.mrb[18].mxu1 }
 0x1d3   : > { %v6230_v38 = vpop.f32.mrb[19].mxu1 }
 0x1d8   : > { %v6232_v39 = vpop.f32.mrb[20].mxu1 }
 0x1d9   : > { %v6234_v40 = vpop.f32.mrb[21].mxu1 }
 0x1da   : > { %v6236_v41 = vpop.f32.mrb[22].mxu1 }
 0x1db   : > { %v6238_v42 = vpop.f32.mrb[23].mxu1 }
 0x1e0   : > { %v6240_v43 = vpop.f32.mrb[24].mxu1 }
 0x1e1   : > { %v6242_v44 = vpop.f32.mrb[25].mxu1 }
 0x1e2   : > { %v6244_v45 = vpop.f32.mrb[26].mxu1 }
 0x1e3   : > { %v6246_v46 = vpop.f32.mrb[27].mxu1 }
 0x1e8   : > { %v6248_v48 = vpop.f32.mrb[28].mxu1 }
 0x1e9   : > { %v6250_v49 = vpop.f32.mrb[29].mxu1 }
 0x1ea   : > { %v6252_v50 = vpop.f32.mrb[30].mxu1 }
 0x1eb   : > { %v6254_v52 = vpop.f32.mrb[31].mxu1 }
 0x1f0   : > { %v6259_v56 = vpop.f32.mrb[32].mxu1 }
 0x1f1   : > { %v6261_v57 = vpop.f32.mrb[33].mxu1 }
 0x1f2   : > { %v6263_v58 = vpop.f32.mrb[34].mxu1 }
 0x1f3   : > { %v6267_v60 = vpop.f32.mrb[35].mxu1 }
 0x1f9   : > { %v3028_v0 = vpop.f32.mrb[0].mxu0 }
 0x1fa   : > { %v4367_v2 = vadd.f32 %v4366_v62, %v3028_v0  ;;  %v3030_v3 = vpop.f32.mrb[1].mxu0 }
 0x1fb   : > { %v4369_v5 = vadd.f32 %v4368_v63, %v3030_v3  ;;  %v3032_v6 = vpop.f32.mrb[2].mxu0  ;;  %v4386_v3 = vadd.f32 %v6212_v30, %v6265_v59  ;;  %v4390_v30 = vadd.f32 %v6216_v31, %v6265_v59 }
 0x1fc   : > { %v3207_v7 = vmax.f32 %v4367_v2, 0.0  ;;  %v4371_v8 = vadd.f32 %v4370_v1, %v3032_v6  ;;  %v3034_v9 = vpop.f32.mrb[3].mxu0  ;;  %v4384_v1 = vadd.f32 %v6210_v28, %v6269_v61  ;;  %v4388_v6 = vadd.f32 %v6214_v29, %v6269_v61 }
 0x1fd   : > { %v3208_v10 = vmax.f32 %v4369_v5, 0.0  ;;  %v4373_v11 = vadd.f32 %v4372_v4, %v3034_v9 }
 0x1fe   : > { %v3209_v12 = vmax.f32 %v4371_v8, 0.0 }
 0x1ff   : > { %v4294_v13 = vpack.c.bf16 %v3208_v10, %v3207_v7  ;;  %v3210_v14 = vmax.f32 %v4373_v11, 0.0 }
 0x201   : > { %3495 = vst [vmem:[%s6278_s12] sm:$0xff] %v4294_v13  ;;  %v4295_v17 = vpack.c.bf16 %v3210_v14, %v3209_v12  ;;  %v3038_v18 = vpop.f32.mrb[4].mxu0 }
 0x202   : > { %v4375_v20 = vadd.f32 %v4374_v15, %v3038_v18  ;;  %v3040_v21 = vpop.f32.mrb[5].mxu0  ;;  %v4392_v15 = vadd.f32 %v6218_v32, %v6269_v61 }
 0x203   : > { %3496 = vst [vmem:[%s6278_s12 + $0x8] sm:$0xff] %v4295_v17  ;;  %v4377_v47 = vadd.f32 %v4376_v16, %v3040_v21  ;;  %v3042_v23 = vpop.f32.mrb[6].mxu0  ;;  %v4394_v17 = vadd.f32 %v6220_v33, %v6265_v59  ;;  %v4398_v33 = vadd.f32 %v6224_v35, %v6265_v59 }
 0x204   : > { %v3211_v51 = vmax.f32 %v4375_v20, 0.0  ;;  %v4379_v24 = vadd.f32 %v4378_v19, %v3042_v23  ;;  %v3044_v53 = vpop.f32.mrb[7].mxu0  ;;  %v4396_v20 = vadd.f32 %v6222_v34, %v6269_v61 }
 0x205   : > { %v3212_v54 = vmax.f32 %v4377_v47, 0.0  ;;  %v4381_v55 = vadd.f32 %v4380_v22, %v3044_v53 }
 0x206   : > { %v3213_v62 = vmax.f32 %v4379_v24, 0.0 }
 0x207   : > { %v4296_v63 = vpack.c.bf16 %v3212_v54, %v3211_v51  ;;  %v3214_v0 = vmax.f32 %v4381_v55, 0.0  ;;  %v4400_v55 = vadd.f32 %v6226_v36, %v6269_v61 }
 0x209   : > { %3497 = vst [vmem:[%s6278_s12 + $0x10] sm:$0xff] %v4296_v63  ;;  %v4297_v26 = vpack.c.bf16 %v3214_v0, %v3213_v62  ;;  %v3048_v2 = vpop.f32.mrb[8].mxu0  ;;  %v4402_v63 = vadd.f32 %v6228_v37, %v6265_v59  ;;  %v4406_v37 = vadd.f32 %v6232_v39, %v6265_v59 }
 0x20a   : > { %v4383_v4 = vadd.f32 %v4382_v25, %v3048_v2  ;;  %v3050_v5 = vpop.f32.mrb[9].mxu0 }
 0x20b   : > { %3498 = vst [vmem:[%s6278_s12 + $0x18] sm:$0xff] %v4297_v26  ;;  %v4385_v7 = vadd.f32 %v4384_v1, %v3050_v5  ;;  %v3052_v8 = vpop.f32.mrb[10].mxu0  ;;  %v4404_v1 = vadd.f32 %v6230_v38, %v6269_v61 }
 0x20c   : > { %v3215_v9 = vmax.f32 %v4383_v4, 0.0  ;;  %v4387_v27 = vadd.f32 %v4386_v3, %v3052_v8  ;;  %v3054_v10 = vpop.f32.mrb[11].mxu0 }
 0x20d   : > { %v3216_v28 = vmax.f32 %v4385_v7, 0.0  ;;  %v4389_v11 = vadd.f32 %v4388_v6, %v3054_v10  ;;  %v4410_v10 = vadd.f32 %v6236_v41, %v6265_v59  ;;  %v4414_v41 = vadd.f32 %v6240_v43, %v6265_v59 }
 0x20e   : > { %v3217_v12 = vmax.f32 %v4387_v27, 0.0 }
 0x20f   : > { %v4298_v13 = vpack.c.bf16 %v3216_v28, %v3215_v9  ;;  %v3218_v14 = vmax.f32 %v4389_v11, 0.0  ;;  %v4408_v9 = vadd.f32 %v6234_v40, %v6269_v61 }
 0x211   : > { %3499 = vst [vmem:[%s6278_s12 + $0x20] sm:$0xff] %v4298_v13  ;;  %v4299_v29 = vpack.c.bf16 %v3218_v14, %v3217_v12  ;;  %v3058_v16 = vpop.f32.mrb[12].mxu0  ;;  %v4412_v12 = vadd.f32 %v6238_v42, %v6269_v61 }
 0x212   : > { %v4391_v18 = vadd.f32 %v4390_v30, %v3058_v16  ;;  %v3060_v19 = vpop.f32.mrb[13].mxu0 }
 0x213   : > { %3500 = vst [vmem:[%s6278_s12 + $0x28] sm:$0xff] %v4299_v29  ;;  %v4393_v21 = vadd.f32 %v4392_v15, %v3060_v19  ;;  %v3062_v22 = vpop.f32.mrb[14].mxu0  ;;  %v4416_v19 = vadd.f32 %v6242_v44, %v6269_v61 }
 0x214   : > { %v3219_v47 = vmax.f32 %v4391_v18, 0.0  ;;  %v4395_v31 = vadd.f32 %v4394_v17, %v3062_v22  ;;  %v3064_v23 = vpop.f32.mrb[15].mxu0 }
 0x215   : > { %v3220_v32 = vmax.f32 %v4393_v21, 0.0  ;;  %v4397_v51 = vadd.f32 %v4396_v20, %v3064_v23  ;;  %v4418_v21 = vadd.f32 %v6244_v45, %v6265_v59  ;;  %v4422_v45 = vadd.f32 %v6248_v48, %v6265_v59 }
 0x216   : > { %v3221_v24 = vmax.f32 %v4395_v31, 0.0  ;;  %v4420_v31 = vadd.f32 %v6246_v46, %v6269_v61 }
 0x217   : > { %v4300_v53 = vpack.c.bf16 %v3220_v32, %v3219_v47  ;;  %v3222_v54 = vmax.f32 %v4397_v51, 0.0 }
 0x219   : > { %3501 = vst [vmem:[%s6278_s12 + $0x30] sm:$0xff] %v4300_v53  ;;  %v4301_v34 = vpack.c.bf16 %v3222_v54, %v3221_v24  ;;  %v3068_v62 = vpop.f32.mrb[16].mxu0 }
 0x21a   : > { %v4399_v0 = vadd.f32 %v4398_v33, %v3068_v62  ;;  %v3070_v25 = vpop.f32.mrb[17].mxu0 }
 0x21b   : > { %3502 = vst [vmem:[%s6278_s12 + $0x38] sm:$0xff] %v4301_v34  ;;  %v4401_v26 = vadd.f32 %v4400_v55, %v3070_v25  ;;  %v3072_v2 = vpop.f32.mrb[18].mxu0  ;;  %v4424_v34 = vadd.f32 %v6250_v49, %v6269_v61 }
 0x21c   : > { %v3223_v3 = vmax.f32 %v4399_v0, 0.0  ;;  %v4403_v35 = vadd.f32 %v4402_v63, %v3072_v2  ;;  %v3074_v4 = vpop.f32.mrb[19].mxu0  ;;  %v4426_v63 = vadd.f32 %v6252_v50, %v6265_v59  ;;  %v4430_v50 = vadd.f32 %v6259_v56, %v6265_v59 }
 0x21d   : > { %v3224_v36 = vmax.f32 %v4401_v26, 0.0  ;;  %v4405_v5 = vadd.f32 %v4404_v1, %v3074_v4  ;;  %v4428_v1 = vadd.f32 %v6254_v52, %v6269_v61 }
 0x21e   : > { %v3225_v6 = vmax.f32 %v4403_v35, 0.0 }
 0x21f   : > { %v4302_v7 = vpack.c.bf16 %v3224_v36, %v3223_v3  ;;  %v3226_v8 = vmax.f32 %v4405_v5, 0.0 }
 0x221   : > { %3503 = vst [vmem:[%s6278_s12 + $0x40] sm:$0xff] %v4302_v7  ;;  %v4303_v38 = vpack.c.bf16 %v3226_v8, %v3225_v6  ;;  %v3078_v27 = vpop.f32.mrb[20].mxu0  ;;  %v4432_v7 = vadd.f32 %v6261_v57, %v6269_v61 }
 0x222   : > { %v4407_v28 = vadd.f32 %v4406_v37, %v3078_v27  ;;  %v3080_v11 = vpop.f32.mrb[21].mxu0  ;;  %v4434_v37 = vadd.f32 %v6263_v58, %v6265_v59  ;;  %v4436_v27 = vadd.f32 %v6267_v60, %v6269_v61 }
 0x223   : > { %3504 = vst [vmem:[%s6278_s12 + $0x48] sm:$0xff] %v4303_v38  ;;  %v4409_v13 = vadd.f32 %v4408_v9, %v3080_v11  ;;  %v3082_v14 = vpop.f32.mrb[22].mxu0 }
 0x224   : > { %v3227_v30 = vmax.f32 %v4407_v28, 0.0  ;;  %v4411_v39 = vadd.f32 %v4410_v10, %v3082_v14  ;;  %v3084_v15 = vpop.f32.mrb[23].mxu0 }
 0x225   : > { %v3228_v40 = vmax.f32 %v4409_v13, 0.0  ;;  %v4413_v29 = vadd.f32 %v4412_v12, %v3084_v15 }
 0x226   : > { %v3229_v16 = vmax.f32 %v4411_v39, 0.0 }
 0x227   : > { %v4304_v17 = vpack.c.bf16 %v3228_v40, %v3227_v30  ;;  %v3230_v18 = vmax.f32 %v4413_v29, 0.0 }
 0x229   : > { %3505 = vst [vmem:[%s6278_s12 + $0x50] sm:$0xff] %v4304_v17  ;;  %v4305_v42 = vpack.c.bf16 %v3230_v18, %v3229_v16  ;;  %v3088_v20 = vpop.f32.mrb[24].mxu0 }
 0x22a   : > { %v4415_v22 = vadd.f32 %v4414_v41, %v3088_v20  ;;  %v3090_v47 = vpop.f32.mrb[25].mxu0 }
 0x22b   : > { %3506 = vst [vmem:[%s6278_s12 + $0x58] sm:$0xff] %v4305_v42  ;;  %v4417_v23 = vadd.f32 %v4416_v19, %v3090_v47  ;;  %v3092_v32 = vpop.f32.mrb[26].mxu0 }
 0x22c   : > { %v3231_v51 = vmax.f32 %v4415_v22, 0.0  ;;  %v4419_v43 = vadd.f32 %v4418_v21, %v3092_v32  ;;  %v3094_v24 = vpop.f32.mrb[27].mxu0 }
 0x22d   : > { %v3232_v44 = vmax.f32 %v4417_v23, 0.0  ;;  %v4421_v53 = vadd.f32 %v4420_v31, %v3094_v24 }
 0x22e   : > { %v3233_v54 = vmax.f32 %v4419_v43, 0.0 }
 0x22f   : > { %v4306_v33 = vpack.c.bf16 %v3232_v44, %v3231_v51  ;;  %v3234_v55 = vmax.f32 %v4421_v53, 0.0 }
 0x231   : > { %3507 = vst [vmem:[%s6278_s12 + $0x60] sm:$0xff] %v4306_v33  ;;  %v4307_v46 = vpack.c.bf16 %v3234_v55, %v3233_v54  ;;  %v3098_v62 = vpop.f32.mrb[28].mxu0 }
 0x232   : > { %v4423_v0 = vadd.f32 %v4422_v45, %v3098_v62  ;;  %v3100_v25 = vpop.f32.mrb[29].mxu0 }
 0x233   : > { %3508 = vst [vmem:[%s6278_s12 + $0x68] sm:$0xff] %v4307_v46  ;;  %v4425_v26 = vadd.f32 %v4424_v34, %v3100_v25  ;;  %v3102_v2 = vpop.f32.mrb[30].mxu0 }
 0x234   : > { %v3235_v3 = vmax.f32 %v4423_v0, 0.0  ;;  %v4427_v48 = vadd.f32 %v4426_v63, %v3102_v2  ;;  %v3104_v35 = vpop.f32.mrb[31].mxu0 }
 0x235   : > { %v3236_v49 = vmax.f32 %v4425_v26, 0.0  ;;  %v4429_v4 = vadd.f32 %v4428_v1, %v3104_v35 }
 0x236   : > { %v3237_v36 = vmax.f32 %v4427_v48, 0.0 }
 0x237   : > { %v4308_v5 = vpack.c.bf16 %v3236_v49, %v3235_v3  ;;  %v3238_v6 = vmax.f32 %v4429_v4, 0.0 }
 0x239   : > { %3509 = vst [vmem:[%s6278_s12 + $0x70] sm:$0xff] %v4308_v5  ;;  %v4309_v52 = vpack.c.bf16 %v3238_v6, %v3237_v36  ;;  %v3108_v8 = vpop.f32.mrb[32].mxu0 }
 0x23a   : > { %v4431_v9 = vadd.f32 %v4430_v50, %v3108_v8  ;;  %v3110_v38 = vpop.f32.mrb[33].mxu0 }
 0x23b   : > { %3510 = vst [vmem:[%s6278_s12 + $0x78] sm:$0xff] %v4309_v52  ;;  %v4433_v10 = vadd.f32 %v4432_v7, %v3110_v38  ;;  %v3112_v28 = vpop.f32.mrb[34].mxu0 }
 0x23c   : > { %v3239_v56 = vmax.f32 %v4431_v9, 0.0  ;;  %v4435_v11 = vadd.f32 %v4434_v37, %v3112_v28  ;;  %v3114_v12 = vpop.f32.mrb[35].mxu0 }
 0x23d   : > { %v3240_v57 = vmax.f32 %v4433_v10, 0.0  ;;  %v4437_v13 = vadd.f32 %v4436_v27, %v3114_v12 }
 0x23e   : > { %v3241_v14 = vmax.f32 %v4435_v11, 0.0 }
 0x23f   : > { %v4310_v30 = vpack.c.bf16 %v3240_v57, %v3239_v56  ;;  %v3242_v39 = vmax.f32 %v4437_v13, 0.0 }
 0x240   : > { %v2692_v58 = vpop.f32.mrb[36].mxu1 }
 0x241   : > { %3511 = vst [vmem:[%s6278_s12 + $0x80] sm:$0xff] %v4310_v30  ;;  %v4311_v15 = vpack.c.bf16 %v3242_v39, %v3241_v14  ;;  %v3118_v40 = vpop.f32.mrb[36].mxu0  ;;  %v4438_v29 = vadd.f32 %v2692_v58, %v6265_v59  ;;  %v2694_v16 = vpop.f32.mrb[37].mxu1 }
 0x242   : > { %v3120_v60 = vpop.f32.mrb[37].mxu0  ;;  %v4440_v17 = vadd.f32 %v2694_v16, %v6269_v61  ;;  %v2696_v18 = vpop.f32.mrb[38].mxu1 }
 0x243   : > { %3512 = vst [vmem:[%s6278_s12 + $0x88] sm:$0xff] %v4311_v15  ;;  %v3122_v41 = vpop.f32.mrb[38].mxu0  ;;  %v4439_v19 = vadd.f32 %v4438_v29, %v3118_v40  ;;  %v4442_v42 = vadd.f32 %v2696_v18, %v6265_v59  ;;  %v2698_v20 = vpop.f32.mrb[39].mxu1 }
 0x244   : > { %v3124_v21 = vpop.f32.mrb[39].mxu0  ;;  %v4441_v22 = vadd.f32 %v4440_v17, %v3120_v60  ;;  %v4444_v47 = vadd.f32 %v2698_v20, %v6269_v61 }
 0x245   : > { %v3243_v31 = vmax.f32 %v4439_v19, 0.0  ;;  %v4443_v23 = vadd.f32 %v4442_v42, %v3122_v41 }
 0x246   : > { %v3244_v32 = vmax.f32 %v4441_v22, 0.0  ;;  %v4445_v51 = vadd.f32 %v4444_v47, %v3124_v21 }
 0x247   : > { %v3245_v43 = vmax.f32 %v4443_v23, 0.0 }
 0x248   : > { %v4312_v24 = vpack.c.bf16 %v3244_v32, %v3243_v31  ;;  %v3246_v44 = vmax.f32 %v4445_v51, 0.0  ;;  %v2702_v53 = vpop.f32.mrb[40].mxu1 }
 0x249   : > { %v3128_v54 = vpop.f32.mrb[40].mxu0  ;;  %v4446_v33 = vadd.f32 %v2702_v53, %v6265_v59  ;;  %v2704_v55 = vpop.f32.mrb[41].mxu1 }
 0x24a   : > { %v3130_v45 = vpop.f32.mrb[41].mxu0  ;;  %3513 = vst [vmem:[%s6278_s12 + $0x90] sm:$0xff] %v4312_v24  ;;  %v4313_v34 = vpack.c.bf16 %v3246_v44, %v3245_v43  ;;  %v4448_v46 = vadd.f32 %v2704_v55, %v6269_v61  ;;  %v2706_v62 = vpop.f32.mrb[42].mxu1 }
 0x24b   : > { %v3132_v63 = vpop.f32.mrb[42].mxu0  ;;  %v4447_v0 = vadd.f32 %v4446_v33, %v3128_v54  ;;  %v4450_v25 = vadd.f32 %v2706_v62, %v6265_v59  ;;  %v2708_v1 = vpop.f32.mrb[43].mxu1 }
 0x24c   : > { %v3134_v26 = vpop.f32.mrb[43].mxu0  ;;  %3514 = vst [vmem:[%s6278_s12 + $0x98] sm:$0xff] %v4313_v34  ;;  %v4449_v2 = vadd.f32 %v4448_v46, %v3130_v45  ;;  %v4452_v3 = vadd.f32 %v2708_v1, %v6269_v61 }
 0x24d   : > { %v3247_v48 = vmax.f32 %v4447_v0, 0.0  ;;  %v4451_v35 = vadd.f32 %v4450_v25, %v3132_v63 }
 0x24e   : > { %v3248_v49 = vmax.f32 %v4449_v2, 0.0  ;;  %v4453_v4 = vadd.f32 %v4452_v3, %v3134_v26 }
 0x24f   : > { %v3249_v36 = vmax.f32 %v4451_v35, 0.0 }
 0x250   : > { %v4314_v5 = vpack.c.bf16 %v3248_v49, %v3247_v48  ;;  %v3250_v6 = vmax.f32 %v4453_v4, 0.0  ;;  %v2712_v50 = vpop.f32.mrb[44].mxu1 }
 0x251   : > { %v3138_v7 = vpop.f32.mrb[44].mxu0  ;;  %v4454_v52 = vadd.f32 %v2712_v50, %v6265_v59  ;;  %v2714_v8 = vpop.f32.mrb[45].mxu1 }
 0x252   : > { %v3140_v37 = vpop.f32.mrb[45].mxu0  ;;  %3515 = vst [vmem:[%s6278_s12 + $0xa0] sm:$0xff] %v4314_v5  ;;  %v4315_v9 = vpack.c.bf16 %v3250_v6, %v3249_v36  ;;  %v4456_v38 = vadd.f32 %v2714_v8, %v6269_v61  ;;  %v2716_v27 = vpop.f32.mrb[46].mxu1 }
 0x253   : > { %v3142_v10 = vpop.f32.mrb[46].mxu0  ;;  %v4455_v28 = vadd.f32 %v4454_v52, %v3138_v7  ;;  %v4458_v56 = vadd.f32 %v2716_v27, %v6265_v59  ;;  %v2718_v11 = vpop.f32.mrb[47].mxu1 }
 0x254   : > { %v3144_v12 = vpop.f32.mrb[47].mxu0  ;;  %3516 = vst [vmem:[%s6278_s12 + $0xa8] sm:$0xff] %v4315_v9  ;;  %v4457_v57 = vadd.f32 %v4456_v38, %v3140_v37  ;;  %v4460_v13 = vadd.f32 %v2718_v11, %v6269_v61 }
 0x255   : > { %v3251_v14 = vmax.f32 %v4455_v28, 0.0  ;;  %v4459_v30 = vadd.f32 %v4458_v56, %v3142_v10 }
 0x256   : > { %v3252_v39 = vmax.f32 %v4457_v57, 0.0  ;;  %v4461_v15 = vadd.f32 %v4460_v13, %v3144_v12 }
 0x257   : > { %v3253_v58 = vmax.f32 %v4459_v30, 0.0 }
 0x258   : > { %v4316_v40 = vpack.c.bf16 %v3252_v39, %v3251_v14  ;;  %v3254_v29 = vmax.f32 %v4461_v15, 0.0  ;;  %v2722_v16 = vpop.f32.mrb[48].mxu1 }
 0x259   : > { %v3148_v60 = vpop.f32.mrb[48].mxu0  ;;  %v4462_v17 = vadd.f32 %v2722_v16, %v6265_v59  ;;  %v2724_v18 = vpop.f32.mrb[49].mxu1 }
 0x25a   : > { %v3150_v41 = vpop.f32.mrb[49].mxu0  ;;  %3517 = vst [vmem:[%s6278_s12 + $0xb0] sm:$0xff] %v4316_v40  ;;  %v4317_v19 = vpack.c.bf16 %v3254_v29, %v3253_v58  ;;  %v4464_v42 = vadd.f32 %v2724_v18, %v6269_v61  ;;  %v2726_v20 = vpop.f32.mrb[50].mxu1 }
 0x25b   : > { %v3152_v21 = vpop.f32.mrb[50].mxu0  ;;  %v4463_v22 = vadd.f32 %v4462_v17, %v3148_v60  ;;  %v4466_v47 = vadd.f32 %v2726_v20, %v6265_v59  ;;  %v2728_v31 = vpop.f32.mrb[51].mxu1 }
 0x25c   : > { %v3154_v23 = vpop.f32.mrb[51].mxu0  ;;  %3518 = vst [vmem:[%s6278_s12 + $0xb8] sm:$0xff] %v4317_v19  ;;  %v4465_v32 = vadd.f32 %v4464_v42, %v3150_v41  ;;  %v4468_v51 = vadd.f32 %v2728_v31, %v6269_v61 }
 0x25d   : > { %v3255_v43 = vmax.f32 %v4463_v22, 0.0  ;;  %v4467_v24 = vadd.f32 %v4466_v47, %v3152_v21 }
 0x25e   : > { %v3256_v44 = vmax.f32 %v4465_v32, 0.0  ;;  %v4469_v53 = vadd.f32 %v4468_v51, %v3154_v23 }
 0x25f   : > { %v3257_v54 = vmax.f32 %v4467_v24, 0.0 }
 0x260   : > { %v4318_v33 = vpack.c.bf16 %v3256_v44, %v3255_v43  ;;  %v3258_v55 = vmax.f32 %v4469_v53, 0.0  ;;  %v2732_v45 = vpop.f32.mrb[52].mxu1 }
 0x261   : > { %v3158_v34 = vpop.f32.mrb[52].mxu0  ;;  %v4470_v46 = vadd.f32 %v2732_v45, %v6265_v59  ;;  %v2734_v62 = vpop.f32.mrb[53].mxu1 }
 0x262   : > { %v3160_v63 = vpop.f32.mrb[53].mxu0  ;;  %3519 = vst [vmem:[%s6278_s12 + $0xc0] sm:$0xff] %v4318_v33  ;;  %v4319_v0 = vpack.c.bf16 %v3258_v55, %v3257_v54  ;;  %v4472_v25 = vadd.f32 %v2734_v62, %v6269_v61  ;;  %v2736_v1 = vpop.f32.mrb[54].mxu1 }
 0x263   : > { %v3162_v26 = vpop.f32.mrb[54].mxu0  ;;  %v4471_v2 = vadd.f32 %v4470_v46, %v3158_v34  ;;  %v4474_v3 = vadd.f32 %v2736_v1, %v6265_v59  ;;  %v2738_v48 = vpop.f32.mrb[55].mxu1 }
 0x264   : > { %v3164_v35 = vpop.f32.mrb[55].mxu0  ;;  %3520 = vst [vmem:[%s6278_s12 + $0xc8] sm:$0xff] %v4319_v0  ;;  %v4473_v49 = vadd.f32 %v4472_v25, %v3160_v63  ;;  %v4476_v4 = vadd.f32 %v2738_v48, %v6269_v61 }
 0x265   : > { %v3259_v36 = vmax.f32 %v4471_v2, 0.0  ;;  %v4475_v5 = vadd.f32 %v4474_v3, %v3162_v26 }
 0x266   : > { %v3260_v6 = vmax.f32 %v4473_v49, 0.0  ;;  %v4477_v50 = vadd.f32 %v4476_v4, %v3164_v35 }
 0x267   : > { %v3261_v7 = vmax.f32 %v4475_v5, 0.0 }
 0x268   : > { %v4320_v52 = vpack.c.bf16 %v3260_v6, %v3259_v36  ;;  %v3262_v8 = vmax.f32 %v4477_v50, 0.0  ;;  %v2742_v37 = vpop.f32.mrb[56].mxu1 }
 0x269   : > { %v3168_v9 = vpop.f32.mrb[56].mxu0  ;;  %v4478_v38 = vadd.f32 %v2742_v37, %v6265_v59  ;;  %v2744_v27 = vpop.f32.mrb[57].mxu1 }
 0x26a   : > { %v3170_v10 = vpop.f32.mrb[57].mxu0  ;;  %3521 = vst [vmem:[%s6278_s12 + $0xd0] sm:$0xff] %v4320_v52  ;;  %v4321_v28 = vpack.c.bf16 %v3262_v8, %v3261_v7  ;;  %v4480_v56 = vadd.f32 %v2744_v27, %v6269_v61  ;;  %v2746_v11 = vpop.f32.mrb[58].mxu1 }
 0x26b   : > { %v3172_v12 = vpop.f32.mrb[58].mxu0  ;;  %v4479_v57 = vadd.f32 %v4478_v38, %v3168_v9  ;;  %v4482_v13 = vadd.f32 %v2746_v11, %v6265_v59  ;;  %v2748_v14 = vpop.f32.mrb[59].mxu1 }
 0x26c   : > { %v3174_v30 = vpop.f32.mrb[59].mxu0  ;;  %3522 = vst [vmem:[%s6278_s12 + $0xd8] sm:$0xff] %v4321_v28  ;;  %v4481_v39 = vadd.f32 %v4480_v56, %v3170_v10  ;;  %v4484_v15 = vadd.f32 %v2748_v14, %v6269_v61 }
 0x26d   : > { %v3263_v58 = vmax.f32 %v4479_v57, 0.0  ;;  %v4483_v40 = vadd.f32 %v4482_v13, %v3172_v12 }
 0x26e   : > { %v3264_v29 = vmax.f32 %v4481_v39, 0.0  ;;  %v4485_v16 = vadd.f32 %v4484_v15, %v3174_v30 }
 0x26f   : > { %v3265_v60 = vmax.f32 %v4483_v40, 0.0 }
 0x270   : > { %v4322_v17 = vpack.c.bf16 %v3264_v29, %v3263_v58  ;;  %v3266_v18 = vmax.f32 %v4485_v16, 0.0  ;;  %v2752_v41 = vpop.f32.mrb[60].mxu1 }
 0x271   : > { %v3178_v19 = vpop.f32.mrb[60].mxu0  ;;  %v4486_v42 = vadd.f32 %v2752_v41, %v6265_v59  ;;  %v2754_v20 = vpop.f32.mrb[61].mxu1 }
 0x272   : > { %v3180_v21 = vpop.f32.mrb[61].mxu0  ;;  %3523 = vst [vmem:[%s6278_s12 + $0xe0] sm:$0xff] %v4322_v17  ;;  %v4323_v22 = vpack.c.bf16 %v3266_v18, %v3265_v60  ;;  %v4488_v47 = vadd.f32 %v2754_v20, %v6269_v61  ;;  %v2756_v31 = vpop.f32.mrb[62].mxu1 }
 0x273   : > { %v3182_v23 = vpop.f32.mrb[62].mxu0  ;;  %v4487_v32 = vadd.f32 %v4486_v42, %v3178_v19  ;;  %v4490_v51 = vadd.f32 %v2756_v31, %v6265_v59  ;;  %v2758_v43 = vpop.f32.mrb[63].mxu1 }
 0x274   : > { %v3184_v24 = vpop.f32.mrb[63].mxu0  ;;  %3524 = vst [vmem:[%s6278_s12 + $0xe8] sm:$0xff] %v4323_v22  ;;  %v4489_v44 = vadd.f32 %v4488_v47, %v3180_v21  ;;  %v4492_v53 = vadd.f32 %v2758_v43, %v6269_v61 }
 0x275   : > { %v3267_v54 = vmax.f32 %v4487_v32, 0.0  ;;  %v4491_v33 = vadd.f32 %v4490_v51, %v3182_v23 }
 0x276   : > { %v3268_v55 = vmax.f32 %v4489_v44, 0.0  ;;  %v4493_v45 = vadd.f32 %v4492_v53, %v3184_v24 }
 0x277   : > { %v3269_v34 = vmax.f32 %v4491_v33, 0.0 }
 0x278   : > { %v4324_v46 = vpack.c.bf16 %v3268_v55, %v3267_v54  ;;  %v3270_v62 = vmax.f32 %v4493_v45, 0.0  ;;  %v2762_v63 = vpop.f32.mrb[64].mxu1 }
 0x279   : > { %v3188_v0 = vpop.f32.mrb[64].mxu0  ;;  %v4494_v25 = vadd.f32 %v2762_v63, %v6265_v59  ;;  %v2764_v1 = vpop.f32.mrb[65].mxu1 }
 0x27a   : > { %v3190_v26 = vpop.f32.mrb[65].mxu0  ;;  %3525 = vst [vmem:[%s6278_s12 + $0xf0] sm:$0xff] %v4324_v46  ;;  %v4325_v2 = vpack.c.bf16 %v3270_v62, %v3269_v34  ;;  %v4496_v3 = vadd.f32 %v2764_v1, %v6269_v61  ;;  %v2766_v48 = vpop.f32.mrb[66].mxu1 }
 0x27b   : > { %v3192_v35 = vpop.f32.mrb[66].mxu0  ;;  %v4495_v49 = vadd.f32 %v4494_v25, %v3188_v0  ;;  %v4498_v4 = vadd.f32 %v2766_v48, %v6265_v59  ;;  %v2768_v36 = vpop.f32.mrb[67].mxu1 }
 0x27c   : > { %v3194_v5 = vpop.f32.mrb[67].mxu0  ;;  %3526 = vst [vmem:[%s6278_s12 + $0xf8] sm:$0xff] %v4325_v2  ;;  %v4497_v6 = vadd.f32 %v4496_v3, %v3190_v26  ;;  %v4500_v50 = vadd.f32 %v2768_v36, %v6269_v61 }
 0x27d   : > { %v3271_v7 = vmax.f32 %v4495_v49, 0.0  ;;  %v4499_v52 = vadd.f32 %v4498_v4, %v3192_v35 }
 0x27e   : > { %v3272_v8 = vmax.f32 %v4497_v6, 0.0  ;;  %v4501_v37 = vadd.f32 %v4500_v50, %v3194_v5 }
 0x27f   : > { %v3273_v9 = vmax.f32 %v4499_v52, 0.0 }
 0x280   : > { %v4326_v38 = vpack.c.bf16 %v3272_v8, %v3271_v7  ;;  %v3274_v27 = vmax.f32 %v4501_v37, 0.0  ;;  %v2772_v10 = vpop.f32.mrb[68].mxu1 }
 0x281   : > { %v3198_v28 = vpop.f32.mrb[68].mxu0  ;;  %v4502_v56 = vadd.f32 %v2772_v10, %v6265_v59  ;;  %v2774_v11 = vpop.f32.mrb[69].mxu1 }
 0x282   : > { %v3200_v12 = vpop.f32.mrb[69].mxu0  ;;  %3527 = vst [vmem:[%s6278_s12 + $0x100] sm:$0xff] %v4326_v38  ;;  %v4327_v57 = vpack.c.bf16 %v3274_v27, %v3273_v9  ;;  %v4504_v13 = vadd.f32 %v2774_v11, %v6269_v61  ;;  %v2776_v14 = vpop.f32.mrb[70].mxu1 }
 0x283   : > { %v3202_v30 = vpop.f32.mrb[70].mxu0  ;;  %v4503_v39 = vadd.f32 %v4502_v56, %v3198_v28  ;;  %v4506_v15 = vadd.f32 %v2776_v14, %v6265_v59  ;;  %v2778_v58 = vpop.f32.mrb[71].mxu1 }
 0x284   : > { %v3204_v40 = vpop.f32.mrb[71].mxu0  ;;  %3528 = vst [vmem:[%s6278_s12 + $0x108] sm:$0xff] %v4327_v57  ;;  %v4505_v29 = vadd.f32 %v4504_v13, %v3200_v12  ;;  %v4508_v16 = vadd.f32 %v2778_v58, %v6269_v61 }
 0x285   : > { %v3275_v60 = vmax.f32 %v4503_v39, 0.0  ;;  %v4507_v17 = vadd.f32 %v4506_v15, %v3202_v30 }
 0x286   : > { %v3276_v18 = vmax.f32 %v4505_v29, 0.0  ;;  %v4509_v41 = vadd.f32 %v4508_v16, %v3204_v40  ;;  %3537 = sbr.rel (!%p5477_p3) target bundleno = 723 (0x2d3), region = 36 }
 0x287   : > { %v3277_v19 = vmax.f32 %v4507_v17, 0.0 }
 0x288   : > { %v4328_v42 = vpack.c.bf16 %v3276_v18, %v3275_v60  ;;  %v3278_v20 = vmax.f32 %v4509_v41, 0.0 }
 0x28a   : > { %3529 = vst [vmem:[%s6278_s12 + $0x110] sm:$0xff] %v4328_v42  ;;  %v4329_v21 = vpack.c.bf16 %v3278_v20, %v3277_v19 }
 0x28c   : > { %3530 = vst [vmem:[%s6278_s12 + $0x118] sm:$0xff] %v4329_v21 }
 0x28d   : > { %s6578_s9 = smov (!%p3541_p9, %s3540_s9), 36 }
 0x28e   : > { %s4330_s21 = sshll.u32 %s6578_s9, 7 }
 0x28f   : > { %p4285_p10 = scmp.eq.s32.totalorder %s4330_s21, 0 }
 0x290   : > { %5316 = sdivrem.u32 (!%p4285_p10), %s6578_s9, 36 }
 0x291   : > { %3552 = sbr.rel (%p4285_p10) target bundleno = 723 (0x2d3), region = 40 }
 0x299   : > { %s6424_s20 = spop.drf %5316 }
 0x29a   : > { %p4286_p11 = scmp.le.s32.totalorder %s6424_s20, 0 }
 0x29b   : > { %s6566_s14 = smov (!%p4286_p11), %s6418_s19  ;;  %s6567_s24 = smov (!%p4286_p11), %s6278_s12 }
 0x29c   : > { %3860 = sbr.rel (%p4286_p11) target bundleno = 694 (0x2b6), region = 122  ;;  %s6433_s23 = smov (!%p4286_p11), 0  }
 0x29d   : > { %s6435_s26 = smov (!%p4286_p11), 0  }
 0x2a3 LB: >> { %v3686_v59 = vld [vmem:[%s5398_s24] sm:$0xff]  ;;  %v3688_v61 = vld [vmem:[%s5398_s24 + $0x8] sm:$0xff]  ;;  %v3690_v22 = vld [vmem:[%s5398_s24 + $0x10] sm:$0xff]  ;;  %s3758_s27 = sadd.s32 1, %s5402_s23  ;;  %s3680_s26 = sadd.s32 1, %s5406_s26   ;;  %s5406_s26 = sphi %s6435_s26, %s3680_s26   ;;  %s5402_s23 = sphi %s6433_s23, %s6570_s23   ;;  %s5398_s24 = sphi %s6567_s24, %s6569_s24   ;;  %s5394_s14 = sphi %s6566_s14, %s6568_s14  }
 0x2a4   : >> { %3687 = vst [vmem:[%s5394_s14] sm:$0xff] %v3686_v59  ;;  %3689 = vst [vmem:[%s5394_s14 + $0x8] sm:$0xff] %v3688_v61  ;;  %v3692_v47 = vld [vmem:[%s5398_s24 + $0x18] sm:$0xff]  ;;  %v3694_v31 = vld [vmem:[%s5398_s24 + $0x20] sm:$0xff]  ;;  %p3759_p12 = scmp.ge.s32.totalorder %s3758_s27, %s6424_s20  ;;  %p3679_p13 = scmp.ge.s32.totalorder %s3680_s26, %s6424_s20 }
 0x2a5   : >> { %3691 = vst [vmem:[%s5394_s14 + $0x10] sm:$0xff] %v3690_v22  ;;  %v3696_v23 = vld [vmem:[%s5398_s24 + $0x28] sm:$0xff]  ;;  %3693 = vst [vmem:[%s5394_s14 + $0x18] sm:$0xff] %v3692_v47  ;;  %v3698_v32 = vld [vmem:[%s5398_s24 + $0x30] sm:$0xff] }
 0x2a6   : >> { %3695 = vst [vmem:[%s5394_s14 + $0x20] sm:$0xff] %v3694_v31  ;;  %3697 = vst [vmem:[%s5394_s14 + $0x28] sm:$0xff] %v3696_v23  ;;  %v3700_v51 = vld [vmem:[%s5398_s24 + $0x38] sm:$0xff]  ;;  %v3702_v43 = vld [vmem:[%s5398_s24 + $0x40] sm:$0xff]  ;;  %s6580_s27 = smov (%p3759_p12, %s3758_s27), 0 }
 0x2a7   : >> { %3699 = vst [vmem:[%s5394_s14 + $0x30] sm:$0xff] %v3698_v32  ;;  %3701 = vst [vmem:[%s5394_s14 + $0x38] sm:$0xff] %v3700_v51  ;;  %v3704_v24 = vld [vmem:[%s5398_s24 + $0x48] sm:$0xff]  ;;  %v3706_v44 = vld [vmem:[%s5398_s24 + $0x50] sm:$0xff]  ;;  %s3761_s28 = smul.u32 288, %s6580_s27  ;;  %s6570_s23 = smov %s6580_s27 }
 0x2a8   : >> { %3703 = vst [vmem:[%s5394_s14 + $0x40] sm:$0xff] %v3702_v43  ;;  %v3708_v53 = vld [vmem:[%s5398_s24 + $0x58] sm:$0xff]  ;;  %3705 = vst [vmem:[%s5394_s14 + $0x48] sm:$0xff] %v3704_v24  ;;  %v3710_v54 = vld [vmem:[%s5398_s24 + $0x60] sm:$0xff] }
 0x2a9   : >> { %3707 = vst [vmem:[%s5394_s14 + $0x50] sm:$0xff] %v3706_v44  ;;  %3709 = vst [vmem:[%s5394_s14 + $0x58] sm:$0xff] %v3708_v53  ;;  %v3712_v33 = vld [vmem:[%s5398_s24 + $0x68] sm:$0xff]  ;;  %v3714_v55 = vld [vmem:[%s5398_s24 + $0x70] sm:$0xff]  ;;  %s6497_s29 = scalar_lea.vmem %s6278_s12, %s3761_s28 [#allocation2]   ;;  %s6500_s30 = scalar_lea.vmem %s6418_s19, %s3761_s28  }
 0x2aa   : >> { %3711 = vst [vmem:[%s5394_s14 + $0x60] sm:$0xff] %v3710_v54  ;;  %3713 = vst [vmem:[%s5394_s14 + $0x68] sm:$0xff] %v3712_v33  ;;  %v3716_v45 = vld [vmem:[%s5398_s24 + $0x78] sm:$0xff]  ;;  %v3718_v34 = vld [vmem:[%s5398_s24 + $0x80] sm:$0xff] }
 0x2ab   : >> { %3715 = vst [vmem:[%s5394_s14 + $0x70] sm:$0xff] %v3714_v55  ;;  %v3720_v46 = vld [vmem:[%s5398_s24 + $0x88] sm:$0xff]  ;;  %3717 = vst [vmem:[%s5394_s14 + $0x78] sm:$0xff] %v3716_v45  ;;  %v3722_v62 = vld [vmem:[%s5398_s24 + $0x90] sm:$0xff] }
 0x2ac   : >> { %3719 = vst [vmem:[%s5394_s14 + $0x80] sm:$0xff] %v3718_v34  ;;  %3721 = vst [vmem:[%s5394_s14 + $0x88] sm:$0xff] %v3720_v46  ;;  %v3724_v63 = vld [vmem:[%s5398_s24 + $0x98] sm:$0xff]  ;;  %v3726_v0 = vld [vmem:[%s5398_s24 + $0xa0] sm:$0xff] }
 0x2ad   : >> { %3723 = vst [vmem:[%s5394_s14 + $0x90] sm:$0xff] %v3722_v62  ;;  %3725 = vst [vmem:[%s5394_s14 + $0x98] sm:$0xff] %v3724_v63  ;;  %v3728_v25 = vld [vmem:[%s5398_s24 + $0xa8] sm:$0xff]  ;;  %v3730_v1 = vld [vmem:[%s5398_s24 + $0xb0] sm:$0xff] }
 0x2ae   : >> { %3727 = vst [vmem:[%s5394_s14 + $0xa0] sm:$0xff] %v3726_v0  ;;  %v3732_v26 = vld [vmem:[%s5398_s24 + $0xb8] sm:$0xff]  ;;  %3729 = vst [vmem:[%s5394_s14 + $0xa8] sm:$0xff] %v3728_v25  ;;  %v3734_v2 = vld [vmem:[%s5398_s24 + $0xc0] sm:$0xff] }
 0x2af   : >> { %3731 = vst [vmem:[%s5394_s14 + $0xb0] sm:$0xff] %v3730_v1  ;;  %3733 = vst [vmem:[%s5394_s14 + $0xb8] sm:$0xff] %v3732_v26  ;;  %v3736_v3 = vld [vmem:[%s5398_s24 + $0xc8] sm:$0xff]  ;;  %v3738_v48 = vld [vmem:[%s5398_s24 + $0xd0] sm:$0xff]  ;;  %3682 = sbr.rel (!%p3679_p13) target bundleno = 675 (0x2a3), region = 128 }
 0x2b0   : >> { %3735 = vst [vmem:[%s5394_s14 + $0xc0] sm:$0xff] %v3734_v2  ;;  %3737 = vst [vmem:[%s5394_s14 + $0xc8] sm:$0xff] %v3736_v3  ;;  %v3740_v35 = vld [vmem:[%s5398_s24 + $0xd8] sm:$0xff]  ;;  %v3742_v49 = vld [vmem:[%s5398_s24 + $0xe0] sm:$0xff] }
 0x2b1   : >> { %3739 = vst [vmem:[%s5394_s14 + $0xd0] sm:$0xff] %v3738_v48  ;;  %v3744_v4 = vld [vmem:[%s5398_s24 + $0xe8] sm:$0xff]  ;;  %3741 = vst [vmem:[%s5394_s14 + $0xd8] sm:$0xff] %v3740_v35  ;;  %v3746_v36 = vld [vmem:[%s5398_s24 + $0xf0] sm:$0xff] }
 0x2b2   : >> { %3743 = vst [vmem:[%s5394_s14 + $0xe0] sm:$0xff] %v3742_v49  ;;  %3745 = vst [vmem:[%s5394_s14 + $0xe8] sm:$0xff] %v3744_v4  ;;  %v3748_v5 = vld [vmem:[%s5398_s24 + $0xf8] sm:$0xff]  ;;  %v3750_v6 = vld [vmem:[%s5398_s24 + $0x100] sm:$0xff] }
 0x2b3   : >> { %3747 = vst [vmem:[%s5394_s14 + $0xf0] sm:$0xff] %v3746_v36  ;;  %3749 = vst [vmem:[%s5394_s14 + $0xf8] sm:$0xff] %v3748_v5  ;;  %v3752_v50 = vld [vmem:[%s5398_s24 + $0x108] sm:$0xff]  ;;  %v3754_v7 = vld [vmem:[%s5398_s24 + $0x110] sm:$0xff] }
 0x2b4   : >> { %3751 = vst [vmem:[%s5394_s14 + $0x100] sm:$0xff] %v3750_v6  ;;  %v3756_v52 = vld [vmem:[%s5398_s24 + $0x118] sm:$0xff]  ;;  %3753 = vst [vmem:[%s5394_s14 + $0x108] sm:$0xff] %v3752_v50  ;;  %s6569_s24 = smov %s6497_s29 }
 0x2b5   : >> { %3755 = vst [vmem:[%s5394_s14 + $0x110] sm:$0xff] %v3754_v7  ;;  %3757 = vst [vmem:[%s5394_s14 + $0x118] sm:$0xff] %v3756_v52  ;;  %s6568_s14 = smov %s6500_s30 }
 0x2b6 PF: > { %5318 = sdivrem.u32 %s6578_s9, 36 }
 0x2b7   : > { %s4287_s4 = smul.u32 288, %s6424_s20 }
 0x2b9   : > { %s3769_s6 = scalar_lea.vmem %s6278_s12, %s4287_s4 [#allocation2]   ;;  %s3771_s25 = scalar_lea.vmem %s6418_s19, %s4287_s4  }
 0x2bf   : > { %s5319_s7 = spop.drf %5318 }
 0x2c0   : > { %p4289_p0 = scmp.le.s32.totalorder %s5319_s7, 0 }
 0x2c1   : > { %s5408_s5 = smov (!%p4289_p0), %s3771_s25   ;;  %s5412_s8 = smov (!%p4289_p0), %s3769_s6  }
 0x2c2   : > { %3874 = sbr.rel (%p4289_p0) target bundleno = 723 (0x2d3), region = 133  ;;  %s5416_s10 = smov (!%p4289_p0), 0  }
 0x2c3   : > { %s5420_s11 = smov (!%p4289_p0), 0  }
 0x2c9 LB: >> { %v3781_v8 = vld [vmem:[%s5414_s8] sm:$0xff]  ;;  %s3783_s17 = sadd.s32 1, %s5418_s10  ;;  %s3775_s11 = sadd.s32 1, %s5422_s11   ;;  %s5422_s11 = sphi %s5420_s11, %s3775_s11   ;;  %s5418_s10 = sphi %s5416_s10, %s5417_s10   ;;  %s5414_s8 = sphi %s5412_s8, %s3788_s8   ;;  %s5410_s5 = sphi %s5408_s5, %s3789_s5  }
 0x2ca   : >> { %3782 = vst [vmem:[%s5410_s5] sm:$0xff] %v3781_v8  ;;  %p3784_p1 = scmp.ge.s32.totalorder %s3783_s17, %s5319_s7  ;;  %p3774_p2 = scmp.ge.s32.totalorder %s3775_s11, %s5319_s7 }
 0x2cc   : >> { %s6582_s17 = smov (%p3784_p1, %s3783_s17), 0  ;;  %3777 = sbr.rel (!%p3774_p2) target bundleno = 713 (0x2c9), region = 139 }
 0x2cd   : >> { %s4290_s12 = sshll.u32 %s6582_s17, 3  ;;  %s5417_s10 = smov %s6582_s17  }
 0x2ce   : >> { %s3788_s8 = scalar_lea.vmem %s3769_s6, %s4290_s12 [#allocation2]   ;;  %s3789_s5 = scalar_lea.vmem %s3771_s25, %s4290_s12  }
 0x2d3 PF: > { %s13_s16 = sadd.s32 1, %s5390_s16   ;;  %s6571_s12 = smov %s5378_s13 }
 0x2d4   : > { %p10_p3 = scmp.ge.s32.totalorder %s13_s16, 4   ;;  %s6572_s13 = smov %s5486_s22 }
 0x2d5   : > { %s6573_s14 = smov %s5386_s15  ;;  %s6574_s15 = smov %s6576_s18 }
 0x2d6   :  { %12 = sbr.rel (!%p10_p3) target bundleno = 3 (0x3), region = 150 }

// kernel: base_model_forward.7
= control target key start
LH: loop header
LB: loop body
LE: loop exit
PB: predicated region body
PF: predicated region fallthrough
CT: control target
= control target key end

     0   :  { %s9656_s1 = inlined_call_operand.vmem [shape: bf16[2304,384], index: 1, kind: input, shape index: {}]   ;;  %s9657_s0 = inlined_call_operand.vmem [shape: bf16[90,2304], index: 0, kind: input, shape index: {}]   ;;  %s9658_s2 = inlined_call_operand.vmem [shape: f32[1,384], index: 2, kind: input, shape index: {}]   ;;  %s9659_s3 = inlined_call_operand.vmem [shape: bf16[90,384], index: 3, kind: output, shape index: {}]  }
   0x1   :  { %v6582_v0 = vld [vmem:[%s9656_s1 + $0x4] ss:$12 sps:$4 sm:$0xff]   ;;  %v6586_v2 = vld [vmem:[%s9656_s1] ss:$12 sps:$4 sm:$0xff]   ;;  %v6588_v4 = vld [vmem:[%s9656_s1 + $0x1c] ss:$12 sps:$4 sm:$0xff]  }
   0x2   :  { %v6584_v1 = vld [vmem:[%s9656_s1 + $0x184] ss:$12 sps:$4 sm:$0xff]   ;;  %3560 = vmatprep.subr.bf16.mxu1 %v6582_v0  ;;  %v6587_v3 = vld [vmem:[%s9656_s1 + $0x180] ss:$12 sps:$4 sm:$0xff]   ;;  %v6590_v5 = vld [vmem:[%s9656_s1 + $0x19c] ss:$12 sps:$4 sm:$0xff]  }
   0x3   :  { %3653 = vmatprep.subr.bf16.mxu0 %v6584_v1  ;;  %3561 = vmatpush1.bf16.msra.mxu1 %v6586_v2  ;;  %v6592_v6 = vld [vmem:[%s9656_s1 + $0x18] ss:$12 sps:$4 sm:$0xff]   ;;  %v6594_v8 = vld [vmem:[%s9656_s1 + $0x34] ss:$12 sps:$4 sm:$0xff]   ;;  %v6598_v10 = vld [vmem:[%s9656_s1 + $0x30] ss:$12 sps:$4 sm:$0xff]  }
   0x4   :  { %3654 = vmatpush1.bf16.msra.mxu0 %v6587_v3  ;;  %3562 = vmatprep.subr.bf16.mxu1 %v6588_v4  ;;  %v6593_v7 = vld [vmem:[%s9656_s1 + $0x198] ss:$12 sps:$4 sm:$0xff]   ;;  %v6596_v9 = vld [vmem:[%s9656_s1 + $0x1b4] ss:$12 sps:$4 sm:$0xff]   ;;  %v6599_v11 = vld [vmem:[%s9656_s1 + $0x1b0] ss:$12 sps:$4 sm:$0xff]  }
   0x5   :  { %3655 = vmatprep.subr.bf16.mxu0 %v6590_v5  ;;  %v6600_v12 = vld [vmem:[%s9656_s1 + $0x4c] ss:$12 sps:$4 sm:$0xff]   ;;  %v6604_v14 = vld [vmem:[%s9656_s1 + $0x48] ss:$12 sps:$4 sm:$0xff]   ;;  %v6606_v16 = vld [vmem:[%s9656_s1 + $0x64] ss:$12 sps:$4 sm:$0xff]  }
   0x6   :  { %v6602_v13 = vld [vmem:[%s9656_s1 + $0x1cc] ss:$12 sps:$4 sm:$0xff]   ;;  %v6605_v15 = vld [vmem:[%s9656_s1 + $0x1c8] ss:$12 sps:$4 sm:$0xff]   ;;  %v6608_v17 = vld [vmem:[%s9656_s1 + $0x1e4] ss:$12 sps:$4 sm:$0xff]  }
   0x7   :  { %3563 = vmatpush1.bf16.msra.mxu1 %v6592_v6  ;;  %v6610_v18 = vld [vmem:[%s9656_s1 + $0x60] ss:$12 sps:$4 sm:$0xff]   ;;  %v6612_v20 = vld [vmem:[%s9656_s1 + $0x7c] ss:$12 sps:$4 sm:$0xff]   ;;  %v6616_v22 = vld [vmem:[%s9656_s1 + $0x78] ss:$12 sps:$4 sm:$0xff]  }
   0x8   :  { %3656 = vmatpush1.bf16.msra.mxu0 %v6593_v7  ;;  %3564 = vmatprep.subr.bf16.mxu1 %v6594_v8  ;;  %v6611_v19 = vld [vmem:[%s9656_s1 + $0x1e0] ss:$12 sps:$4 sm:$0xff]   ;;  %v6614_v21 = vld [vmem:[%s9656_s1 + $0x1fc] ss:$12 sps:$4 sm:$0xff]   ;;  %v6617_v23 = vld [vmem:[%s9656_s1 + $0x1f8] ss:$12 sps:$4 sm:$0xff]  }
   0x9   :  { %3657 = vmatprep.subr.bf16.mxu0 %v6596_v9  ;;  %v6618_v24 = vld [vmem:[%s9656_s1 + $0x94] ss:$12 sps:$4 sm:$0xff]   ;;  %v6622_v26 = vld [vmem:[%s9656_s1 + $0x90] ss:$12 sps:$4 sm:$0xff]   ;;  %v6624_v28 = vld [vmem:[%s9656_s1 + $0xac] ss:$12 sps:$4 sm:$0xff]  }
   0xa   :  { %v6620_v25 = vld [vmem:[%s9656_s1 + $0x214] ss:$12 sps:$4 sm:$0xff]   ;;  %v6623_v27 = vld [vmem:[%s9656_s1 + $0x210] ss:$12 sps:$4 sm:$0xff]   ;;  %v6626_v29 = vld [vmem:[%s9656_s1 + $0x22c] ss:$12 sps:$4 sm:$0xff]  }
   0xb   :  { %3565 = vmatpush1.bf16.msra.mxu1 %v6598_v10  ;;  %v6628_v30 = vld [vmem:[%s9656_s1 + $0xa8] ss:$12 sps:$4 sm:$0xff]   ;;  %v6630_v32 = vld [vmem:[%s9656_s1 + $0xc4] ss:$12 sps:$4 sm:$0xff]   ;;  %v6634_v34 = vld [vmem:[%s9656_s1 + $0xc0] ss:$12 sps:$4 sm:$0xff]  }
   0xc   :  { %3658 = vmatpush1.bf16.msra.mxu0 %v6599_v11  ;;  %3566 = vmatprep.subr.bf16.mxu1 %v6600_v12  ;;  %v6629_v31 = vld [vmem:[%s9656_s1 + $0x228] ss:$12 sps:$4 sm:$0xff]   ;;  %v6632_v33 = vld [vmem:[%s9656_s1 + $0x244] ss:$12 sps:$4 sm:$0xff]   ;;  %v6635_v35 = vld [vmem:[%s9656_s1 + $0x240] ss:$12 sps:$4 sm:$0xff]  }
   0xd   :  { %3659 = vmatprep.subr.bf16.mxu0 %v6602_v13  ;;  %v6636_v36 = vld [vmem:[%s9656_s1 + $0xdc] ss:$12 sps:$4 sm:$0xff]   ;;  %v6640_v38 = vld [vmem:[%s9656_s1 + $0xd8] ss:$12 sps:$4 sm:$0xff]   ;;  %v6642_v40 = vld [vmem:[%s9656_s1 + $0xf4] ss:$12 sps:$4 sm:$0xff]  }
   0xe   :  { %v6638_v37 = vld [vmem:[%s9656_s1 + $0x25c] ss:$12 sps:$4 sm:$0xff]   ;;  %v6641_v39 = vld [vmem:[%s9656_s1 + $0x258] ss:$12 sps:$4 sm:$0xff]   ;;  %v6644_v41 = vld [vmem:[%s9656_s1 + $0x274] ss:$12 sps:$4 sm:$0xff]  }
   0xf   :  { %3567 = vmatpush1.bf16.msra.mxu1 %v6604_v14  ;;  %v6646_v42 = vld [vmem:[%s9656_s1 + $0xf0] ss:$12 sps:$4 sm:$0xff]   ;;  %v6648_v44 = vld [vmem:[%s9656_s1 + $0x10c] ss:$12 sps:$4 sm:$0xff]   ;;  %v6652_v46 = vld [vmem:[%s9656_s1 + $0x108] ss:$12 sps:$4 sm:$0xff]  }
  0x10   :  { %3660 = vmatpush1.bf16.msra.mxu0 %v6605_v15  ;;  %3568 = vmatprep.subr.bf16.mxu1 %v6606_v16  ;;  %v6647_v43 = vld [vmem:[%s9656_s1 + $0x270] ss:$12 sps:$4 sm:$0xff]   ;;  %v6650_v45 = vld [vmem:[%s9656_s1 + $0x28c] ss:$12 sps:$4 sm:$0xff]   ;;  %v6653_v47 = vld [vmem:[%s9656_s1 + $0x288] ss:$12 sps:$4 sm:$0xff]  }
  0x11   :  { %3661 = vmatprep.subr.bf16.mxu0 %v6608_v17  ;;  %v6654_v48 = vld [vmem:[%s9656_s1 + $0x124] ss:$12 sps:$4 sm:$0xff]   ;;  %v7499_v51 = vld [vmem:[%s9657_s0 + $0xc] ss:$72 sps:$4 sm:$0xff]   ;;  %v6660_v54 = vld [vmem:[%s9656_s1 + $0x13c] ss:$12 sps:$4 sm:$0xff]  }
  0x12   :  { %v7491_v49 = vld [vmem:[%s9657_s0 + $0x4] ss:$72 sps:$4 sm:$0xff]   ;;  %3685 = vmatprep.mubr.bf16.mxu0 %v7499_v51  ;;  %v6662_v55 = vld [vmem:[%s9656_s1 + $0x2bc] ss:$12 sps:$4 sm:$0xff]   ;;  %v6666_v58 = vld [vmem:[%s9656_s1 + $0x154] ss:$12 sps:$4 sm:$0xff]  }
  0x13   :  { %3569 = vmatpush1.bf16.msra.mxu1 %v6610_v18  ;;  %v6656_v50 = vld [vmem:[%s9656_s1 + $0x2a4] ss:$12 sps:$4 sm:$0xff]   ;;  %3592 = vmatprep.mubr.bf16.mxu1 %v7491_v49  ;;  %v6658_v52 = vld [vmem:[%s9656_s1 + $0x120] ss:$12 sps:$4 sm:$0xff]   ;;  %v6676_v0 = vld [vmem:[%s9656_s1 + $0x168] ss:$12 sps:$4 sm:$0xff]  }
  0x14   :  { %3662 = vmatpush1.bf16.msra.mxu0 %v6611_v19  ;;  %3570 = vmatprep.subr.bf16.mxu1 %v6612_v20  ;;  %v6659_v53 = vld [vmem:[%s9656_s1 + $0x2a0] ss:$12 sps:$4 sm:$0xff]   ;;  %v6664_v56 = vld [vmem:[%s9656_s1 + $0x138] ss:$12 sps:$4 sm:$0xff]   ;;  %v6670_v60 = vld [vmem:[%s9656_s1 + $0x150] ss:$12 sps:$4 sm:$0xff]  }
  0x15   :  { %3663 = vmatprep.subr.bf16.mxu0 %v6614_v21  ;;  %v6665_v57 = vld [vmem:[%s9656_s1 + $0x2b8] ss:$12 sps:$4 sm:$0xff]   ;;  %v6668_v59 = vld [vmem:[%s9656_s1 + $0x2d4] ss:$12 sps:$4 sm:$0xff]   ;;  %v6671_v61 = vld [vmem:[%s9656_s1 + $0x2d0] ss:$12 sps:$4 sm:$0xff]  }
  0x16   :  { %v6672_v62 = vld [vmem:[%s9656_s1 + $0x16c] ss:$12 sps:$4 sm:$0xff]   ;;  %v6677_v1 = vld [vmem:[%s9656_s1 + $0x2e8] ss:$12 sps:$4 sm:$0xff]   ;;  %v6686_v2 = vld [vmem:[%s9656_s1 + $0x304] ss:$12 sps:$4 sm:$0xff]  }
  0x17   :  { %3571 = vmatpush1.bf16.msra.mxu1 %v6616_v22  ;;  %v6674_v63 = vld [vmem:[%s9656_s1 + $0x2ec] ss:$12 sps:$4 sm:$0xff]   ;;  %v7551_v3 = vld [vmem:[%s9657_s0] ss:$72 sps:$4 sm:$0xff]   ;;  %v7570_v8 = vld [vmem:[%s9657_s0 + $0x94] ss:$72 sps:$4 sm:$0xff]  }
  0x18   :  { %3664 = vmatpush1.bf16.msra.mxu0 %v6617_v23  ;;  %3572 = vmatprep.subr.bf16.mxu1 %v6618_v24  ;;  %v6699_v4 = vld [vmem:[%s9656_s1 + $0xc8] ss:$12 sps:$4 sm:$0xff]   ;;  %v6684_v6 = vld [vmem:[%s9656_s1 + $0x300] ss:$12 sps:$4 sm:$0xff]   ;;  %v7581_v11 = vld [vmem:[%s9657_s0 + $0x9c] ss:$72 sps:$4 sm:$0xff]  }
  0x19   :  { %3665 = vmatprep.subr.bf16.mxu0 %v6620_v25  ;;  %v7559_v5 = vld [vmem:[%s9657_s0 + $0x8] ss:$72 sps:$4 sm:$0xff]   ;;  %v6707_v10 = vld [vmem:[%s9656_s1 + $0xe0] ss:$12 sps:$4 sm:$0xff]   ;;  %v6687_v12 = vld [vmem:[%s9656_s1 + $0x318] ss:$12 sps:$4 sm:$0xff]  }
  0x1a   :  { %v6689_v7 = vld [vmem:[%s9656_s1 + $0x31c] ss:$12 sps:$4 sm:$0xff]   ;;  %v6695_v13 = vld [vmem:[%s9656_s1 + $0x334] ss:$12 sps:$4 sm:$0xff]   ;;  %v7595_v14 = vld [vmem:[%s9657_s0 + $0x90] ss:$72 sps:$4 sm:$0xff]  }
  0x1b   :  { %3573 = vmatpush1.bf16.msra.mxu1 %v6622_v26  ;;  %v6700_v9 = vld [vmem:[%s9656_s1 + $0x8] ss:$12 sps:$4 sm:$0xff]   ;;  %v6711_v15 = vld [vmem:[%s9656_s1 + $0x20] ss:$12 sps:$4 sm:$0xff]   ;;  %v6693_v16 = vld [vmem:[%s9656_s1 + $0x330] ss:$12 sps:$4 sm:$0xff]  }
  0x1c   :  { %3666 = vmatpush1.bf16.msra.mxu0 %v6623_v27  ;;  %3574 = vmatprep.subr.bf16.mxu1 %v6624_v28  ;;  %v6720_v17 = vld [vmem:[%s9656_s1 + $0xf8] ss:$12 sps:$4 sm:$0xff]   ;;  %v6726_v22 = vld [vmem:[%s9656_s1 + $0x110] ss:$12 sps:$4 sm:$0xff]   ;;  %v7629_v23 = vld [vmem:[%s9657_s0 + $0x12c] ss:$72 sps:$4 sm:$0xff]  }
  0x1d   :  { %3667 = vmatprep.subr.bf16.mxu0 %v6626_v29  ;;  %v6698_v18 = vld [vmem:[%s9656_s1 + $0x34c] ss:$12 sps:$4 sm:$0xff]   ;;  %v6696_v24 = vld [vmem:[%s9656_s1 + $0x348] ss:$12 sps:$4 sm:$0xff]   ;;  %v6706_v25 = vld [vmem:[%s9656_s1 + $0x364] ss:$12 sps:$4 sm:$0xff]  }
  0x1e   :  { %v7613_v19 = vld [vmem:[%s9657_s0 + $0x98] ss:$72 sps:$4 sm:$0xff]   ;;  %v7618_v20 = vld [vmem:[%s9657_s0 + $0x124] ss:$72 sps:$4 sm:$0xff]   ;;  %v6727_v27 = vld [vmem:[%s9656_s1 + $0x50] ss:$12 sps:$4 sm:$0xff]  }
  0x1f   :  { %3575 = vmatpush1.bf16.msra.mxu1 %v6628_v30  ;;  %v6722_v21 = vld [vmem:[%s9656_s1 + $0x38] ss:$12 sps:$4 sm:$0xff]   ;;  %v7643_v26 = vld [vmem:[%s9657_s0 + $0x120] ss:$72 sps:$4 sm:$0xff]  }
  0x20   :  { %3668 = vmatpush1.bf16.msra.mxu0 %v6629_v31  ;;  %3576 = vmatprep.subr.bf16.mxu1 %v6630_v32  ;;  %v6704_v28 = vld [vmem:[%s9656_s1 + $0x360] ss:$12 sps:$4 sm:$0xff]   ;;  %v6736_v29 = vld [vmem:[%s9656_s1 + $0x128] ss:$12 sps:$4 sm:$0xff]  }
  0x21   :  { %3669 = vmatprep.subr.bf16.mxu0 %v6632_v33  ;;  %v6710_v30 = vld [vmem:[%s9656_s1 + $0x37c] ss:$12 sps:$4 sm:$0xff]  }
  0x22   :  { %v7661_v31 = vld [vmem:[%s9657_s0 + $0x1b4] ss:$72 sps:$4 sm:$0xff]   ;;  %v7666_v32 = vld [vmem:[%s9657_s0 + $0x128] ss:$72 sps:$4 sm:$0xff]  }
  0x23   :  { %3577 = vmatpush1.bf16.msra.mxu1 %v6634_v34  ;;  %v6738_v33 = vld [vmem:[%s9656_s1 + $0x68] ss:$12 sps:$4 sm:$0xff]   ;;  %v6742_v34 = vld [vmem:[%s9656_s1 + $0x140] ss:$12 sps:$4 sm:$0xff]  }
  0x24   :  { %3670 = vmatpush1.bf16.msra.mxu0 %v6635_v35  ;;  %3578 = vmatprep.subr.bf16.mxu1 %v6636_v36  ;;  %v7677_v35 = vld [vmem:[%s9657_s0 + $0x1bc] ss:$72 sps:$4 sm:$0xff]  }
  0x25   :  { %3671 = vmatprep.subr.bf16.mxu0 %v6638_v37  ;;  %v6708_v36 = vld [vmem:[%s9656_s1 + $0x378] ss:$12 sps:$4 sm:$0xff]  }
  0x26   :  { %v7688_v37 = vld [vmem:[%s9657_s0 + $0x1b0] ss:$72 sps:$4 sm:$0xff]  }
  0x27   :  { %3579 = vmatpush1.bf16.msra.mxu1 %v6640_v38  ;;  %v6719_v38 = vld [vmem:[%s9656_s1 + $0x394] ss:$12 sps:$4 sm:$0xff]  }
  0x28   :  { %3672 = vmatpush1.bf16.msra.mxu0 %v6641_v39  ;;  %3580 = vmatprep.subr.bf16.mxu1 %v6642_v40  ;;  %v6743_v39 = vld [vmem:[%s9656_s1 + $0x80] ss:$12 sps:$4 sm:$0xff]   ;;  %v6717_v40 = vld [vmem:[%s9656_s1 + $0x390] ss:$12 sps:$4 sm:$0xff]  }
  0x29   :  { %3673 = vmatprep.subr.bf16.mxu0 %v6644_v41  ;;  %v6752_v41 = vld [vmem:[%s9656_s1 + $0x158] ss:$12 sps:$4 sm:$0xff]  }
  0x2b   :  { %3581 = vmatpush1.bf16.msra.mxu1 %v6646_v42  ;;  %v6725_v42 = vld [vmem:[%s9656_s1 + $0x3ac] ss:$12 sps:$4 sm:$0xff]  }
  0x2c   :  { %3674 = vmatpush1.bf16.msra.mxu0 %v6647_v43  ;;  %3582 = vmatprep.subr.bf16.mxu1 %v6648_v44  ;;  %v7709_v43 = vld [vmem:[%s9657_s0 + $0x1b8] ss:$72 sps:$4 sm:$0xff]   ;;  %v7714_v44 = vld [vmem:[%s9657_s0 + $0x244] ss:$72 sps:$4 sm:$0xff]  }
  0x2d   :  { %3675 = vmatprep.subr.bf16.mxu0 %v6650_v45  ;;  %v6754_v45 = vld [vmem:[%s9656_s1 + $0x98] ss:$12 sps:$4 sm:$0xff]  }
  0x2f   :  { %3583 = vmatpush1.bf16.msra.mxu1 %v6652_v46  ;;  %v6758_v46 = vld [vmem:[%s9656_s1 + $0x170] ss:$12 sps:$4 sm:$0xff]  }
  0x30   :  { %3676 = vmatpush1.bf16.msra.mxu0 %v6653_v47  ;;  %3584 = vmatprep.subr.bf16.mxu1 %v6654_v48  ;;  %v7725_v47 = vld [vmem:[%s9657_s0 + $0x24c] ss:$72 sps:$4 sm:$0xff]  }
  0x31   :  { %3677 = vmatprep.subr.bf16.mxu0 %v6656_v50  ;;  %v6723_v48 = vld [vmem:[%s9656_s1 + $0x3a8] ss:$12 sps:$4 sm:$0xff]   ;;  %v6735_v50 = vld [vmem:[%s9656_s1 + $0x3c4] ss:$12 sps:$4 sm:$0xff]  }
  0x33   :  { %3585 = vmatpush1.bf16.msra.mxu1 %v6658_v52  ;;  %v6759_v52 = vld [vmem:[%s9656_s1 + $0xb0] ss:$12 sps:$4 sm:$0xff]  }
  0x34   :  { %3678 = vmatpush1.bf16.msra.mxu0 %v6659_v53  ;;  %3586 = vmatprep.subr.bf16.mxu1 %v6660_v54  ;;  %v7742_v53 = vld [vmem:[%s9657_s0 + $0x240] ss:$72 sps:$4 sm:$0xff]  }
  0x35   :  { %3679 = vmatprep.subr.bf16.mxu0 %v6662_v55  ;;  %v6733_v54 = vld [vmem:[%s9656_s1 + $0x3c0] ss:$12 sps:$4 sm:$0xff]   ;;  %v6741_v55 = vld [vmem:[%s9656_s1 + $0x3dc] ss:$12 sps:$4 sm:$0xff]  }
  0x37   :  { %3587 = vmatpush1.bf16.msra.mxu1 %v6664_v56  ;;  %v7754_v56 = vld [vmem:[%s9657_s0 + $0x2d4] ss:$72 sps:$4 sm:$0xff]  }
  0x38   :  { %3680 = vmatpush1.bf16.msra.mxu0 %v6665_v57  ;;  %3588 = vmatprep.subr.bf16.mxu1 %v6666_v58  ;;  %v7759_v57 = vld [vmem:[%s9657_s0 + $0x248] ss:$72 sps:$4 sm:$0xff]  }
  0x39   :  { %3681 = vmatprep.subr.bf16.mxu0 %v6668_v59  ;;  %v6778_v58 = vld [vmem:[%s9656_s1 + $0x248] ss:$12 sps:$4 sm:$0xff]   ;;  %v7767_v59 = vld [vmem:[%s9657_s0 + $0x2dc] ss:$72 sps:$4 sm:$0xff]  }
  0x3b   :  { %3589 = vmatpush1.bf16.msra.mxu1 %v6670_v60  ;;  %v6739_v60 = vld [vmem:[%s9656_s1 + $0x3d8] ss:$12 sps:$4 sm:$0xff]  }
  0x3c   :  { %3682 = vmatpush1.bf16.msra.mxu0 %v6671_v61  ;;  %3590 = vmatprep.subr.bf16.mxu1 %v6672_v62  ;;  %v6751_v61 = vld [vmem:[%s9656_s1 + $0x3f4] ss:$12 sps:$4 sm:$0xff]   ;;  %v7782_v62 = vld [vmem:[%s9657_s0 + $0x2d0] ss:$72 sps:$4 sm:$0xff]  }
  0x3d   :  { %3683 = vmatprep.subr.bf16.mxu0 %v6674_v63  ;;  %v6749_v63 = vld [vmem:[%s9656_s1 + $0x3f0] ss:$12 sps:$4 sm:$0xff]  }
  0x3f   :  { %3591 = vmatpush1.bf16.msra.mxu1 %v6676_v0  ;;  %v7790_v0 = vld [vmem:[%s9657_s0 + $0x2d8] ss:$72 sps:$4 sm:$0xff]  }
  0x40   :  { %3684 = vmatpush1.bf16.msra.mxu0 %v6677_v1  ;;  %5898 = vmatprep.subr.bf16.mxu1 %v6699_v4  ;;  %v6757_v1 = vld [vmem:[%s9656_s1 + $0x40c] ss:$12 sps:$4 sm:$0xff]   ;;  %v6755_v4 = vld [vmem:[%s9656_s1 + $0x408] ss:$12 sps:$4 sm:$0xff]  }
  0x41   :  { %3746 = vmatprep.subr.bf16.mxu0 %v6686_v2  ;;  %v7798_v2 = vld [vmem:[%s9657_s0 + $0x14] ss:$72 sps:$4 sm:$0xff]  }
  0x42   :  { %3593 = vmatmul.mubr.bf16.vlgmr.msra.gmra.mrb[0].mxu1 %v7551_v3 }
  0x43   :  { %3686 = vmatmul.mubr.bf16.vlgmr.msra.gmra.mrb[0].mxu0 %v7559_v5  ;;  %3602 = vmatprep.mubr.bf16.mxu1 %v7570_v8 }
  0x44   :  { %3747 = vmatpush1.bf16.msra.mxu0 %v6684_v6  ;;  %5899 = vmatpush3.bf16.msra.mxu1 %v6700_v9  ;;  %v6764_v6 = vld [vmem:[%s9656_s1 + $0x424] ss:$12 sps:$4 sm:$0xff]   ;;  %v6768_v9 = vld [vmem:[%s9656_s1 + $0x43c] ss:$12 sps:$4 sm:$0xff]  }
  0x45   :  { %3748 = vmatprep.subr.bf16.mxu0 %v6689_v7  ;;  %5900 = vmatprep.subr.bf16.mxu1 %v6707_v10  ;;  %v6762_v7 = vld [vmem:[%s9656_s1 + $0x420] ss:$12 sps:$4 sm:$0xff]  }
  0x46   :  { %3695 = vmatprep.mubr.bf16.mxu0 %v7581_v11  ;;  %v6786_v10 = vld [vmem:[%s9656_s1 + $0x260] ss:$12 sps:$4 sm:$0xff]  }
  0x48   :  { %3749 = vmatpush1.bf16.msra.mxu0 %v6687_v12  ;;  %5901 = vmatpush3.bf16.msra.mxu1 %v6711_v15  ;;  %v6766_v12 = vld [vmem:[%s9656_s1 + $0x438] ss:$12 sps:$4 sm:$0xff]   ;;  %v6790_v15 = vld [vmem:[%s9656_s1 + $0x1a0] ss:$12 sps:$4 sm:$0xff]  }
  0x49   :  { %3750 = vmatprep.subr.bf16.mxu0 %v6695_v13  ;;  %5902 = vmatprep.subr.bf16.mxu1 %v6720_v17  ;;  %v6773_v13 = vld [vmem:[%s9656_s1 + $0x454] ss:$12 sps:$4 sm:$0xff]   ;;  %v6795_v17 = vld [vmem:[%s9656_s1 + $0x1b8] ss:$12 sps:$4 sm:$0xff]  }
  0x4a   :  { %3603 = vmatmul.mubr.bf16.gmra.mrb[4].mxu1 %v7595_v14 }
  0x4b   :  { %3696 = vmatmul.mubr.bf16.gmra.mrb[4].mxu0 %v7613_v19  ;;  %3612 = vmatprep.mubr.bf16.mxu1 %v7618_v20 }
  0x4c   :  { %3751 = vmatpush1.bf16.msra.mxu0 %v6693_v16  ;;  %5903 = vmatpush3.bf16.msra.mxu1 %v6722_v21  ;;  %v6777_v16 = vld [vmem:[%s9656_s1 + $0x46c] ss:$12 sps:$4 sm:$0xff]   ;;  %v6775_v21 = vld [vmem:[%s9656_s1 + $0x468] ss:$12 sps:$4 sm:$0xff]  }
  0x4d   :  { %3752 = vmatprep.subr.bf16.mxu0 %v6698_v18  ;;  %5904 = vmatprep.subr.bf16.mxu1 %v6726_v22  ;;  %v6799_v18 = vld [vmem:[%s9656_s1 + $0x290] ss:$12 sps:$4 sm:$0xff]  }
  0x4e   :  { %3705 = vmatprep.mubr.bf16.mxu0 %v7629_v23  ;;  %v6785_v22 = vld [vmem:[%s9656_s1 + $0x484] ss:$12 sps:$4 sm:$0xff]  }
  0x50   :  { %3753 = vmatpush1.bf16.msra.mxu0 %v6696_v24  ;;  %5905 = vmatpush3.bf16.msra.mxu1 %v6727_v27  ;;  %v6800_v24 = vld [vmem:[%s9656_s1 + $0x1d0] ss:$12 sps:$4 sm:$0xff]  }
  0x51   :  { %3754 = vmatprep.subr.bf16.mxu0 %v6706_v25  ;;  %5906 = vmatprep.subr.bf16.mxu1 %v6736_v29  ;;  %v7865_v25 = vld [vmem:[%s9657_s0 + $0x10] ss:$72 sps:$4 sm:$0xff]   ;;  %v6789_v27 = vld [vmem:[%s9656_s1 + $0x49c] ss:$12 sps:$4 sm:$0xff]   ;;  %v6809_v29 = vld [vmem:[%s9656_s1 + $0x2c0] ss:$12 sps:$4 sm:$0xff]  }
  0x52   :  { %3613 = vmatmul.mubr.bf16.gmra.mrb[8].mxu1 %v7643_v26 }
  0x53   :  { %3706 = vmatmul.mubr.bf16.gmra.mrb[8].mxu0 %v7666_v32  ;;  %3622 = vmatprep.mubr.bf16.mxu1 %v7661_v31 }
  0x54   :  { %3755 = vmatpush1.bf16.msra.mxu0 %v6704_v28  ;;  %5907 = vmatpush3.bf16.msra.mxu1 %v6738_v33  ;;  %v6805_v28 = vld [vmem:[%s9656_s1 + $0x1e8] ss:$12 sps:$4 sm:$0xff]   ;;  %v6787_v33 = vld [vmem:[%s9656_s1 + $0x498] ss:$12 sps:$4 sm:$0xff]  }
  0x55   :  { %3756 = vmatprep.subr.bf16.mxu0 %v6710_v30  ;;  %5908 = vmatprep.subr.bf16.mxu1 %v6742_v34  ;;  %v7882_v30 = vld [vmem:[%s9657_s0 + $0xa4] ss:$72 sps:$4 sm:$0xff]   ;;  %v6793_v34 = vld [vmem:[%s9656_s1 + $0x4b4] ss:$12 sps:$4 sm:$0xff]  }
  0x56   :  { %3715 = vmatprep.mubr.bf16.mxu0 %v7677_v35 }
  0x58   :  { %3757 = vmatpush1.bf16.msra.mxu0 %v6708_v36  ;;  %5909 = vmatpush3.bf16.msra.mxu1 %v6743_v39  ;;  %v6810_v36 = vld [vmem:[%s9656_s1 + $0x200] ss:$12 sps:$4 sm:$0xff]  }
  0x59   :  { %3758 = vmatprep.subr.bf16.mxu0 %v6719_v38  ;;  %5910 = vmatprep.subr.bf16.mxu1 %v6752_v41  ;;  %v6791_v38 = vld [vmem:[%s9656_s1 + $0x4b0] ss:$12 sps:$4 sm:$0xff]   ;;  %v6798_v39 = vld [vmem:[%s9656_s1 + $0x4cc] ss:$12 sps:$4 sm:$0xff]  }
  0x5a   :  { %3623 = vmatmul.mubr.bf16.gmra.mrb[12].mxu1 %v7688_v37  ;;  %v6822_v41 = vld [vmem:[%s9656_s1 + $0x2f0] ss:$12 sps:$4 sm:$0xff]  }
  0x5b   :  { %3716 = vmatmul.mubr.bf16.gmra.mrb[12].mxu0 %v7709_v43  ;;  %3632 = vmatprep.mubr.bf16.mxu1 %v7714_v44 }
  0x5c   :  { %3759 = vmatpush1.bf16.msra.mxu0 %v6717_v40  ;;  %5911 = vmatpush3.bf16.msra.mxu1 %v6754_v45  ;;  %v6818_v40 = vld [vmem:[%s9656_s1 + $0x218] ss:$12 sps:$4 sm:$0xff]   ;;  %v6796_v45 = vld [vmem:[%s9656_s1 + $0x4c8] ss:$12 sps:$4 sm:$0xff]  }
  0x5d   :  { %3760 = vmatprep.subr.bf16.mxu0 %v6725_v42  ;;  %5912 = vmatprep.subr.bf16.mxu1 %v6758_v46  ;;  %v7920_v42 = vld [vmem:[%s9657_s0 + $0x134] ss:$72 sps:$4 sm:$0xff]   ;;  %v6803_v46 = vld [vmem:[%s9656_s1 + $0x4e4] ss:$12 sps:$4 sm:$0xff]  }
  0x5e   :  { %3725 = vmatprep.mubr.bf16.mxu0 %v7725_v47 }
  0x60   :  { %3761 = vmatpush1.bf16.msra.mxu0 %v6723_v48  ;;  %5913 = vmatpush3.bf16.msra.mxu1 %v6759_v52  ;;  %v6823_v48 = vld [vmem:[%s9656_s1 + $0x230] ss:$12 sps:$4 sm:$0xff]  }
  0x61   :  { %3762 = vmatprep.subr.bf16.mxu0 %v6735_v50  ;;  %5950 = vmatprep.subr.bf16.mxu1 %v6778_v58  ;;  %v6801_v50 = vld [vmem:[%s9656_s1 + $0x4e0] ss:$12 sps:$4 sm:$0xff]   ;;  %v6808_v52 = vld [vmem:[%s9656_s1 + $0x4fc] ss:$12 sps:$4 sm:$0xff]  }
  0x62   :  { %3633 = vmatmul.mubr.bf16.gmra.mrb[16].mxu1 %v7742_v53  ;;  %v6815_v58 = vld [vmem:[%s9656_s1 + $0x514] ss:$12 sps:$4 sm:$0xff]  }
  0x63   :  { %3726 = vmatmul.mubr.bf16.gmra.mrb[16].mxu0 %v7759_v57  ;;  %3642 = vmatprep.mubr.bf16.mxu1 %v7754_v56 }
  0x64   :  { %3763 = vmatpush1.bf16.msra.mxu0 %v6733_v54  ;;  %3735 = vmatprep.mubr.bf16.mxu0 %v7767_v59  ;;  %v7952_v54 = vld [vmem:[%s9657_s0 + $0x1c4] ss:$72 sps:$4 sm:$0xff]  }
  0x65   :  { %3764 = vmatprep.subr.bf16.mxu0 %v6741_v55  ;;  %v6806_v55 = vld [vmem:[%s9656_s1 + $0x4f8] ss:$12 sps:$4 sm:$0xff]  }
  0x68   :  { %3765 = vmatpush1.bf16.msra.mxu0 %v6739_v60  ;;  %v7970_v60 = vld [vmem:[%s9657_s0 + $0x1c0] ss:$72 sps:$4 sm:$0xff]  }
  0x69   :  { %3766 = vmatprep.subr.bf16.mxu0 %v6751_v61  ;;  %v7978_v61 = vld [vmem:[%s9657_s0 + $0x254] ss:$72 sps:$4 sm:$0xff]  }
  0x6a   :  { %3643 = vmatmul.mubr.bf16.gmra.mrb[20].mxu1 %v7782_v62 }
  0x6b   :  { %3736 = vmatmul.mubr.bf16.gmra.mrb[20].mxu0 %v7790_v0  ;;  %4429 = vmatprep.mubr.bf16.mxu1 %v7491_v49  ;;  %v6779_v49 = vld [vmem:[%s9656_s1 + $0x188] ss:$12 sps:$4 sm:$0xff]  }
  0x6c   :  { %3767 = vmatpush1.bf16.msra.mxu0 %v6749_v63  ;;  %3778 = vmatprep.mubr.bf16.mxu0 %v7798_v2  ;;  %v6819_v63 = vld [vmem:[%s9656_s1 + $0x528] ss:$12 sps:$4 sm:$0xff]  }
  0x6d   :  { %3768 = vmatprep.subr.bf16.mxu0 %v6757_v1  ;;  %v6828_v1 = vld [vmem:[%s9656_s1 + $0x544] ss:$12 sps:$4 sm:$0xff]  }
  0x70   :  { %3769 = vmatpush1.bf16.msra.mxu0 %v6755_v4  ;;  %v7996_v4 = vld [vmem:[%s9657_s0 + $0x250] ss:$72 sps:$4 sm:$0xff]  }
  0x71   :  { %3770 = vmatprep.subr.bf16.mxu0 %v6764_v6  ;;  %v6843_v6 = vld [vmem:[%s9656_s1 + $0x308] ss:$12 sps:$4 sm:$0xff]  }
  0x72   :  { %4430 = vmatmul.mubr.bf16.vlgmr.msra.gmra.mrb[24].mxu1 %v7551_v3  ;;  %v6794_v3 = vld [vmem:[%s9656_s1 + $0x278] ss:$12 sps:$4 sm:$0xff]  }
  0x73   :  { %4437 = vmatprep.mubr.bf16.mxu1 %v7570_v8  ;;  %5951 = vmatpush3.bf16.msra.mxu1 %v6779_v49  ;;  %v6771_v8 = vld [vmem:[%s9656_s1 + $0x450] ss:$12 sps:$4 sm:$0xff]   ;;  %v6830_v49 = vld [vmem:[%s9656_s1 + $0x558] ss:$12 sps:$4 sm:$0xff]  }
  0x74   :  { %3771 = vmatpush1.bf16.msra.mxu0 %v6762_v7  ;;  %5952 = vmatprep.subr.bf16.mxu1 %v6786_v10  ;;  %v6850_v7 = vld [vmem:[%s9656_s1 + $0x3e0] ss:$12 sps:$4 sm:$0xff]  }
  0x75   :  { %3772 = vmatprep.subr.bf16.mxu0 %v6768_v9  ;;  %v8010_v9 = vld [vmem:[%s9657_s0 + $0x2e4] ss:$72 sps:$4 sm:$0xff]   ;;  %v6837_v10 = vld [vmem:[%s9656_s1 + $0x574] ss:$12 sps:$4 sm:$0xff]  }
  0x77   :  { %5953 = vmatpush3.bf16.msra.mxu1 %v6790_v15  ;;  %v6841_v15 = vld [vmem:[%s9656_s1 + $0x58c] ss:$12 sps:$4 sm:$0xff]  }
  0x78   :  { %3773 = vmatpush1.bf16.msra.mxu0 %v6766_v12  ;;  %5954 = vmatprep.subr.bf16.mxu1 %v6794_v3  ;;  %v6854_v12 = vld [vmem:[%s9656_s1 + $0x320] ss:$12 sps:$4 sm:$0xff]   ;;  %v6862_v3 = vld [vmem:[%s9656_s1 + $0x338] ss:$12 sps:$4 sm:$0xff]  }
  0x79   :  { %3774 = vmatprep.subr.bf16.mxu0 %v6773_v13  ;;  %v6835_v13 = vld [vmem:[%s9656_s1 + $0x570] ss:$12 sps:$4 sm:$0xff]  }
  0x7a   :  { %4438 = vmatmul.mubr.bf16.gmra.mrb[28].mxu1 %v7595_v14  ;;  %v6804_v14 = vld [vmem:[%s9656_s1 + $0x2a8] ss:$12 sps:$4 sm:$0xff]  }
  0x7b   :  { %4445 = vmatprep.mubr.bf16.mxu1 %v7618_v20  ;;  %5955 = vmatpush3.bf16.msra.mxu1 %v6795_v17  ;;  %v6783_v20 = vld [vmem:[%s9656_s1 + $0x480] ss:$12 sps:$4 sm:$0xff]   ;;  %v6839_v17 = vld [vmem:[%s9656_s1 + $0x588] ss:$12 sps:$4 sm:$0xff]  }
  0x7c   :  { %3775 = vmatpush1.bf16.msra.mxu0 %v6771_v8  ;;  %5956 = vmatprep.subr.bf16.mxu1 %v6799_v18  ;;  %v6866_v8 = vld [vmem:[%s9656_s1 + $0x410] ss:$12 sps:$4 sm:$0xff]  }
  0x7d   :  { %3776 = vmatprep.subr.bf16.mxu0 %v6777_v16  ;;  %v8048_v16 = vld [vmem:[%s9657_s0 + $0x1c] ss:$72 sps:$4 sm:$0xff]  }
  0x7e   :  { %v6848_v18 = vld [vmem:[%s9656_s1 + $0x5a4] ss:$12 sps:$4 sm:$0xff]  }
  0x7f   :  { %5957 = vmatpush3.bf16.msra.mxu1 %v6800_v24  ;;  %v6875_v24 = vld [vmem:[%s9656_s1 + $0x368] ss:$12 sps:$4 sm:$0xff]  }
  0x80   :  { %3777 = vmatpush1.bf16.msra.mxu0 %v6775_v21  ;;  %5958 = vmatprep.subr.bf16.mxu1 %v6804_v14  ;;  %v6867_v21 = vld [vmem:[%s9656_s1 + $0x350] ss:$12 sps:$4 sm:$0xff]   ;;  %v6879_v14 = vld [vmem:[%s9656_s1 + $0x440] ss:$12 sps:$4 sm:$0xff]  }
  0x81   :  { %3839 = vmatprep.subr.bf16.mxu0 %v6785_v22  ;;  %v6853_v22 = vld [vmem:[%s9656_s1 + $0x5bc] ss:$12 sps:$4 sm:$0xff]  }
  0x82   :  { %4446 = vmatmul.mubr.bf16.gmra.mrb[32].mxu1 %v7643_v26  ;;  %v6816_v26 = vld [vmem:[%s9656_s1 + $0x2d8] ss:$12 sps:$4 sm:$0xff]  }
  0x83   :  { %3779 = vmatmul.mubr.bf16.vlgmr.msra.gmra.mrb[0].mxu0 %v7865_v25  ;;  %4453 = vmatprep.mubr.bf16.mxu1 %v7661_v31  ;;  %v7903_v31 = vld [vmem:[%s9657_s0 + $0xa0] ss:$72 sps:$4 sm:$0xff]  }
  0x84   :  { %3840 = vmatpush1.bf16.msra.mxu0 %v6783_v20  ;;  %5959 = vmatpush3.bf16.msra.mxu1 %v6805_v28  ;;  %v6851_v20 = vld [vmem:[%s9656_s1 + $0x5b8] ss:$12 sps:$4 sm:$0xff]   ;;  %v6880_v28 = vld [vmem:[%s9656_s1 + $0x380] ss:$12 sps:$4 sm:$0xff]  }
  0x85   :  { %3841 = vmatprep.subr.bf16.mxu0 %v6789_v27  ;;  %5960 = vmatprep.subr.bf16.mxu1 %v6809_v29  ;;  %v6859_v27 = vld [vmem:[%s9656_s1 + $0x5d4] ss:$12 sps:$4 sm:$0xff]   ;;  %v6865_v29 = vld [vmem:[%s9656_s1 + $0x5ec] ss:$12 sps:$4 sm:$0xff]  }
  0x86   :  { %3788 = vmatprep.mubr.bf16.mxu0 %v7882_v30 }
  0x88   :  { %3842 = vmatpush1.bf16.msra.mxu0 %v6787_v33  ;;  %5961 = vmatpush3.bf16.msra.mxu1 %v6810_v36  ;;  %v6885_v33 = vld [vmem:[%s9656_s1 + $0x398] ss:$12 sps:$4 sm:$0xff]   ;;  %v6863_v36 = vld [vmem:[%s9656_s1 + $0x5e8] ss:$12 sps:$4 sm:$0xff]  }
  0x89   :  { %3843 = vmatprep.subr.bf16.mxu0 %v6793_v34  ;;  %5962 = vmatprep.subr.bf16.mxu1 %v6816_v26  ;;  %v6889_v34 = vld [vmem:[%s9656_s1 + $0x470] ss:$12 sps:$4 sm:$0xff]  }
  0x8a   :  { %4454 = vmatmul.mubr.bf16.gmra.mrb[36].mxu1 %v7688_v37  ;;  %v6842_v37 = vld [vmem:[%s9656_s1 + $0x3c8] ss:$12 sps:$4 sm:$0xff]   ;;  %v6873_v26 = vld [vmem:[%s9656_s1 + $0x604] ss:$12 sps:$4 sm:$0xff]  }
  0x8b   :  { %3789 = vmatmul.mubr.bf16.gmra.mrb[4].mxu0 %v7903_v31  ;;  %4461 = vmatprep.mubr.bf16.mxu1 %v7714_v44  ;;  %v7941_v44 = vld [vmem:[%s9657_s0 + $0x130] ss:$72 sps:$4 sm:$0xff]  }
  0x8c   :  { %3844 = vmatpush1.bf16.msra.mxu0 %v6791_v38  ;;  %5963 = vmatpush3.bf16.msra.mxu1 %v6818_v40  ;;  %v6890_v38 = vld [vmem:[%s9656_s1 + $0x3b0] ss:$12 sps:$4 sm:$0xff]  }
  0x8d   :  { %3845 = vmatprep.subr.bf16.mxu0 %v6798_v39  ;;  %5964 = vmatprep.subr.bf16.mxu1 %v6822_v41  ;;  %v8121_v39 = vld [vmem:[%s9657_s0 + $0x18] ss:$72 sps:$4 sm:$0xff]   ;;  %v6878_v40 = vld [vmem:[%s9656_s1 + $0x61c] ss:$12 sps:$4 sm:$0xff]   ;;  %v8132_v41 = vld [vmem:[%s9657_s0 + $0xac] ss:$72 sps:$4 sm:$0xff]  }
  0x8e   :  { %3798 = vmatprep.mubr.bf16.mxu0 %v7920_v42 }
  0x90   :  { %3846 = vmatpush1.bf16.msra.mxu0 %v6796_v45  ;;  %5965 = vmatpush3.bf16.msra.mxu1 %v6823_v48  ;;  %v6876_v45 = vld [vmem:[%s9656_s1 + $0x618] ss:$12 sps:$4 sm:$0xff]   ;;  %v6881_v48 = vld [vmem:[%s9656_s1 + $0x630] ss:$12 sps:$4 sm:$0xff]  }
  0x91   :  { %3847 = vmatprep.subr.bf16.mxu0 %v6803_v46  ;;  %6002 = vmatprep.subr.bf16.mxu1 %v6842_v37  ;;  %v6883_v46 = vld [vmem:[%s9656_s1 + $0x634] ss:$12 sps:$4 sm:$0xff]   ;;  %v8158_v37 = vld [vmem:[%s9657_s0 + $0x13c] ss:$72 sps:$4 sm:$0xff]  }
  0x92   :  { %4462 = vmatmul.mubr.bf16.gmra.mrb[40].mxu1 %v7742_v53  ;;  %v6813_v53 = vld [vmem:[%s9656_s1 + $0x510] ss:$12 sps:$4 sm:$0xff]  }
  0x93   :  { %3799 = vmatmul.mubr.bf16.gmra.mrb[8].mxu0 %v7941_v44  ;;  %4469 = vmatprep.mubr.bf16.mxu1 %v7754_v56  ;;  %v6821_v56 = vld [vmem:[%s9656_s1 + $0x52c] ss:$12 sps:$4 sm:$0xff]  }
  0x94   :  { %3848 = vmatpush1.bf16.msra.mxu0 %v6801_v50  ;;  %3808 = vmatprep.mubr.bf16.mxu0 %v7952_v54  ;;  %v6886_v50 = vld [vmem:[%s9656_s1 + $0x648] ss:$12 sps:$4 sm:$0xff]  }
  0x95   :  { %3849 = vmatprep.subr.bf16.mxu0 %v6808_v52  ;;  %v6893_v52 = vld [vmem:[%s9656_s1 + $0x664] ss:$12 sps:$4 sm:$0xff]  }
  0x98   :  { %3850 = vmatpush1.bf16.msra.mxu0 %v6806_v55  ;;  %v6896_v55 = vld [vmem:[%s9656_s1 + $0x67c] ss:$12 sps:$4 sm:$0xff]  }
  0x99   :  { %3851 = vmatprep.subr.bf16.mxu0 %v6815_v58  ;;  %v8179_v58 = vld [vmem:[%s9657_s0 + $0x138] ss:$72 sps:$4 sm:$0xff]  }
  0x9a   :  { %4470 = vmatmul.mubr.bf16.gmra.mrb[44].mxu1 %v7782_v62  ;;  %v6826_v62 = vld [vmem:[%s9656_s1 + $0x540] ss:$12 sps:$4 sm:$0xff]  }
  0x9b   :  { %3809 = vmatmul.mubr.bf16.gmra.mrb[12].mxu0 %v7970_v60  ;;  %4510 = vmatprep.mubr.bf16.mxu1 %v7499_v51  ;;  %v6832_v51 = vld [vmem:[%s9656_s1 + $0x55c] ss:$12 sps:$4 sm:$0xff]  }
  0x9c   :  { %3852 = vmatpush1.bf16.msra.mxu0 %v6813_v53  ;;  %3818 = vmatprep.mubr.bf16.mxu0 %v7978_v61  ;;  %v6914_v53 = vld [vmem:[%s9656_s1 + $0x560] ss:$12 sps:$4 sm:$0xff]  }
  0x9d   :  { %3853 = vmatprep.subr.bf16.mxu0 %v6821_v56  ;;  %v8190_v56 = vld [vmem:[%s9657_s0 + $0x1cc] ss:$72 sps:$4 sm:$0xff]  }
  0xa0   :  { %3854 = vmatpush1.bf16.msra.mxu0 %v6819_v63  ;;  %v6894_v63 = vld [vmem:[%s9656_s1 + $0x678] ss:$12 sps:$4 sm:$0xff]  }
  0xa1   :  { %3855 = vmatprep.subr.bf16.mxu0 %v6828_v1  ;;  %v6901_v1 = vld [vmem:[%s9656_s1 + $0x694] ss:$12 sps:$4 sm:$0xff]  }
  0xa2   :  { %4511 = vmatmul.mubr.bf16.vlgmr.msra.gmra.mrb[48].mxu1 %v7559_v5  ;;  %v6860_v5 = vld [vmem:[%s9656_s1 + $0x3f8] ss:$12 sps:$4 sm:$0xff]  }
  0xa3   :  { %3819 = vmatmul.mubr.bf16.gmra.mrb[16].mxu0 %v7996_v4  ;;  %4518 = vmatprep.mubr.bf16.mxu1 %v7581_v11  ;;  %v8031_v11 = vld [vmem:[%s9657_s0 + $0x2e0] ss:$72 sps:$4 sm:$0xff]  }
  0xa4   :  { %3856 = vmatpush1.bf16.msra.mxu0 %v6826_v62  ;;  %6003 = vmatpush3.bf16.msra.mxu1 %v6843_v6  ;;  %v6918_v62 = vld [vmem:[%s9656_s1 + $0x4a0] ss:$12 sps:$4 sm:$0xff]   ;;  %v8217_v6 = vld [vmem:[%s9657_s0 + $0x1c8] ss:$72 sps:$4 sm:$0xff]  }
  0xa5   :  { %3857 = vmatprep.subr.bf16.mxu0 %v6832_v51  ;;  %6004 = vmatprep.subr.bf16.mxu1 %v6850_v7  ;;  %v6905_v51 = vld [vmem:[%s9656_s1 + $0x6ac] ss:$12 sps:$4 sm:$0xff]  }
  0xa6   :  { %3828 = vmatprep.mubr.bf16.mxu0 %v8010_v9  ;;  %v6926_v7 = vld [vmem:[%s9656_s1 + $0x4b8] ss:$12 sps:$4 sm:$0xff]  }
  0xa8   :  { %3858 = vmatpush1.bf16.msra.mxu0 %v6830_v49  ;;  %6005 = vmatpush3.bf16.msra.mxu1 %v6854_v12  ;;  %v6930_v49 = vld [vmem:[%s9656_s1 + $0x590] ss:$12 sps:$4 sm:$0xff]   ;;  %v6903_v12 = vld [vmem:[%s9656_s1 + $0x6a8] ss:$12 sps:$4 sm:$0xff]  }
  0xa9   :  { %3859 = vmatprep.subr.bf16.mxu0 %v6837_v10  ;;  %6006 = vmatprep.subr.bf16.mxu1 %v6860_v5  ;;  %v8228_v10 = vld [vmem:[%s9657_s0 + $0x25c] ss:$72 sps:$4 sm:$0xff]  }
  0xaa   :  { %4519 = vmatmul.mubr.bf16.gmra.mrb[52].mxu1 %v7613_v19  ;;  %v6874_v19 = vld [vmem:[%s9656_s1 + $0x428] ss:$12 sps:$4 sm:$0xff]   ;;  %v6912_v5 = vld [vmem:[%s9656_s1 + $0x6c4] ss:$12 sps:$4 sm:$0xff]  }
  0xab   :  { %3829 = vmatmul.mubr.bf16.gmra.mrb[20].mxu0 %v8031_v11  ;;  %4526 = vmatprep.mubr.bf16.mxu1 %v7629_v23  ;;  %v6846_v23 = vld [vmem:[%s9656_s1 + $0x5a0] ss:$12 sps:$4 sm:$0xff]  }
  0xac   :  { %3860 = vmatpush1.bf16.msra.mxu0 %v6835_v13  ;;  %6007 = vmatpush3.bf16.msra.mxu1 %v6862_v3  ;;  %v6931_v13 = vld [vmem:[%s9656_s1 + $0x4d0] ss:$12 sps:$4 sm:$0xff]  }
  0xad   :  { %3861 = vmatprep.subr.bf16.mxu0 %v6841_v15  ;;  %6008 = vmatprep.subr.bf16.mxu1 %v6866_v8  ;;  %v8252_v15 = vld [vmem:[%s9657_s0 + $0x258] ss:$72 sps:$4 sm:$0xff]   ;;  %v6917_v3 = vld [vmem:[%s9656_s1 + $0x6dc] ss:$12 sps:$4 sm:$0xff]  }
  0xae   :  { %3871 = vmatprep.mubr.bf16.mxu0 %v8048_v16  ;;  %v6939_v8 = vld [vmem:[%s9656_s1 + $0x4e8] ss:$12 sps:$4 sm:$0xff]  }
  0xb0   :  { %3862 = vmatpush1.bf16.msra.mxu0 %v6839_v17  ;;  %6009 = vmatpush3.bf16.msra.mxu1 %v6867_v21  ;;  %v6943_v17 = vld [vmem:[%s9656_s1 + $0x5c0] ss:$12 sps:$4 sm:$0xff]   ;;  %v6915_v21 = vld [vmem:[%s9656_s1 + $0x6d8] ss:$12 sps:$4 sm:$0xff]  }
  0xb1   :  { %3863 = vmatprep.subr.bf16.mxu0 %v6848_v18  ;;  %6010 = vmatprep.subr.bf16.mxu1 %v6874_v19  ;;  %v8266_v18 = vld [vmem:[%s9657_s0 + $0x2ec] ss:$72 sps:$4 sm:$0xff]  }
  0xb2   :  { %4527 = vmatmul.mubr.bf16.gmra.mrb[56].mxu1 %v7666_v32  ;;  %v6884_v32 = vld [vmem:[%s9656_s1 + $0x458] ss:$12 sps:$4 sm:$0xff]   ;;  %v6923_v19 = vld [vmem:[%s9656_s1 + $0x6f4] ss:$12 sps:$4 sm:$0xff]  }
  0xb3   :  { %4534 = vmatprep.mubr.bf16.mxu1 %v7677_v35  ;;  %v6857_v35 = vld [vmem:[%s9656_s1 + $0x5d0] ss:$12 sps:$4 sm:$0xff]  }
  0xb4   :  { %3864 = vmatpush1.bf16.msra.mxu0 %v6846_v23  ;;  %6011 = vmatpush3.bf16.msra.mxu1 %v6875_v24  ;;  %v6944_v23 = vld [vmem:[%s9656_s1 + $0x500] ss:$12 sps:$4 sm:$0xff]  }
  0xb5   :  { %3865 = vmatprep.subr.bf16.mxu0 %v6853_v22  ;;  %6012 = vmatprep.subr.bf16.mxu1 %v6879_v14  ;;  %v8290_v22 = vld [vmem:[%s9657_s0 + $0x2e8] ss:$72 sps:$4 sm:$0xff]   ;;  %v6929_v24 = vld [vmem:[%s9656_s1 + $0x70c] ss:$12 sps:$4 sm:$0xff]  }
  0xb6   :  { %v6952_v14 = vld [vmem:[%s9656_s1 + $0x518] ss:$12 sps:$4 sm:$0xff]  }
  0xb8   :  { %3866 = vmatpush1.bf16.msra.mxu0 %v6851_v20  ;;  %6013 = vmatpush3.bf16.msra.mxu1 %v6880_v28  ;;  %v6956_v20 = vld [vmem:[%s9656_s1 + $0x5f0] ss:$12 sps:$4 sm:$0xff]   ;;  %v6927_v28 = vld [vmem:[%s9656_s1 + $0x708] ss:$12 sps:$4 sm:$0xff]  }
  0xb9   :  { %3867 = vmatprep.subr.bf16.mxu0 %v6859_v27  ;;  %6014 = vmatprep.subr.bf16.mxu1 %v6884_v32  ;;  %v8304_v27 = vld [vmem:[%s9657_s0 + $0x24] ss:$72 sps:$4 sm:$0xff]  }
  0xba   :  { %4535 = vmatmul.mubr.bf16.gmra.mrb[60].mxu1 %v7709_v43  ;;  %v6906_v43 = vld [vmem:[%s9656_s1 + $0x548] ss:$12 sps:$4 sm:$0xff]   ;;  %v6936_v32 = vld [vmem:[%s9656_s1 + $0x724] ss:$12 sps:$4 sm:$0xff]  }
  0xbb   :  { %4542 = vmatprep.mubr.bf16.mxu1 %v7725_v47  ;;  %v6871_v47 = vld [vmem:[%s9656_s1 + $0x600] ss:$12 sps:$4 sm:$0xff]  }
  0xbc   :  { %3868 = vmatpush1.bf16.msra.mxu0 %v6857_v35  ;;  %6015 = vmatpush3.bf16.msra.mxu1 %v6885_v33  ;;  %v6957_v35 = vld [vmem:[%s9656_s1 + $0x530] ss:$12 sps:$4 sm:$0xff]   ;;  %v6940_v33 = vld [vmem:[%s9656_s1 + $0x738] ss:$12 sps:$4 sm:$0xff]  }
  0xbd   :  { %3869 = vmatprep.subr.bf16.mxu0 %v6865_v29  ;;  %6016 = vmatprep.subr.bf16.mxu1 %v6889_v34  ;;  %v6942_v29 = vld [vmem:[%s9656_s1 + $0x73c] ss:$12 sps:$4 sm:$0xff]   ;;  %v6949_v34 = vld [vmem:[%s9656_s1 + $0x754] ss:$12 sps:$4 sm:$0xff]  }
  0xc0   :  { %3870 = vmatpush1.bf16.msra.mxu0 %v6863_v36  ;;  %6017 = vmatpush3.bf16.msra.mxu1 %v6890_v38  ;;  %v6947_v36 = vld [vmem:[%s9656_s1 + $0x750] ss:$12 sps:$4 sm:$0xff]   ;;  %v8353_v38 = vld [vmem:[%s9657_s0 + $0x20] ss:$72 sps:$4 sm:$0xff]  }
  0xc1   :  { %3932 = vmatprep.subr.bf16.mxu0 %v6873_v26  ;;  %6054 = vmatprep.subr.bf16.mxu1 %v6906_v43  ;;  %v6963_v26 = vld [vmem:[%s9656_s1 + $0x784] ss:$12 sps:$4 sm:$0xff]   ;;  %v6966_v43 = vld [vmem:[%s9656_s1 + $0x79c] ss:$12 sps:$4 sm:$0xff]  }
  0xc2   :  { %4543 = vmatmul.mubr.bf16.gmra.mrb[64].mxu1 %v7759_v57  ;;  %v8147_v57 = vld [vmem:[%s9657_s0 + $0xa8] ss:$72 sps:$4 sm:$0xff]  }
  0xc3   :  { %3872 = vmatmul.mubr.bf16.vlgmr.msra.gmra.mrb[0].mxu0 %v8121_v39  ;;  %4550 = vmatprep.mubr.bf16.mxu1 %v7767_v59  ;;  %v6888_v59 = vld [vmem:[%s9656_s1 + $0x64c] ss:$12 sps:$4 sm:$0xff]  }
  0xc4   :  { %3933 = vmatpush1.bf16.msra.mxu0 %v6871_v47  ;;  %3881 = vmatprep.mubr.bf16.mxu0 %v8132_v41  ;;  %v6978_v47 = vld [vmem:[%s9656_s1 + $0x6e0] ss:$12 sps:$4 sm:$0xff]  }
  0xc5   :  { %3934 = vmatprep.subr.bf16.mxu0 %v6878_v40  ;;  %v8370_v40 = vld [vmem:[%s9657_s0 + $0xb4] ss:$72 sps:$4 sm:$0xff]  }
  0xc8   :  { %3935 = vmatpush1.bf16.msra.mxu0 %v6876_v45  ;;  %v6964_v45 = vld [vmem:[%s9656_s1 + $0x798] ss:$12 sps:$4 sm:$0xff]  }
  0xc9   :  { %3936 = vmatprep.subr.bf16.mxu0 %v6883_v46  ;;  %v6969_v46 = vld [vmem:[%s9656_s1 + $0x7b4] ss:$12 sps:$4 sm:$0xff]  }
  0xca   :  { %4551 = vmatmul.mubr.bf16.gmra.mrb[68].mxu1 %v7790_v0  ;;  %v6891_v0 = vld [vmem:[%s9656_s1 + $0x660] ss:$12 sps:$4 sm:$0xff]  }
  0xcb   :  { %3882 = vmatmul.mubr.bf16.gmra.mrb[4].mxu0 %v8147_v57  ;;  %4591 = vmatprep.mubr.bf16.mxu1 %v7798_v2  ;;  %v6907_v2 = vld [vmem:[%s9656_s1 + $0x488] ss:$12 sps:$4 sm:$0xff]  }
  0xcc   :  { %3937 = vmatpush1.bf16.msra.mxu0 %v6881_v48  ;;  %3891 = vmatprep.mubr.bf16.mxu0 %v8158_v37  ;;  %v6982_v48 = vld [vmem:[%s9656_s1 + $0x620] ss:$12 sps:$4 sm:$0xff]  }
  0xcd   :  { %3938 = vmatprep.subr.bf16.mxu0 %v6888_v59  ;;  %v6972_v59 = vld [vmem:[%s9656_s1 + $0x7cc] ss:$12 sps:$4 sm:$0xff]  }
  0xd0   :  { %3939 = vmatpush1.bf16.msra.mxu0 %v6886_v50  ;;  %v8397_v50 = vld [vmem:[%s9657_s0 + $0xb0] ss:$72 sps:$4 sm:$0xff]  }
  0xd1   :  { %3940 = vmatprep.subr.bf16.mxu0 %v6893_v52  ;;  %v6990_v52 = vld [vmem:[%s9656_s1 + $0x638] ss:$12 sps:$4 sm:$0xff]  }
  0xd2   :  { %4592 = vmatmul.mubr.bf16.vlgmr.msra.gmra.mrb[72].mxu1 %v7865_v25  ;;  %v6899_v25 = vld [vmem:[%s9656_s1 + $0x690] ss:$12 sps:$4 sm:$0xff]  }
  0xd3   :  { %3892 = vmatmul.mubr.bf16.gmra.mrb[8].mxu0 %v8179_v58  ;;  %4599 = vmatprep.mubr.bf16.mxu1 %v7882_v30  ;;  %v6924_v30 = vld [vmem:[%s9656_s1 + $0x578] ss:$12 sps:$4 sm:$0xff]  }
  0xd4   :  { %3941 = vmatpush1.bf16.msra.mxu0 %v6891_v0  ;;  %6055 = vmatpush3.bf16.msra.mxu1 %v6907_v2  ;;  %v6994_v0 = vld [vmem:[%s9656_s1 + $0x710] ss:$12 sps:$4 sm:$0xff]   ;;  %v6970_v2 = vld [vmem:[%s9656_s1 + $0x7c8] ss:$12 sps:$4 sm:$0xff]  }
  0xd5   :  { %3942 = vmatprep.subr.bf16.mxu0 %v6896_v55  ;;  %6056 = vmatprep.subr.bf16.mxu1 %v6914_v53  ;;  %v8408_v55 = vld [vmem:[%s9657_s0 + $0x144] ss:$72 sps:$4 sm:$0xff]  }
  0xd6   :  { %3901 = vmatprep.mubr.bf16.mxu0 %v8190_v56  ;;  %v6977_v53 = vld [vmem:[%s9656_s1 + $0x7e4] ss:$12 sps:$4 sm:$0xff]  }
  0xd8   :  { %3943 = vmatpush1.bf16.msra.mxu0 %v6894_v63  ;;  %6057 = vmatpush3.bf16.msra.mxu1 %v6918_v62  ;;  %v6995_v63 = vld [vmem:[%s9656_s1 + $0x650] ss:$12 sps:$4 sm:$0xff]   ;;  %v8435_v62 = vld [vmem:[%s9657_s0 + $0x140] ss:$72 sps:$4 sm:$0xff]  }
  0xd9   :  { %3944 = vmatprep.subr.bf16.mxu0 %v6901_v1  ;;  %6058 = vmatprep.subr.bf16.mxu1 %v6924_v30  ;;  %v6981_v1 = vld [vmem:[%s9656_s1 + $0x7fc] ss:$12 sps:$4 sm:$0xff]   ;;  %v7007_v30 = vld [vmem:[%s9656_s1 + $0x740] ss:$12 sps:$4 sm:$0xff]  }
  0xda   :  { %4600 = vmatmul.mubr.bf16.gmra.mrb[76].mxu1 %v7903_v31  ;;  %v6910_v31 = vld [vmem:[%s9656_s1 + $0x6c0] ss:$12 sps:$4 sm:$0xff]  }
  0xdb   :  { %3902 = vmatmul.mubr.bf16.gmra.mrb[12].mxu0 %v8217_v6  ;;  %4607 = vmatprep.mubr.bf16.mxu1 %v7920_v42  ;;  %v6937_v42 = vld [vmem:[%s9656_s1 + $0x5a8] ss:$12 sps:$4 sm:$0xff]  }
  0xdc   :  { %3945 = vmatpush1.bf16.msra.mxu0 %v6899_v25  ;;  %6059 = vmatpush3.bf16.msra.mxu1 %v6926_v7  ;;  %v7003_v25 = vld [vmem:[%s9656_s1 + $0x668] ss:$12 sps:$4 sm:$0xff]   ;;  %v6979_v7 = vld [vmem:[%s9656_s1 + $0x7f8] ss:$12 sps:$4 sm:$0xff]  }
  0xdd   :  { %3946 = vmatprep.subr.bf16.mxu0 %v6905_v51  ;;  %6060 = vmatprep.subr.bf16.mxu1 %v6930_v49  ;;  %v8446_v51 = vld [vmem:[%s9657_s0 + $0x1d4] ss:$72 sps:$4 sm:$0xff]  }
  0xde   :  { %3911 = vmatprep.mubr.bf16.mxu0 %v8228_v10  ;;  %v6987_v49 = vld [vmem:[%s9656_s1 + $0x814] ss:$12 sps:$4 sm:$0xff]  }
  0xe0   :  { %3947 = vmatpush1.bf16.msra.mxu0 %v6903_v12  ;;  %6061 = vmatpush3.bf16.msra.mxu1 %v6931_v13  ;;  %v7008_v12 = vld [vmem:[%s9656_s1 + $0x680] ss:$12 sps:$4 sm:$0xff]  }
  0xe1   :  { %3948 = vmatprep.subr.bf16.mxu0 %v6912_v5  ;;  %6062 = vmatprep.subr.bf16.mxu1 %v6937_v42  ;;  %v7014_v5 = vld [vmem:[%s9656_s1 + $0x758] ss:$12 sps:$4 sm:$0xff]  }
  0xe2   :  { %4608 = vmatmul.mubr.bf16.gmra.mrb[80].mxu1 %v7941_v44  ;;  %v6921_v44 = vld [vmem:[%s9656_s1 + $0x6f0] ss:$12 sps:$4 sm:$0xff]   ;;  %v6993_v42 = vld [vmem:[%s9656_s1 + $0x82c] ss:$12 sps:$4 sm:$0xff]  }
  0xe3   :  { %3912 = vmatmul.mubr.bf16.gmra.mrb[16].mxu0 %v8252_v15  ;;  %4615 = vmatprep.mubr.bf16.mxu1 %v7952_v54  ;;  %v6950_v54 = vld [vmem:[%s9656_s1 + $0x5d8] ss:$12 sps:$4 sm:$0xff]  }
  0xe4   :  { %3949 = vmatpush1.bf16.msra.mxu0 %v6910_v31  ;;  %6063 = vmatpush3.bf16.msra.mxu1 %v6939_v8  ;;  %v8474_v31 = vld [vmem:[%s9657_s0 + $0x1d0] ss:$72 sps:$4 sm:$0xff]  }
  0xe5   :  { %3950 = vmatprep.subr.bf16.mxu0 %v6917_v3  ;;  %6064 = vmatprep.subr.bf16.mxu1 %v6943_v17  ;;  %v7016_v17 = vld [vmem:[%s9656_s1 + $0x698] ss:$12 sps:$4 sm:$0xff]  }
  0xe6   :  { %3921 = vmatprep.mubr.bf16.mxu0 %v8266_v18 }
  0xe8   :  { %3951 = vmatpush1.bf16.msra.mxu0 %v6915_v21  ;;  %6065 = vmatpush3.bf16.msra.mxu1 %v6944_v23  ;;  %v7020_v21 = vld [vmem:[%s9656_s1 + $0x770] ss:$12 sps:$4 sm:$0xff]   ;;  %v6991_v23 = vld [vmem:[%s9656_s1 + $0x828] ss:$12 sps:$4 sm:$0xff]  }
  0xe9   :  { %3952 = vmatprep.subr.bf16.mxu0 %v6923_v19  ;;  %6066 = vmatprep.subr.bf16.mxu1 %v6950_v54  ;;  %v8492_v19 = vld [vmem:[%s9657_s0 + $0x264] ss:$72 sps:$4 sm:$0xff]   ;;  %v7021_v54 = vld [vmem:[%s9656_s1 + $0x6b0] ss:$12 sps:$4 sm:$0xff]  }
  0xea   :  { %4616 = vmatmul.mubr.bf16.gmra.mrb[84].mxu1 %v7970_v60  ;;  %v6973_v60 = vld [vmem:[%s9656_s1 + $0x6c8] ss:$12 sps:$4 sm:$0xff]  }
  0xeb   :  { %3922 = vmatmul.mubr.bf16.gmra.mrb[20].mxu0 %v8290_v22  ;;  %4623 = vmatprep.mubr.bf16.mxu1 %v7978_v61  ;;  %v6934_v61 = vld [vmem:[%s9656_s1 + $0x720] ss:$12 sps:$4 sm:$0xff]  }
  0xec   :  { %3953 = vmatpush1.bf16.msra.mxu0 %v6921_v44  ;;  %6067 = vmatpush3.bf16.msra.mxu1 %v6952_v14  ;;  %v7000_v44 = vld [vmem:[%s9656_s1 + $0x844] ss:$12 sps:$4 sm:$0xff]  }
  0xed   :  { %3954 = vmatprep.subr.bf16.mxu0 %v6929_v24  ;;  %6068 = vmatprep.subr.bf16.mxu1 %v6956_v20  ;;  %v6998_v20 = vld [vmem:[%s9656_s1 + $0x840] ss:$12 sps:$4 sm:$0xff]  }
  0xee   :  { %3964 = vmatprep.mubr.bf16.mxu0 %v8304_v27 }
  0xf0   :  { %3955 = vmatpush1.bf16.msra.mxu0 %v6927_v28  ;;  %6069 = vmatpush3.bf16.msra.mxu1 %v6957_v35 }
  0xf1   :  { %3956 = vmatprep.subr.bf16.mxu0 %v6936_v32  ;;  %6106 = vmatprep.subr.bf16.mxu1 %v6973_v60  ;;  %v7006_v32 = vld [vmem:[%s9656_s1 + $0x85c] ss:$12 sps:$4 sm:$0xff]  }
  0xf2   :  { %4624 = vmatmul.mubr.bf16.gmra.mrb[88].mxu1 %v7996_v4  ;;  %v6955_v4 = vld [vmem:[%s9656_s1 + $0x76c] ss:$12 sps:$4 sm:$0xff]   ;;  %v8532_v60 = vld [vmem:[%s9657_s0 + $0x2f4] ss:$72 sps:$4 sm:$0xff]  }
  0xf3   :  { %4631 = vmatprep.mubr.bf16.mxu1 %v8010_v9  ;;  %v6953_v9 = vld [vmem:[%s9656_s1 + $0x768] ss:$12 sps:$4 sm:$0xff]  }
  0xf4   :  { %3957 = vmatpush1.bf16.msra.mxu0 %v6934_v61  ;;  %v7004_v61 = vld [vmem:[%s9656_s1 + $0x858] ss:$12 sps:$4 sm:$0xff]  }
  0xf5   :  { %3958 = vmatprep.subr.bf16.mxu0 %v6942_v29  ;;  %v7013_v29 = vld [vmem:[%s9656_s1 + $0x874] ss:$12 sps:$4 sm:$0xff]  }
  0xf8   :  { %3959 = vmatpush1.bf16.msra.mxu0 %v6940_v33 }
  0xf9   :  { %3960 = vmatprep.subr.bf16.mxu0 %v6949_v34 }
  0xfa   :  { %4632 = vmatmul.mubr.bf16.gmra.mrb[92].mxu1 %v8031_v11  ;;  %v6961_v11 = vld [vmem:[%s9656_s1 + $0x780] ss:$12 sps:$4 sm:$0xff]  }
  0xfb   :  { %4672 = vmatprep.mubr.bf16.mxu1 %v8048_v16  ;;  %v6974_v16 = vld [vmem:[%s9656_s1 + $0x608] ss:$12 sps:$4 sm:$0xff]  }
  0xfc   :  { %3961 = vmatpush1.bf16.msra.mxu0 %v6947_v36  ;;  %v8554_v36 = vld [vmem:[%s9657_s0 + $0x2f0] ss:$72 sps:$4 sm:$0xff]  }
  0xfd   :  { %3962 = vmatprep.subr.bf16.mxu0 %v6955_v4  ;;  %v7019_v4 = vld [vmem:[%s9656_s1 + $0x88c] ss:$12 sps:$4 sm:$0xff]  }
 0x100   :  { %3963 = vmatpush1.bf16.msra.mxu0 %v6953_v9 }
 0x101   :  { %4025 = vmatprep.subr.bf16.mxu0 %v6963_v26  ;;  %v8566_v26 = vld [vmem:[%s9657_s0 + $0x2c] ss:$72 sps:$4 sm:$0xff]  }
 0x102   :  { %4673 = vmatmul.mubr.bf16.vlgmr.msra.gmra.mrb[96].mxu1 %v8121_v39  ;;  %v6967_v39 = vld [vmem:[%s9656_s1 + $0x7b0] ss:$12 sps:$4 sm:$0xff]  }
 0x103   :  { %3965 = vmatmul.mubr.bf16.vlgmr.msra.gmra.mrb[0].mxu0 %v8353_v38  ;;  %4680 = vmatprep.mubr.bf16.mxu1 %v8132_v41  ;;  %v6988_v41 = vld [vmem:[%s9656_s1 + $0x6f8] ss:$12 sps:$4 sm:$0xff]  }
 0x104   :  { %4026 = vmatpush1.bf16.msra.mxu0 %v6961_v11  ;;  %6107 = vmatpush3.bf16.msra.mxu1 %v6974_v16  ;;  %v7017_v11 = vld [vmem:[%s9656_s1 + $0x888] ss:$12 sps:$4 sm:$0xff]  }
 0x105   :  { %4027 = vmatprep.subr.bf16.mxu0 %v6966_v43  ;;  %6108 = vmatprep.subr.bf16.mxu1 %v6978_v47  ;;  %v7026_v43 = vld [vmem:[%s9656_s1 + $0x8a4] ss:$12 sps:$4 sm:$0xff]  }
 0x106   :  { %3974 = vmatprep.mubr.bf16.mxu0 %v8370_v40 }
 0x108   :  { %4028 = vmatpush1.bf16.msra.mxu0 %v6964_v45  ;;  %6109 = vmatpush3.bf16.msra.mxu1 %v6982_v48  ;;  %v7041_v48 = vld [vmem:[%s9656_s1 + $0x788] ss:$12 sps:$4 sm:$0xff]  }
 0x109   :  { %4029 = vmatprep.subr.bf16.mxu0 %v6969_v46  ;;  %6110 = vmatprep.subr.bf16.mxu1 %v6988_v41  ;;  %v7028_v41 = vld [vmem:[%s9656_s1 + $0x8b8] ss:$12 sps:$4 sm:$0xff]  }
 0x10a   :  { %4681 = vmatmul.mubr.bf16.gmra.mrb[100].mxu1 %v8147_v57  ;;  %v6975_v57 = vld [vmem:[%s9656_s1 + $0x7e0] ss:$12 sps:$4 sm:$0xff]  }
 0x10b   :  { %3975 = vmatmul.mubr.bf16.gmra.mrb[4].mxu0 %v8397_v50  ;;  %4688 = vmatprep.mubr.bf16.mxu1 %v8158_v37  ;;  %v7001_v37 = vld [vmem:[%s9656_s1 + $0x728] ss:$12 sps:$4 sm:$0xff]  }
 0x10c   :  { %4030 = vmatpush1.bf16.msra.mxu0 %v6967_v39  ;;  %6111 = vmatpush3.bf16.msra.mxu1 %v6990_v52  ;;  %v7048_v39 = vld [vmem:[%s9656_s1 + $0x860] ss:$12 sps:$4 sm:$0xff]  }
 0x10d   :  { %4031 = vmatprep.subr.bf16.mxu0 %v6972_v59  ;;  %6112 = vmatprep.subr.bf16.mxu1 %v6994_v0  ;;  %v7035_v59 = vld [vmem:[%s9656_s1 + $0x8d4] ss:$12 sps:$4 sm:$0xff]  }
 0x10e   :  { %3984 = vmatprep.mubr.bf16.mxu0 %v8408_v55  ;;  %v7052_v52 = vld [vmem:[%s9656_s1 + $0x7a0] ss:$12 sps:$4 sm:$0xff]  }
 0x110   :  { %4032 = vmatpush1.bf16.msra.mxu0 %v6970_v2  ;;  %6113 = vmatpush3.bf16.msra.mxu1 %v6995_v63 }
 0x111   :  { %4033 = vmatprep.subr.bf16.mxu0 %v6977_v53  ;;  %6114 = vmatprep.subr.bf16.mxu1 %v7001_v37  ;;  %v7039_v53 = vld [vmem:[%s9656_s1 + $0x8ec] ss:$12 sps:$4 sm:$0xff]  }
 0x112   :  { %4689 = vmatmul.mubr.bf16.gmra.mrb[104].mxu1 %v8179_v58  ;;  %v7057_v37 = vld [vmem:[%s9656_s1 + $0x7b8] ss:$12 sps:$4 sm:$0xff]  }
 0x113   :  { %3985 = vmatmul.mubr.bf16.gmra.mrb[8].mxu0 %v8435_v62  ;;  %4696 = vmatprep.mubr.bf16.mxu1 %v8190_v56  ;;  %v6985_v56 = vld [vmem:[%s9656_s1 + $0x810] ss:$12 sps:$4 sm:$0xff]  }
 0x114   :  { %4034 = vmatpush1.bf16.msra.mxu0 %v6975_v57  ;;  %6115 = vmatpush3.bf16.msra.mxu1 %v7003_v25  ;;  %v7037_v25 = vld [vmem:[%s9656_s1 + $0x8e8] ss:$12 sps:$4 sm:$0xff]  }
 0x115   :  { %4035 = vmatprep.subr.bf16.mxu0 %v6981_v1  ;;  %v8460_v58 = vpop.f32.mrb[0].mxu1  ;;  %6116 = vmatprep.subr.bf16.mxu1 %v7007_v30  ;;  %v7061_v1 = vld [vmem:[%s9656_s1 + $0x890] ss:$12 sps:$4 sm:$0xff]  }
 0x116   :  { %3994 = vmatprep.mubr.bf16.mxu0 %v8446_v51  ;;  %v8469_v13 = vpop.f32.mrb[1].mxu1  ;;  %v7047_v30 = vld [vmem:[%s9656_s1 + $0x904] ss:$12 sps:$4 sm:$0xff]  }
 0x117   :  { %v8479_v3 = vpop.f32.mrb[2].mxu1 }
 0x118   :  { %4036 = vmatpush1.bf16.msra.mxu0 %v6979_v7  ;;  %v8481_v8 = vpop.f32.mrb[3].mxu1  ;;  %6117 = vmatpush3.bf16.msra.mxu1 %v7008_v12  ;;  %v7062_v7 = vld [vmem:[%s9656_s1 + $0x7d0] ss:$12 sps:$4 sm:$0xff]  }
 0x119   :  { %4037 = vmatprep.subr.bf16.mxu0 %v6987_v49  ;;  %6118 = vmatprep.subr.bf16.mxu1 %v7014_v5  ;;  %v7045_v5 = vld [vmem:[%s9656_s1 + $0x900] ss:$12 sps:$4 sm:$0xff]  }
 0x11a   :  { %4697 = vmatmul.mubr.bf16.gmra.mrb[108].mxu1 %v8217_v6  ;;  %v8509_v6 = vld [vmem:[%s9657_s0 + $0x260] ss:$72 sps:$4 sm:$0xff]  }
 0x11b   :  { %3995 = vmatmul.mubr.bf16.gmra.mrb[12].mxu0 %v8474_v31  ;;  %4704 = vmatprep.mubr.bf16.mxu1 %v8228_v10  ;;  %v7040_v10 = vld [vmem:[%s9656_s1 + $0x848] ss:$12 sps:$4 sm:$0xff]  }
 0x11c   :  { %4038 = vmatpush1.bf16.msra.mxu0 %v6985_v56  ;;  %6119 = vmatpush3.bf16.msra.mxu1 %v7016_v17 }
 0x11d   :  { %4039 = vmatprep.subr.bf16.mxu0 %v6993_v42  ;;  %v8511_v24 = vpop.f32.mrb[4].mxu1  ;;  %6120 = vmatprep.subr.bf16.mxu1 %v7020_v21  ;;  %v7051_v42 = vld [vmem:[%s9656_s1 + $0x91c] ss:$12 sps:$4 sm:$0xff]  }
 0x11e   :  { %4004 = vmatprep.mubr.bf16.mxu0 %v8492_v19  ;;  %v8517_v14 = vpop.f32.mrb[5].mxu1  ;;  %v7067_v21 = vld [vmem:[%s9656_s1 + $0x7e8] ss:$12 sps:$4 sm:$0xff]  }
 0x11f   :  { %v8522_v28 = vpop.f32.mrb[6].mxu1 }
 0x120   :  { %4040 = vmatpush1.bf16.msra.mxu0 %v6991_v23  ;;  %v8527_v35 = vpop.f32.mrb[7].mxu1  ;;  %6121 = vmatpush3.bf16.msra.mxu1 %v7021_v54  ;;  %v7071_v23 = vld [vmem:[%s9656_s1 + $0x8c0] ss:$12 sps:$4 sm:$0xff]   ;;  %v7049_v54 = vld [vmem:[%s9656_s1 + $0x918] ss:$12 sps:$4 sm:$0xff]  }
 0x121   :  { %4041 = vmatprep.subr.bf16.mxu0 %v7000_v44  ;;  %6158 = vmatprep.subr.bf16.mxu1 %v7040_v10  ;;  %v8674_v44 = vld [vmem:[%s9657_s0 + $0xbc] ss:$72 sps:$4 sm:$0xff]   ;;  %v7055_v10 = vld [vmem:[%s9656_s1 + $0x934] ss:$12 sps:$4 sm:$0xff]  }
 0x122   :  { %4705 = vmatmul.mubr.bf16.gmra.mrb[112].mxu1 %v8252_v15  ;;  %v7011_v15 = vld [vmem:[%s9656_s1 + $0x870] ss:$12 sps:$4 sm:$0xff]  }
 0x123   :  { %4005 = vmatmul.mubr.bf16.gmra.mrb[16].mxu0 %v8509_v6  ;;  %4712 = vmatprep.mubr.bf16.mxu1 %v8266_v18 }
 0x124   :  { %4042 = vmatpush1.bf16.msra.mxu0 %v6998_v20  ;;  %4014 = vmatprep.mubr.bf16.mxu0 %v8532_v60  ;;  %v7072_v20 = vld [vmem:[%s9656_s1 + $0x800] ss:$12 sps:$4 sm:$0xff]  }
 0x125   :  { %4043 = vmatprep.subr.bf16.mxu0 %v7006_v32  ;;  %v8544_v33 = vpop.f32.mrb[8].mxu1 }
 0x126   :  { %v8549_v34 = vpop.f32.mrb[9].mxu1 }
 0x127   :  { %v8556_v18 = vpop.f32.mrb[10].mxu1 }
 0x128   :  { %4044 = vmatpush1.bf16.msra.mxu0 %v7004_v61  ;;  %v8561_v9 = vpop.f32.mrb[11].mxu1  ;;  %v7060_v61 = vld [vmem:[%s9656_s1 + $0x94c] ss:$12 sps:$4 sm:$0xff]  }
 0x129   :  { %4045 = vmatprep.subr.bf16.mxu0 %v7013_v29 }
 0x12a   :  { %4713 = vmatmul.mubr.bf16.gmra.mrb[116].mxu1 %v8290_v22  ;;  %v7024_v22 = vld [vmem:[%s9656_s1 + $0x8a0] ss:$12 sps:$4 sm:$0xff]  }
 0x12b   :  { %4015 = vmatmul.mubr.bf16.gmra.mrb[20].mxu0 %v8554_v36  ;;  %4753 = vmatprep.mubr.bf16.mxu1 %v8304_v27  ;;  %v7030_v27 = vld [vmem:[%s9656_s1 + $0x8bc] ss:$12 sps:$4 sm:$0xff]  }
 0x12c   :  { %4046 = vmatpush1.bf16.msra.mxu0 %v7011_v15  ;;  %4057 = vmatprep.mubr.bf16.mxu0 %v8566_v26  ;;  %v8701_v15 = vld [vmem:[%s9657_s0 + $0xb8] ss:$72 sps:$4 sm:$0xff]  }
 0x12d   :  { %4047 = vmatprep.subr.bf16.mxu0 %v7019_v4  ;;  %v8578_v16 = vpop.f32.mrb[12].mxu1 }
 0x12e   :  { %v8583_v47 = vpop.f32.mrb[13].mxu1 }
 0x12f   :  { %v8588_v45 = vpop.f32.mrb[14].mxu1 }
 0x130   :  { %4048 = vmatpush1.bf16.msra.mxu0 %v7017_v11  ;;  %v8590_v46 = vpop.f32.mrb[15].mxu1 }
 0x131   :  { %4049 = vmatprep.subr.bf16.mxu0 %v7026_v43 }
 0x132   :  { %4754 = vmatmul.mubr.bf16.vlgmr.msra.gmra.mrb[120].mxu1 %v8353_v38  ;;  %v7033_v38 = vld [vmem:[%s9656_s1 + $0x8d0] ss:$12 sps:$4 sm:$0xff]  }
 0x133   :  { %4761 = vmatprep.mubr.bf16.mxu1 %v8370_v40  ;;  %6159 = vmatpush3.bf16.msra.mxu1 %v7041_v48  ;;  %v7056_v40 = vld [vmem:[%s9656_s1 + $0x878] ss:$12 sps:$4 sm:$0xff]  }
 0x134   :  { %4050 = vmatpush1.bf16.msra.mxu0 %v7024_v22  ;;  %6160 = vmatprep.subr.bf16.mxu1 %v7048_v39  ;;  %v7080_v22 = vld [vmem:[%s9656_s1 + $0x818] ss:$12 sps:$4 sm:$0xff]   ;;  %v8716_v39 = vld [vmem:[%s9657_s0 + $0x14c] ss:$72 sps:$4 sm:$0xff]  }
 0x135   :  { %4051 = vmatprep.subr.bf16.mxu0 %v7030_v27  ;;  %v8612_v0 = vpop.f32.mrb[16].mxu1  ;;  %v7084_v27 = vld [vmem:[%s9656_s1 + $0x8f0] ss:$12 sps:$4 sm:$0xff]  }
 0x136   :  { %v8617_v2 = vpop.f32.mrb[17].mxu1 }
 0x137   :  { %v8622_v63 = vpop.f32.mrb[18].mxu1  ;;  %6161 = vmatpush3.bf16.msra.mxu1 %v7052_v52  ;;  %v7085_v52 = vld [vmem:[%s9656_s1 + $0x830] ss:$12 sps:$4 sm:$0xff]  }
 0x138   :  { %4052 = vmatpush1.bf16.msra.mxu0 %v7028_v41  ;;  %v8624_v57 = vpop.f32.mrb[19].mxu1  ;;  %6162 = vmatprep.subr.bf16.mxu1 %v7056_v40  ;;  %v7058_v41 = vld [vmem:[%s9656_s1 + $0x948] ss:$12 sps:$4 sm:$0xff]  }
 0x139   :  { %4053 = vmatprep.subr.bf16.mxu0 %v7035_v59  ;;  %v7065_v59 = vld [vmem:[%s9656_s1 + $0x964] ss:$12 sps:$4 sm:$0xff]  }
 0x13a   :  { %4762 = vmatmul.mubr.bf16.gmra.mrb[124].mxu1 %v8397_v50  ;;  %v7066_v50 = vld [vmem:[%s9656_s1 + $0x8a8] ss:$12 sps:$4 sm:$0xff]  }
 0x13b   :  { %4769 = vmatprep.mubr.bf16.mxu1 %v8408_v55  ;;  %6163 = vmatpush3.bf16.msra.mxu1 %v7057_v37  ;;  %v8651_v55 = vld [vmem:[%s9657_s0 + $0x28] ss:$72 sps:$4 sm:$0xff]  }
 0x13c   :  { %4054 = vmatpush1.bf16.msra.mxu0 %v7033_v38  ;;  %6164 = vmatprep.subr.bf16.mxu1 %v7061_v1  ;;  %v7070_v37 = vld [vmem:[%s9656_s1 + $0x97c] ss:$12 sps:$4 sm:$0xff]  }
 0x13d   :  { %4055 = vmatprep.subr.bf16.mxu0 %v7039_v53  ;;  %v8643_v49 = vpop.f32.mrb[20].mxu1  ;;  %v7063_v53 = vld [vmem:[%s9656_s1 + $0x960] ss:$12 sps:$4 sm:$0xff]  }
 0x13e   :  { %v8653_v12 = vpop.f32.mrb[21].mxu1 }
 0x13f   :  { %v8658_v56 = vpop.f32.mrb[22].mxu1  ;;  %6165 = vmatpush3.bf16.msra.mxu1 %v7062_v7  ;;  %v8750_v7 = vld [vmem:[%s9657_s0 + $0x1dc] ss:$72 sps:$4 sm:$0xff]  }
 0x140   :  { %4056 = vmatpush1.bf16.msra.mxu0 %v7037_v25  ;;  %v8663_v17 = vpop.f32.mrb[23].mxu1  ;;  %6166 = vmatprep.subr.bf16.mxu1 %v7066_v50 }
 0x141   :  { %4118 = vmatprep.subr.bf16.mxu0 %v7047_v30 }
 0x142   :  { %4770 = vmatmul.mubr.bf16.gmra.mrb[128].mxu1 %v8435_v62  ;;  %v7053_v62 = vld [vmem:[%s9656_s1 + $0x930] ss:$12 sps:$4 sm:$0xff]  }
 0x143   :  { %4058 = vmatmul.mubr.bf16.vlgmr.msra.gmra.mrb[0].mxu0 %v8651_v55  ;;  %4777 = vmatprep.mubr.bf16.mxu1 %v8446_v51  ;;  %v7078_v51 = vld [vmem:[%s9656_s1 + $0x8d8] ss:$12 sps:$4 sm:$0xff]  }
 0x144   :  { %4119 = vmatpush1.bf16.msra.mxu0 %v7045_v5  ;;  %6167 = vmatpush3.bf16.msra.mxu1 %v7067_v21  ;;  %v7068_v5 = vld [vmem:[%s9656_s1 + $0x978] ss:$12 sps:$4 sm:$0xff]  }
 0x145   :  { %4120 = vmatprep.subr.bf16.mxu0 %v7051_v42  ;;  %v5914_v32 = vpop.f32.mrb[24].mxu1  ;;  %6168 = vmatprep.subr.bf16.mxu1 %v7071_v23  ;;  %v7077_v42 = vld [vmem:[%s9656_s1 + $0x994] ss:$12 sps:$4 sm:$0xff]  }
 0x146   :  { %4067 = vmatprep.mubr.bf16.mxu0 %v8674_v44  ;;  %v5915_v29 = vpop.f32.mrb[25].mxu1 }
 0x147   :  { %v8703_v4 = vadd.f32 %v5915_v29, %v5914_v32  ;;  %v5917_v11 = vpop.f32.mrb[26].mxu1  ;;  %v8780_v32 = vld [vmem:[%s9657_s0 + $0x26c] ss:$72 sps:$4 sm:$0xff]   ;;  %v7090_v29 = vld [vmem:[%s9656_s1 + $0x9c4] ss:$12 sps:$4 sm:$0xff]  }
 0x148   :  { %4121 = vmatpush1.bf16.msra.mxu0 %v7049_v54  ;;  %v5918_v43 = vpop.f32.mrb[27].mxu1  ;;  %6169 = vmatpush3.bf16.msra.mxu1 %v7072_v20  ;;  %v7075_v54 = vld [vmem:[%s9656_s1 + $0x990] ss:$12 sps:$4 sm:$0xff]  }
 0x149   :  { %4122 = vmatprep.subr.bf16.mxu0 %v7055_v10  ;;  %v8711_v48 = vadd.f32 %v5918_v43, %v5917_v11  ;;  %6170 = vmatprep.subr.bf16.mxu1 %v7078_v51  ;;  %v8800_v43 = vld [vmem:[%s9657_s0 + $0x268] ss:$72 sps:$4 sm:$0xff]  }
 0x14a   :  { %4778 = vmatmul.mubr.bf16.gmra.mrb[132].mxu1 %v8474_v31  ;;  %v8733_v31 = vld [vmem:[%s9657_s0 + $0x148] ss:$72 sps:$4 sm:$0xff]  }
 0x14b   :  { %4068 = vmatmul.mubr.bf16.gmra.mrb[4].mxu0 %v8701_v15  ;;  %4785 = vmatprep.mubr.bf16.mxu1 %v8492_v19  ;;  %v7104_v19 = vld [vmem:[%s9656_s1 + $0x9c8] ss:$12 sps:$4 sm:$0xff]  }
 0x14c   :  { %4123 = vmatpush1.bf16.msra.mxu0 %v7053_v62  ;;  %6171 = vmatpush3.bf16.msra.mxu1 %v7080_v22 }
 0x14d   :  { %4124 = vmatprep.subr.bf16.mxu0 %v7060_v61  ;;  %v5920_v38 = vpop.f32.mrb[28].mxu1  ;;  %6172 = vmatprep.subr.bf16.mxu1 %v7084_v27  ;;  %v7081_v61 = vld [vmem:[%s9656_s1 + $0x9a8] ss:$12 sps:$4 sm:$0xff]  }
 0x14e   :  { %4077 = vmatprep.mubr.bf16.mxu0 %v8716_v39  ;;  %v5921_v40 = vpop.f32.mrb[29].mxu1 }
 0x14f   :  { %v8745_v1 = vadd.f32 %v5921_v40, %v5920_v38  ;;  %v5923_v25 = vpop.f32.mrb[30].mxu1  ;;  %v7112_v38 = vld [vmem:[%s9656_s1 + $0x9e0] ss:$12 sps:$4 sm:$0xff]   ;;  %v8818_v40 = vld [vmem:[%s9657_s0 + $0x2fc] ss:$72 sps:$4 sm:$0xff]  }
 0x150   :  { %4125 = vmatpush1.bf16.msra.mxu0 %v7058_v41  ;;  %v5924_v30 = vpop.f32.mrb[31].mxu1  ;;  %6173 = vmatpush3.bf16.msra.mxu1 %v7085_v52 }
 0x151   :  { %4126 = vmatprep.subr.bf16.mxu0 %v7065_v59  ;;  %v8752_v50 = vadd.f32 %v5924_v30, %v5923_v25  ;;  %6210 = vmatprep.subr.bf16.mxu1 %v7104_v19  ;;  %v7105_v59 = vld [vmem:[%s9656_s1 + $0x908] ss:$12 sps:$4 sm:$0xff]   ;;  %v7116_v25 = vld [vmem:[%s9656_s1 + $0x920] ss:$12 sps:$4 sm:$0xff]   ;;  %v7122_v30 = vld [vmem:[%s9656_s1 + $0x9f8] ss:$12 sps:$4 sm:$0xff]  }
 0x152   :  { %4786 = vmatmul.mubr.bf16.gmra.mrb[136].mxu1 %v8509_v6  ;;  %v8767_v6 = vld [vmem:[%s9657_s0 + $0x1d8] ss:$72 sps:$4 sm:$0xff]  }
 0x153   :  { %4078 = vmatmul.mubr.bf16.gmra.mrb[8].mxu0 %v8733_v31  ;;  %4793 = vmatprep.mubr.bf16.mxu1 %v8532_v60  ;;  %v7083_v60 = vld [vmem:[%s9656_s1 + $0x9ac] ss:$12 sps:$4 sm:$0xff]  }
 0x154   :  { %4127 = vmatpush1.bf16.msra.mxu0 %v7063_v53  ;;  %4087 = vmatprep.mubr.bf16.mxu0 %v8750_v7  ;;  %v7092_v53 = vld [vmem:[%s9656_s1 + $0x9d8] ss:$12 sps:$4 sm:$0xff]  }
 0x155   :  { %4128 = vmatprep.subr.bf16.mxu0 %v7070_v37  ;;  %v5926_v21 = vpop.f32.mrb[32].mxu1  ;;  %v7099_v37 = vld [vmem:[%s9656_s1 + $0x9f4] ss:$12 sps:$4 sm:$0xff]  }
 0x156   :  { %v5927_v23 = vpop.f32.mrb[33].mxu1 }
 0x157   :  { %v8775_v10 = vadd.f32 %v5927_v23, %v5926_v21  ;;  %v5929_v20 = vpop.f32.mrb[34].mxu1 }
 0x158   :  { %4129 = vmatpush1.bf16.msra.mxu0 %v7068_v5  ;;  %v5930_v62 = vpop.f32.mrb[35].mxu1 }
 0x159   :  { %4130 = vmatprep.subr.bf16.mxu0 %v7077_v42  ;;  %v8782_v51 = vadd.f32 %v5930_v62, %v5929_v20  ;;  %v7097_v42 = vld [vmem:[%s9656_s1 + $0x9f0] ss:$12 sps:$4 sm:$0xff]   ;;  %v7124_v62 = vld [vmem:[%s9656_s1 + $0x938] ss:$12 sps:$4 sm:$0xff]  }
 0x15a   :  { %4794 = vmatmul.mubr.bf16.gmra.mrb[140].mxu1 %v8554_v36  ;;  %v7088_v36 = vld [vmem:[%s9656_s1 + $0x9c0] ss:$12 sps:$4 sm:$0xff]  }
 0x15b   :  { %4088 = vmatmul.mubr.bf16.gmra.mrb[12].mxu0 %v8767_v6  ;;  %4834 = vmatprep.mubr.bf16.mxu1 %v8566_v26  ;;  %v7094_v26 = vld [vmem:[%s9656_s1 + $0x9dc] ss:$12 sps:$4 sm:$0xff]  }
 0x15c   :  { %4131 = vmatpush1.bf16.msra.mxu0 %v7075_v54  ;;  %4097 = vmatprep.mubr.bf16.mxu0 %v8780_v32  ;;  %v701_v54 = vlaneseq }
 0x15d   :  { %4132 = vmatprep.subr.bf16.mxu0 %v7083_v60  ;;  %v5932_v11 = vpop.f32.mrb[36].mxu1  ;;  %v7103_v60 = vld [vmem:[%s9656_s1 + $0xa0c] ss:$12 sps:$4 sm:$0xff]  }
 0x15e   :  { %v5933_v22 = vpop.f32.mrb[37].mxu1 }
 0x15f   :  { %v8805_v27 = vadd.f32 %v5933_v22, %v5932_v11  ;;  %v5935_v41 = vpop.f32.mrb[38].mxu1  ;;  %v7101_v11 = vld [vmem:[%s9656_s1 + $0xa08] ss:$12 sps:$4 sm:$0xff]   ;;  %v7110_v22 = vld [vmem:[%s9656_s1 + $0xa24] ss:$12 sps:$4 sm:$0xff]  }
 0x160   :  { %4133 = vmatpush1.bf16.msra.mxu0 %v7081_v61  ;;  %v5936_v52 = vpop.f32.mrb[39].mxu1 }
 0x161   :  { %4134 = vmatprep.subr.bf16.mxu0 %v7090_v29  ;;  %v8813_v19 = vadd.f32 %v5936_v52, %v5935_v41  ;;  %v7128_v29 = vld [vmem:[%s9656_s1 + $0xa10] ss:$12 sps:$4 sm:$0xff]   ;;  %v7108_v52 = vld [vmem:[%s9656_s1 + $0xa20] ss:$12 sps:$4 sm:$0xff]  }
 0x162   :  { %4835 = vmatmul.mubr.bf16.vlgmr.msra.gmra.mrb[144].mxu1 %v8651_v55 }
 0x163   :  { %4098 = vmatmul.mubr.bf16.gmra.mrb[16].mxu0 %v8800_v43  ;;  %4842 = vmatprep.mubr.bf16.mxu1 %v8674_v44  ;;  %v8839_v44 = vld [vmem:[%s9657_s0 + $0x2f8] ss:$72 sps:$4 sm:$0xff]  }
 0x164   :  { %4135 = vmatpush1.bf16.msra.mxu0 %v7088_v36  ;;  %6211 = vmatpush3.bf16.msra.mxu1 %v7105_v59  ;;  %v8860_v36 = vld [vmem:[%s9657_s0 + $0x34] ss:$72 sps:$4 sm:$0xff]  }
 0x165   :  { %4136 = vmatprep.subr.bf16.mxu0 %v7094_v26  ;;  %v5938_v55 = vpop.f32.mrb[40].mxu1  ;;  %6212 = vmatprep.subr.bf16.mxu1 %v7112_v38  ;;  %v8871_v26 = vshrl.u32 %v701_v54, 7 }
 0x166   :  { %4107 = vmatprep.mubr.bf16.mxu0 %v8818_v40  ;;  %v5939_v5 = vpop.f32.mrb[41].mxu1 }
 0x167   :  { %v8844_v21 = vadd.f32 %v5939_v5, %v5938_v55  ;;  %v5941_v23 = vpop.f32.mrb[42].mxu1  ;;  %v711_v59 = vsub.s32 2, %v8871_v26  ;;  %v7115_v55 = vld [vmem:[%s9656_s1 + $0xa3c] ss:$12 sps:$4 sm:$0xff]  }
 0x168   :  { %4137 = vmatpush1.bf16.msra.mxu0 %v7092_v53  ;;  %v5942_v20 = vpop.f32.mrb[43].mxu1  ;;  %6213 = vmatpush3.bf16.msra.mxu1 %v7116_v25 }
 0x169   :  { %4138 = vmatprep.subr.bf16.mxu0 %v7099_v37  ;;  %v8852_v61 = vadd.f32 %v5942_v20, %v5941_v23  ;;  %6214 = vmatprep.subr.bf16.mxu1 %v7122_v30  ;;  %v7137_v30 = vld [vmem:[%s9656_s1 + $0x968] ss:$12 sps:$4 sm:$0xff]   ;;  %v699_v23 = vld [vmem:[%s9658_s2] sm:$0x7] }
 0x16a   :  { %4843 = vmatmul.mubr.bf16.gmra.mrb[148].mxu1 %v8701_v15  ;;  %v7129_v15 = vld [vmem:[%s9656_s1 + $0x950] ss:$12 sps:$4 sm:$0xff]   ;;  %v8901_v54 = vrot.slane %v699_v23, %v711_v59  ;;  %v7121_v20 = vld [vmem:[%s9656_s1 + $0xa54] ss:$12 sps:$4 sm:$0xff]  }
 0x16b   :  { %4108 = vmatmul.mubr.bf16.gmra.mrb[20].mxu0 %v8839_v44  ;;  %4850 = vmatprep.mubr.bf16.mxu1 %v8716_v39  ;;  %v7136_v39 = vld [vmem:[%s9656_s1 + $0xa28] ss:$12 sps:$4 sm:$0xff]  }
 0x16c   :  { %4139 = vmatpush1.bf16.msra.mxu0 %v7097_v42  ;;  %6215 = vmatpush3.bf16.msra.mxu1 %v7124_v62  ;;  %v7141_v42 = vld [vmem:[%s9656_s1 + $0xa40] ss:$12 sps:$4 sm:$0xff]  }
 0x16d   :  { %4140 = vmatprep.subr.bf16.mxu0 %v7103_v60  ;;  %v5944_v41 = vpop.f32.mrb[44].mxu1  ;;  %6216 = vmatprep.subr.bf16.mxu1 %v7128_v29  ;;  %v7113_v60 = vld [vmem:[%s9656_s1 + $0xa38] ss:$12 sps:$4 sm:$0xff]   ;;  %v7142_v62 = vld [vmem:[%s9656_s1 + $0x980] ss:$12 sps:$4 sm:$0xff]  }
 0x16e   :  { %4150 = vmatprep.mubr.bf16.mxu0 %v8860_v36  ;;  %v5945_v38 = vpop.f32.mrb[45].mxu1  ;;  %v7146_v29 = vld [vmem:[%s9656_s1 + $0xa58] ss:$12 sps:$4 sm:$0xff]  }
 0x16f   :  { %v8884_v53 = vadd.f32 %v5945_v38, %v5944_v41  ;;  %v5947_v37 = vpop.f32.mrb[46].mxu1  ;;  %v7119_v41 = vld [vmem:[%s9656_s1 + $0xa50] ss:$12 sps:$4 sm:$0xff]  }
 0x170   :  { %4141 = vmatpush1.bf16.msra.mxu0 %v7101_v11  ;;  %v5948_v25 = vpop.f32.mrb[47].mxu1  ;;  %6217 = vmatpush3.bf16.msra.mxu1 %v7129_v15 }
 0x171   :  { %4142 = vmatprep.subr.bf16.mxu0 %v7110_v22  ;;  %v8892_v5 = vadd.f32 %v5948_v25, %v5947_v37  ;;  %6218 = vmatprep.subr.bf16.mxu1 %v7136_v39  ;;  %v7127_v39 = vld [vmem:[%s9656_s1 + $0xa6c] ss:$12 sps:$4 sm:$0xff]   ;;  %v7151_v25 = vld [vmem:[%s9656_s1 + $0xa70] ss:$12 sps:$4 sm:$0xff]  }
 0x172   :  { %4851 = vmatmul.mubr.bf16.gmra.mrb[152].mxu1 %v8733_v31 }
 0x173   :  { %4858 = vmatprep.mubr.bf16.mxu1 %v8750_v7  ;;  %v4432_v7 = vadd.f32 %v8703_v4, %v8901_v54  ;;  %v4435_v4 = vadd.f32 %v8711_v48, %v8901_v54  ;;  %v8944_v48 = vld [vmem:[%s9657_s0 + $0x30] ss:$72 sps:$4 sm:$0xff]  }
 0x174   :  { %4143 = vmatpush1.bf16.msra.mxu0 %v7108_v52  ;;  %6219 = vmatpush3.bf16.msra.mxu1 %v7137_v30  ;;  %v7147_v52 = vld [vmem:[%s9656_s1 + $0x998] ss:$12 sps:$4 sm:$0xff]   ;;  %v7125_v30 = vld [vmem:[%s9656_s1 + $0xa68] ss:$12 sps:$4 sm:$0xff]  }
 0x175   :  { %4144 = vmatprep.subr.bf16.mxu0 %v7115_v55  ;;  %v5966_v31 = vpop.f32.mrb[48].mxu1  ;;  %6220 = vmatprep.subr.bf16.mxu1 %v7141_v42  ;;  %v7135_v42 = vld [vmem:[%s9656_s1 + $0xa84] ss:$12 sps:$4 sm:$0xff]  }
 0x176   :  { %v5967_v11 = vpop.f32.mrb[49].mxu1 }
 0x177   :  { %v5968_v22 = vadd.f32 %v5967_v11, %v5966_v31  ;;  %v5969_v15 = vpop.f32.mrb[50].mxu1  ;;  %v7140_v11 = vld [vmem:[%s9656_s1 + $0xa9c] ss:$12 sps:$4 sm:$0xff]  }
 0x178   :  { %4145 = vmatpush1.bf16.msra.mxu0 %v7113_v60  ;;  %v5970_v59 = vpop.f32.mrb[51].mxu1  ;;  %6221 = vmatpush3.bf16.msra.mxu1 %v7142_v62 }
 0x179   :  { %4146 = vmatprep.subr.bf16.mxu0 %v7121_v20  ;;  %v8929_v38 = vadd.f32 %v5968_v22, %v4432_v7  ;;  %v5971_v37 = vadd.f32 %v5970_v59, %v5969_v15  ;;  %6222 = vmatprep.subr.bf16.mxu1 %v7146_v29  ;;  %v4440_v20 = vadd.f32 %v8745_v1, %v8901_v54  ;;  %v7133_v29 = vld [vmem:[%s9656_s1 + $0xa80] ss:$12 sps:$4 sm:$0xff]   ;;  %v7138_v59 = vld [vmem:[%s9656_s1 + $0xa98] ss:$12 sps:$4 sm:$0xff]  }
 0x17a   :  { %4859 = vmatmul.mubr.bf16.gmra.mrb[156].mxu1 %v8767_v6  ;;  %v7152_v6 = vld [vmem:[%s9656_s1 + $0x9b0] ss:$12 sps:$4 sm:$0xff]   ;;  %v7159_v22 = vld [vmem:[%s9657_s0 + $0xc4] ss:$72 sps:$4 sm:$0xff]   ;;  %v4443_v1 = vadd.f32 %v8752_v50, %v8901_v54  ;;  %v7145_v50 = vld [vmem:[%s9656_s1 + $0xab4] ss:$12 sps:$4 sm:$0xff]  }
 0x17b   :  { %v8935_v55 = vadd.f32 %v5971_v37, %v4435_v4  ;;  %4866 = vmatprep.mubr.bf16.mxu1 %v8780_v32  ;;  %v7168_v32 = vld [vmem:[%s9656_s1 + $0xb48] ss:$12 sps:$4 sm:$0xff]   ;;  %v4448_v37 = vadd.f32 %v8775_v10, %v8901_v54  ;;  %v4451_v10 = vadd.f32 %v8782_v51, %v8901_v54  ;;  %v7155_v51 = vld [vmem:[%s9656_s1 + $0xae4] ss:$12 sps:$4 sm:$0xff]  }
 0x17c   :  { %4147 = vmatpush1.bf16.msra.mxu0 %v7119_v41  ;;  %6223 = vmatpush3.bf16.msra.mxu1 %v7147_v52 }
 0x17d   :  { %4148 = vmatprep.subr.bf16.mxu0 %v7127_v39  ;;  %v5972_v23 = vpop.f32.mrb[52].mxu1  ;;  %6224 = vmatprep.subr.bf16.mxu1 %v7151_v25 }
 0x17e   :  { %v5973_v60 = vpop.f32.mrb[53].mxu1 }
 0x17f   :  { %v5974_v62 = vadd.f32 %v5973_v60, %v5972_v23  ;;  %v5975_v31 = vpop.f32.mrb[54].mxu1  ;;  %v8997_v23 = vld [vmem:[%s9657_s0 + $0x154] ss:$72 sps:$4 sm:$0xff]  }
 0x180   :  { %4149 = vmatpush1.bf16.msra.mxu0 %v7125_v30  ;;  %v5976_v7 = vpop.f32.mrb[55].mxu1  ;;  %6225 = vmatpush3.bf16.msra.mxu1 %v7152_v6 }
 0x181   :  { %4211 = vmatprep.subr.bf16.mxu0 %v7135_v42  ;;  %v8968_v15 = vadd.f32 %v5974_v62, %v4440_v20  ;;  %v5977_v41 = vadd.f32 %v5976_v7, %v5975_v31  ;;  %6262 = vmatprep.subr.bf16.mxu1 %v7168_v32  ;;  %v7150_v42 = vld [vmem:[%s9656_s1 + $0xacc] ss:$12 sps:$4 sm:$0xff]   ;;  %v7148_v62 = vld [vmem:[%s9656_s1 + $0xac8] ss:$12 sps:$4 sm:$0xff]  }
 0x182   :  { %4867 = vmatmul.mubr.bf16.gmra.mrb[160].mxu1 %v8800_v43  ;;  %v8984_v43 = vld [vmem:[%s9657_s0 + $0xc0] ss:$72 sps:$4 sm:$0xff]  }
 0x183   :  { %4151 = vmatmul.mubr.bf16.vlgmr.msra.gmra.mrb[0].mxu0 %v8944_v48  ;;  %v8972_v39 = vadd.f32 %v5977_v41, %v4443_v1  ;;  %4874 = vmatprep.mubr.bf16.mxu1 %v8818_v40  ;;  %v7143_v40 = vld [vmem:[%s9656_s1 + $0xab0] ss:$12 sps:$4 sm:$0xff]   ;;  %v7153_v1 = vld [vmem:[%s9656_s1 + $0xae0] ss:$12 sps:$4 sm:$0xff]  }
 0x184   :  { %4212 = vmatpush1.bf16.msra.mxu0 %v7133_v29  ;;  %4160 = vmatprep.mubr.bf16.mxu0 %v7159_v22  ;;  %v9018_v29 = vld [vmem:[%s9657_s0 + $0x150] ss:$72 sps:$4 sm:$0xff]  }
 0x185   :  { %4213 = vmatprep.subr.bf16.mxu0 %v7140_v11  ;;  %v5978_v52 = vpop.f32.mrb[56].mxu1  ;;  %v4456_v11 = vadd.f32 %v8805_v27, %v8901_v54  ;;  %v4459_v27 = vadd.f32 %v8813_v19, %v8901_v54  ;;  %v7156_v19 = vld [vmem:[%s9656_s1 + $0xaf8] ss:$12 sps:$4 sm:$0xff]  }
 0x186   :  { %v5979_v4 = vpop.f32.mrb[57].mxu1 }
 0x187   :  { %v5980_v25 = vadd.f32 %v5979_v4, %v5978_v52  ;;  %v5981_v30 = vpop.f32.mrb[58].mxu1 }
 0x188   :  { %4214 = vmatpush1.bf16.msra.mxu0 %v7138_v59  ;;  %v5982_v6 = vpop.f32.mrb[59].mxu1  ;;  %v7158_v59 = vld [vmem:[%s9656_s1 + $0xafc] ss:$12 sps:$4 sm:$0xff]  }
 0x189   :  { %4215 = vmatprep.subr.bf16.mxu0 %v7145_v50  ;;  %v9001_v32 = vadd.f32 %v5980_v25, %v4448_v37  ;;  %v5983_v60 = vadd.f32 %v5982_v6, %v5981_v30  ;;  %v7169_v50 = vld [vmem:[%s9656_s1 + $0xa88] ss:$12 sps:$4 sm:$0xff]   ;;  %v7176_v37 = vld [vmem:[%s9656_s1 + $0xb60] ss:$12 sps:$4 sm:$0xff]   ;;  %v7187_v6 = vld [vmem:[%s9656_s1 + $0xb78] ss:$12 sps:$4 sm:$0xff]  }
 0x18a   :  { %4875 = vmatmul.mubr.bf16.gmra.mrb[164].mxu1 %v8839_v44  ;;  %v9041_v25 = vld [vmem:[%s9657_s0 + $0x1e4] ss:$72 sps:$4 sm:$0xff]  }
 0x18b   :  { %4161 = vmatmul.mubr.bf16.gmra.mrb[4].mxu0 %v8984_v43  ;;  %v9005_v20 = vadd.f32 %v5983_v60, %v4451_v10  ;;  %4915 = vmatprep.mubr.bf16.mxu1 %v8860_v36  ;;  %v4464_v60 = vadd.f32 %v8844_v21, %v8901_v54  ;;  %v4467_v21 = vadd.f32 %v8852_v61, %v8901_v54  ;;  %v7165_v61 = vld [vmem:[%s9656_s1 + $0xb28] ss:$12 sps:$4 sm:$0xff]  }
 0x18c   :  { %4216 = vmatpush1.bf16.msra.mxu0 %v7143_v40  ;;  %4170 = vmatprep.mubr.bf16.mxu0 %v8997_v23  ;;  %v7163_v40 = vld [vmem:[%s9656_s1 + $0xb14] ss:$12 sps:$4 sm:$0xff]  }
 0x18d   :  { %4217 = vmatprep.subr.bf16.mxu0 %v7150_v42  ;;  %v5984_v31 = vpop.f32.mrb[60].mxu1 }
 0x18e   :  { %v5985_v44 = vpop.f32.mrb[61].mxu1 }
 0x18f   :  { %v5986_v7 = vadd.f32 %v5985_v44, %v5984_v31  ;;  %v5987_v36 = vpop.f32.mrb[62].mxu1  ;;  %v7161_v31 = vld [vmem:[%s9656_s1 + $0xb10] ss:$12 sps:$4 sm:$0xff]  }
 0x190   :  { %4218 = vmatpush1.bf16.msra.mxu0 %v7148_v62  ;;  %v5988_v41 = vpop.f32.mrb[63].mxu1 }
 0x191   :  { %4219 = vmatprep.subr.bf16.mxu0 %v7155_v51  ;;  %v9033_v52 = vadd.f32 %v5986_v7, %v4456_v11  ;;  %v5989_v4 = vadd.f32 %v5988_v41, %v5987_v36  ;;  %v7167_v11 = vld [vmem:[%s9656_s1 + $0xb2c] ss:$12 sps:$4 sm:$0xff]   ;;  %v7192_v41 = vld [vmem:[%s9656_s1 + $0xb90] ss:$12 sps:$4 sm:$0xff]  }
 0x192   :  { %4916 = vmatmul.mubr.bf16.vlgmr.msra.gmra.mrb[168].mxu1 %v8944_v48  ;;  %v7180_v48 = vld [vmem:[%s9656_s1 + $0xaa0] ss:$12 sps:$4 sm:$0xff]   ;;  %v7188_v7 = vld [vmem:[%s9656_s1 + $0xab8] ss:$12 sps:$4 sm:$0xff]  }
 0x193   :  { %4171 = vmatmul.mubr.bf16.gmra.mrb[8].mxu0 %v9018_v29  ;;  %v9045_v30 = vadd.f32 %v5989_v4, %v4459_v27  ;;  %4923 = vmatprep.mubr.bf16.mxu1 %v7159_v22  ;;  %v9063_v22 = vld [vmem:[%s9657_s0 + $0x1e0] ss:$72 sps:$4 sm:$0xff]   ;;  %v7174_v27 = vld [vmem:[%s9656_s1 + $0xb44] ss:$12 sps:$4 sm:$0xff]  }
 0x194   :  { %4220 = vmatpush1.bf16.msra.mxu0 %v7153_v1  ;;  %6263 = vmatpush3.bf16.msra.mxu1 %v7169_v50 }
 0x195   :  { %4221 = vmatprep.subr.bf16.mxu0 %v7158_v59  ;;  %v5990_v42 = vpop.f32.mrb[64].mxu1  ;;  %6264 = vmatprep.subr.bf16.mxu1 %v7176_v37  ;;  %v9086_v59 = vld [vmem:[%s9657_s0 + $0x274] ss:$72 sps:$4 sm:$0xff]  }
 0x196   :  { %4180 = vmatprep.mubr.bf16.mxu0 %v9041_v25  ;;  %v5991_v10 = vpop.f32.mrb[65].mxu1  ;;  %v7200_v37 = vld [vmem:[%s9656_s1 + $0xba8] ss:$12 sps:$4 sm:$0xff]  }
 0x197   :  { %v5992_v62 = vadd.f32 %v5991_v10, %v5990_v42  ;;  %v5993_v51 = vpop.f32.mrb[66].mxu1 }
 0x198   :  { %4222 = vmatpush1.bf16.msra.mxu0 %v7156_v19  ;;  %v5994_v44 = vpop.f32.mrb[67].mxu1  ;;  %6265 = vmatpush3.bf16.msra.mxu1 %v7180_v48 }
 0x199   :  { %4223 = vmatprep.subr.bf16.mxu0 %v7163_v40  ;;  %v9078_v36 = vadd.f32 %v5992_v62, %v4464_v60  ;;  %v5995_v1 = vadd.f32 %v5994_v44, %v5993_v51  ;;  %6266 = vmatprep.subr.bf16.mxu1 %v7187_v6  ;;  %v4472_v40 = vadd.f32 %v8884_v53, %v8901_v54  ;;  %v7172_v6 = vld [vmem:[%s9656_s1 + $0xb40] ss:$12 sps:$4 sm:$0xff]   ;;  %v7179_v60 = vld [vmem:[%s9656_s1 + $0xb5c] ss:$12 sps:$4 sm:$0xff]  }
 0x19a   :  { %4924 = vmatmul.mubr.bf16.gmra.mrb[172].mxu1 %v8984_v43  ;;  %v7193_v43 = vld [vmem:[%s9656_s1 + $0xad0] ss:$12 sps:$4 sm:$0xff]   ;;  %v7201_v62 = vld [vmem:[%s9656_s1 + $0xae8] ss:$12 sps:$4 sm:$0xff]   ;;  %v4475_v53 = vadd.f32 %v8892_v5, %v8901_v54  ;;  %v7205_v44 = vld [vmem:[%s9656_s1 + $0xbc0] ss:$12 sps:$4 sm:$0xff]  }
 0x19b   :  { %4181 = vmatmul.mubr.bf16.gmra.mrb[12].mxu0 %v9063_v22  ;;  %v9090_v50 = vadd.f32 %v5995_v1, %v4467_v21  ;;  %4931 = vmatprep.mubr.bf16.mxu1 %v8997_v23  ;;  %v9109_v23 = vld [vmem:[%s9657_s0 + $0x270] ss:$72 sps:$4 sm:$0xff]   ;;  %v7185_v54 = vld [vmem:[%s9656_s1 + $0xb74] ss:$12 sps:$4 sm:$0xff]  }
 0x19c   :  { %4224 = vmatpush1.bf16.msra.mxu0 %v7161_v31  ;;  %6267 = vmatpush3.bf16.msra.mxu1 %v7188_v7  ;;  %v7177_v5 = vld [vmem:[%s9656_s1 + $0xb58] ss:$12 sps:$4 sm:$0xff]  }
 0x19d   :  { %4225 = vmatprep.subr.bf16.mxu0 %v7167_v11  ;;  %v5996_v4 = vpop.f32.mrb[68].mxu1  ;;  %6268 = vmatprep.subr.bf16.mxu1 %v7192_v41  ;;  %v7207_v11 = vld [vmem:[%s9657_s0 + $0x304] ss:$72 sps:$4 sm:$0xff]  }
 0x19e   :  { %4190 = vmatprep.mubr.bf16.mxu0 %v9086_v59  ;;  %v5997_v19 = vpop.f32.mrb[69].mxu1  ;;  %v7213_v1 = vld [vmem:[%s9656_s1 + $0xbd8] ss:$12 sps:$4 sm:$0xff]  }
 0x19f   :  { %v5998_v48 = vadd.f32 %v5997_v19, %v5996_v4  ;;  %v5999_v42 = vpop.f32.mrb[70].mxu1  ;;  %v7214_v19 = vld [vmem:[%s9656_s1 + $0xb18] ss:$12 sps:$4 sm:$0xff]  }
 0x1a0   :  { %4226 = vmatpush1.bf16.msra.mxu0 %v7165_v61  ;;  %v6000_v10 = vpop.f32.mrb[71].mxu1  ;;  %6269 = vmatpush3.bf16.msra.mxu1 %v7193_v43  ;;  %v7183_v43 = vld [vmem:[%s9656_s1 + $0xb70] ss:$12 sps:$4 sm:$0xff]  }
 0x1a1   :  { %4227 = vmatprep.subr.bf16.mxu0 %v7174_v27  ;;  %v9124_v51 = vadd.f32 %v5998_v48, %v4472_v40  ;;  %v6001_v31 = vadd.f32 %v6000_v10, %v5999_v42  ;;  %6270 = vmatprep.subr.bf16.mxu1 %v7200_v37  ;;  %v7191_v37 = vld [vmem:[%s9656_s1 + $0xb8c] ss:$12 sps:$4 sm:$0xff]   ;;  %v7218_v42 = vld [vmem:[%s9656_s1 + $0xbf0] ss:$12 sps:$4 sm:$0xff]  }
 0x1a2   :  { %4932 = vmatmul.mubr.bf16.gmra.mrb[176].mxu1 %v9018_v29  ;;  %v7206_v29 = vld [vmem:[%s9656_s1 + $0xb00] ss:$12 sps:$4 sm:$0xff]  }
 0x1a3   :  { %4191 = vmatmul.mubr.bf16.gmra.mrb[16].mxu0 %v9109_v23  ;;  %v9134_v7 = vadd.f32 %v6001_v31, %v4475_v53  ;;  %4939 = vmatprep.mubr.bf16.mxu1 %v9041_v25  ;;  %v7212_v25 = vld [vmem:[%s9657_s0 + $0x300] ss:$72 sps:$4 sm:$0xff]  }
 0x1a4   :  { %4228 = vmatpush1.bf16.msra.mxu0 %v7172_v6  ;;  %6271 = vmatpush3.bf16.msra.mxu1 %v7201_v62  ;;  %v7222_v6 = vld [vmem:[%s9657_s0 + $0x3c] ss:$72 sps:$4 sm:$0xff]  }
 0x1a5   :  { %4229 = vmatprep.subr.bf16.mxu0 %v7179_v60  ;;  %v6018_v21 = vpop.f32.mrb[72].mxu1  ;;  %6272 = vmatprep.subr.bf16.mxu1 %v7205_v44  ;;  %v7198_v60 = vld [vmem:[%s9656_s1 + $0xba4] ss:$12 sps:$4 sm:$0xff]   ;;  %v7196_v44 = vld [vmem:[%s9656_s1 + $0xba0] ss:$12 sps:$4 sm:$0xff]  }
 0x1a6   :  { %4200 = vmatprep.mubr.bf16.mxu0 %v7207_v11  ;;  %v6019_v41 = vpop.f32.mrb[73].mxu1 }
 0x1a7   :  { %v6020_v61 = vadd.f32 %v6019_v41, %v6018_v21  ;;  %v6021_v27 = vpop.f32.mrb[74].mxu1  ;;  %v7202_v41 = vld [vmem:[%s9656_s1 + $0xbb8] ss:$12 sps:$4 sm:$0xff]  }
 0x1a8   :  { %4230 = vmatpush1.bf16.msra.mxu0 %v7177_v5  ;;  %v6022_v4 = vpop.f32.mrb[75].mxu1  ;;  %6273 = vmatpush3.bf16.msra.mxu1 %v7206_v29 }
 0x1a9   :  { %4231 = vmatprep.subr.bf16.mxu0 %v7185_v54  ;;  %v9162_v40 = vadd.f32 %v6020_v61, %v8929_v38  ;;  %v6023_v48 = vadd.f32 %v6022_v4, %v6021_v27  ;;  %6274 = vmatprep.subr.bf16.mxu1 %v7213_v1  ;;  %v7189_v38 = vld [vmem:[%s9656_s1 + $0xb88] ss:$12 sps:$4 sm:$0xff]  }
 0x1aa   :  { %4940 = vmatmul.mubr.bf16.gmra.mrb[180].mxu1 %v9063_v22  ;;  %v7219_v22 = vld [vmem:[%s9656_s1 + $0xb30] ss:$12 sps:$4 sm:$0xff]   ;;  %v7211_v61 = vld [vmem:[%s9656_s1 + $0xbd4] ss:$12 sps:$4 sm:$0xff]  }
 0x1ab   :  { %4201 = vmatmul.mubr.bf16.gmra.mrb[20].mxu0 %v7212_v25  ;;  %v9172_v10 = vadd.f32 %v6023_v48, %v8935_v55  ;;  %4947 = vmatprep.mubr.bf16.mxu1 %v9086_v59  ;;  %v7238_v55 = vld [vmem:[%s9656_s1 + $0xcc8] ss:$12 sps:$4 sm:$0xff]  }
 0x1ac   :  { %4232 = vmatpush1.bf16.msra.mxu0 %v7183_v43  ;;  %6275 = vmatpush3.bf16.msra.mxu1 %v7214_v19  ;;  %v7204_v54 = vld [vmem:[%s9656_s1 + $0xbbc] ss:$12 sps:$4 sm:$0xff]  }
 0x1ad   :  { %4233 = vmatprep.subr.bf16.mxu0 %v7191_v37  ;;  %v6024_v62 = vpop.f32.mrb[76].mxu1  ;;  %6276 = vmatprep.subr.bf16.mxu1 %v7218_v42  ;;  %v7215_v42 = vld [vmem:[%s9656_s1 + $0xbe8] ss:$12 sps:$4 sm:$0xff]  }
 0x1ae   :  { %4243 = vmatprep.mubr.bf16.mxu0 %v7222_v6  ;;  %v6025_v53 = vpop.f32.mrb[77].mxu1 }
 0x1af   :  { %v6026_v31 = vadd.f32 %v6025_v53, %v6024_v62  ;;  %v6027_v59 = vpop.f32.mrb[78].mxu1  ;;  %v7223_v62 = vld [vmem:[%s9656_s1 + $0xc00] ss:$12 sps:$4 sm:$0xff]   ;;  %v7228_v53 = vld [vmem:[%s9656_s1 + $0xc1c] ss:$12 sps:$4 sm:$0xff]  }
 0x1b0   :  { %4234 = vmatpush1.bf16.msra.mxu0 %v7189_v38  ;;  %v6028_v5 = vpop.f32.mrb[79].mxu1  ;;  %6277 = vmatpush3.bf16.msra.mxu1 %v7219_v22  ;;  %v7225_v38 = vld [vmem:[%s9656_s1 + $0xc04] ss:$12 sps:$4 sm:$0xff]  }
 0x1b1   :  { %4235 = vmatprep.subr.bf16.mxu0 %v7198_v60  ;;  %v9194_v29 = vadd.f32 %v6026_v31, %v8968_v15  ;;  %v6029_v21 = vadd.f32 %v6028_v5, %v6027_v59  ;;  %6314 = vmatprep.subr.bf16.mxu1 %v7238_v55  ;;  %v7239_v31 = vld [vmem:[%s9656_s1 + $0xc08] ss:$12 sps:$4 sm:$0xff]   ;;  %v7246_v5 = vld [vmem:[%s9656_s1 + $0xce0] ss:$12 sps:$4 sm:$0xff]  }
 0x1b2   :  { %4948 = vmatmul.mubr.bf16.gmra.mrb[184].mxu1 %v9109_v23 }
 0x1b3   :  { %v9198_v1 = vadd.f32 %v6029_v21, %v8972_v39  ;;  %4955 = vmatprep.mubr.bf16.mxu1 %v7207_v11  ;;  %v7209_v39 = vld [vmem:[%s9656_s1 + $0xbd0] ss:$12 sps:$4 sm:$0xff]   ;;  %v7217_v11 = vld [vmem:[%s9656_s1 + $0xbec] ss:$12 sps:$4 sm:$0xff]  }
 0x1b4   :  { %4236 = vmatpush1.bf16.msra.mxu0 %v7196_v44  ;;  %v7226_v21 = vld [vmem:[%s9656_s1 + $0xc18] ss:$12 sps:$4 sm:$0xff]  }
 0x1b5   :  { %4237 = vmatprep.subr.bf16.mxu0 %v7204_v54  ;;  %v6030_v15 = vpop.f32.mrb[80].mxu1 }
 0x1b6   :  { %v6031_v27 = vpop.f32.mrb[81].mxu1 }
 0x1b7   :  { %v6032_v43 = vadd.f32 %v6031_v27, %v6030_v15  ;;  %v6033_v4 = vpop.f32.mrb[82].mxu1  ;;  %v7234_v27 = vld [vmem:[%s9657_s0 + $0xc8] ss:$72 sps:$4 sm:$0xff]  }
 0x1b8   :  { %4238 = vmatpush1.bf16.msra.mxu0 %v7202_v41  ;;  %v6034_v23 = vpop.f32.mrb[83].mxu1  ;;  %v7250_v41 = vld [vmem:[%s9656_s1 + $0xc20] ss:$12 sps:$4 sm:$0xff]  }
 0x1b9   :  { %4239 = vmatprep.subr.bf16.mxu0 %v7211_v61  ;;  %v9213_v37 = vadd.f32 %v6032_v43, %v9001_v32  ;;  %v6035_v19 = vadd.f32 %v6034_v23, %v6033_v4  ;;  %v7220_v32 = vld [vmem:[%s9657_s0 + $0x38] ss:$72 sps:$4 sm:$0xff]   ;;  %v7240_v23 = vld [vmem:[%s9657_s0 + $0x15c] ss:$72 sps:$4 sm:$0xff]  }
 0x1ba   :  { %4956 = vmatmul.mubr.bf16.gmra.mrb[188].mxu1 %v7212_v25 }
 0x1bb   :  { %v9216_v48 = vadd.f32 %v6035_v19, %v9005_v20  ;;  %4996 = vmatprep.mubr.bf16.mxu1 %v7222_v6  ;;  %v7229_v6 = vld [vmem:[%s9657_s0 + $0xcc] ss:$72 sps:$4 sm:$0xff]  }
 0x1bc   :  { %4240 = vmatpush1.bf16.msra.mxu0 %v7209_v39  ;;  %v7231_v39 = vld [vmem:[%s9656_s1 + $0xc30] ss:$12 sps:$4 sm:$0xff]   ;;  %v7237_v19 = vld [vmem:[%s9656_s1 + $0xc4c] ss:$12 sps:$4 sm:$0xff]  }
 0x1bd   :  { %4241 = vmatprep.subr.bf16.mxu0 %v7217_v11  ;;  %v6036_v60 = vpop.f32.mrb[84].mxu1 }
 0x1be   :  { %v6037_v22 = vpop.f32.mrb[85].mxu1 }
 0x1bf   :  { %v6038_v25 = vadd.f32 %v6037_v22, %v6036_v60  ;;  %v6039_v20 = vpop.f32.mrb[86].mxu1  ;;  %v7262_v22 = vld [vmem:[%s9656_s1 + $0xd10] ss:$12 sps:$4 sm:$0xff]  }
 0x1c0   :  { %4242 = vmatpush1.bf16.msra.mxu0 %v7215_v42  ;;  %v6040_v55 = vpop.f32.mrb[87].mxu1  ;;  %v7258_v42 = vld [vmem:[%s9656_s1 + $0xc38] ss:$12 sps:$4 sm:$0xff]  }
 0x1c1   :  { %4304 = vmatprep.subr.bf16.mxu0 %v7225_v38  ;;  %v9240_v59 = vadd.f32 %v6038_v25, %v9033_v52  ;;  %v6041_v44 = vadd.f32 %v6040_v55, %v6039_v20  ;;  %v7233_v52 = vld [vmem:[%s9656_s1 + $0xc34] ss:$12 sps:$4 sm:$0xff]   ;;  %v7263_v20 = vld [vmem:[%s9656_s1 + $0xc50] ss:$12 sps:$4 sm:$0xff]  }
 0x1c2   :  { %4997 = vmatmul.mubr.bf16.vlgmr.msra.gmra.mrb[192].mxu1 %v7220_v32  ;;  %v7235_v25 = vld [vmem:[%s9656_s1 + $0xc48] ss:$12 sps:$4 sm:$0xff]   ;;  %v7245_v55 = vld [vmem:[%s9657_s0 + $0x158] ss:$72 sps:$4 sm:$0xff]  }
 0x1c3   :  { %4244 = vmatmul.mubr.bf16.vlgmr.msra.gmra.mrb[0].mxu0 %v7220_v32  ;;  %v9246_v54 = vadd.f32 %v6041_v44, %v9045_v30  ;;  %5004 = vmatprep.mubr.bf16.mxu1 %v7229_v6  ;;  %v7257_v30 = vld [vmem:[%s9656_s1 + $0xcf8] ss:$12 sps:$4 sm:$0xff]   ;;  %v7242_v44 = vld [vmem:[%s9656_s1 + $0xc60] ss:$12 sps:$4 sm:$0xff]  }
 0x1c4   :  { %4305 = vmatpush1.bf16.msra.mxu0 %v7223_v62  ;;  %6315 = vmatpush3.bf16.msra.mxu1 %v7239_v31 }
 0x1c5   :  { %4306 = vmatprep.subr.bf16.mxu0 %v7228_v53  ;;  %v6042_v61 = vpop.f32.mrb[88].mxu1  ;;  %6316 = vmatprep.subr.bf16.mxu1 %v7246_v5  ;;  %v7251_v5 = vld [vmem:[%s9657_s0 + $0x1ec] ss:$72 sps:$4 sm:$0xff]  }
 0x1c6   :  { %4253 = vmatprep.mubr.bf16.mxu0 %v7229_v6  ;;  %v6043_v15 = vpop.f32.mrb[89].mxu1 }
 0x1c7   :  { %v6044_v43 = vadd.f32 %v6043_v15, %v6042_v61  ;;  %v6045_v4 = vpop.f32.mrb[90].mxu1  ;;  %v7275_v15 = vld [vmem:[%s9656_s1 + $0xd40] ss:$12 sps:$4 sm:$0xff]  }
 0x1c8   :  { %4307 = vmatpush1.bf16.msra.mxu0 %v7226_v21  ;;  %v6046_v11 = vpop.f32.mrb[91].mxu1  ;;  %6317 = vmatpush3.bf16.msra.mxu1 %v7250_v41  ;;  %v7271_v41 = vld [vmem:[%s9656_s1 + $0xc68] ss:$12 sps:$4 sm:$0xff]  }
 0x1c9   :  { %4308 = vmatprep.subr.bf16.mxu0 %v7233_v52  ;;  %v9276_v38 = vadd.f32 %v6044_v43, %v9078_v36  ;;  %v6047_v60 = vadd.f32 %v6046_v11, %v6045_v4  ;;  %6318 = vmatprep.subr.bf16.mxu1 %v7257_v30  ;;  %v7244_v36 = vld [vmem:[%s9656_s1 + $0xc64] ss:$12 sps:$4 sm:$0xff]   ;;  %v7249_v52 = vld [vmem:[%s9656_s1 + $0xc7c] ss:$12 sps:$4 sm:$0xff]   ;;  %v7276_v4 = vld [vmem:[%s9656_s1 + $0xc80] ss:$12 sps:$4 sm:$0xff]  }
 0x1ca   :  { %5005 = vmatmul.mubr.bf16.gmra.mrb[196].mxu1 %v7234_v27  ;;  %v7247_v43 = vld [vmem:[%s9656_s1 + $0xc78] ss:$12 sps:$4 sm:$0xff]   ;;  %v7256_v11 = vld [vmem:[%s9657_s0 + $0x1e8] ss:$72 sps:$4 sm:$0xff]  }
 0x1cb   :  { %4254 = vmatmul.mubr.bf16.gmra.mrb[4].mxu0 %v7234_v27  ;;  %v9282_v32 = vadd.f32 %v6047_v60, %v9090_v50  ;;  %5012 = vmatprep.mubr.bf16.mxu1 %v7240_v23  ;;  %v7270_v50 = vld [vmem:[%s9656_s1 + $0xd28] ss:$12 sps:$4 sm:$0xff]   ;;  %v7253_v60 = vld [vmem:[%s9656_s1 + $0xc90] ss:$12 sps:$4 sm:$0xff]  }
 0x1cc   :  { %4309 = vmatpush1.bf16.msra.mxu0 %v7231_v39  ;;  %6319 = vmatpush3.bf16.msra.mxu1 %v7258_v42 }
 0x1cd   :  { %4310 = vmatprep.subr.bf16.mxu0 %v7237_v19  ;;  %v6048_v62 = vpop.f32.mrb[92].mxu1  ;;  %6320 = vmatprep.subr.bf16.mxu1 %v7262_v22  ;;  %v7264_v22 = vld [vmem:[%s9657_s0 + $0x27c] ss:$72 sps:$4 sm:$0xff]  }
 0x1ce   :  { %4263 = vmatprep.mubr.bf16.mxu0 %v7240_v23  ;;  %v6049_v6 = vpop.f32.mrb[93].mxu1 }
 0x1cf   :  { %v6050_v53 = vadd.f32 %v6049_v6, %v6048_v62  ;;  %v6051_v31 = vpop.f32.mrb[94].mxu1  ;;  %v7288_v6 = vld [vmem:[%s9656_s1 + $0xd70] ss:$12 sps:$4 sm:$0xff]  }
 0x1d0   :  { %4311 = vmatpush1.bf16.msra.mxu0 %v7235_v25  ;;  %v6052_v21 = vpop.f32.mrb[95].mxu1  ;;  %6321 = vmatpush3.bf16.msra.mxu1 %v7263_v20  ;;  %v7284_v20 = vld [vmem:[%s9656_s1 + $0xc98] ss:$12 sps:$4 sm:$0xff]  }
 0x1d1   :  { %4312 = vmatprep.subr.bf16.mxu0 %v7244_v36  ;;  %v9312_v61 = vadd.f32 %v6050_v53, %v9124_v51  ;;  %v6053_v30 = vadd.f32 %v6052_v21, %v6051_v31  ;;  %6322 = vmatprep.subr.bf16.mxu1 %v7270_v50  ;;  %v7255_v51 = vld [vmem:[%s9656_s1 + $0xc94] ss:$12 sps:$4 sm:$0xff]   ;;  %v7261_v36 = vld [vmem:[%s9656_s1 + $0xcac] ss:$12 sps:$4 sm:$0xff]   ;;  %v7289_v31 = vld [vmem:[%s9656_s1 + $0xcb0] ss:$12 sps:$4 sm:$0xff]  }
 0x1d2   :  { %5013 = vmatmul.mubr.bf16.gmra.mrb[200].mxu1 %v7245_v55  ;;  %v7259_v53 = vld [vmem:[%s9656_s1 + $0xca8] ss:$12 sps:$4 sm:$0xff]  }
 0x1d3   :  { %4264 = vmatmul.mubr.bf16.gmra.mrb[8].mxu0 %v7245_v55  ;;  %v9318_v27 = vadd.f32 %v6053_v30, %v9134_v7  ;;  %5020 = vmatprep.mubr.bf16.mxu1 %v7251_v5  ;;  %v7283_v7 = vld [vmem:[%s9656_s1 + $0xd58] ss:$12 sps:$4 sm:$0xff]   ;;  %v7277_v30 = vld [vmem:[%s9657_s0 + $0x30c] ss:$72 sps:$4 sm:$0xff]  }
 0x1d4   :  { %4313 = vmatpush1.bf16.msra.mxu0 %v7242_v44  ;;  %6323 = vmatpush3.bf16.msra.mxu1 %v7271_v41  ;;  %v7266_v41 = vld [vmem:[%s9656_s1 + $0xcc0] ss:$12 sps:$4 sm:$0xff]  }
 0x1d5   :  { %4314 = vmatprep.subr.bf16.mxu0 %v7249_v52  ;;  %v6070_v39 = vpop.f32.mrb[96].mxu1  ;;  %6324 = vmatprep.subr.bf16.mxu1 %v7275_v15 }
 0x1d6   :  { %4273 = vmatprep.mubr.bf16.mxu0 %v7251_v5  ;;  %v6071_v23 = vpop.f32.mrb[97].mxu1  ;;  %v7269_v5 = vld [vmem:[%s9657_s0 + $0x278] ss:$72 sps:$4 sm:$0xff]  }
 0x1d7   :  { %v6072_v19 = vadd.f32 %v6071_v23, %v6070_v39  ;;  %v6073_v42 = vpop.f32.mrb[98].mxu1  ;;  %v7281_v23 = vld [vmem:[%s9656_s1 + $0xcf4] ss:$12 sps:$4 sm:$0xff]  }
 0x1d8   :  { %4315 = vmatpush1.bf16.msra.mxu0 %v7247_v43  ;;  %v6074_v25 = vpop.f32.mrb[99].mxu1  ;;  %6325 = vmatpush3.bf16.msra.mxu1 %v7276_v4  ;;  %v7274_v43 = vld [vmem:[%s9656_s1 + $0xcdc] ss:$12 sps:$4 sm:$0xff]  }
 0x1d9   :  { %4316 = vmatprep.subr.bf16.mxu0 %v7255_v51  ;;  %v9348_v62 = vadd.f32 %v6072_v19, %v9162_v40  ;;  %v6075_v50 = vadd.f32 %v6074_v25, %v6073_v42  ;;  %6326 = vmatprep.subr.bf16.mxu1 %v7283_v7  ;;  %v7268_v40 = vld [vmem:[%s9656_s1 + $0xcc4] ss:$12 sps:$4 sm:$0xff]  }
 0x1da   :  { %5021 = vmatmul.mubr.bf16.gmra.mrb[204].mxu1 %v7256_v11  ;;  %v7272_v7 = vld [vmem:[%s9656_s1 + $0xcd8] ss:$12 sps:$4 sm:$0xff]   ;;  %v7282_v19 = vld [vmem:[%s9657_s0 + $0x308] ss:$72 sps:$4 sm:$0xff]  }
 0x1db   :  { %4274 = vmatmul.mubr.bf16.gmra.mrb[12].mxu0 %v7256_v11  ;;  %v9354_v55 = vadd.f32 %v6075_v50, %v9172_v10  ;;  %5028 = vmatprep.mubr.bf16.mxu1 %v7264_v22 }
 0x1dc   :  { %4317 = vmatpush1.bf16.msra.mxu0 %v7253_v60  ;;  %6327 = vmatpush3.bf16.msra.mxu1 %v7284_v20  ;;  %v7279_v60 = vld [vmem:[%s9656_s1 + $0xcf0] ss:$12 sps:$4 sm:$0xff]  }
 0x1dd   :  { %4318 = vmatprep.subr.bf16.mxu0 %v7261_v36  ;;  %v6076_v44 = vpop.f32.mrb[100].mxu1  ;;  %6328 = vmatprep.subr.bf16.mxu1 %v7288_v6  ;;  %v7287_v36 = vld [vmem:[%s9656_s1 + $0xd0c] ss:$12 sps:$4 sm:$0xff]  }
 0x1de   :  { %4283 = vmatprep.mubr.bf16.mxu0 %v7264_v22  ;;  %v6077_v10 = vpop.f32.mrb[101].mxu1  ;;  %v7292_v22 = vld [vmem:[%s9657_s0 + $0x44] ss:$72 sps:$4 sm:$0xff]  }
 0x1df   :  { %v6078_v21 = vadd.f32 %v6077_v10, %v6076_v44  ;;  %v6079_v52 = vpop.f32.mrb[102].mxu1  ;;  %v7290_v44 = vld [vmem:[%s9657_s0 + $0x40] ss:$72 sps:$4 sm:$0xff]  }
 0x1e0   :  { %4319 = vmatpush1.bf16.msra.mxu0 %v7259_v53  ;;  %v6080_v15 = vpop.f32.mrb[103].mxu1  ;;  %6329 = vmatpush3.bf16.msra.mxu1 %v7289_v31  ;;  %v7285_v53 = vld [vmem:[%s9656_s1 + $0xd08] ss:$12 sps:$4 sm:$0xff]  }
 0x1e1   :  { %4320 = vmatprep.subr.bf16.mxu0 %v7268_v40  ;;  %v9378_v51 = vadd.f32 %v6078_v21, %v9194_v29  ;;  %v6081_v4 = vadd.f32 %v6080_v15, %v6079_v52  ;;  %v7295_v40 = vld [vmem:[%s9656_s1 + $0xd24] ss:$12 sps:$4 sm:$0xff]   ;;  %v7299_v21 = vld [vmem:[%s9657_s0 + $0xd4] ss:$72 sps:$4 sm:$0xff]  }
 0x1e2   :  { %5029 = vmatmul.mubr.bf16.gmra.mrb[208].mxu1 %v7269_v5 }
 0x1e3   :  { %4284 = vmatmul.mubr.bf16.gmra.mrb[16].mxu0 %v7269_v5  ;;  %v9381_v39 = vadd.f32 %v6081_v4, %v9198_v1  ;;  %5036 = vmatprep.mubr.bf16.mxu1 %v7277_v30  ;;  %v7293_v5 = vld [vmem:[%s9656_s1 + $0xd20] ss:$12 sps:$4 sm:$0xff]   ;;  %v7296_v4 = vld [vmem:[%s9656_s1 + $0xd38] ss:$12 sps:$4 sm:$0xff]  }
 0x1e4   :  { %4321 = vmatpush1.bf16.msra.mxu0 %v7266_v41  ;;  %4293 = vmatprep.mubr.bf16.mxu0 %v7277_v30  ;;  %v7298_v41 = vld [vmem:[%s9656_s1 + $0xd3c] ss:$12 sps:$4 sm:$0xff]  }
 0x1e5   :  { %4322 = vmatprep.subr.bf16.mxu0 %v7274_v43  ;;  %v6082_v29 = vpop.f32.mrb[104].mxu1 }
 0x1e6   :  { %v6083_v11 = vpop.f32.mrb[105].mxu1 }
 0x1e7   :  { %v6084_v1 = vadd.f32 %v6083_v11, %v6082_v29  ;;  %v6085_v42 = vpop.f32.mrb[106].mxu1 }
 0x1e8   :  { %4323 = vmatpush1.bf16.msra.mxu0 %v7272_v7  ;;  %v6086_v25 = vpop.f32.mrb[107].mxu1  ;;  %v7303_v7 = vld [vmem:[%s9656_s1 + $0xd54] ss:$12 sps:$4 sm:$0xff]  }
 0x1e9   :  { %4324 = vmatprep.subr.bf16.mxu0 %v7281_v23  ;;  %v9402_v20 = vadd.f32 %v6084_v1, %v9213_v37  ;;  %v6087_v50 = vadd.f32 %v6086_v25, %v6085_v42  ;;  %v7308_v1 = vld [vmem:[%s9657_s0 + $0x164] ss:$72 sps:$4 sm:$0xff]  }
 0x1ea   :  { %5037 = vmatmul.mubr.bf16.gmra.mrb[212].mxu1 %v7282_v19 }
 0x1eb   :  { %4294 = vmatmul.mubr.bf16.gmra.mrb[20].mxu0 %v7282_v19  ;;  %v9405_v6 = vadd.f32 %v6087_v50, %v9216_v48  ;;  %5077 = vmatprep.mubr.bf16.mxu1 %v7292_v22  ;;  %v7301_v19 = vld [vmem:[%s9656_s1 + $0xd50] ss:$12 sps:$4 sm:$0xff]   ;;  %v7305_v50 = vld [vmem:[%s9656_s1 + $0xd68] ss:$12 sps:$4 sm:$0xff]  }
 0x1ec   :  { %4325 = vmatpush1.bf16.msra.mxu0 %v7279_v60  ;;  %4336 = vmatprep.mubr.bf16.mxu0 %v7292_v22  ;;  %v7307_v60 = vld [vmem:[%s9656_s1 + $0xd6c] ss:$12 sps:$4 sm:$0xff]  }
 0x1ed   :  { %4326 = vmatprep.subr.bf16.mxu0 %v7287_v36  ;;  %v6088_v37 = vpop.f32.mrb[108].mxu1 }
 0x1ee   :  { %v6089_v31 = vpop.f32.mrb[109].mxu1 }
 0x1ef   :  { %v6090_v48 = vadd.f32 %v6089_v31, %v6088_v37  ;;  %v6091_v10 = vpop.f32.mrb[110].mxu1  ;;  %v7310_v37 = vld [vmem:[%s9657_s0 + $0x160] ss:$72 sps:$4 sm:$0xff]  }
 0x1f0   :  { %4327 = vmatpush1.bf16.msra.mxu0 %v7285_v53  ;;  %v6092_v52 = vpop.f32.mrb[111].mxu1 }
 0x1f1   :  { %4328 = vmatprep.subr.bf16.mxu0 %v7295_v40  ;;  %v9426_v30 = vadd.f32 %v6090_v48, %v9240_v59  ;;  %v6093_v15 = vadd.f32 %v6092_v52, %v6091_v10  ;;  %v7304_v59 = vld [vmem:[%s9657_s0 + $0xd0] ss:$72 sps:$4 sm:$0xff]  }
 0x1f2   :  { %5078 = vmatmul.mubr.bf16.vlgmr.msra.gmra.mrb[216].mxu1 %v7290_v44 }
 0x1f3   :  { %v9429_v43 = vadd.f32 %v6093_v15, %v9246_v54  ;;  %5085 = vmatprep.mubr.bf16.mxu1 %v7299_v21 }
 0x1f4   :  { %4329 = vmatpush1.bf16.msra.mxu0 %v7293_v5 }
 0x1f5   :  { %4330 = vmatprep.subr.bf16.mxu0 %v7298_v41  ;;  %v6094_v23 = vpop.f32.mrb[112].mxu1 }
 0x1f6   :  { %v6095_v29 = vpop.f32.mrb[113].mxu1 }
 0x1f7   :  { %v6096_v11 = vadd.f32 %v6095_v29, %v6094_v23  ;;  %v6097_v54 = vpop.f32.mrb[114].mxu1 }
 0x1f8   :  { %4331 = vmatpush1.bf16.msra.mxu0 %v7296_v4  ;;  %v6098_v42 = vpop.f32.mrb[115].mxu1  ;;  %v7313_v4 = vld [vmem:[%s9657_s0 + $0x1f0] ss:$72 sps:$4 sm:$0xff]  }
 0x1f9   :  { %4332 = vmatprep.subr.bf16.mxu0 %v7303_v7  ;;  %v9450_v22 = vadd.f32 %v6096_v11, %v9276_v38  ;;  %v6099_v25 = vadd.f32 %v6098_v42, %v6097_v54 }
 0x1fa   :  { %5086 = vmatmul.mubr.bf16.gmra.mrb[220].mxu1 %v7304_v59 }
 0x1fb   :  { %v9453_v36 = vadd.f32 %v6099_v25, %v9282_v32  ;;  %5093 = vmatprep.mubr.bf16.mxu1 %v7308_v1  ;;  %v7311_v32 = vld [vmem:[%s9657_s0 + $0x1f4] ss:$72 sps:$4 sm:$0xff]  }
 0x1fc   :  { %4333 = vmatpush1.bf16.msra.mxu0 %v7301_v19  ;;  %v7316_v19 = vld [vmem:[%s9657_s0 + $0x280] ss:$72 sps:$4 sm:$0xff]  }
 0x1fd   :  { %4334 = vmatprep.subr.bf16.mxu0 %v7307_v60  ;;  %v6100_v53 = vpop.f32.mrb[116].mxu1 }
 0x1fe   :  { %v6101_v40 = vpop.f32.mrb[117].mxu1 }
 0x1ff   :  { %v6102_v38 = vadd.f32 %v6101_v40, %v6100_v53  ;;  %v6103_v31 = vpop.f32.mrb[118].mxu1  ;;  %v7319_v40 = vld [vmem:[%s9657_s0 + $0x310] ss:$72 sps:$4 sm:$0xff]  }
 0x200   :  { %4335 = vmatpush1.bf16.msra.mxu0 %v7305_v50  ;;  %v6104_v48 = vpop.f32.mrb[119].mxu1 }
 0x201   :  { %v9465_v10 = vadd.f32 %v6102_v38, %v9312_v61  ;;  %v6105_v5 = vadd.f32 %v6104_v48, %v6103_v31  ;;  %v7314_v61 = vld [vmem:[%s9657_s0 + $0x284] ss:$72 sps:$4 sm:$0xff]  }
 0x202   :  { %5094 = vmatmul.mubr.bf16.gmra.mrb[224].mxu1 %v7310_v37 }
 0x203   :  { %4337 = vmatmul.mubr.bf16.vlgmr.msra.gmra.mrb[0].mxu0 %v7290_v44  ;;  %v9468_v52 = vadd.f32 %v6105_v5, %v9318_v27  ;;  %5101 = vmatprep.mubr.bf16.mxu1 %v7311_v32 }
 0x204   :  { %4346 = vmatprep.mubr.bf16.mxu0 %v7299_v21 }
 0x205   :  { %v6122_v41 = vpop.f32.mrb[120].mxu1 }
 0x206   :  { %v6123_v15 = vpop.f32.mrb[121].mxu1 }
 0x207   :  { %v6124_v7 = vadd.f32 %v6123_v15, %v6122_v41  ;;  %v6125_v23 = vpop.f32.mrb[122].mxu1 }
 0x208   :  { %v6126_v29 = vpop.f32.mrb[123].mxu1 }
 0x209   :  { %v9477_v44 = vadd.f32 %v6124_v7, %v9348_v62  ;;  %v6127_v27 = vadd.f32 %v6126_v29, %v6125_v23  ;;  %v7317_v62 = vld [vmem:[%s9657_s0 + $0x314] ss:$72 sps:$4 sm:$0xff]  }
 0x20a   :  { %5102 = vmatmul.mubr.bf16.gmra.mrb[228].mxu1 %v7313_v4 }
 0x20b   :  { %4347 = vmatmul.mubr.bf16.gmra.mrb[4].mxu0 %v7304_v59  ;;  %v9480_v21 = vadd.f32 %v6127_v27, %v9354_v55  ;;  %5109 = vmatprep.mubr.bf16.mxu1 %v7314_v61 }
 0x20c   :  { %4356 = vmatprep.mubr.bf16.mxu0 %v7308_v1 }
 0x20d   :  { %v6128_v11 = vpop.f32.mrb[124].mxu1 }
 0x20e   :  { %v6129_v54 = vpop.f32.mrb[125].mxu1 }
 0x20f   :  { %v6130_v42 = vadd.f32 %v6129_v54, %v6128_v11  ;;  %v6131_v60 = vpop.f32.mrb[126].mxu1 }
 0x210   :  { %v6132_v25 = vpop.f32.mrb[127].mxu1 }
 0x211   :  { %v4764_v59 = vadd.f32 %v6130_v42, %v9378_v51  ;;  %v6133_v50 = vadd.f32 %v6132_v25, %v6131_v60 }
 0x212   :  { %5110 = vmatmul.mubr.bf16.gmra.mrb[232].mxu1 %v7316_v19 }
 0x213   :  { %4357 = vmatmul.mubr.bf16.gmra.mrb[8].mxu0 %v7310_v37  ;;  %v4767_v55 = vadd.f32 %v6133_v50, %v9381_v39  ;;  %5117 = vmatprep.mubr.bf16.mxu1 %v7317_v62 }
 0x214   :  { %4366 = vmatprep.mubr.bf16.mxu0 %v7311_v32 }
 0x215   :  { %v6134_v1 = vpop.f32.mrb[128].mxu1 }
 0x216   :  { %v6135_v53 = vpop.f32.mrb[129].mxu1 }
 0x217   :  { %v6136_v38 = vadd.f32 %v6135_v53, %v6134_v1  ;;  %v6137_v31 = vpop.f32.mrb[130].mxu1 }
 0x218   :  { %v6138_v48 = vpop.f32.mrb[131].mxu1 }
 0x219   :  { %v4772_v5 = vadd.f32 %v6136_v38, %v9402_v20  ;;  %v6139_v41 = vadd.f32 %v6138_v48, %v6137_v31 }
 0x21a   :  { %5118 = vmatmul.mubr.bf16.gmra.mrb[236].mxu1 %v7319_v40 }
 0x21b   :  { %4367 = vmatmul.mubr.bf16.gmra.mrb[12].mxu0 %v7313_v4  ;;  %v4775_v51 = vadd.f32 %v6139_v41, %v9405_v6 }
 0x21c   :  { %4376 = vmatprep.mubr.bf16.mxu0 %v7314_v61 }
 0x21d   :  { %v6140_v39 = vpop.f32.mrb[132].mxu1 }
 0x21e   :  { %v6141_v37 = vpop.f32.mrb[133].mxu1 }
 0x21f   :  { %v6142_v32 = vadd.f32 %v6141_v37, %v6140_v39  ;;  %v6143_v15 = vpop.f32.mrb[134].mxu1 }
 0x220   :  { %v6144_v7 = vpop.f32.mrb[135].mxu1 }
 0x221   :  { %v4780_v23 = vadd.f32 %v6142_v32, %v9426_v30  ;;  %v6145_v29 = vadd.f32 %v6144_v7, %v6143_v15 }
 0x223   :  { %4377 = vmatmul.mubr.bf16.gmra.mrb[16].mxu0 %v7316_v19  ;;  %v4783_v27 = vadd.f32 %v6145_v29, %v9429_v43 }
 0x224   :  { %4386 = vmatprep.mubr.bf16.mxu0 %v7317_v62 }
 0x225   :  { %v6146_v11 = vpop.f32.mrb[136].mxu1 }
 0x226   :  { %v6147_v20 = vpop.f32.mrb[137].mxu1 }
 0x227   :  { %v6148_v54 = vadd.f32 %v6147_v20, %v6146_v11  ;;  %v6149_v4 = vpop.f32.mrb[138].mxu1 }
 0x228   :  { %v6150_v42 = vpop.f32.mrb[139].mxu1 }
 0x229   :  { %v4788_v6 = vadd.f32 %v6148_v54, %v9450_v22  ;;  %v6151_v61 = vadd.f32 %v6150_v42, %v6149_v4 }
 0x22b   :  { %4387 = vmatmul.mubr.bf16.gmra.mrb[20].mxu0 %v7319_v40  ;;  %v4791_v60 = vadd.f32 %v6151_v61, %v9453_v36 }
 0x22d   :  { %v6152_v25 = vpop.f32.mrb[140].mxu1 }
 0x22e   :  { %v6153_v50 = vpop.f32.mrb[141].mxu1 }
 0x22f   :  { %v6154_v1 = vadd.f32 %v6153_v50, %v6152_v25  ;;  %v6155_v30 = vpop.f32.mrb[142].mxu1 }
 0x230   :  { %v6156_v53 = vpop.f32.mrb[143].mxu1 }
 0x231   :  { %v4796_v19 = vadd.f32 %v6154_v1, %v9465_v10  ;;  %v6157_v43 = vadd.f32 %v6156_v53, %v6155_v30 }
 0x233   :  { %v4799_v62 = vadd.f32 %v6157_v43, %v9468_v52 }
 0x235   :  { %v6174_v38 = vpop.f32.mrb[144].mxu1 }
 0x236   :  { %v6175_v31 = vpop.f32.mrb[145].mxu1 }
 0x237   :  { %v6176_v48 = vadd.f32 %v6175_v31, %v6174_v38  ;;  %v6177_v41 = vpop.f32.mrb[146].mxu1 }
 0x238   :  { %v6178_v39 = vpop.f32.mrb[147].mxu1 }
 0x239   :  { %v4837_v22 = vadd.f32 %v6176_v48, %v9477_v44  ;;  %v6179_v40 = vadd.f32 %v6178_v39, %v6177_v41 }
 0x23b   :  { %v4840_v36 = vadd.f32 %v6179_v40, %v9480_v21 }
 0x23d   :  { %v6180_v37 = vpop.f32.mrb[148].mxu1 }
 0x23e   :  { %v6181_v32 = vpop.f32.mrb[149].mxu1 }
 0x23f   :  { %v6182_v15 = vadd.f32 %v6181_v32, %v6180_v37  ;;  %v6183_v7 = vpop.f32.mrb[150].mxu1 }
 0x240   :  { %v6184_v29 = vpop.f32.mrb[151].mxu1 }
 0x241   :  { %v4845_v11 = vadd.f32 %v6182_v15, %v4764_v59  ;;  %v6185_v10 = vadd.f32 %v6184_v29, %v6183_v7 }
 0x243   :  { %v4848_v20 = vadd.f32 %v6185_v10, %v4767_v55 }
 0x245   :  { %v6186_v54 = vpop.f32.mrb[152].mxu1 }
 0x246   :  { %v6187_v52 = vpop.f32.mrb[153].mxu1 }
 0x247   :  { %v6188_v4 = vadd.f32 %v6187_v52, %v6186_v54  ;;  %v6189_v42 = vpop.f32.mrb[154].mxu1 }
 0x248   :  { %v6190_v61 = vpop.f32.mrb[155].mxu1 }
 0x249   :  { %v4853_v25 = vadd.f32 %v6188_v4, %v4772_v5  ;;  %v6191_v50 = vadd.f32 %v6190_v61, %v6189_v42 }
 0x24b   :  { %v4856_v1 = vadd.f32 %v6191_v50, %v4775_v51 }
 0x24d   :  { %v6192_v44 = vpop.f32.mrb[156].mxu1 }
 0x24e   :  { %v6193_v30 = vpop.f32.mrb[157].mxu1 }
 0x24f   :  { %v6194_v53 = vadd.f32 %v6193_v30, %v6192_v44  ;;  %v6195_v21 = vpop.f32.mrb[158].mxu1 }
 0x250   :  { %v6196_v43 = vpop.f32.mrb[159].mxu1 }
 0x251   :  { %v4861_v38 = vadd.f32 %v6194_v53, %v4780_v23  ;;  %v6197_v31 = vadd.f32 %v6196_v43, %v6195_v21 }
 0x253   :  { %v4864_v48 = vadd.f32 %v6197_v31, %v4783_v27 }
 0x255   :  { %v6198_v41 = vpop.f32.mrb[160].mxu1 }
 0x256   :  { %v6199_v59 = vpop.f32.mrb[161].mxu1 }
 0x257   :  { %v6200_v39 = vadd.f32 %v6199_v59, %v6198_v41  ;;  %v6201_v55 = vpop.f32.mrb[162].mxu1 }
 0x258   :  { %v6202_v40 = vpop.f32.mrb[163].mxu1 }
 0x259   :  { %v4869_v37 = vadd.f32 %v6200_v39, %v4788_v6  ;;  %v6203_v32 = vadd.f32 %v6202_v40, %v6201_v55 }
 0x25b   :  { %v4872_v15 = vadd.f32 %v6203_v32, %v4791_v60 }
 0x25d   :  { %v6204_v7 = vpop.f32.mrb[164].mxu1 }
 0x25e   :  { %v6205_v5 = vpop.f32.mrb[165].mxu1 }
 0x25f   :  { %v6206_v29 = vadd.f32 %v6205_v5, %v6204_v7  ;;  %v6207_v51 = vpop.f32.mrb[166].mxu1 }
 0x260   :  { %v6208_v10 = vpop.f32.mrb[167].mxu1 }
 0x261   :  { %v4877_v54 = vadd.f32 %v6206_v29, %v4796_v19  ;;  %v6209_v52 = vadd.f32 %v6208_v10, %v6207_v51 }
 0x263   :  { %v4880_v4 = vadd.f32 %v6209_v52, %v4799_v62 }
 0x265   :  { %v6226_v42 = vpop.f32.mrb[168].mxu1 }
 0x266   :  { %v6227_v23 = vpop.f32.mrb[169].mxu1 }
 0x267   :  { %v6228_v61 = vadd.f32 %v6227_v23, %v6226_v42  ;;  %v6229_v27 = vpop.f32.mrb[170].mxu1 }
 0x268   :  { %v6230_v50 = vpop.f32.mrb[171].mxu1 }
 0x269   :  { %v4918_v44 = vadd.f32 %v6228_v61, %v4837_v22  ;;  %v6231_v30 = vadd.f32 %v6230_v50, %v6229_v27 }
 0x26b   :  { %v4921_v53 = vadd.f32 %v6231_v30, %v4840_v36 }
 0x26d   :  { %v6232_v21 = vpop.f32.mrb[172].mxu1 }
 0x26e   :  { %v6233_v6 = vpop.f32.mrb[173].mxu1 }
 0x26f   :  { %v6234_v43 = vadd.f32 %v6233_v6, %v6232_v21  ;;  %v6235_v60 = vpop.f32.mrb[174].mxu1 }
 0x270   :  { %v6236_v31 = vpop.f32.mrb[175].mxu1 }
 0x271   :  { %v4926_v41 = vadd.f32 %v6234_v43, %v4845_v11  ;;  %v6237_v59 = vadd.f32 %v6236_v31, %v6235_v60 }
 0x273   :  { %v4929_v39 = vadd.f32 %v6237_v59, %v4848_v20 }
 0x275   :  { %v6238_v55 = vpop.f32.mrb[176].mxu1 }
 0x276   :  { %v6239_v19 = vpop.f32.mrb[177].mxu1 }
 0x277   :  { %v6240_v40 = vadd.f32 %v6239_v19, %v6238_v55  ;;  %v6241_v62 = vpop.f32.mrb[178].mxu1 }
 0x278   :  { %v6242_v32 = vpop.f32.mrb[179].mxu1 }
 0x279   :  { %v4934_v7 = vadd.f32 %v6240_v40, %v4853_v25  ;;  %v6243_v5 = vadd.f32 %v6242_v32, %v6241_v62 }
 0x27b   :  { %v4937_v29 = vadd.f32 %v6243_v5, %v4856_v1 }
 0x27d   :  { %v6244_v51 = vpop.f32.mrb[180].mxu1 }
 0x27e   :  { %v6245_v22 = vpop.f32.mrb[181].mxu1 }
 0x27f   :  { %v6246_v10 = vadd.f32 %v6245_v22, %v6244_v51  ;;  %v6247_v36 = vpop.f32.mrb[182].mxu1 }
 0x280   :  { %v6248_v52 = vpop.f32.mrb[183].mxu1 }
 0x281   :  { %v4942_v42 = vadd.f32 %v6246_v10, %v4861_v38  ;;  %v6249_v23 = vadd.f32 %v6248_v52, %v6247_v36 }
 0x283   :  { %v4945_v61 = vadd.f32 %v6249_v23, %v4864_v48 }
 0x285   :  { %v6250_v27 = vpop.f32.mrb[184].mxu1 }
 0x286   :  { %v6251_v11 = vpop.f32.mrb[185].mxu1 }
 0x287   :  { %v6252_v50 = vadd.f32 %v6251_v11, %v6250_v27  ;;  %v6253_v20 = vpop.f32.mrb[186].mxu1 }
 0x288   :  { %v6254_v30 = vpop.f32.mrb[187].mxu1 }
 0x289   :  { %v4950_v21 = vadd.f32 %v6252_v50, %v4869_v37  ;;  %v6255_v6 = vadd.f32 %v6254_v30, %v6253_v20 }
 0x28b   :  { %v4953_v43 = vadd.f32 %v6255_v6, %v4872_v15 }
 0x28d   :  { %v6256_v60 = vpop.f32.mrb[188].mxu1 }
 0x28e   :  { %v6257_v25 = vpop.f32.mrb[189].mxu1 }
 0x28f   :  { %v6258_v31 = vadd.f32 %v6257_v25, %v6256_v60  ;;  %v6259_v1 = vpop.f32.mrb[190].mxu1 }
 0x290   :  { %v6260_v59 = vpop.f32.mrb[191].mxu1 }
 0x291   :  { %v4958_v55 = vadd.f32 %v6258_v31, %v4877_v54  ;;  %v6261_v19 = vadd.f32 %v6260_v59, %v6259_v1 }
 0x293   :  { %v4961_v40 = vadd.f32 %v6261_v19, %v4880_v4 }
 0x295   :  { %v6278_v62 = vpop.f32.mrb[192].mxu1 }
 0x296   :  { %v6279_v38 = vpop.f32.mrb[193].mxu1 }
 0x297   :  { %v6280_v32 = vadd.f32 %v6279_v38, %v6278_v62  ;;  %v6281_v48 = vpop.f32.mrb[194].mxu1 }
 0x298   :  { %v6282_v5 = vpop.f32.mrb[195].mxu1 }
 0x299   :  { %v4999_v51 = vadd.f32 %v6280_v32, %v4918_v44  ;;  %v6283_v22 = vadd.f32 %v6282_v5, %v6281_v48 }
 0x29b   :  { %v5002_v10 = vadd.f32 %v6283_v22, %v4921_v53 }
 0x29d   :  { %v6284_v36 = vpop.f32.mrb[196].mxu1 }
 0x29e   :  { %v6285_v37 = vpop.f32.mrb[197].mxu1 }
 0x29f   :  { %v6286_v52 = vadd.f32 %v6285_v37, %v6284_v36  ;;  %v6287_v15 = vpop.f32.mrb[198].mxu1 }
 0x2a0   :  { %v6288_v23 = vpop.f32.mrb[199].mxu1 }
 0x2a1   :  { %v5007_v27 = vadd.f32 %v6286_v52, %v4926_v41  ;;  %v6289_v11 = vadd.f32 %v6288_v23, %v6287_v15 }
 0x2a3   :  { %v5010_v50 = vadd.f32 %v6289_v11, %v4929_v39 }
 0x2a5   :  { %v6290_v20 = vpop.f32.mrb[200].mxu1 }
 0x2a6   :  { %v6291_v54 = vpop.f32.mrb[201].mxu1 }
 0x2a7   :  { %v6292_v30 = vadd.f32 %v6291_v54, %v6290_v20  ;;  %v6293_v4 = vpop.f32.mrb[202].mxu1 }
 0x2a8   :  { %v6294_v6 = vpop.f32.mrb[203].mxu1 }
 0x2a9   :  { %v9503_v60 = vadd.f32 %v6292_v30, %v4934_v7  ;;  %v6295_v25 = vadd.f32 %v6294_v6, %v6293_v4 }
 0x2ab   :  { %v9505_v31 = vadd.f32 %v6295_v25, %v4937_v29 }
 0x2ad   :  { %v6296_v44 = vpop.f32.mrb[204].mxu1 }
 0x2ae   :  { %v6297_v53 = vpop.f32.mrb[205].mxu1 }
 0x2af   :  { %v6298_v1 = vadd.f32 %v6297_v53, %v6296_v44  ;;  %v6299_v59 = vpop.f32.mrb[206].mxu1 }
 0x2b0   :  { %v6300_v19 = vpop.f32.mrb[207].mxu1 }
 0x2b1   :  { %v9507_v62 = vadd.f32 %v6298_v1, %v4942_v42  ;;  %v6301_v41 = vadd.f32 %v6300_v19, %v6299_v59  ;;  %v703_v1 = vsub.s32 0, %v8871_v26  ;;  %v707_v59 = vsub.s32 1, %v8871_v26 }
 0x2b3   :  { %v9509_v38 = vadd.f32 %v6301_v41, %v4945_v61 }
 0x2b5   :  { %v6302_v39 = vpop.f32.mrb[208].mxu1 }
 0x2b6   :  { %v6303_v32 = vpop.f32.mrb[209].mxu1 }
 0x2b7   :  { %v6304_v48 = vadd.f32 %v6303_v32, %v6302_v39  ;;  %v6305_v5 = vpop.f32.mrb[210].mxu1 }
 0x2b8   :  { %v6306_v22 = vpop.f32.mrb[211].mxu1 }
 0x2b9   :  { %v9511_v7 = vadd.f32 %v6304_v48, %v4950_v21  ;;  %v6307_v36 = vadd.f32 %v6306_v22, %v6305_v5 }
 0x2bb   :  { %v9513_v29 = vadd.f32 %v6307_v36, %v4953_v43 }
 0x2bd   :  { %v6308_v37 = vpop.f32.mrb[212].mxu1 }
 0x2be   :  { %v6309_v52 = vpop.f32.mrb[213].mxu1 }
 0x2bf   :  { %v6310_v15 = vadd.f32 %v6309_v52, %v6308_v37  ;;  %v6311_v23 = vpop.f32.mrb[214].mxu1 }
 0x2c0   :  { %v6312_v11 = vpop.f32.mrb[215].mxu1 }
 0x2c1   :  { %v9515_v42 = vadd.f32 %v6310_v15, %v4958_v55  ;;  %v6313_v20 = vadd.f32 %v6312_v11, %v6311_v23 }
 0x2c3   :  { %v9517_v61 = vadd.f32 %v6313_v20, %v4961_v40 }
 0x2c5   :  { %v6330_v54 = vpop.f32.mrb[216].mxu1 }
 0x2c6   :  { %v6331_v30 = vpop.f32.mrb[217].mxu1 }
 0x2c7   :  { %v6332_v4 = vadd.f32 %v6331_v30, %v6330_v54  ;;  %v6333_v6 = vpop.f32.mrb[218].mxu1 }
 0x2c8   :  { %v6334_v25 = vpop.f32.mrb[219].mxu1 }
 0x2c9   :  { %v5080_v21 = vadd.f32 %v6332_v4, %v4999_v51  ;;  %v6335_v44 = vadd.f32 %v6334_v25, %v6333_v6  ;;  %v7320_v51 = vld [vmem:[%s9658_s2] sm:$0x7] }
 0x2ca   :  { %v9529_v22 = vrot.slane %v7320_v51, %v707_v59 }
 0x2cb   :  { %v5128_v53 = vmax.f32 %v5080_v21, 0.0  ;;  %v5083_v43 = vadd.f32 %v6335_v44, %v5002_v10  ;;  %v9527_v10 = vrot.slane %v7320_v51, %v703_v1 }
 0x2cc   :  { %v3597_v23 = vadd.f32 %v8469_v13, %v9529_v22 }
 0x2cd   :  { %v5875_v19 = vpack.c.bf16 %v5128_v53, %v5128_v53  ;;  %v5131_v41 = vmax.f32 %v5083_v43, 0.0  ;;  %v6336_v55 = vpop.f32.mrb[220].mxu1  ;;  %v3595_v15 = vadd.f32 %v8460_v58, %v9527_v10  ;;  %v3599_v4 = vadd.f32 %v8479_v3, %v9527_v10 }
 0x2ce   :  { %v6337_v39 = vpop.f32.mrb[221].mxu1 }
 0x2cf   :  { %5283 = vst [vmem:[%s9659_s3 + $0x8] sm:$0xf] %v5875_v19  ;;  %v5877_v40 = vpack.c.bf16 %v5131_v41, %v5131_v41  ;;  %v6338_v32 = vadd.f32 %v6337_v39, %v6336_v55  ;;  %v6339_v48 = vpop.f32.mrb[222].mxu1 }
 0x2d0   :  { %v6340_v5 = vpop.f32.mrb[223].mxu1 }
 0x2d1   :  { %5285 = vst [vmem:[%s9659_s3 + $0x14] sm:$0xf] %v5877_v40  ;;  %v5088_v26 = vadd.f32 %v6338_v32, %v5007_v27  ;;  %v6341_v36 = vadd.f32 %v6340_v5, %v6339_v48  ;;  %v3601_v27 = vadd.f32 %v8481_v8, %v9529_v22  ;;  %v3605_v5 = vadd.f32 %v8511_v24, %v9527_v10 }
 0x2d2   :  { %v3611_v24 = vadd.f32 %v8527_v35, %v9529_v22 }
 0x2d3   :  { %v5134_v37 = vmax.f32 %v5088_v26, 0.0  ;;  %v5091_v52 = vadd.f32 %v6341_v36, %v5010_v50  ;;  %v3607_v26 = vadd.f32 %v8517_v14, %v9529_v22 }
 0x2d5   :  { %v5879_v11 = vpack.c.bf16 %v5134_v37, %v5134_v37  ;;  %v5137_v20 = vmax.f32 %v5091_v52, 0.0  ;;  %v6342_v30 = vpop.f32.mrb[224].mxu1 }
 0x2d6   :  { %v4338_v54 = vpop.f32.mrb[0].mxu0  ;;  %v6343_v21 = vpop.f32.mrb[225].mxu1 }
 0x2d7   :  { %v6367_v6 = vadd.f32 %v4338_v54, %v3595_v15  ;;  %v4340_v25 = vpop.f32.mrb[1].mxu0  ;;  %5287 = vst [vmem:[%s9659_s3 + $0x20] sm:$0xf] %v5879_v11  ;;  %v5881_v58 = vpack.c.bf16 %v5137_v20, %v5137_v20  ;;  %v6344_v13 = vadd.f32 %v6343_v21, %v6342_v30  ;;  %v6345_v53 = vpop.f32.mrb[226].mxu1 }
 0x2d8   :  { %v6369_v50 = vadd.f32 %v4340_v25, %v3597_v23  ;;  %v4342_v44 = vpop.f32.mrb[2].mxu0  ;;  %v6346_v19 = vpop.f32.mrb[227].mxu1  ;;  %v3609_v23 = vadd.f32 %v8522_v28, %v9527_v10 }
 0x2d9   :  { %v5126_v43 = vmax.f32 %v6367_v6, 0.0  ;;  %v6371_v1 = vadd.f32 %v4342_v44, %v3599_v4  ;;  %v4344_v59 = vpop.f32.mrb[3].mxu0  ;;  %5289 = vst [vmem:[%s9659_s3 + $0x2c] sm:$0xf] %v5881_v58  ;;  %v5096_v8 = vadd.f32 %v6344_v13, %v9503_v60  ;;  %v6347_v55 = vadd.f32 %v6346_v19, %v6345_v53 }
 0x2da   :  { %v5127_v3 = vmax.f32 %v6369_v50, 0.0  ;;  %v6373_v41 = vadd.f32 %v4344_v59, %v3601_v27  ;;  %v3615_v19 = vadd.f32 %v8544_v33, %v9527_v10  ;;  %v3621_v33 = vadd.f32 %v8561_v9, %v9529_v22 }
 0x2db   :  { %v5129_v39 = vmax.f32 %v6371_v1, 0.0  ;;  %v5140_v32 = vmax.f32 %v5096_v8, 0.0  ;;  %v5099_v51 = vadd.f32 %v6347_v55, %v9505_v31 }
 0x2dc   :  { %v5874_v40 = vpack.c.bf16 %v5127_v3, %v5126_v43  ;;  %v5130_v48 = vmax.f32 %v6373_v41, 0.0  ;;  %v3617_v3 = vadd.f32 %v8549_v34, %v9529_v22 }
 0x2dd   :  { %v5883_v36 = vpack.c.bf16 %v5140_v32, %v5140_v32  ;;  %v5143_v37 = vmax.f32 %v5099_v51, 0.0  ;;  %v6348_v15 = vpop.f32.mrb[228].mxu1 }
 0x2de   :  { %5282 = vst [vmem:[%s9659_s3] sm:$0xff] %v5874_v40  ;;  %v5876_v60 = vpack.c.bf16 %v5130_v48, %v5129_v39  ;;  %v4348_v52 = vpop.f32.mrb[4].mxu0  ;;  %v6349_v20 = vpop.f32.mrb[229].mxu1  ;;  %v3619_v40 = vadd.f32 %v8556_v18, %v9527_v10 }
 0x2df   :  { %v6375_v11 = vadd.f32 %v4348_v52, %v3605_v5  ;;  %v4350_v31 = vpop.f32.mrb[5].mxu0  ;;  %5291 = vst [vmem:[%s9659_s3 + $0x38] sm:$0xf] %v5883_v36  ;;  %v5885_v14 = vpack.c.bf16 %v5143_v37, %v5143_v37  ;;  %v6350_v30 = vadd.f32 %v6349_v20, %v6348_v15  ;;  %v6351_v6 = vpop.f32.mrb[230].mxu1 }
 0x2e0   :  { %5284 = vst [vmem:[%s9659_s3 + $0xc] sm:$0xff] %v5876_v60  ;;  %v6377_v54 = vadd.f32 %v4350_v31, %v3607_v26  ;;  %v4352_v4 = vpop.f32.mrb[6].mxu0  ;;  %v6352_v27 = vpop.f32.mrb[231].mxu1 }
 0x2e1   :  { %v5132_v28 = vmax.f32 %v6375_v11, 0.0  ;;  %v6379_v25 = vadd.f32 %v4352_v4, %v3609_v23  ;;  %v4354_v21 = vpop.f32.mrb[7].mxu0  ;;  %5293 = vst [vmem:[%s9659_s3 + $0x44] sm:$0xf] %v5885_v14  ;;  %v5104_v58 = vadd.f32 %v6350_v30, %v9507_v62  ;;  %v6353_v13 = vadd.f32 %v6352_v27, %v6351_v6 }
 0x2e2   :  { %v5133_v35 = vmax.f32 %v6377_v54, 0.0  ;;  %v6381_v50 = vadd.f32 %v4354_v21, %v3611_v24  ;;  %v3625_v30 = vadd.f32 %v8578_v16, %v9527_v10  ;;  %v3627_v4 = vadd.f32 %v8583_v47, %v9529_v22 }
 0x2e3   :  { %v5135_v44 = vmax.f32 %v6379_v25, 0.0  ;;  %v5146_v43 = vmax.f32 %v5104_v58, 0.0  ;;  %v5107_v59 = vadd.f32 %v6353_v13, %v9509_v38  ;;  %v3629_v27 = vadd.f32 %v8588_v45, %v9527_v10 }
 0x2e4   :  { %v5878_v53 = vpack.c.bf16 %v5133_v35, %v5132_v28  ;;  %v5136_v1 = vmax.f32 %v6381_v50, 0.0  ;;  %v3631_v16 = vadd.f32 %v8590_v46, %v9529_v22 }
 0x2e5   :  { %v5887_v8 = vpack.c.bf16 %v5146_v43, %v5146_v43  ;;  %v5149_v41 = vmax.f32 %v5107_v59, 0.0  ;;  %v6354_v39 = vpop.f32.mrb[232].mxu1 }
 0x2e6   :  { %5286 = vst [vmem:[%s9659_s3 + $0x18] sm:$0xff] %v5878_v53  ;;  %v5880_v62 = vpack.c.bf16 %v5136_v1, %v5135_v44  ;;  %v4358_v55 = vpop.f32.mrb[8].mxu0  ;;  %v6355_v48 = vpop.f32.mrb[233].mxu1 }
 0x2e7   :  { %v6383_v32 = vadd.f32 %v4358_v55, %v3615_v19  ;;  %v4360_v38 = vpop.f32.mrb[9].mxu0  ;;  %5295 = vst [vmem:[%s9659_s3 + $0x50] sm:$0xf] %v5887_v8  ;;  %v5889_v34 = vpack.c.bf16 %v5149_v41, %v5149_v41  ;;  %v6356_v5 = vadd.f32 %v6355_v48, %v6354_v39  ;;  %v6357_v36 = vpop.f32.mrb[234].mxu1 }
 0x2e8   :  { %5288 = vst [vmem:[%s9659_s3 + $0x24] sm:$0xff] %v5880_v62  ;;  %v6385_v51 = vadd.f32 %v4360_v38, %v3617_v3  ;;  %v4362_v26 = vpop.f32.mrb[10].mxu0  ;;  %v6358_v52 = vpop.f32.mrb[235].mxu1  ;;  %v3637_v38 = vadd.f32 %v8617_v2, %v9529_v22 }
 0x2e9   :  { %v5138_v18 = vmax.f32 %v6383_v32, 0.0  ;;  %v6387_v60 = vadd.f32 %v4362_v26, %v3619_v40  ;;  %v4364_v37 = vpop.f32.mrb[11].mxu0  ;;  %5297 = vst [vmem:[%s9659_s3 + $0x5c] sm:$0xf] %v5889_v34  ;;  %v5112_v15 = vadd.f32 %v6356_v5, %v9511_v7  ;;  %v6359_v11 = vadd.f32 %v6358_v52, %v6357_v36 }
 0x2ea   :  { %v5139_v9 = vmax.f32 %v6385_v51, 0.0  ;;  %v6389_v23 = vadd.f32 %v4364_v37, %v3621_v33  ;;  %v3635_v32 = vadd.f32 %v8612_v0, %v9527_v10  ;;  %v3639_v51 = vadd.f32 %v8622_v63, %v9527_v10 }
 0x2eb   :  { %v5141_v31 = vmax.f32 %v6387_v60, 0.0  ;;  %v5152_v24 = vmax.f32 %v5112_v15, 0.0  ;;  %v5115_v54 = vadd.f32 %v6359_v11, %v9513_v29  ;;  %v3647_v11 = vadd.f32 %v8653_v12, %v9529_v22 }
 0x2ec   :  { %v5882_v20 = vpack.c.bf16 %v5139_v9, %v5138_v18  ;;  %v5142_v14 = vmax.f32 %v6389_v23, 0.0  ;;  %v3645_v23 = vadd.f32 %v8643_v49, %v9527_v10 }
 0x2ed   :  { %v5891_v6 = vpack.c.bf16 %v5152_v24, %v5152_v24  ;;  %v5155_v28 = vmax.f32 %v5115_v54, 0.0  ;;  %v6360_v21 = vpop.f32.mrb[236].mxu1  ;;  %v3649_v24 = vadd.f32 %v8658_v56, %v9527_v10 }
 0x2ee   :  { %5290 = vst [vmem:[%s9659_s3 + $0x30] sm:$0xff] %v5882_v20  ;;  %v5884_v7 = vpack.c.bf16 %v5142_v14, %v5141_v31  ;;  %v4368_v25 = vpop.f32.mrb[12].mxu0  ;;  %v6361_v58 = vpop.f32.mrb[237].mxu1 }
 0x2ef   :  { %v6391_v35 = vadd.f32 %v4368_v25, %v3625_v30  ;;  %v4370_v29 = vpop.f32.mrb[13].mxu0  ;;  %5299 = vst [vmem:[%s9659_s3 + $0x68] sm:$0xf] %v5891_v6  ;;  %v5893_v47 = vpack.c.bf16 %v5155_v28, %v5155_v28  ;;  %v6362_v13 = vadd.f32 %v6361_v58, %v6360_v21  ;;  %v6363_v53 = vpop.f32.mrb[238].mxu1  ;;  %v3651_v30 = vadd.f32 %v8663_v17, %v9529_v22 }
 0x2f0   :  { %5292 = vst [vmem:[%s9659_s3 + $0x3c] sm:$0xff] %v5884_v7  ;;  %v6393_v50 = vadd.f32 %v4370_v29, %v3627_v4  ;;  %v4372_v44 = vpop.f32.mrb[14].mxu0  ;;  %v6364_v59 = vpop.f32.mrb[239].mxu1 }
 0x2f1   :  { %v5144_v45 = vmax.f32 %v6391_v35, 0.0  ;;  %v6395_v43 = vadd.f32 %v4372_v44, %v3629_v27  ;;  %v4374_v1 = vpop.f32.mrb[15].mxu0  ;;  %5301 = vst [vmem:[%s9659_s3 + $0x74] sm:$0xf] %v5893_v47  ;;  %v5120_v19 = vadd.f32 %v6362_v13, %v9515_v42  ;;  %v6365_v8 = vadd.f32 %v6364_v59, %v6363_v53 }
 0x2f2   :  { %v5145_v46 = vmax.f32 %v6393_v50, 0.0  ;;  %v6397_v3 = vadd.f32 %v4374_v1, %v3631_v16 }
 0x2f3   :  { %v5147_v62 = vmax.f32 %v6395_v43, 0.0  ;;  %v5158_v55 = vmax.f32 %v5120_v19, 0.0  ;;  %v5123_v40 = vadd.f32 %v6365_v8, %v9517_v61  ;;  %v3641_v61 = vadd.f32 %v8624_v57, %v9529_v22 }
 0x2f4   :  { %v5886_v41 = vpack.c.bf16 %v5145_v46, %v5144_v45  ;;  %v5148_v39 = vmax.f32 %v6397_v3, 0.0 }
 0x2f5   :  { %v5895_v48 = vpack.c.bf16 %v5158_v55, %v5158_v55  ;;  %v5161_v33 = vmax.f32 %v5123_v40, 0.0 }
 0x2f6   :  { %5294 = vst [vmem:[%s9659_s3 + $0x48] sm:$0xff] %v5886_v41  ;;  %v5888_v42 = vpack.c.bf16 %v5148_v39, %v5147_v62  ;;  %v4378_v34 = vpop.f32.mrb[16].mxu0 }
 0x2f7   :  { %v6399_v5 = vadd.f32 %v4378_v34, %v3635_v32  ;;  %v4380_v26 = vpop.f32.mrb[17].mxu0  ;;  %5303 = vst [vmem:[%s9659_s3 + $0x80] sm:$0xf] %v5895_v48  ;;  %v5897_v0 = vpack.c.bf16 %v5161_v33, %v5161_v33 }
 0x2f8   :  { %5296 = vst [vmem:[%s9659_s3 + $0x54] sm:$0xff] %v5888_v42  ;;  %v6401_v2 = vadd.f32 %v4380_v26, %v3637_v38  ;;  %v4382_v36 = vpop.f32.mrb[18].mxu0 }
 0x2f9   :  { %v5150_v18 = vmax.f32 %v6399_v5, 0.0  ;;  %v6403_v60 = vadd.f32 %v4382_v36, %v3639_v51  ;;  %v4384_v37 = vpop.f32.mrb[19].mxu0  ;;  %5305 = vst [vmem:[%s9659_s3 + $0x8c] sm:$0xf] %v5897_v0 }
 0x2fa   :  { %v5151_v63 = vmax.f32 %v6401_v2, 0.0  ;;  %v6405_v57 = vadd.f32 %v4384_v37, %v3641_v61 }
 0x2fb   :  { %v5153_v52 = vmax.f32 %v6403_v60, 0.0 }
 0x2fc   :  { %v5890_v9 = vpack.c.bf16 %v5151_v63, %v5150_v18  ;;  %v5154_v15 = vmax.f32 %v6405_v57, 0.0 }
 0x2fe   :  { %5298 = vst [vmem:[%s9659_s3 + $0x60] sm:$0xff] %v5890_v9  ;;  %v5892_v31 = vpack.c.bf16 %v5154_v15, %v5153_v52  ;;  %v4388_v20 = vpop.f32.mrb[20].mxu0 }
 0x2ff   :  { %v6407_v14 = vadd.f32 %v4388_v20, %v3645_v23  ;;  %v4390_v54 = vpop.f32.mrb[21].mxu0 }
 0x300   :  { %5300 = vst [vmem:[%s9659_s3 + $0x6c] sm:$0xff] %v5892_v31  ;;  %v6409_v49 = vadd.f32 %v4390_v54, %v3647_v11  ;;  %v4392_v12 = vpop.f32.mrb[22].mxu0 }
 0x301   :  { %v5156_v4 = vmax.f32 %v6407_v14, 0.0  ;;  %v6411_v6 = vadd.f32 %v4392_v12, %v3649_v24  ;;  %v4394_v7 = vpop.f32.mrb[23].mxu0 }
 0x302   :  { %v5157_v28 = vmax.f32 %v6409_v49, 0.0  ;;  %v6413_v25 = vadd.f32 %v4394_v7, %v3651_v30 }
 0x303   :  { %v5159_v21 = vmax.f32 %v6411_v6, 0.0 }
 0x304   :  { %v5894_v27 = vpack.c.bf16 %v5157_v28, %v5156_v4  ;;  %v5160_v35 = vmax.f32 %v6413_v25, 0.0 }
 0x306   :  { %5302 = vst [vmem:[%s9659_s3 + $0x78] sm:$0xff] %v5894_v27  ;;  %v5896_v56 = vpack.c.bf16 %v5160_v35, %v5159_v21 }
 0x308   :  { %5304 = vst [vmem:[%s9659_s3 + $0x84] sm:$0xff] %v5896_v56 }

// kernel: base_model_forward.9
= control target key start
LH: loop header
LB: loop body
LE: loop exit
PB: predicated region body
PF: predicated region fallthrough
CT: control target
= control target key end

     0   :  { %s6022_s1 = inlined_call_operand.vmem [shape: bf16[3456,256], index: 1, kind: input, shape index: {}]   ;;  %s6023_s0 = inlined_call_operand.vmem [shape: bf16[10,3456], index: 0, kind: input, shape index: {}]   ;;  %s6024_s2 = inlined_call_operand.vmem [shape: f32[1,256], index: 2, kind: input, shape index: {}]   ;;  %s6025_s3 = inlined_call_operand.vmem [shape: bf16[10,256], index: 3, kind: output, shape index: {}]  }
   0x1   :  { %v3927_v0 = vld [vmem:[%s6022_s1 + $0x4] ss:$8 sps:$4 sm:$0xff]   ;;  %v3931_v2 = vld [vmem:[%s6022_s1] ss:$8 sps:$4 sm:$0xff]   ;;  %v3933_v4 = vld [vmem:[%s6022_s1 + $0x14] ss:$8 sps:$4 sm:$0xff]  }
   0x2   :  { %v3929_v1 = vld [vmem:[%s6022_s1 + $0x704] ss:$8 sps:$4 sm:$0xff]   ;;  %2783 = vmatprep.subr.bf16.mxu1 %v3927_v0  ;;  %v3932_v3 = vld [vmem:[%s6022_s1 + $0x700] ss:$8 sps:$4 sm:$0xff]   ;;  %v3935_v5 = vld [vmem:[%s6022_s1 + $0x714] ss:$8 sps:$4 sm:$0xff]  }
   0x3   :  { %3084 = vmatprep.subr.bf16.mxu0 %v3929_v1  ;;  %2784 = vmatpush1.bf16.msra.mxu1 %v3931_v2  ;;  %v3937_v6 = vld [vmem:[%s6022_s1 + $0x10] ss:$8 sps:$4 sm:$0xff]   ;;  %v3939_v8 = vld [vmem:[%s6022_s1 + $0x24] ss:$8 sps:$4 sm:$0xff]   ;;  %v3943_v10 = vld [vmem:[%s6022_s1 + $0x20] ss:$8 sps:$4 sm:$0xff]  }
   0x4   :  { %3085 = vmatpush1.bf16.msra.mxu0 %v3932_v3  ;;  %2785 = vmatprep.subr.bf16.mxu1 %v3933_v4  ;;  %v3938_v7 = vld [vmem:[%s6022_s1 + $0x710] ss:$8 sps:$4 sm:$0xff]   ;;  %v3941_v9 = vld [vmem:[%s6022_s1 + $0x724] ss:$8 sps:$4 sm:$0xff]   ;;  %v3944_v11 = vld [vmem:[%s6022_s1 + $0x720] ss:$8 sps:$4 sm:$0xff]  }
   0x5   :  { %3086 = vmatprep.subr.bf16.mxu0 %v3935_v5  ;;  %v3945_v12 = vld [vmem:[%s6022_s1 + $0x34] ss:$8 sps:$4 sm:$0xff]   ;;  %v3949_v14 = vld [vmem:[%s6022_s1 + $0x30] ss:$8 sps:$4 sm:$0xff]   ;;  %v3951_v16 = vld [vmem:[%s6022_s1 + $0x44] ss:$8 sps:$4 sm:$0xff]  }
   0x6   :  { %v3947_v13 = vld [vmem:[%s6022_s1 + $0x734] ss:$8 sps:$4 sm:$0xff]   ;;  %v3950_v15 = vld [vmem:[%s6022_s1 + $0x730] ss:$8 sps:$4 sm:$0xff]   ;;  %v3953_v17 = vld [vmem:[%s6022_s1 + $0x744] ss:$8 sps:$4 sm:$0xff]  }
   0x7   :  { %2786 = vmatpush1.bf16.msra.mxu1 %v3937_v6  ;;  %v3955_v18 = vld [vmem:[%s6022_s1 + $0x40] ss:$8 sps:$4 sm:$0xff]   ;;  %v3957_v20 = vld [vmem:[%s6022_s1 + $0x54] ss:$8 sps:$4 sm:$0xff]   ;;  %v3961_v22 = vld [vmem:[%s6022_s1 + $0x50] ss:$8 sps:$4 sm:$0xff]  }
   0x8   :  { %3087 = vmatpush1.bf16.msra.mxu0 %v3938_v7  ;;  %2787 = vmatprep.subr.bf16.mxu1 %v3939_v8  ;;  %v3956_v19 = vld [vmem:[%s6022_s1 + $0x740] ss:$8 sps:$4 sm:$0xff]   ;;  %v3959_v21 = vld [vmem:[%s6022_s1 + $0x754] ss:$8 sps:$4 sm:$0xff]   ;;  %v3962_v23 = vld [vmem:[%s6022_s1 + $0x750] ss:$8 sps:$4 sm:$0xff]  }
   0x9   :  { %3088 = vmatprep.subr.bf16.mxu0 %v3941_v9  ;;  %v3963_v24 = vld [vmem:[%s6022_s1 + $0x64] ss:$8 sps:$4 sm:$0xff]   ;;  %v3967_v26 = vld [vmem:[%s6022_s1 + $0x60] ss:$8 sps:$4 sm:$0xff]   ;;  %v3969_v28 = vld [vmem:[%s6022_s1 + $0x74] ss:$8 sps:$4 sm:$0xff]  }
   0xa   :  { %v3965_v25 = vld [vmem:[%s6022_s1 + $0x764] ss:$8 sps:$4 sm:$0xff]   ;;  %v3968_v27 = vld [vmem:[%s6022_s1 + $0x760] ss:$8 sps:$4 sm:$0xff]   ;;  %v3971_v29 = vld [vmem:[%s6022_s1 + $0x774] ss:$8 sps:$4 sm:$0xff]  }
   0xb   :  { %2788 = vmatpush1.bf16.msra.mxu1 %v3943_v10  ;;  %v3973_v30 = vld [vmem:[%s6022_s1 + $0x70] ss:$8 sps:$4 sm:$0xff]   ;;  %v3975_v32 = vld [vmem:[%s6022_s1 + $0x84] ss:$8 sps:$4 sm:$0xff]   ;;  %v3979_v34 = vld [vmem:[%s6022_s1 + $0x80] ss:$8 sps:$4 sm:$0xff]  }
   0xc   :  { %3089 = vmatpush1.bf16.msra.mxu0 %v3944_v11  ;;  %2789 = vmatprep.subr.bf16.mxu1 %v3945_v12  ;;  %v3974_v31 = vld [vmem:[%s6022_s1 + $0x770] ss:$8 sps:$4 sm:$0xff]   ;;  %v3977_v33 = vld [vmem:[%s6022_s1 + $0x784] ss:$8 sps:$4 sm:$0xff]   ;;  %v3980_v35 = vld [vmem:[%s6022_s1 + $0x780] ss:$8 sps:$4 sm:$0xff]  }
   0xd   :  { %3090 = vmatprep.subr.bf16.mxu0 %v3947_v13  ;;  %v3981_v36 = vld [vmem:[%s6022_s1 + $0x94] ss:$8 sps:$4 sm:$0xff]   ;;  %v3985_v38 = vld [vmem:[%s6022_s1 + $0x90] ss:$8 sps:$4 sm:$0xff]   ;;  %v3987_v40 = vld [vmem:[%s6022_s1 + $0xa4] ss:$8 sps:$4 sm:$0xff]  }
   0xe   :  { %v3983_v37 = vld [vmem:[%s6022_s1 + $0x794] ss:$8 sps:$4 sm:$0xff]   ;;  %v3986_v39 = vld [vmem:[%s6022_s1 + $0x790] ss:$8 sps:$4 sm:$0xff]   ;;  %v3989_v41 = vld [vmem:[%s6022_s1 + $0x7a4] ss:$8 sps:$4 sm:$0xff]  }
   0xf   :  { %2790 = vmatpush1.bf16.msra.mxu1 %v3949_v14  ;;  %v3991_v42 = vld [vmem:[%s6022_s1 + $0xa0] ss:$8 sps:$4 sm:$0xff]   ;;  %v3993_v44 = vld [vmem:[%s6022_s1 + $0xb4] ss:$8 sps:$4 sm:$0xff]   ;;  %v3997_v46 = vld [vmem:[%s6022_s1 + $0xb0] ss:$8 sps:$4 sm:$0xff]  }
  0x10   :  { %3091 = vmatpush1.bf16.msra.mxu0 %v3950_v15  ;;  %2791 = vmatprep.subr.bf16.mxu1 %v3951_v16  ;;  %v3992_v43 = vld [vmem:[%s6022_s1 + $0x7a0] ss:$8 sps:$4 sm:$0xff]   ;;  %v3995_v45 = vld [vmem:[%s6022_s1 + $0x7b4] ss:$8 sps:$4 sm:$0xff]   ;;  %v3998_v47 = vld [vmem:[%s6022_s1 + $0x7b0] ss:$8 sps:$4 sm:$0xff]  }
  0x11   :  { %3092 = vmatprep.subr.bf16.mxu0 %v3953_v17  ;;  %v4025_v48 = vld [vmem:[%s6023_s0 + $0x4] ss:$108 sps:$4 sm:$0xff]   ;;  %v4031_v51 = vld [vmem:[%s6023_s0 + $0x3c] ss:$108 sps:$4 sm:$0xff]   ;;  %v4023_v4 = vld [vmem:[%s6023_s0] ss:$108 sps:$4 sm:$0xff]  }
  0x12   :  { %v3999_v49 = vld [vmem:[%s6022_s1 + $0xc4] ss:$8 sps:$4 sm:$0xff]   ;;  %2815 = vmatprep.mubr.bf16.mxu1 %v4025_v48  ;;  %v4003_v52 = vld [vmem:[%s6022_s1 + $0xc0] ss:$8 sps:$4 sm:$0xff]   ;;  %v4005_v54 = vld [vmem:[%s6022_s1 + $0xd4] ss:$8 sps:$4 sm:$0xff]   ;;  %3116 = vmatprep.mubr.bf16.mxu0 %v4031_v51 }
  0x13   :  { %2792 = vmatpush1.bf16.msra.mxu1 %v3955_v18  ;;  %v4001_v50 = vld [vmem:[%s6022_s1 + $0x7c4] ss:$8 sps:$4 sm:$0xff]   ;;  %v4004_v53 = vld [vmem:[%s6022_s1 + $0x7c0] ss:$8 sps:$4 sm:$0xff]   ;;  %v4007_v55 = vld [vmem:[%s6022_s1 + $0x7d4] ss:$8 sps:$4 sm:$0xff]  }
  0x14   :  { %3093 = vmatpush1.bf16.msra.mxu0 %v3956_v19  ;;  %2793 = vmatprep.subr.bf16.mxu1 %v3957_v20  ;;  %v4009_v56 = vld [vmem:[%s6022_s1 + $0xd0] ss:$8 sps:$4 sm:$0xff]   ;;  %v4011_v58 = vld [vmem:[%s6022_s1 + $0xe4] ss:$8 sps:$4 sm:$0xff]   ;;  %v4015_v60 = vld [vmem:[%s6022_s1 + $0xe0] ss:$8 sps:$4 sm:$0xff]  }
  0x15   :  { %3094 = vmatprep.subr.bf16.mxu0 %v3959_v21  ;;  %v4010_v57 = vld [vmem:[%s6022_s1 + $0x7d0] ss:$8 sps:$4 sm:$0xff]   ;;  %v4013_v59 = vld [vmem:[%s6022_s1 + $0x7e4] ss:$8 sps:$4 sm:$0xff]   ;;  %v4016_v61 = vld [vmem:[%s6022_s1 + $0x7e0] ss:$8 sps:$4 sm:$0xff]  }
  0x16   :  { %v4017_v62 = vld [vmem:[%s6022_s1 + $0xf4] ss:$8 sps:$4 sm:$0xff]   ;;  %v4021_v0 = vld [vmem:[%s6022_s1 + $0xf0] ss:$8 sps:$4 sm:$0xff]   ;;  %v4028_v2 = vld [vmem:[%s6022_s1 + $0x104] ss:$8 sps:$4 sm:$0xff]  }
  0x17   :  { %2794 = vmatpush1.bf16.msra.mxu1 %v3961_v22  ;;  %v4019_v63 = vld [vmem:[%s6022_s1 + $0x7f4] ss:$8 sps:$4 sm:$0xff]   ;;  %v4022_v1 = vld [vmem:[%s6022_s1 + $0x7f0] ss:$8 sps:$4 sm:$0xff]   ;;  %v4034_v3 = vld [vmem:[%s6022_s1 + $0x804] ss:$8 sps:$4 sm:$0xff]  }
  0x18   :  { %3095 = vmatpush1.bf16.msra.mxu0 %v3962_v23  ;;  %2795 = vmatprep.subr.bf16.mxu1 %v3963_v24  ;;  %v4026_v5 = vld [vmem:[%s6022_s1 + $0x100] ss:$8 sps:$4 sm:$0xff]   ;;  %v4029_v6 = vld [vmem:[%s6023_s0 + $0x38] ss:$108 sps:$4 sm:$0xff]   ;;  %v4037_v8 = vld [vmem:[%s6022_s1 + $0x114] ss:$8 sps:$4 sm:$0xff]  }
  0x19   :  { %3096 = vmatprep.subr.bf16.mxu0 %v3965_v25  ;;  %v4032_v7 = vld [vmem:[%s6022_s1 + $0x800] ss:$8 sps:$4 sm:$0xff]   ;;  %v4040_v9 = vld [vmem:[%s6022_s1 + $0x814] ss:$8 sps:$4 sm:$0xff]   ;;  %v4035_v10 = vld [vmem:[%s6022_s1 + $0x110] ss:$8 sps:$4 sm:$0xff]  }
  0x1a   :  { %v4038_v11 = vld [vmem:[%s6022_s1 + $0x810] ss:$8 sps:$4 sm:$0xff]   ;;  %v4043_v12 = vld [vmem:[%s6022_s1 + $0x124] ss:$8 sps:$4 sm:$0xff]   ;;  %v4041_v14 = vld [vmem:[%s6022_s1 + $0x120] ss:$8 sps:$4 sm:$0xff]  }
  0x1b   :  { %2796 = vmatpush1.bf16.msra.mxu1 %v3967_v26  ;;  %v4046_v13 = vld [vmem:[%s6022_s1 + $0x824] ss:$8 sps:$4 sm:$0xff]   ;;  %v4044_v15 = vld [vmem:[%s6022_s1 + $0x820] ss:$8 sps:$4 sm:$0xff]   ;;  %v4049_v16 = vld [vmem:[%s6022_s1 + $0x134] ss:$8 sps:$4 sm:$0xff]  }
  0x1c   :  { %3097 = vmatpush1.bf16.msra.mxu0 %v3968_v27  ;;  %2797 = vmatprep.subr.bf16.mxu1 %v3969_v28  ;;  %v4052_v17 = vld [vmem:[%s6022_s1 + $0x834] ss:$8 sps:$4 sm:$0xff]   ;;  %v4047_v18 = vld [vmem:[%s6022_s1 + $0x130] ss:$8 sps:$4 sm:$0xff]   ;;  %v4055_v20 = vld [vmem:[%s6022_s1 + $0x144] ss:$8 sps:$4 sm:$0xff]  }
  0x1d   :  { %3098 = vmatprep.subr.bf16.mxu0 %v3971_v29  ;;  %v4050_v19 = vld [vmem:[%s6022_s1 + $0x830] ss:$8 sps:$4 sm:$0xff]   ;;  %v4058_v21 = vld [vmem:[%s6022_s1 + $0x844] ss:$8 sps:$4 sm:$0xff]   ;;  %v4053_v22 = vld [vmem:[%s6022_s1 + $0x140] ss:$8 sps:$4 sm:$0xff]  }
  0x1e   :  { %v4056_v23 = vld [vmem:[%s6022_s1 + $0x840] ss:$8 sps:$4 sm:$0xff]   ;;  %v4061_v24 = vld [vmem:[%s6022_s1 + $0x154] ss:$8 sps:$4 sm:$0xff]   ;;  %v4059_v26 = vld [vmem:[%s6022_s1 + $0x150] ss:$8 sps:$4 sm:$0xff]  }
  0x1f   :  { %2798 = vmatpush1.bf16.msra.mxu1 %v3973_v30  ;;  %v4064_v25 = vld [vmem:[%s6022_s1 + $0x854] ss:$8 sps:$4 sm:$0xff]   ;;  %v4062_v27 = vld [vmem:[%s6022_s1 + $0x850] ss:$8 sps:$4 sm:$0xff]   ;;  %v4067_v28 = vld [vmem:[%s6022_s1 + $0x164] ss:$8 sps:$4 sm:$0xff]  }
  0x20   :  { %3099 = vmatpush1.bf16.msra.mxu0 %v3974_v31  ;;  %2799 = vmatprep.subr.bf16.mxu1 %v3975_v32  ;;  %v4070_v29 = vld [vmem:[%s6022_s1 + $0x864] ss:$8 sps:$4 sm:$0xff]   ;;  %v4065_v30 = vld [vmem:[%s6022_s1 + $0x160] ss:$8 sps:$4 sm:$0xff]   ;;  %v4073_v32 = vld [vmem:[%s6022_s1 + $0x174] ss:$8 sps:$4 sm:$0xff]  }
  0x21   :  { %3100 = vmatprep.subr.bf16.mxu0 %v3977_v33  ;;  %v4068_v31 = vld [vmem:[%s6022_s1 + $0x860] ss:$8 sps:$4 sm:$0xff]   ;;  %v4076_v33 = vld [vmem:[%s6022_s1 + $0x874] ss:$8 sps:$4 sm:$0xff]  }
  0x22   :  { %v4089_v48 = vld [vmem:[%s6022_s1 + $0x1a0] ss:$8 sps:$4 sm:$0xff]   ;;  %v4100_v51 = vld [vmem:[%s6022_s1 + $0x8b4] ss:$8 sps:$4 sm:$0xff]  }
  0x23   :  { %2800 = vmatpush1.bf16.msra.mxu1 %v3979_v34  ;;  %v4127_v34 = vld [vmem:[%s6023_s0 + $0xc] ss:$108 sps:$4 sm:$0xff]  }
  0x24   :  { %3101 = vmatpush1.bf16.msra.mxu0 %v3980_v35  ;;  %2801 = vmatprep.subr.bf16.mxu1 %v3981_v36  ;;  %v4071_v35 = vld [vmem:[%s6022_s1 + $0x170] ss:$8 sps:$4 sm:$0xff]  }
  0x25   :  { %3102 = vmatprep.subr.bf16.mxu0 %v3983_v37  ;;  %v4074_v36 = vld [vmem:[%s6022_s1 + $0x870] ss:$8 sps:$4 sm:$0xff]  }
  0x26   :  { %v4133_v37 = vld [vmem:[%s6023_s0 + $0x44] ss:$108 sps:$4 sm:$0xff]  }
  0x27   :  { %2802 = vmatpush1.bf16.msra.mxu1 %v3985_v38  ;;  %v4079_v38 = vld [vmem:[%s6022_s1 + $0x184] ss:$8 sps:$4 sm:$0xff]  }
  0x28   :  { %3103 = vmatpush1.bf16.msra.mxu0 %v3986_v39  ;;  %2803 = vmatprep.subr.bf16.mxu1 %v3987_v40  ;;  %v4082_v39 = vld [vmem:[%s6022_s1 + $0x884] ss:$8 sps:$4 sm:$0xff]   ;;  %v4077_v40 = vld [vmem:[%s6022_s1 + $0x180] ss:$8 sps:$4 sm:$0xff]  }
  0x29   :  { %3104 = vmatprep.subr.bf16.mxu0 %v3989_v41  ;;  %v4080_v41 = vld [vmem:[%s6022_s1 + $0x880] ss:$8 sps:$4 sm:$0xff]  }
  0x2b   :  { %2804 = vmatpush1.bf16.msra.mxu1 %v3991_v42  ;;  %v4085_v42 = vld [vmem:[%s6022_s1 + $0x194] ss:$8 sps:$4 sm:$0xff]  }
  0x2c   :  { %3105 = vmatpush1.bf16.msra.mxu0 %v3992_v43  ;;  %2805 = vmatprep.subr.bf16.mxu1 %v3993_v44  ;;  %v4088_v43 = vld [vmem:[%s6022_s1 + $0x894] ss:$8 sps:$4 sm:$0xff]   ;;  %v4083_v44 = vld [vmem:[%s6022_s1 + $0x190] ss:$8 sps:$4 sm:$0xff]  }
  0x2d   :  { %3106 = vmatprep.subr.bf16.mxu0 %v3995_v45  ;;  %v4086_v45 = vld [vmem:[%s6022_s1 + $0x890] ss:$8 sps:$4 sm:$0xff]  }
  0x2f   :  { %2806 = vmatpush1.bf16.msra.mxu1 %v3997_v46  ;;  %v4091_v46 = vld [vmem:[%s6022_s1 + $0x1a4] ss:$8 sps:$4 sm:$0xff]  }
  0x30   :  { %3107 = vmatpush1.bf16.msra.mxu0 %v3998_v47  ;;  %2807 = vmatprep.subr.bf16.mxu1 %v3999_v49  ;;  %v4094_v47 = vld [vmem:[%s6022_s1 + $0x8a4] ss:$8 sps:$4 sm:$0xff]   ;;  %v4092_v49 = vld [vmem:[%s6022_s1 + $0x8a0] ss:$8 sps:$4 sm:$0xff]  }
  0x31   :  { %3108 = vmatprep.subr.bf16.mxu0 %v4001_v50  ;;  %v4097_v50 = vld [vmem:[%s6022_s1 + $0x1b4] ss:$8 sps:$4 sm:$0xff]  }
  0x33   :  { %2808 = vmatpush1.bf16.msra.mxu1 %v4003_v52  ;;  %v4095_v52 = vld [vmem:[%s6022_s1 + $0x1b0] ss:$8 sps:$4 sm:$0xff]  }
  0x34   :  { %3109 = vmatpush1.bf16.msra.mxu0 %v4004_v53  ;;  %2809 = vmatprep.subr.bf16.mxu1 %v4005_v54  ;;  %v4098_v53 = vld [vmem:[%s6022_s1 + $0x8b0] ss:$8 sps:$4 sm:$0xff]   ;;  %v4103_v54 = vld [vmem:[%s6022_s1 + $0x1c4] ss:$8 sps:$4 sm:$0xff]  }
  0x35   :  { %3110 = vmatprep.subr.bf16.mxu0 %v4007_v55  ;;  %v4106_v55 = vld [vmem:[%s6022_s1 + $0x8c4] ss:$8 sps:$4 sm:$0xff]  }
  0x37   :  { %2810 = vmatpush1.bf16.msra.mxu1 %v4009_v56  ;;  %v4101_v56 = vld [vmem:[%s6022_s1 + $0x1c0] ss:$8 sps:$4 sm:$0xff]  }
  0x38   :  { %3111 = vmatpush1.bf16.msra.mxu0 %v4010_v57  ;;  %2811 = vmatprep.subr.bf16.mxu1 %v4011_v58  ;;  %v4104_v57 = vld [vmem:[%s6022_s1 + $0x8c0] ss:$8 sps:$4 sm:$0xff]   ;;  %v4109_v58 = vld [vmem:[%s6022_s1 + $0x1d4] ss:$8 sps:$4 sm:$0xff]  }
  0x39   :  { %3112 = vmatprep.subr.bf16.mxu0 %v4013_v59  ;;  %v4112_v59 = vld [vmem:[%s6022_s1 + $0x8d4] ss:$8 sps:$4 sm:$0xff]  }
  0x3b   :  { %2812 = vmatpush1.bf16.msra.mxu1 %v4015_v60  ;;  %v4107_v60 = vld [vmem:[%s6022_s1 + $0x1d0] ss:$8 sps:$4 sm:$0xff]  }
  0x3c   :  { %3113 = vmatpush1.bf16.msra.mxu0 %v4016_v61  ;;  %2813 = vmatprep.subr.bf16.mxu1 %v4017_v62  ;;  %v4110_v61 = vld [vmem:[%s6022_s1 + $0x8d0] ss:$8 sps:$4 sm:$0xff]   ;;  %v4115_v62 = vld [vmem:[%s6022_s1 + $0x1e4] ss:$8 sps:$4 sm:$0xff]  }
  0x3d   :  { %3114 = vmatprep.subr.bf16.mxu0 %v4019_v63  ;;  %v4118_v63 = vld [vmem:[%s6022_s1 + $0x8e4] ss:$8 sps:$4 sm:$0xff]  }
  0x3f   :  { %2814 = vmatpush1.bf16.msra.mxu1 %v4021_v0  ;;  %v4113_v0 = vld [vmem:[%s6022_s1 + $0x1e0] ss:$8 sps:$4 sm:$0xff]  }
  0x40   :  { %3115 = vmatpush1.bf16.msra.mxu0 %v4022_v1  ;;  %2826 = vmatprep.subr.bf16.mxu1 %v4028_v2  ;;  %v4116_v1 = vld [vmem:[%s6022_s1 + $0x8e0] ss:$8 sps:$4 sm:$0xff]   ;;  %v4121_v2 = vld [vmem:[%s6022_s1 + $0x1f4] ss:$8 sps:$4 sm:$0xff]  }
  0x41   :  { %3127 = vmatprep.subr.bf16.mxu0 %v4034_v3  ;;  %v4124_v3 = vld [vmem:[%s6022_s1 + $0x8f4] ss:$8 sps:$4 sm:$0xff]  }
  0x42   :  { %2816 = vmatmul.mubr.bf16.vlgmr.msra.gmra.mrb[0].mxu1 %v4023_v4  ;;  %v4119_v4 = vld [vmem:[%s6022_s1 + $0x1f0] ss:$8 sps:$4 sm:$0xff]  }
  0x43   :  { %3117 = vmatmul.mubr.bf16.vlgmr.msra.gmra.mrb[0].mxu0 %v4029_v6  ;;  %2827 = vmatpush1.bf16.msra.mxu1 %v4026_v5  ;;  %v4122_v5 = vld [vmem:[%s6022_s1 + $0x8f0] ss:$8 sps:$4 sm:$0xff]   ;;  %v4130_v6 = vld [vmem:[%s6022_s1 + $0x204] ss:$8 sps:$4 sm:$0xff]  }
  0x44   :  { %3128 = vmatpush1.bf16.msra.mxu0 %v4032_v7  ;;  %2828 = vmatprep.subr.bf16.mxu1 %v4037_v8  ;;  %v4136_v7 = vld [vmem:[%s6022_s1 + $0x904] ss:$8 sps:$4 sm:$0xff]   ;;  %v4125_v8 = vld [vmem:[%s6023_s0 + $0x8] ss:$108 sps:$4 sm:$0xff]  }
  0x45   :  { %3129 = vmatprep.subr.bf16.mxu0 %v4040_v9  ;;  %2858 = vmatprep.mubr.bf16.mxu1 %v4127_v34  ;;  %v4128_v9 = vld [vmem:[%s6022_s1 + $0x200] ss:$8 sps:$4 sm:$0xff]   ;;  %v4169_v34 = vld [vmem:[%s6022_s1 + $0x264] ss:$8 sps:$4 sm:$0xff]  }
  0x46   :  { %3159 = vmatprep.mubr.bf16.mxu0 %v4133_v37  ;;  %v4170_v37 = vld [vmem:[%s6022_s1 + $0x960] ss:$8 sps:$4 sm:$0xff]  }
  0x47   :  { %2829 = vmatpush1.bf16.msra.mxu1 %v4035_v10  ;;  %v4131_v10 = vld [vmem:[%s6023_s0 + $0x40] ss:$108 sps:$4 sm:$0xff]  }
  0x48   :  { %3130 = vmatpush1.bf16.msra.mxu0 %v4038_v11  ;;  %2830 = vmatprep.subr.bf16.mxu1 %v4043_v12  ;;  %v4134_v11 = vld [vmem:[%s6022_s1 + $0x900] ss:$8 sps:$4 sm:$0xff]   ;;  %v4139_v12 = vld [vmem:[%s6022_s1 + $0x214] ss:$8 sps:$4 sm:$0xff]  }
  0x49   :  { %3131 = vmatprep.subr.bf16.mxu0 %v4046_v13  ;;  %v4142_v13 = vld [vmem:[%s6022_s1 + $0x914] ss:$8 sps:$4 sm:$0xff]  }
  0x4b   :  { %2831 = vmatpush1.bf16.msra.mxu1 %v4041_v14  ;;  %v4137_v14 = vld [vmem:[%s6022_s1 + $0x210] ss:$8 sps:$4 sm:$0xff]  }
  0x4c   :  { %3132 = vmatpush1.bf16.msra.mxu0 %v4044_v15  ;;  %2832 = vmatprep.subr.bf16.mxu1 %v4049_v16  ;;  %v4140_v15 = vld [vmem:[%s6022_s1 + $0x910] ss:$8 sps:$4 sm:$0xff]   ;;  %v4145_v16 = vld [vmem:[%s6022_s1 + $0x224] ss:$8 sps:$4 sm:$0xff]  }
  0x4d   :  { %3133 = vmatprep.subr.bf16.mxu0 %v4052_v17  ;;  %v4148_v17 = vld [vmem:[%s6022_s1 + $0x924] ss:$8 sps:$4 sm:$0xff]  }
  0x4f   :  { %2833 = vmatpush1.bf16.msra.mxu1 %v4047_v18  ;;  %v4143_v18 = vld [vmem:[%s6022_s1 + $0x220] ss:$8 sps:$4 sm:$0xff]  }
  0x50   :  { %3134 = vmatpush1.bf16.msra.mxu0 %v4050_v19  ;;  %2834 = vmatprep.subr.bf16.mxu1 %v4055_v20  ;;  %v4229_v19 = vld [vmem:[%s6023_s0 + $0x14] ss:$108 sps:$4 sm:$0xff]  }
  0x51   :  { %3135 = vmatprep.subr.bf16.mxu0 %v4058_v21  ;;  %v4146_v20 = vld [vmem:[%s6022_s1 + $0x920] ss:$8 sps:$4 sm:$0xff]   ;;  %v4151_v21 = vld [vmem:[%s6022_s1 + $0x234] ss:$8 sps:$4 sm:$0xff]  }
  0x53   :  { %2835 = vmatpush1.bf16.msra.mxu1 %v4053_v22  ;;  %v4154_v22 = vld [vmem:[%s6022_s1 + $0x934] ss:$8 sps:$4 sm:$0xff]  }
  0x54   :  { %3136 = vmatpush1.bf16.msra.mxu0 %v4056_v23  ;;  %2836 = vmatprep.subr.bf16.mxu1 %v4061_v24  ;;  %v4235_v23 = vld [vmem:[%s6023_s0 + $0x4c] ss:$108 sps:$4 sm:$0xff]  }
  0x55   :  { %3137 = vmatprep.subr.bf16.mxu0 %v4064_v25  ;;  %v4149_v24 = vld [vmem:[%s6022_s1 + $0x230] ss:$8 sps:$4 sm:$0xff]  }
  0x56   :  { %v4152_v25 = vld [vmem:[%s6022_s1 + $0x930] ss:$8 sps:$4 sm:$0xff]  }
  0x57   :  { %2837 = vmatpush1.bf16.msra.mxu1 %v4059_v26  ;;  %v4157_v26 = vld [vmem:[%s6022_s1 + $0x244] ss:$8 sps:$4 sm:$0xff]  }
  0x58   :  { %3138 = vmatpush1.bf16.msra.mxu0 %v4062_v27  ;;  %2838 = vmatprep.subr.bf16.mxu1 %v4067_v28  ;;  %v4160_v27 = vld [vmem:[%s6022_s1 + $0x944] ss:$8 sps:$4 sm:$0xff]   ;;  %v4155_v28 = vld [vmem:[%s6022_s1 + $0x240] ss:$8 sps:$4 sm:$0xff]  }
  0x59   :  { %3139 = vmatprep.subr.bf16.mxu0 %v4070_v29  ;;  %v4158_v29 = vld [vmem:[%s6022_s1 + $0x940] ss:$8 sps:$4 sm:$0xff]  }
  0x5b   :  { %2839 = vmatpush1.bf16.msra.mxu1 %v4065_v30  ;;  %v4163_v30 = vld [vmem:[%s6022_s1 + $0x254] ss:$8 sps:$4 sm:$0xff]  }
  0x5c   :  { %3140 = vmatpush1.bf16.msra.mxu0 %v4068_v31  ;;  %2840 = vmatprep.subr.bf16.mxu1 %v4073_v32  ;;  %v4166_v31 = vld [vmem:[%s6022_s1 + $0x954] ss:$8 sps:$4 sm:$0xff]   ;;  %v4161_v32 = vld [vmem:[%s6022_s1 + $0x250] ss:$8 sps:$4 sm:$0xff]  }
  0x5d   :  { %3141 = vmatprep.subr.bf16.mxu0 %v4076_v33  ;;  %v4164_v33 = vld [vmem:[%s6022_s1 + $0x950] ss:$8 sps:$4 sm:$0xff]  }
  0x5f   :  { %2841 = vmatpush1.bf16.msra.mxu1 %v4071_v35  ;;  %v4172_v35 = vld [vmem:[%s6022_s1 + $0x964] ss:$8 sps:$4 sm:$0xff]  }
  0x60   :  { %3142 = vmatpush1.bf16.msra.mxu0 %v4074_v36  ;;  %2842 = vmatprep.subr.bf16.mxu1 %v4079_v38  ;;  %v4167_v36 = vld [vmem:[%s6022_s1 + $0x260] ss:$8 sps:$4 sm:$0xff]   ;;  %v4175_v38 = vld [vmem:[%s6022_s1 + $0x274] ss:$8 sps:$4 sm:$0xff]  }
  0x61   :  { %3143 = vmatprep.subr.bf16.mxu0 %v4082_v39  ;;  %v4178_v39 = vld [vmem:[%s6022_s1 + $0x974] ss:$8 sps:$4 sm:$0xff]  }
  0x63   :  { %2843 = vmatpush1.bf16.msra.mxu1 %v4077_v40  ;;  %v4173_v40 = vld [vmem:[%s6022_s1 + $0x270] ss:$8 sps:$4 sm:$0xff]  }
  0x64   :  { %3144 = vmatpush1.bf16.msra.mxu0 %v4080_v41  ;;  %2844 = vmatprep.subr.bf16.mxu1 %v4085_v42  ;;  %v4176_v41 = vld [vmem:[%s6022_s1 + $0x970] ss:$8 sps:$4 sm:$0xff]   ;;  %v4181_v42 = vld [vmem:[%s6022_s1 + $0x284] ss:$8 sps:$4 sm:$0xff]  }
  0x65   :  { %3145 = vmatprep.subr.bf16.mxu0 %v4088_v43  ;;  %v4184_v43 = vld [vmem:[%s6022_s1 + $0x984] ss:$8 sps:$4 sm:$0xff]  }
  0x67   :  { %2845 = vmatpush1.bf16.msra.mxu1 %v4083_v44  ;;  %v4179_v44 = vld [vmem:[%s6022_s1 + $0x280] ss:$8 sps:$4 sm:$0xff]  }
  0x68   :  { %3146 = vmatpush1.bf16.msra.mxu0 %v4086_v45  ;;  %2846 = vmatprep.subr.bf16.mxu1 %v4091_v46  ;;  %v4182_v45 = vld [vmem:[%s6022_s1 + $0x980] ss:$8 sps:$4 sm:$0xff]   ;;  %v4187_v46 = vld [vmem:[%s6022_s1 + $0x294] ss:$8 sps:$4 sm:$0xff]  }
  0x69   :  { %3147 = vmatprep.subr.bf16.mxu0 %v4094_v47  ;;  %v4190_v47 = vld [vmem:[%s6022_s1 + $0x994] ss:$8 sps:$4 sm:$0xff]  }
  0x6b   :  { %2847 = vmatpush1.bf16.msra.mxu1 %v4089_v48  ;;  %v4185_v48 = vld [vmem:[%s6022_s1 + $0x290] ss:$8 sps:$4 sm:$0xff]  }
  0x6c   :  { %3148 = vmatpush1.bf16.msra.mxu0 %v4092_v49  ;;  %2848 = vmatprep.subr.bf16.mxu1 %v4097_v50  ;;  %v4188_v49 = vld [vmem:[%s6022_s1 + $0x990] ss:$8 sps:$4 sm:$0xff]   ;;  %v4193_v50 = vld [vmem:[%s6022_s1 + $0x2a4] ss:$8 sps:$4 sm:$0xff]  }
  0x6d   :  { %3149 = vmatprep.subr.bf16.mxu0 %v4100_v51  ;;  %v4196_v51 = vld [vmem:[%s6022_s1 + $0x9a4] ss:$8 sps:$4 sm:$0xff]  }
  0x6f   :  { %2849 = vmatpush1.bf16.msra.mxu1 %v4095_v52  ;;  %v4191_v52 = vld [vmem:[%s6022_s1 + $0x2a0] ss:$8 sps:$4 sm:$0xff]  }
  0x70   :  { %3150 = vmatpush1.bf16.msra.mxu0 %v4098_v53  ;;  %2850 = vmatprep.subr.bf16.mxu1 %v4103_v54  ;;  %v4194_v53 = vld [vmem:[%s6022_s1 + $0x9a0] ss:$8 sps:$4 sm:$0xff]   ;;  %v4199_v54 = vld [vmem:[%s6022_s1 + $0x2b4] ss:$8 sps:$4 sm:$0xff]  }
  0x71   :  { %3151 = vmatprep.subr.bf16.mxu0 %v4106_v55  ;;  %v4202_v55 = vld [vmem:[%s6022_s1 + $0x9b4] ss:$8 sps:$4 sm:$0xff]  }
  0x73   :  { %2851 = vmatpush1.bf16.msra.mxu1 %v4101_v56  ;;  %v4197_v56 = vld [vmem:[%s6022_s1 + $0x2b0] ss:$8 sps:$4 sm:$0xff]  }
  0x74   :  { %3152 = vmatpush1.bf16.msra.mxu0 %v4104_v57  ;;  %2852 = vmatprep.subr.bf16.mxu1 %v4109_v58  ;;  %v4200_v57 = vld [vmem:[%s6022_s1 + $0x9b0] ss:$8 sps:$4 sm:$0xff]   ;;  %v4205_v58 = vld [vmem:[%s6022_s1 + $0x2c4] ss:$8 sps:$4 sm:$0xff]  }
  0x75   :  { %3153 = vmatprep.subr.bf16.mxu0 %v4112_v59  ;;  %v4208_v59 = vld [vmem:[%s6022_s1 + $0x9c4] ss:$8 sps:$4 sm:$0xff]  }
  0x77   :  { %2853 = vmatpush1.bf16.msra.mxu1 %v4107_v60  ;;  %v4203_v60 = vld [vmem:[%s6022_s1 + $0x2c0] ss:$8 sps:$4 sm:$0xff]  }
  0x78   :  { %3154 = vmatpush1.bf16.msra.mxu0 %v4110_v61  ;;  %2854 = vmatprep.subr.bf16.mxu1 %v4115_v62  ;;  %v4206_v61 = vld [vmem:[%s6022_s1 + $0x9c0] ss:$8 sps:$4 sm:$0xff]   ;;  %v4211_v62 = vld [vmem:[%s6022_s1 + $0x2d4] ss:$8 sps:$4 sm:$0xff]  }
  0x79   :  { %3155 = vmatprep.subr.bf16.mxu0 %v4118_v63  ;;  %v4214_v63 = vld [vmem:[%s6022_s1 + $0x9d4] ss:$8 sps:$4 sm:$0xff]  }
  0x7b   :  { %2855 = vmatpush1.bf16.msra.mxu1 %v4113_v0  ;;  %v4209_v0 = vld [vmem:[%s6022_s1 + $0x2d0] ss:$8 sps:$4 sm:$0xff]  }
  0x7c   :  { %3156 = vmatpush1.bf16.msra.mxu0 %v4116_v1  ;;  %2856 = vmatprep.subr.bf16.mxu1 %v4121_v2  ;;  %v4212_v1 = vld [vmem:[%s6022_s1 + $0x9d0] ss:$8 sps:$4 sm:$0xff]   ;;  %v4217_v2 = vld [vmem:[%s6022_s1 + $0x2e4] ss:$8 sps:$4 sm:$0xff]  }
  0x7d   :  { %3157 = vmatprep.subr.bf16.mxu0 %v4124_v3  ;;  %v4220_v3 = vld [vmem:[%s6022_s1 + $0x9e4] ss:$8 sps:$4 sm:$0xff]  }
  0x7f   :  { %2857 = vmatpush1.bf16.msra.mxu1 %v4119_v4  ;;  %v4215_v4 = vld [vmem:[%s6022_s1 + $0x2e0] ss:$8 sps:$4 sm:$0xff]  }
  0x80   :  { %3158 = vmatpush1.bf16.msra.mxu0 %v4122_v5  ;;  %2869 = vmatprep.subr.bf16.mxu1 %v4130_v6  ;;  %v4218_v5 = vld [vmem:[%s6022_s1 + $0x9e0] ss:$8 sps:$4 sm:$0xff]   ;;  %v4223_v6 = vld [vmem:[%s6022_s1 + $0x2f4] ss:$8 sps:$4 sm:$0xff]  }
  0x81   :  { %3170 = vmatprep.subr.bf16.mxu0 %v4136_v7  ;;  %v4226_v7 = vld [vmem:[%s6022_s1 + $0x9f4] ss:$8 sps:$4 sm:$0xff]  }
  0x82   :  { %2859 = vmatmul.mubr.bf16.vlgmr.msra.gmra.mrb[0].mxu1 %v4125_v8  ;;  %v4221_v8 = vld [vmem:[%s6022_s1 + $0x2f0] ss:$8 sps:$4 sm:$0xff]  }
  0x83   :  { %3160 = vmatmul.mubr.bf16.vlgmr.msra.gmra.mrb[0].mxu0 %v4131_v10  ;;  %2870 = vmatpush1.bf16.msra.mxu1 %v4128_v9  ;;  %v4224_v9 = vld [vmem:[%s6022_s1 + $0x9f0] ss:$8 sps:$4 sm:$0xff]   ;;  %v4232_v10 = vld [vmem:[%s6022_s1 + $0x304] ss:$8 sps:$4 sm:$0xff]  }
  0x84   :  { %3171 = vmatpush1.bf16.msra.mxu0 %v4134_v11  ;;  %2871 = vmatprep.subr.bf16.mxu1 %v4139_v12  ;;  %v4238_v11 = vld [vmem:[%s6022_s1 + $0xa04] ss:$8 sps:$4 sm:$0xff]   ;;  %v4227_v12 = vld [vmem:[%s6023_s0 + $0x10] ss:$108 sps:$4 sm:$0xff]  }
  0x85   :  { %3172 = vmatprep.subr.bf16.mxu0 %v4142_v13  ;;  %2901 = vmatprep.mubr.bf16.mxu1 %v4229_v19  ;;  %v4230_v13 = vld [vmem:[%s6022_s1 + $0x300] ss:$8 sps:$4 sm:$0xff]  }
  0x86   :  { %3202 = vmatprep.mubr.bf16.mxu0 %v4235_v23  ;;  %v4337_v19 = vld [vmem:[%s6023_s0 + $0x54] ss:$108 sps:$4 sm:$0xff]   ;;  %v4250_v23 = vld [vmem:[%s6022_s1 + $0xa24] ss:$8 sps:$4 sm:$0xff]  }
  0x87   :  { %2872 = vmatpush1.bf16.msra.mxu1 %v4137_v14  ;;  %v4233_v14 = vld [vmem:[%s6023_s0 + $0x48] ss:$108 sps:$4 sm:$0xff]  }
  0x88   :  { %3173 = vmatpush1.bf16.msra.mxu0 %v4140_v15  ;;  %2873 = vmatprep.subr.bf16.mxu1 %v4145_v16  ;;  %v4236_v15 = vld [vmem:[%s6022_s1 + $0xa00] ss:$8 sps:$4 sm:$0xff]   ;;  %v4241_v16 = vld [vmem:[%s6022_s1 + $0x314] ss:$8 sps:$4 sm:$0xff]  }
  0x89   :  { %3174 = vmatprep.subr.bf16.mxu0 %v4148_v17  ;;  %v4244_v17 = vld [vmem:[%s6022_s1 + $0xa14] ss:$8 sps:$4 sm:$0xff]  }
  0x8b   :  { %2874 = vmatpush1.bf16.msra.mxu1 %v4143_v18  ;;  %v4331_v18 = vld [vmem:[%s6023_s0 + $0x1c] ss:$108 sps:$4 sm:$0xff]  }
  0x8c   :  { %3175 = vmatpush1.bf16.msra.mxu0 %v4146_v20  ;;  %2875 = vmatprep.subr.bf16.mxu1 %v4151_v21  ;;  %v4239_v20 = vld [vmem:[%s6022_s1 + $0x310] ss:$8 sps:$4 sm:$0xff]  }
  0x8d   :  { %3176 = vmatprep.subr.bf16.mxu0 %v4154_v22  ;;  %v4242_v21 = vld [vmem:[%s6022_s1 + $0xa10] ss:$8 sps:$4 sm:$0xff]   ;;  %v4247_v22 = vld [vmem:[%s6022_s1 + $0x324] ss:$8 sps:$4 sm:$0xff]  }
  0x8f   :  { %2876 = vmatpush1.bf16.msra.mxu1 %v4149_v24  ;;  %v4245_v24 = vld [vmem:[%s6022_s1 + $0x320] ss:$8 sps:$4 sm:$0xff]  }
  0x90   :  { %3177 = vmatpush1.bf16.msra.mxu0 %v4152_v25  ;;  %2877 = vmatprep.subr.bf16.mxu1 %v4157_v26  ;;  %v4248_v25 = vld [vmem:[%s6022_s1 + $0xa20] ss:$8 sps:$4 sm:$0xff]   ;;  %v4253_v26 = vld [vmem:[%s6022_s1 + $0x334] ss:$8 sps:$4 sm:$0xff]  }
  0x91   :  { %3178 = vmatprep.subr.bf16.mxu0 %v4160_v27  ;;  %v4256_v27 = vld [vmem:[%s6022_s1 + $0xa34] ss:$8 sps:$4 sm:$0xff]  }
  0x93   :  { %2878 = vmatpush1.bf16.msra.mxu1 %v4155_v28  ;;  %v4251_v28 = vld [vmem:[%s6022_s1 + $0x330] ss:$8 sps:$4 sm:$0xff]  }
  0x94   :  { %3179 = vmatpush1.bf16.msra.mxu0 %v4158_v29  ;;  %2879 = vmatprep.subr.bf16.mxu1 %v4163_v30  ;;  %v4254_v29 = vld [vmem:[%s6022_s1 + $0xa30] ss:$8 sps:$4 sm:$0xff]   ;;  %v4259_v30 = vld [vmem:[%s6022_s1 + $0x344] ss:$8 sps:$4 sm:$0xff]  }
  0x95   :  { %3180 = vmatprep.subr.bf16.mxu0 %v4166_v31  ;;  %v4262_v31 = vld [vmem:[%s6022_s1 + $0xa44] ss:$8 sps:$4 sm:$0xff]  }
  0x97   :  { %2880 = vmatpush1.bf16.msra.mxu1 %v4161_v32  ;;  %v4257_v32 = vld [vmem:[%s6022_s1 + $0x340] ss:$8 sps:$4 sm:$0xff]  }
  0x98   :  { %3181 = vmatpush1.bf16.msra.mxu0 %v4164_v33  ;;  %2881 = vmatprep.subr.bf16.mxu1 %v4169_v34  ;;  %v4260_v33 = vld [vmem:[%s6022_s1 + $0xa40] ss:$8 sps:$4 sm:$0xff]   ;;  %v4265_v34 = vld [vmem:[%s6022_s1 + $0x354] ss:$8 sps:$4 sm:$0xff]  }
  0x99   :  { %3182 = vmatprep.subr.bf16.mxu0 %v4172_v35  ;;  %v4268_v35 = vld [vmem:[%s6022_s1 + $0xa54] ss:$8 sps:$4 sm:$0xff]  }
  0x9b   :  { %2882 = vmatpush1.bf16.msra.mxu1 %v4167_v36  ;;  %v4263_v36 = vld [vmem:[%s6022_s1 + $0x350] ss:$8 sps:$4 sm:$0xff]  }
  0x9c   :  { %3183 = vmatpush1.bf16.msra.mxu0 %v4170_v37  ;;  %2883 = vmatprep.subr.bf16.mxu1 %v4175_v38  ;;  %v4266_v37 = vld [vmem:[%s6022_s1 + $0xa50] ss:$8 sps:$4 sm:$0xff]   ;;  %v4271_v38 = vld [vmem:[%s6022_s1 + $0x364] ss:$8 sps:$4 sm:$0xff]  }
  0x9d   :  { %3184 = vmatprep.subr.bf16.mxu0 %v4178_v39  ;;  %v4274_v39 = vld [vmem:[%s6022_s1 + $0xa64] ss:$8 sps:$4 sm:$0xff]  }
  0x9f   :  { %2884 = vmatpush1.bf16.msra.mxu1 %v4173_v40  ;;  %v4269_v40 = vld [vmem:[%s6022_s1 + $0x360] ss:$8 sps:$4 sm:$0xff]  }
  0xa0   :  { %3185 = vmatpush1.bf16.msra.mxu0 %v4176_v41  ;;  %2885 = vmatprep.subr.bf16.mxu1 %v4181_v42  ;;  %v4272_v41 = vld [vmem:[%s6022_s1 + $0xa60] ss:$8 sps:$4 sm:$0xff]   ;;  %v4277_v42 = vld [vmem:[%s6022_s1 + $0x374] ss:$8 sps:$4 sm:$0xff]  }
  0xa1   :  { %3186 = vmatprep.subr.bf16.mxu0 %v4184_v43  ;;  %v4280_v43 = vld [vmem:[%s6022_s1 + $0xa74] ss:$8 sps:$4 sm:$0xff]  }
  0xa3   :  { %2886 = vmatpush1.bf16.msra.mxu1 %v4179_v44  ;;  %v4275_v44 = vld [vmem:[%s6022_s1 + $0x370] ss:$8 sps:$4 sm:$0xff]  }
  0xa4   :  { %3187 = vmatpush1.bf16.msra.mxu0 %v4182_v45  ;;  %2887 = vmatprep.subr.bf16.mxu1 %v4187_v46  ;;  %v4278_v45 = vld [vmem:[%s6022_s1 + $0xa70] ss:$8 sps:$4 sm:$0xff]   ;;  %v4283_v46 = vld [vmem:[%s6022_s1 + $0x384] ss:$8 sps:$4 sm:$0xff]  }
  0xa5   :  { %3188 = vmatprep.subr.bf16.mxu0 %v4190_v47  ;;  %v4286_v47 = vld [vmem:[%s6022_s1 + $0xa84] ss:$8 sps:$4 sm:$0xff]  }
  0xa7   :  { %2888 = vmatpush1.bf16.msra.mxu1 %v4185_v48  ;;  %v4281_v48 = vld [vmem:[%s6022_s1 + $0x380] ss:$8 sps:$4 sm:$0xff]  }
  0xa8   :  { %3189 = vmatpush1.bf16.msra.mxu0 %v4188_v49  ;;  %2889 = vmatprep.subr.bf16.mxu1 %v4193_v50  ;;  %v4284_v49 = vld [vmem:[%s6022_s1 + $0xa80] ss:$8 sps:$4 sm:$0xff]   ;;  %v4289_v50 = vld [vmem:[%s6022_s1 + $0x394] ss:$8 sps:$4 sm:$0xff]  }
  0xa9   :  { %3190 = vmatprep.subr.bf16.mxu0 %v4196_v51  ;;  %v4292_v51 = vld [vmem:[%s6022_s1 + $0xa94] ss:$8 sps:$4 sm:$0xff]  }
  0xab   :  { %2890 = vmatpush1.bf16.msra.mxu1 %v4191_v52  ;;  %v4287_v52 = vld [vmem:[%s6022_s1 + $0x390] ss:$8 sps:$4 sm:$0xff]  }
  0xac   :  { %3191 = vmatpush1.bf16.msra.mxu0 %v4194_v53  ;;  %2891 = vmatprep.subr.bf16.mxu1 %v4199_v54  ;;  %v4290_v53 = vld [vmem:[%s6022_s1 + $0xa90] ss:$8 sps:$4 sm:$0xff]   ;;  %v4295_v54 = vld [vmem:[%s6022_s1 + $0x3a4] ss:$8 sps:$4 sm:$0xff]  }
  0xad   :  { %3192 = vmatprep.subr.bf16.mxu0 %v4202_v55  ;;  %v4298_v55 = vld [vmem:[%s6022_s1 + $0xaa4] ss:$8 sps:$4 sm:$0xff]  }
  0xaf   :  { %2892 = vmatpush1.bf16.msra.mxu1 %v4197_v56  ;;  %v4293_v56 = vld [vmem:[%s6022_s1 + $0x3a0] ss:$8 sps:$4 sm:$0xff]  }
  0xb0   :  { %3193 = vmatpush1.bf16.msra.mxu0 %v4200_v57  ;;  %2893 = vmatprep.subr.bf16.mxu1 %v4205_v58  ;;  %v4296_v57 = vld [vmem:[%s6022_s1 + $0xaa0] ss:$8 sps:$4 sm:$0xff]   ;;  %v4301_v58 = vld [vmem:[%s6022_s1 + $0x3b4] ss:$8 sps:$4 sm:$0xff]  }
  0xb1   :  { %3194 = vmatprep.subr.bf16.mxu0 %v4208_v59  ;;  %v4304_v59 = vld [vmem:[%s6022_s1 + $0xab4] ss:$8 sps:$4 sm:$0xff]  }
  0xb3   :  { %2894 = vmatpush1.bf16.msra.mxu1 %v4203_v60  ;;  %v4299_v60 = vld [vmem:[%s6022_s1 + $0x3b0] ss:$8 sps:$4 sm:$0xff]  }
  0xb4   :  { %3195 = vmatpush1.bf16.msra.mxu0 %v4206_v61  ;;  %2895 = vmatprep.subr.bf16.mxu1 %v4211_v62  ;;  %v4302_v61 = vld [vmem:[%s6022_s1 + $0xab0] ss:$8 sps:$4 sm:$0xff]   ;;  %v4307_v62 = vld [vmem:[%s6022_s1 + $0x3c4] ss:$8 sps:$4 sm:$0xff]  }
  0xb5   :  { %3196 = vmatprep.subr.bf16.mxu0 %v4214_v63  ;;  %v4310_v63 = vld [vmem:[%s6022_s1 + $0xac4] ss:$8 sps:$4 sm:$0xff]  }
  0xb7   :  { %2896 = vmatpush1.bf16.msra.mxu1 %v4209_v0  ;;  %v4305_v0 = vld [vmem:[%s6022_s1 + $0x3c0] ss:$8 sps:$4 sm:$0xff]  }
  0xb8   :  { %3197 = vmatpush1.bf16.msra.mxu0 %v4212_v1  ;;  %2897 = vmatprep.subr.bf16.mxu1 %v4217_v2  ;;  %v4308_v1 = vld [vmem:[%s6022_s1 + $0xac0] ss:$8 sps:$4 sm:$0xff]   ;;  %v4313_v2 = vld [vmem:[%s6022_s1 + $0x3d4] ss:$8 sps:$4 sm:$0xff]  }
  0xb9   :  { %3198 = vmatprep.subr.bf16.mxu0 %v4220_v3  ;;  %v4316_v3 = vld [vmem:[%s6022_s1 + $0xad4] ss:$8 sps:$4 sm:$0xff]  }
  0xbb   :  { %2898 = vmatpush1.bf16.msra.mxu1 %v4215_v4  ;;  %v4311_v4 = vld [vmem:[%s6022_s1 + $0x3d0] ss:$8 sps:$4 sm:$0xff]  }
  0xbc   :  { %3199 = vmatpush1.bf16.msra.mxu0 %v4218_v5  ;;  %2899 = vmatprep.subr.bf16.mxu1 %v4223_v6  ;;  %v4314_v5 = vld [vmem:[%s6022_s1 + $0xad0] ss:$8 sps:$4 sm:$0xff]   ;;  %v4319_v6 = vld [vmem:[%s6022_s1 + $0x3e4] ss:$8 sps:$4 sm:$0xff]  }
  0xbd   :  { %3200 = vmatprep.subr.bf16.mxu0 %v4226_v7  ;;  %v4322_v7 = vld [vmem:[%s6022_s1 + $0xae4] ss:$8 sps:$4 sm:$0xff]  }
  0xbf   :  { %2900 = vmatpush1.bf16.msra.mxu1 %v4221_v8  ;;  %v4317_v8 = vld [vmem:[%s6022_s1 + $0x3e0] ss:$8 sps:$4 sm:$0xff]  }
  0xc0   :  { %3201 = vmatpush1.bf16.msra.mxu0 %v4224_v9  ;;  %2912 = vmatprep.subr.bf16.mxu1 %v4232_v10  ;;  %v4320_v9 = vld [vmem:[%s6022_s1 + $0xae0] ss:$8 sps:$4 sm:$0xff]   ;;  %v4325_v10 = vld [vmem:[%s6022_s1 + $0x3f4] ss:$8 sps:$4 sm:$0xff]  }
  0xc1   :  { %3213 = vmatprep.subr.bf16.mxu0 %v4238_v11  ;;  %v4328_v11 = vld [vmem:[%s6022_s1 + $0xaf4] ss:$8 sps:$4 sm:$0xff]  }
  0xc2   :  { %2902 = vmatmul.mubr.bf16.vlgmr.msra.gmra.mrb[0].mxu1 %v4227_v12  ;;  %v4323_v12 = vld [vmem:[%s6022_s1 + $0x3f0] ss:$8 sps:$4 sm:$0xff]  }
  0xc3   :  { %3203 = vmatmul.mubr.bf16.vlgmr.msra.gmra.mrb[0].mxu0 %v4233_v14  ;;  %2913 = vmatpush1.bf16.msra.mxu1 %v4230_v13  ;;  %v4326_v13 = vld [vmem:[%s6022_s1 + $0xaf0] ss:$8 sps:$4 sm:$0xff]   ;;  %v4334_v14 = vld [vmem:[%s6022_s1 + $0x404] ss:$8 sps:$4 sm:$0xff]  }
  0xc4   :  { %3214 = vmatpush1.bf16.msra.mxu0 %v4236_v15  ;;  %2914 = vmatprep.subr.bf16.mxu1 %v4241_v16  ;;  %v4340_v15 = vld [vmem:[%s6022_s1 + $0xb04] ss:$8 sps:$4 sm:$0xff]  }
  0xc5   :  { %3215 = vmatprep.subr.bf16.mxu0 %v4244_v17  ;;  %2944 = vmatprep.mubr.bf16.mxu1 %v4331_v18  ;;  %v4329_v16 = vld [vmem:[%s6023_s0 + $0x18] ss:$108 sps:$4 sm:$0xff]   ;;  %v4332_v17 = vld [vmem:[%s6022_s1 + $0x400] ss:$8 sps:$4 sm:$0xff]   ;;  %v4335_v18 = vld [vmem:[%s6023_s0 + $0x50] ss:$108 sps:$4 sm:$0xff]  }
  0xc6   :  { %3245 = vmatprep.mubr.bf16.mxu0 %v4337_v19  ;;  %v4338_v19 = vld [vmem:[%s6022_s1 + $0xb00] ss:$8 sps:$4 sm:$0xff]  }
  0xc7   :  { %2915 = vmatpush1.bf16.msra.mxu1 %v4239_v20  ;;  %v4343_v20 = vld [vmem:[%s6022_s1 + $0x414] ss:$8 sps:$4 sm:$0xff]  }
  0xc8   :  { %3216 = vmatpush1.bf16.msra.mxu0 %v4242_v21  ;;  %2916 = vmatprep.subr.bf16.mxu1 %v4247_v22  ;;  %v4346_v21 = vld [vmem:[%s6022_s1 + $0xb14] ss:$8 sps:$4 sm:$0xff]   ;;  %v4433_v22 = vld [vmem:[%s6023_s0 + $0x24] ss:$108 sps:$4 sm:$0xff]  }
  0xc9   :  { %3217 = vmatprep.subr.bf16.mxu0 %v4250_v23  ;;  %v4439_v23 = vld [vmem:[%s6023_s0 + $0x5c] ss:$108 sps:$4 sm:$0xff]  }
  0xcb   :  { %2917 = vmatpush1.bf16.msra.mxu1 %v4245_v24  ;;  %v4341_v24 = vld [vmem:[%s6022_s1 + $0x410] ss:$8 sps:$4 sm:$0xff]  }
  0xcc   :  { %3218 = vmatpush1.bf16.msra.mxu0 %v4248_v25  ;;  %2918 = vmatprep.subr.bf16.mxu1 %v4253_v26  ;;  %v4344_v25 = vld [vmem:[%s6022_s1 + $0xb10] ss:$8 sps:$4 sm:$0xff]   ;;  %v4349_v26 = vld [vmem:[%s6022_s1 + $0x424] ss:$8 sps:$4 sm:$0xff]  }
  0xcd   :  { %3219 = vmatprep.subr.bf16.mxu0 %v4256_v27  ;;  %v4352_v27 = vld [vmem:[%s6022_s1 + $0xb24] ss:$8 sps:$4 sm:$0xff]  }
  0xcf   :  { %2919 = vmatpush1.bf16.msra.mxu1 %v4251_v28  ;;  %v4347_v28 = vld [vmem:[%s6022_s1 + $0x420] ss:$8 sps:$4 sm:$0xff]  }
  0xd0   :  { %3220 = vmatpush1.bf16.msra.mxu0 %v4254_v29  ;;  %2920 = vmatprep.subr.bf16.mxu1 %v4259_v30  ;;  %v4350_v29 = vld [vmem:[%s6022_s1 + $0xb20] ss:$8 sps:$4 sm:$0xff]   ;;  %v4355_v30 = vld [vmem:[%s6022_s1 + $0x434] ss:$8 sps:$4 sm:$0xff]  }
  0xd1   :  { %3221 = vmatprep.subr.bf16.mxu0 %v4262_v31  ;;  %v4358_v31 = vld [vmem:[%s6022_s1 + $0xb34] ss:$8 sps:$4 sm:$0xff]  }
  0xd3   :  { %2921 = vmatpush1.bf16.msra.mxu1 %v4257_v32  ;;  %v4353_v32 = vld [vmem:[%s6022_s1 + $0x430] ss:$8 sps:$4 sm:$0xff]  }
  0xd4   :  { %3222 = vmatpush1.bf16.msra.mxu0 %v4260_v33  ;;  %2922 = vmatprep.subr.bf16.mxu1 %v4265_v34  ;;  %v4356_v33 = vld [vmem:[%s6022_s1 + $0xb30] ss:$8 sps:$4 sm:$0xff]   ;;  %v4361_v34 = vld [vmem:[%s6022_s1 + $0x444] ss:$8 sps:$4 sm:$0xff]  }
  0xd5   :  { %3223 = vmatprep.subr.bf16.mxu0 %v4268_v35  ;;  %v4364_v35 = vld [vmem:[%s6022_s1 + $0xb44] ss:$8 sps:$4 sm:$0xff]  }
  0xd7   :  { %2923 = vmatpush1.bf16.msra.mxu1 %v4263_v36  ;;  %v4359_v36 = vld [vmem:[%s6022_s1 + $0x440] ss:$8 sps:$4 sm:$0xff]  }
  0xd8   :  { %3224 = vmatpush1.bf16.msra.mxu0 %v4266_v37  ;;  %2924 = vmatprep.subr.bf16.mxu1 %v4271_v38  ;;  %v4362_v37 = vld [vmem:[%s6022_s1 + $0xb40] ss:$8 sps:$4 sm:$0xff]   ;;  %v4367_v38 = vld [vmem:[%s6022_s1 + $0x454] ss:$8 sps:$4 sm:$0xff]  }
  0xd9   :  { %3225 = vmatprep.subr.bf16.mxu0 %v4274_v39  ;;  %v4370_v39 = vld [vmem:[%s6022_s1 + $0xb54] ss:$8 sps:$4 sm:$0xff]  }
  0xdb   :  { %2925 = vmatpush1.bf16.msra.mxu1 %v4269_v40  ;;  %v4365_v40 = vld [vmem:[%s6022_s1 + $0x450] ss:$8 sps:$4 sm:$0xff]  }
  0xdc   :  { %3226 = vmatpush1.bf16.msra.mxu0 %v4272_v41  ;;  %2926 = vmatprep.subr.bf16.mxu1 %v4277_v42  ;;  %v4368_v41 = vld [vmem:[%s6022_s1 + $0xb50] ss:$8 sps:$4 sm:$0xff]   ;;  %v4373_v42 = vld [vmem:[%s6022_s1 + $0x464] ss:$8 sps:$4 sm:$0xff]  }
  0xdd   :  { %3227 = vmatprep.subr.bf16.mxu0 %v4280_v43  ;;  %v4376_v43 = vld [vmem:[%s6022_s1 + $0xb64] ss:$8 sps:$4 sm:$0xff]  }
  0xdf   :  { %2927 = vmatpush1.bf16.msra.mxu1 %v4275_v44  ;;  %v4371_v44 = vld [vmem:[%s6022_s1 + $0x460] ss:$8 sps:$4 sm:$0xff]  }
  0xe0   :  { %3228 = vmatpush1.bf16.msra.mxu0 %v4278_v45  ;;  %2928 = vmatprep.subr.bf16.mxu1 %v4283_v46  ;;  %v4374_v45 = vld [vmem:[%s6022_s1 + $0xb60] ss:$8 sps:$4 sm:$0xff]   ;;  %v4379_v46 = vld [vmem:[%s6022_s1 + $0x474] ss:$8 sps:$4 sm:$0xff]  }
  0xe1   :  { %3229 = vmatprep.subr.bf16.mxu0 %v4286_v47  ;;  %v4382_v47 = vld [vmem:[%s6022_s1 + $0xb74] ss:$8 sps:$4 sm:$0xff]  }
  0xe3   :  { %2929 = vmatpush1.bf16.msra.mxu1 %v4281_v48  ;;  %v4377_v48 = vld [vmem:[%s6022_s1 + $0x470] ss:$8 sps:$4 sm:$0xff]  }
  0xe4   :  { %3230 = vmatpush1.bf16.msra.mxu0 %v4284_v49  ;;  %2930 = vmatprep.subr.bf16.mxu1 %v4289_v50  ;;  %v4380_v49 = vld [vmem:[%s6022_s1 + $0xb70] ss:$8 sps:$4 sm:$0xff]   ;;  %v4385_v50 = vld [vmem:[%s6022_s1 + $0x484] ss:$8 sps:$4 sm:$0xff]  }
  0xe5   :  { %3231 = vmatprep.subr.bf16.mxu0 %v4292_v51  ;;  %v4388_v51 = vld [vmem:[%s6022_s1 + $0xb84] ss:$8 sps:$4 sm:$0xff]  }
  0xe7   :  { %2931 = vmatpush1.bf16.msra.mxu1 %v4287_v52  ;;  %v4383_v52 = vld [vmem:[%s6022_s1 + $0x480] ss:$8 sps:$4 sm:$0xff]  }
  0xe8   :  { %3232 = vmatpush1.bf16.msra.mxu0 %v4290_v53  ;;  %2932 = vmatprep.subr.bf16.mxu1 %v4295_v54  ;;  %v4386_v53 = vld [vmem:[%s6022_s1 + $0xb80] ss:$8 sps:$4 sm:$0xff]   ;;  %v4391_v54 = vld [vmem:[%s6022_s1 + $0x494] ss:$8 sps:$4 sm:$0xff]  }
  0xe9   :  { %3233 = vmatprep.subr.bf16.mxu0 %v4298_v55  ;;  %v4394_v55 = vld [vmem:[%s6022_s1 + $0xb94] ss:$8 sps:$4 sm:$0xff]  }
  0xeb   :  { %2933 = vmatpush1.bf16.msra.mxu1 %v4293_v56  ;;  %v4389_v56 = vld [vmem:[%s6022_s1 + $0x490] ss:$8 sps:$4 sm:$0xff]  }
  0xec   :  { %3234 = vmatpush1.bf16.msra.mxu0 %v4296_v57  ;;  %2934 = vmatprep.subr.bf16.mxu1 %v4301_v58  ;;  %v4392_v57 = vld [vmem:[%s6022_s1 + $0xb90] ss:$8 sps:$4 sm:$0xff]   ;;  %v4397_v58 = vld [vmem:[%s6022_s1 + $0x4a4] ss:$8 sps:$4 sm:$0xff]  }
  0xed   :  { %3235 = vmatprep.subr.bf16.mxu0 %v4304_v59  ;;  %v4400_v59 = vld [vmem:[%s6022_s1 + $0xba4] ss:$8 sps:$4 sm:$0xff]  }
  0xef   :  { %2935 = vmatpush1.bf16.msra.mxu1 %v4299_v60  ;;  %v4395_v60 = vld [vmem:[%s6022_s1 + $0x4a0] ss:$8 sps:$4 sm:$0xff]  }
  0xf0   :  { %3236 = vmatpush1.bf16.msra.mxu0 %v4302_v61  ;;  %2936 = vmatprep.subr.bf16.mxu1 %v4307_v62  ;;  %v4398_v61 = vld [vmem:[%s6022_s1 + $0xba0] ss:$8 sps:$4 sm:$0xff]   ;;  %v4403_v62 = vld [vmem:[%s6022_s1 + $0x4b4] ss:$8 sps:$4 sm:$0xff]  }
  0xf1   :  { %3237 = vmatprep.subr.bf16.mxu0 %v4310_v63  ;;  %v4406_v63 = vld [vmem:[%s6022_s1 + $0xbb4] ss:$8 sps:$4 sm:$0xff]  }
  0xf3   :  { %2937 = vmatpush1.bf16.msra.mxu1 %v4305_v0  ;;  %v4401_v0 = vld [vmem:[%s6022_s1 + $0x4b0] ss:$8 sps:$4 sm:$0xff]  }
  0xf4   :  { %3238 = vmatpush1.bf16.msra.mxu0 %v4308_v1  ;;  %2938 = vmatprep.subr.bf16.mxu1 %v4313_v2  ;;  %v4404_v1 = vld [vmem:[%s6022_s1 + $0xbb0] ss:$8 sps:$4 sm:$0xff]   ;;  %v4409_v2 = vld [vmem:[%s6022_s1 + $0x4c4] ss:$8 sps:$4 sm:$0xff]  }
  0xf5   :  { %3239 = vmatprep.subr.bf16.mxu0 %v4316_v3  ;;  %v4412_v3 = vld [vmem:[%s6022_s1 + $0xbc4] ss:$8 sps:$4 sm:$0xff]  }
  0xf7   :  { %2939 = vmatpush1.bf16.msra.mxu1 %v4311_v4  ;;  %v4407_v4 = vld [vmem:[%s6022_s1 + $0x4c0] ss:$8 sps:$4 sm:$0xff]  }
  0xf8   :  { %3240 = vmatpush1.bf16.msra.mxu0 %v4314_v5  ;;  %2940 = vmatprep.subr.bf16.mxu1 %v4319_v6  ;;  %v4410_v5 = vld [vmem:[%s6022_s1 + $0xbc0] ss:$8 sps:$4 sm:$0xff]   ;;  %v4415_v6 = vld [vmem:[%s6022_s1 + $0x4d4] ss:$8 sps:$4 sm:$0xff]  }
  0xf9   :  { %3241 = vmatprep.subr.bf16.mxu0 %v4322_v7  ;;  %v4418_v7 = vld [vmem:[%s6022_s1 + $0xbd4] ss:$8 sps:$4 sm:$0xff]  }
  0xfb   :  { %2941 = vmatpush1.bf16.msra.mxu1 %v4317_v8  ;;  %v4413_v8 = vld [vmem:[%s6022_s1 + $0x4d0] ss:$8 sps:$4 sm:$0xff]  }
  0xfc   :  { %3242 = vmatpush1.bf16.msra.mxu0 %v4320_v9  ;;  %2942 = vmatprep.subr.bf16.mxu1 %v4325_v10  ;;  %v4416_v9 = vld [vmem:[%s6022_s1 + $0xbd0] ss:$8 sps:$4 sm:$0xff]   ;;  %v4421_v10 = vld [vmem:[%s6022_s1 + $0x4e4] ss:$8 sps:$4 sm:$0xff]  }
  0xfd   :  { %3243 = vmatprep.subr.bf16.mxu0 %v4328_v11  ;;  %v4424_v11 = vld [vmem:[%s6022_s1 + $0xbe4] ss:$8 sps:$4 sm:$0xff]  }
  0xff   :  { %2943 = vmatpush1.bf16.msra.mxu1 %v4323_v12  ;;  %v4419_v12 = vld [vmem:[%s6022_s1 + $0x4e0] ss:$8 sps:$4 sm:$0xff]  }
 0x100   :  { %3244 = vmatpush1.bf16.msra.mxu0 %v4326_v13  ;;  %2955 = vmatprep.subr.bf16.mxu1 %v4334_v14  ;;  %v4422_v13 = vld [vmem:[%s6022_s1 + $0xbe0] ss:$8 sps:$4 sm:$0xff]   ;;  %v4427_v14 = vld [vmem:[%s6022_s1 + $0x4f4] ss:$8 sps:$4 sm:$0xff]  }
 0x101   :  { %3256 = vmatprep.subr.bf16.mxu0 %v4340_v15  ;;  %v4430_v15 = vld [vmem:[%s6022_s1 + $0xbf4] ss:$8 sps:$4 sm:$0xff]  }
 0x102   :  { %2945 = vmatmul.mubr.bf16.vlgmr.msra.gmra.mrb[0].mxu1 %v4329_v16  ;;  %v4425_v16 = vld [vmem:[%s6022_s1 + $0x4f0] ss:$8 sps:$4 sm:$0xff]  }
 0x103   :  { %3246 = vmatmul.mubr.bf16.vlgmr.msra.gmra.mrb[0].mxu0 %v4335_v18  ;;  %2956 = vmatpush1.bf16.msra.mxu1 %v4332_v17  ;;  %v4428_v17 = vld [vmem:[%s6022_s1 + $0xbf0] ss:$8 sps:$4 sm:$0xff]   ;;  %v4436_v18 = vld [vmem:[%s6022_s1 + $0x504] ss:$8 sps:$4 sm:$0xff]  }
 0x104   :  { %3257 = vmatpush1.bf16.msra.mxu0 %v4338_v19  ;;  %2957 = vmatprep.subr.bf16.mxu1 %v4343_v20  ;;  %v4442_v19 = vld [vmem:[%s6022_s1 + $0xc04] ss:$8 sps:$4 sm:$0xff]  }
 0x105   :  { %3258 = vmatprep.subr.bf16.mxu0 %v4346_v21  ;;  %2987 = vmatprep.mubr.bf16.mxu1 %v4433_v22  ;;  %v4431_v20 = vld [vmem:[%s6023_s0 + $0x20] ss:$108 sps:$4 sm:$0xff]   ;;  %v4437_v21 = vld [vmem:[%s6023_s0 + $0x58] ss:$108 sps:$4 sm:$0xff]  }
 0x106   :  { %3288 = vmatprep.mubr.bf16.mxu0 %v4439_v23  ;;  %v4434_v22 = vld [vmem:[%s6022_s1 + $0x500] ss:$8 sps:$4 sm:$0xff]  }
 0x107   :  { %2958 = vmatpush1.bf16.msra.mxu1 %v4341_v24  ;;  %v4440_v23 = vld [vmem:[%s6022_s1 + $0xc00] ss:$8 sps:$4 sm:$0xff]   ;;  %v4445_v24 = vld [vmem:[%s6022_s1 + $0x514] ss:$8 sps:$4 sm:$0xff]  }
 0x108   :  { %3259 = vmatpush1.bf16.msra.mxu0 %v4344_v25  ;;  %2959 = vmatprep.subr.bf16.mxu1 %v4349_v26  ;;  %v4448_v25 = vld [vmem:[%s6022_s1 + $0xc14] ss:$8 sps:$4 sm:$0xff]   ;;  %v4535_v26 = vld [vmem:[%s6023_s0 + $0x2c] ss:$108 sps:$4 sm:$0xff]  }
 0x109   :  { %3260 = vmatprep.subr.bf16.mxu0 %v4352_v27  ;;  %v4541_v27 = vld [vmem:[%s6023_s0 + $0x64] ss:$108 sps:$4 sm:$0xff]  }
 0x10b   :  { %2960 = vmatpush1.bf16.msra.mxu1 %v4347_v28  ;;  %v4443_v28 = vld [vmem:[%s6022_s1 + $0x510] ss:$8 sps:$4 sm:$0xff]  }
 0x10c   :  { %3261 = vmatpush1.bf16.msra.mxu0 %v4350_v29  ;;  %2961 = vmatprep.subr.bf16.mxu1 %v4355_v30  ;;  %v4446_v29 = vld [vmem:[%s6022_s1 + $0xc10] ss:$8 sps:$4 sm:$0xff]   ;;  %v4451_v30 = vld [vmem:[%s6022_s1 + $0x524] ss:$8 sps:$4 sm:$0xff]  }
 0x10d   :  { %3262 = vmatprep.subr.bf16.mxu0 %v4358_v31  ;;  %v4454_v31 = vld [vmem:[%s6022_s1 + $0xc24] ss:$8 sps:$4 sm:$0xff]  }
 0x10f   :  { %2962 = vmatpush1.bf16.msra.mxu1 %v4353_v32  ;;  %v4449_v32 = vld [vmem:[%s6022_s1 + $0x520] ss:$8 sps:$4 sm:$0xff]  }
 0x110   :  { %3263 = vmatpush1.bf16.msra.mxu0 %v4356_v33  ;;  %2963 = vmatprep.subr.bf16.mxu1 %v4361_v34  ;;  %v4452_v33 = vld [vmem:[%s6022_s1 + $0xc20] ss:$8 sps:$4 sm:$0xff]   ;;  %v4457_v34 = vld [vmem:[%s6022_s1 + $0x534] ss:$8 sps:$4 sm:$0xff]  }
 0x111   :  { %3264 = vmatprep.subr.bf16.mxu0 %v4364_v35  ;;  %v4460_v35 = vld [vmem:[%s6022_s1 + $0xc34] ss:$8 sps:$4 sm:$0xff]  }
 0x113   :  { %2964 = vmatpush1.bf16.msra.mxu1 %v4359_v36  ;;  %v4455_v36 = vld [vmem:[%s6022_s1 + $0x530] ss:$8 sps:$4 sm:$0xff]  }
 0x114   :  { %3265 = vmatpush1.bf16.msra.mxu0 %v4362_v37  ;;  %2965 = vmatprep.subr.bf16.mxu1 %v4367_v38  ;;  %v4458_v37 = vld [vmem:[%s6022_s1 + $0xc30] ss:$8 sps:$4 sm:$0xff]   ;;  %v4463_v38 = vld [vmem:[%s6022_s1 + $0x544] ss:$8 sps:$4 sm:$0xff]  }
 0x115   :  { %3266 = vmatprep.subr.bf16.mxu0 %v4370_v39  ;;  %v4466_v39 = vld [vmem:[%s6022_s1 + $0xc44] ss:$8 sps:$4 sm:$0xff]  }
 0x117   :  { %2966 = vmatpush1.bf16.msra.mxu1 %v4365_v40  ;;  %v4461_v40 = vld [vmem:[%s6022_s1 + $0x540] ss:$8 sps:$4 sm:$0xff]  }
 0x118   :  { %3267 = vmatpush1.bf16.msra.mxu0 %v4368_v41  ;;  %2967 = vmatprep.subr.bf16.mxu1 %v4373_v42  ;;  %v4464_v41 = vld [vmem:[%s6022_s1 + $0xc40] ss:$8 sps:$4 sm:$0xff]   ;;  %v4469_v42 = vld [vmem:[%s6022_s1 + $0x554] ss:$8 sps:$4 sm:$0xff]  }
 0x119   :  { %3268 = vmatprep.subr.bf16.mxu0 %v4376_v43  ;;  %v4472_v43 = vld [vmem:[%s6022_s1 + $0xc54] ss:$8 sps:$4 sm:$0xff]  }
 0x11b   :  { %2968 = vmatpush1.bf16.msra.mxu1 %v4371_v44  ;;  %v4467_v44 = vld [vmem:[%s6022_s1 + $0x550] ss:$8 sps:$4 sm:$0xff]  }
 0x11c   :  { %3269 = vmatpush1.bf16.msra.mxu0 %v4374_v45  ;;  %2969 = vmatprep.subr.bf16.mxu1 %v4379_v46  ;;  %v4470_v45 = vld [vmem:[%s6022_s1 + $0xc50] ss:$8 sps:$4 sm:$0xff]   ;;  %v4475_v46 = vld [vmem:[%s6022_s1 + $0x564] ss:$8 sps:$4 sm:$0xff]  }
 0x11d   :  { %3270 = vmatprep.subr.bf16.mxu0 %v4382_v47  ;;  %v4478_v47 = vld [vmem:[%s6022_s1 + $0xc64] ss:$8 sps:$4 sm:$0xff]  }
 0x11f   :  { %2970 = vmatpush1.bf16.msra.mxu1 %v4377_v48  ;;  %v4473_v48 = vld [vmem:[%s6022_s1 + $0x560] ss:$8 sps:$4 sm:$0xff]  }
 0x120   :  { %3271 = vmatpush1.bf16.msra.mxu0 %v4380_v49  ;;  %2971 = vmatprep.subr.bf16.mxu1 %v4385_v50  ;;  %v4476_v49 = vld [vmem:[%s6022_s1 + $0xc60] ss:$8 sps:$4 sm:$0xff]   ;;  %v4481_v50 = vld [vmem:[%s6022_s1 + $0x574] ss:$8 sps:$4 sm:$0xff]  }
 0x121   :  { %3272 = vmatprep.subr.bf16.mxu0 %v4388_v51  ;;  %v4484_v51 = vld [vmem:[%s6022_s1 + $0xc74] ss:$8 sps:$4 sm:$0xff]  }
 0x123   :  { %2972 = vmatpush1.bf16.msra.mxu1 %v4383_v52  ;;  %v4479_v52 = vld [vmem:[%s6022_s1 + $0x570] ss:$8 sps:$4 sm:$0xff]  }
 0x124   :  { %3273 = vmatpush1.bf16.msra.mxu0 %v4386_v53  ;;  %2973 = vmatprep.subr.bf16.mxu1 %v4391_v54  ;;  %v4482_v53 = vld [vmem:[%s6022_s1 + $0xc70] ss:$8 sps:$4 sm:$0xff]   ;;  %v4487_v54 = vld [vmem:[%s6022_s1 + $0x584] ss:$8 sps:$4 sm:$0xff]  }
 0x125   :  { %3274 = vmatprep.subr.bf16.mxu0 %v4394_v55  ;;  %v4490_v55 = vld [vmem:[%s6022_s1 + $0xc84] ss:$8 sps:$4 sm:$0xff]  }
 0x127   :  { %2974 = vmatpush1.bf16.msra.mxu1 %v4389_v56  ;;  %v4485_v56 = vld [vmem:[%s6022_s1 + $0x580] ss:$8 sps:$4 sm:$0xff]  }
 0x128   :  { %3275 = vmatpush1.bf16.msra.mxu0 %v4392_v57  ;;  %2975 = vmatprep.subr.bf16.mxu1 %v4397_v58  ;;  %v4488_v57 = vld [vmem:[%s6022_s1 + $0xc80] ss:$8 sps:$4 sm:$0xff]   ;;  %v4493_v58 = vld [vmem:[%s6022_s1 + $0x594] ss:$8 sps:$4 sm:$0xff]  }
 0x129   :  { %3276 = vmatprep.subr.bf16.mxu0 %v4400_v59  ;;  %v4496_v59 = vld [vmem:[%s6022_s1 + $0xc94] ss:$8 sps:$4 sm:$0xff]  }
 0x12b   :  { %2976 = vmatpush1.bf16.msra.mxu1 %v4395_v60  ;;  %v4491_v60 = vld [vmem:[%s6022_s1 + $0x590] ss:$8 sps:$4 sm:$0xff]  }
 0x12c   :  { %3277 = vmatpush1.bf16.msra.mxu0 %v4398_v61  ;;  %2977 = vmatprep.subr.bf16.mxu1 %v4403_v62  ;;  %v4494_v61 = vld [vmem:[%s6022_s1 + $0xc90] ss:$8 sps:$4 sm:$0xff]   ;;  %v4499_v62 = vld [vmem:[%s6022_s1 + $0x5a4] ss:$8 sps:$4 sm:$0xff]  }
 0x12d   :  { %3278 = vmatprep.subr.bf16.mxu0 %v4406_v63  ;;  %v4502_v63 = vld [vmem:[%s6022_s1 + $0xca4] ss:$8 sps:$4 sm:$0xff]  }
 0x12f   :  { %2978 = vmatpush1.bf16.msra.mxu1 %v4401_v0  ;;  %v4497_v0 = vld [vmem:[%s6022_s1 + $0x5a0] ss:$8 sps:$4 sm:$0xff]  }
 0x130   :  { %3279 = vmatpush1.bf16.msra.mxu0 %v4404_v1  ;;  %2979 = vmatprep.subr.bf16.mxu1 %v4409_v2  ;;  %v4500_v1 = vld [vmem:[%s6022_s1 + $0xca0] ss:$8 sps:$4 sm:$0xff]   ;;  %v4505_v2 = vld [vmem:[%s6022_s1 + $0x5b4] ss:$8 sps:$4 sm:$0xff]  }
 0x131   :  { %3280 = vmatprep.subr.bf16.mxu0 %v4412_v3  ;;  %v4508_v3 = vld [vmem:[%s6022_s1 + $0xcb4] ss:$8 sps:$4 sm:$0xff]  }
 0x133   :  { %2980 = vmatpush1.bf16.msra.mxu1 %v4407_v4  ;;  %v4503_v4 = vld [vmem:[%s6022_s1 + $0x5b0] ss:$8 sps:$4 sm:$0xff]  }
 0x134   :  { %3281 = vmatpush1.bf16.msra.mxu0 %v4410_v5  ;;  %2981 = vmatprep.subr.bf16.mxu1 %v4415_v6  ;;  %v4506_v5 = vld [vmem:[%s6022_s1 + $0xcb0] ss:$8 sps:$4 sm:$0xff]   ;;  %v4511_v6 = vld [vmem:[%s6022_s1 + $0x5c4] ss:$8 sps:$4 sm:$0xff]  }
 0x135   :  { %3282 = vmatprep.subr.bf16.mxu0 %v4418_v7  ;;  %v4514_v7 = vld [vmem:[%s6022_s1 + $0xcc4] ss:$8 sps:$4 sm:$0xff]  }
 0x137   :  { %2982 = vmatpush1.bf16.msra.mxu1 %v4413_v8  ;;  %v4509_v8 = vld [vmem:[%s6022_s1 + $0x5c0] ss:$8 sps:$4 sm:$0xff]  }
 0x138   :  { %3283 = vmatpush1.bf16.msra.mxu0 %v4416_v9  ;;  %2983 = vmatprep.subr.bf16.mxu1 %v4421_v10  ;;  %v4512_v9 = vld [vmem:[%s6022_s1 + $0xcc0] ss:$8 sps:$4 sm:$0xff]   ;;  %v4517_v10 = vld [vmem:[%s6022_s1 + $0x5d4] ss:$8 sps:$4 sm:$0xff]  }
 0x139   :  { %3284 = vmatprep.subr.bf16.mxu0 %v4424_v11  ;;  %v4520_v11 = vld [vmem:[%s6022_s1 + $0xcd4] ss:$8 sps:$4 sm:$0xff]  }
 0x13b   :  { %2984 = vmatpush1.bf16.msra.mxu1 %v4419_v12  ;;  %v4515_v12 = vld [vmem:[%s6022_s1 + $0x5d0] ss:$8 sps:$4 sm:$0xff]  }
 0x13c   :  { %3285 = vmatpush1.bf16.msra.mxu0 %v4422_v13  ;;  %2985 = vmatprep.subr.bf16.mxu1 %v4427_v14  ;;  %v4518_v13 = vld [vmem:[%s6022_s1 + $0xcd0] ss:$8 sps:$4 sm:$0xff]   ;;  %v4523_v14 = vld [vmem:[%s6022_s1 + $0x5e4] ss:$8 sps:$4 sm:$0xff]  }
 0x13d   :  { %3286 = vmatprep.subr.bf16.mxu0 %v4430_v15  ;;  %v4526_v15 = vld [vmem:[%s6022_s1 + $0xce4] ss:$8 sps:$4 sm:$0xff]  }
 0x13f   :  { %2986 = vmatpush1.bf16.msra.mxu1 %v4425_v16  ;;  %v4521_v16 = vld [vmem:[%s6022_s1 + $0x5e0] ss:$8 sps:$4 sm:$0xff]  }
 0x140   :  { %3287 = vmatpush1.bf16.msra.mxu0 %v4428_v17  ;;  %2998 = vmatprep.subr.bf16.mxu1 %v4436_v18  ;;  %v4524_v17 = vld [vmem:[%s6022_s1 + $0xce0] ss:$8 sps:$4 sm:$0xff]   ;;  %v4529_v18 = vld [vmem:[%s6022_s1 + $0x5f4] ss:$8 sps:$4 sm:$0xff]  }
 0x141   :  { %3299 = vmatprep.subr.bf16.mxu0 %v4442_v19  ;;  %v4532_v19 = vld [vmem:[%s6022_s1 + $0xcf4] ss:$8 sps:$4 sm:$0xff]  }
 0x142   :  { %2988 = vmatmul.mubr.bf16.vlgmr.msra.gmra.mrb[0].mxu1 %v4431_v20  ;;  %v4527_v20 = vld [vmem:[%s6022_s1 + $0x5f0] ss:$8 sps:$4 sm:$0xff]  }
 0x143   :  { %3289 = vmatmul.mubr.bf16.vlgmr.msra.gmra.mrb[0].mxu0 %v4437_v21  ;;  %2999 = vmatpush1.bf16.msra.mxu1 %v4434_v22  ;;  %v4530_v21 = vld [vmem:[%s6022_s1 + $0xcf0] ss:$8 sps:$4 sm:$0xff]   ;;  %v4538_v22 = vld [vmem:[%s6022_s1 + $0x604] ss:$8 sps:$4 sm:$0xff]  }
 0x144   :  { %3300 = vmatpush1.bf16.msra.mxu0 %v4440_v23  ;;  %3000 = vmatprep.subr.bf16.mxu1 %v4445_v24  ;;  %v4544_v23 = vld [vmem:[%s6022_s1 + $0xd04] ss:$8 sps:$4 sm:$0xff]   ;;  %v4533_v24 = vld [vmem:[%s6023_s0 + $0x28] ss:$108 sps:$4 sm:$0xff]  }
 0x145   :  { %3301 = vmatprep.subr.bf16.mxu0 %v4448_v25  ;;  %3030 = vmatprep.mubr.bf16.mxu1 %v4535_v26  ;;  %v4539_v25 = vld [vmem:[%s6023_s0 + $0x60] ss:$108 sps:$4 sm:$0xff]  }
 0x146   :  { %3331 = vmatprep.mubr.bf16.mxu0 %v4541_v27  ;;  %v4536_v26 = vld [vmem:[%s6022_s1 + $0x600] ss:$8 sps:$4 sm:$0xff]  }
 0x147   :  { %3001 = vmatpush1.bf16.msra.mxu1 %v4443_v28  ;;  %v4542_v27 = vld [vmem:[%s6022_s1 + $0xd00] ss:$8 sps:$4 sm:$0xff]   ;;  %v4547_v28 = vld [vmem:[%s6022_s1 + $0x614] ss:$8 sps:$4 sm:$0xff]  }
 0x148   :  { %3302 = vmatpush1.bf16.msra.mxu0 %v4446_v29  ;;  %3002 = vmatprep.subr.bf16.mxu1 %v4451_v30  ;;  %v4550_v29 = vld [vmem:[%s6022_s1 + $0xd14] ss:$8 sps:$4 sm:$0xff]  }
 0x149   :  { %3303 = vmatprep.subr.bf16.mxu0 %v4454_v31  ;;  %v4614_v30 = vld [vmem:[%s6023_s0 + $0x34] ss:$108 sps:$4 sm:$0xff]   ;;  %v4545_v31 = vld [vmem:[%s6022_s1 + $0x610] ss:$8 sps:$4 sm:$0xff]  }
 0x14b   :  { %3003 = vmatpush1.bf16.msra.mxu1 %v4449_v32  ;;  %v4548_v32 = vld [vmem:[%s6022_s1 + $0xd10] ss:$8 sps:$4 sm:$0xff]  }
 0x14c   :  { %3304 = vmatpush1.bf16.msra.mxu0 %v4452_v33  ;;  %3004 = vmatprep.subr.bf16.mxu1 %v4457_v34  ;;  %v4553_v33 = vld [vmem:[%s6022_s1 + $0x624] ss:$8 sps:$4 sm:$0xff]  }
 0x14d   :  { %3305 = vmatprep.subr.bf16.mxu0 %v4460_v35  ;;  %v4556_v34 = vld [vmem:[%s6022_s1 + $0xd24] ss:$8 sps:$4 sm:$0xff]   ;;  %v4615_v35 = vmov 0  }
 0x14f   :  { %3005 = vmatpush1.bf16.msra.mxu1 %v4455_v36  ;;  %v4551_v36 = vld [vmem:[%s6022_s1 + $0x620] ss:$8 sps:$4 sm:$0xff]  }
 0x150   :  { %3306 = vmatpush1.bf16.msra.mxu0 %v4458_v37  ;;  %3006 = vmatprep.subr.bf16.mxu1 %v4463_v38  ;;  %v4554_v37 = vld [vmem:[%s6022_s1 + $0xd20] ss:$8 sps:$4 sm:$0xff]   ;;  %v4559_v38 = vld [vmem:[%s6022_s1 + $0x634] ss:$8 sps:$4 sm:$0xff]  }
 0x151   :  { %3307 = vmatprep.subr.bf16.mxu0 %v4466_v39  ;;  %v4562_v39 = vld [vmem:[%s6022_s1 + $0xd34] ss:$8 sps:$4 sm:$0xff]  }
 0x153   :  { %3007 = vmatpush1.bf16.msra.mxu1 %v4461_v40  ;;  %v4557_v40 = vld [vmem:[%s6022_s1 + $0x630] ss:$8 sps:$4 sm:$0xff]  }
 0x154   :  { %3308 = vmatpush1.bf16.msra.mxu0 %v4464_v41  ;;  %3008 = vmatprep.subr.bf16.mxu1 %v4469_v42  ;;  %v4560_v41 = vld [vmem:[%s6022_s1 + $0xd30] ss:$8 sps:$4 sm:$0xff]   ;;  %v4565_v42 = vld [vmem:[%s6022_s1 + $0x644] ss:$8 sps:$4 sm:$0xff]  }
 0x155   :  { %3309 = vmatprep.subr.bf16.mxu0 %v4472_v43  ;;  %v4568_v43 = vld [vmem:[%s6022_s1 + $0xd44] ss:$8 sps:$4 sm:$0xff]  }
 0x157   :  { %3009 = vmatpush1.bf16.msra.mxu1 %v4467_v44  ;;  %v4563_v44 = vld [vmem:[%s6022_s1 + $0x640] ss:$8 sps:$4 sm:$0xff]  }
 0x158   :  { %3310 = vmatpush1.bf16.msra.mxu0 %v4470_v45  ;;  %3010 = vmatprep.subr.bf16.mxu1 %v4475_v46  ;;  %v4566_v45 = vld [vmem:[%s6022_s1 + $0xd40] ss:$8 sps:$4 sm:$0xff]   ;;  %v4571_v46 = vld [vmem:[%s6022_s1 + $0x654] ss:$8 sps:$4 sm:$0xff]  }
 0x159   :  { %3311 = vmatprep.subr.bf16.mxu0 %v4478_v47  ;;  %v4574_v47 = vld [vmem:[%s6022_s1 + $0xd54] ss:$8 sps:$4 sm:$0xff]  }
 0x15b   :  { %3011 = vmatpush1.bf16.msra.mxu1 %v4473_v48  ;;  %v4569_v48 = vld [vmem:[%s6022_s1 + $0x650] ss:$8 sps:$4 sm:$0xff]  }
 0x15c   :  { %3312 = vmatpush1.bf16.msra.mxu0 %v4476_v49  ;;  %3012 = vmatprep.subr.bf16.mxu1 %v4481_v50  ;;  %v4572_v49 = vld [vmem:[%s6022_s1 + $0xd50] ss:$8 sps:$4 sm:$0xff]   ;;  %v4577_v50 = vld [vmem:[%s6022_s1 + $0x664] ss:$8 sps:$4 sm:$0xff]  }
 0x15d   :  { %3313 = vmatprep.subr.bf16.mxu0 %v4484_v51  ;;  %v4580_v51 = vld [vmem:[%s6022_s1 + $0xd64] ss:$8 sps:$4 sm:$0xff]  }
 0x15f   :  { %3013 = vmatpush1.bf16.msra.mxu1 %v4479_v52  ;;  %v4575_v52 = vld [vmem:[%s6022_s1 + $0x660] ss:$8 sps:$4 sm:$0xff]  }
 0x160   :  { %3314 = vmatpush1.bf16.msra.mxu0 %v4482_v53  ;;  %3014 = vmatprep.subr.bf16.mxu1 %v4487_v54  ;;  %v4578_v53 = vld [vmem:[%s6022_s1 + $0xd60] ss:$8 sps:$4 sm:$0xff]   ;;  %v4583_v54 = vld [vmem:[%s6022_s1 + $0x674] ss:$8 sps:$4 sm:$0xff]  }
 0x161   :  { %3315 = vmatprep.subr.bf16.mxu0 %v4490_v55  ;;  %v4586_v55 = vld [vmem:[%s6022_s1 + $0xd74] ss:$8 sps:$4 sm:$0xff]  }
 0x163   :  { %3015 = vmatpush1.bf16.msra.mxu1 %v4485_v56  ;;  %v4581_v56 = vld [vmem:[%s6022_s1 + $0x670] ss:$8 sps:$4 sm:$0xff]  }
 0x164   :  { %3316 = vmatpush1.bf16.msra.mxu0 %v4488_v57  ;;  %3016 = vmatprep.subr.bf16.mxu1 %v4493_v58  ;;  %v4584_v57 = vld [vmem:[%s6022_s1 + $0xd70] ss:$8 sps:$4 sm:$0xff]   ;;  %v4589_v58 = vld [vmem:[%s6022_s1 + $0x684] ss:$8 sps:$4 sm:$0xff]  }
 0x165   :  { %3317 = vmatprep.subr.bf16.mxu0 %v4496_v59  ;;  %v4590_v59 = vld [vmem:[%s6023_s0 + $0x68] ss:$108 sps:$4 sm:$0xff]  }
 0x167   :  { %3017 = vmatpush1.bf16.msra.mxu1 %v4491_v60  ;;  %v4587_v60 = vld [vmem:[%s6022_s1 + $0x680] ss:$8 sps:$4 sm:$0xff]  }
 0x168   :  { %3318 = vmatpush1.bf16.msra.mxu0 %v4494_v61  ;;  %3018 = vmatprep.subr.bf16.mxu1 %v4499_v62  ;;  %v4593_v61 = vld [vmem:[%s6022_s1 + $0x694] ss:$8 sps:$4 sm:$0xff]   ;;  %v4591_v62 = vld [vmem:[%s6022_s1 + $0x690] ss:$8 sps:$4 sm:$0xff]  }
 0x169   :  { %3319 = vmatprep.subr.bf16.mxu0 %v4502_v63  ;;  %v4596_v63 = vld [vmem:[%s6022_s1 + $0x6a4] ss:$8 sps:$4 sm:$0xff]  }
 0x16b   :  { %3019 = vmatpush1.bf16.msra.mxu1 %v4497_v0  ;;  %v4594_v0 = vld [vmem:[%s6022_s1 + $0x6a0] ss:$8 sps:$4 sm:$0xff]  }
 0x16c   :  { %3320 = vmatpush1.bf16.msra.mxu0 %v4500_v1  ;;  %3020 = vmatprep.subr.bf16.mxu1 %v4505_v2  ;;  %v4599_v1 = vld [vmem:[%s6022_s1 + $0x6b4] ss:$8 sps:$4 sm:$0xff]   ;;  %v4597_v2 = vld [vmem:[%s6022_s1 + $0x6b0] ss:$8 sps:$4 sm:$0xff]  }
 0x16d   :  { %3321 = vmatprep.subr.bf16.mxu0 %v4508_v3  ;;  %v4602_v3 = vld [vmem:[%s6022_s1 + $0x6c4] ss:$8 sps:$4 sm:$0xff]  }
 0x16f   :  { %3021 = vmatpush1.bf16.msra.mxu1 %v4503_v4  ;;  %v4600_v4 = vld [vmem:[%s6022_s1 + $0x6c0] ss:$8 sps:$4 sm:$0xff]  }
 0x170   :  { %3322 = vmatpush1.bf16.msra.mxu0 %v4506_v5  ;;  %3022 = vmatprep.subr.bf16.mxu1 %v4511_v6  ;;  %v4605_v5 = vld [vmem:[%s6022_s1 + $0x6d4] ss:$8 sps:$4 sm:$0xff]   ;;  %v4603_v6 = vld [vmem:[%s6022_s1 + $0x6d0] ss:$8 sps:$4 sm:$0xff]  }
 0x171   :  { %3323 = vmatprep.subr.bf16.mxu0 %v4514_v7  ;;  %v4608_v7 = vld [vmem:[%s6022_s1 + $0x6e4] ss:$8 sps:$4 sm:$0xff]  }
 0x173   :  { %3023 = vmatpush1.bf16.msra.mxu1 %v4509_v8  ;;  %v4606_v8 = vld [vmem:[%s6022_s1 + $0x6e0] ss:$8 sps:$4 sm:$0xff]  }
 0x174   :  { %3324 = vmatpush1.bf16.msra.mxu0 %v4512_v9  ;;  %3024 = vmatprep.subr.bf16.mxu1 %v4517_v10  ;;  %v4611_v9 = vld [vmem:[%s6022_s1 + $0x6f4] ss:$8 sps:$4 sm:$0xff]   ;;  %v4609_v10 = vld [vmem:[%s6022_s1 + $0x6f0] ss:$8 sps:$4 sm:$0xff]  }
 0x175   :  { %3325 = vmatprep.subr.bf16.mxu0 %v4520_v11  ;;  %v4612_v11 = vld [vmem:[%s6023_s0 + $0x30] ss:$108 sps:$4 sm:$0xff]  }
 0x177   :  { %3025 = vmatpush1.bf16.msra.mxu1 %v4515_v12 }
 0x178   :  { %3326 = vmatpush1.bf16.msra.mxu0 %v4518_v13  ;;  %3026 = vmatprep.subr.bf16.mxu1 %v4523_v14 }
 0x179   :  { %3327 = vmatprep.subr.bf16.mxu0 %v4526_v15 }
 0x17b   :  { %3027 = vmatpush1.bf16.msra.mxu1 %v4521_v16  ;;  %v477_v16 = vlaneseq }
 0x17c   :  { %3328 = vmatpush1.bf16.msra.mxu0 %v4524_v17  ;;  %3028 = vmatprep.subr.bf16.mxu1 %v4529_v18 }
 0x17d   :  { %3329 = vmatprep.subr.bf16.mxu0 %v4532_v19  ;;  %v478_v17 = vshrl.u32 %v477_v16, 7  ;;  %v475_v19 = vld [vmem:[%s6024_s2] sm:$0x3] }
 0x17f   :  { %3029 = vmatpush1.bf16.msra.mxu1 %v4527_v20  ;;  %v479_v18 = vsub.s32 0, %v478_v17  ;;  %v483_v20 = vsub.s32 1, %v478_v17 }
 0x180   :  { %3330 = vmatpush1.bf16.msra.mxu0 %v4530_v21  ;;  %3041 = vmatprep.subr.bf16.mxu1 %v4538_v22 }
 0x181   :  { %3342 = vmatprep.subr.bf16.mxu0 %v4544_v23  ;;  %v480_v21 = vrot.slane %v475_v19, %v479_v18  ;;  %v484_v22 = vrot.slane %v475_v19, %v483_v20 }
 0x182   :  { %3031 = vmatmul.mubr.bf16.vlgmr.msra.gmra.mrb[0].mxu1 %v4533_v24 }
 0x183   :  { %3332 = vmatmul.mubr.bf16.vlgmr.msra.gmra.mrb[0].mxu0 %v4539_v25  ;;  %3042 = vmatpush1.bf16.msra.mxu1 %v4536_v26 }
 0x184   :  { %3343 = vmatpush1.bf16.msra.mxu0 %v4542_v27  ;;  %3043 = vmatprep.subr.bf16.mxu1 %v4547_v28 }
 0x185   :  { %3344 = vmatprep.subr.bf16.mxu0 %v4550_v29  ;;  %3374 = vmatprep.mubr.bf16.mxu0 %v4615_v35 }
 0x186   :  { %3073 = vmatprep.mubr.bf16.mxu1 %v4614_v30 }
 0x187   :  { %3044 = vmatpush1.bf16.msra.mxu1 %v4545_v31 }
 0x188   :  { %3345 = vmatpush1.bf16.msra.mxu0 %v4548_v32  ;;  %3045 = vmatprep.subr.bf16.mxu1 %v4553_v33 }
 0x189   :  { %3346 = vmatprep.subr.bf16.mxu0 %v4556_v34 }
 0x18b   :  { %3046 = vmatpush1.bf16.msra.mxu1 %v4551_v36 }
 0x18c   :  { %3347 = vmatpush1.bf16.msra.mxu0 %v4554_v37  ;;  %3047 = vmatprep.subr.bf16.mxu1 %v4559_v38 }
 0x18d   :  { %3348 = vmatprep.subr.bf16.mxu0 %v4562_v39 }
 0x18f   :  { %3048 = vmatpush1.bf16.msra.mxu1 %v4557_v40 }
 0x190   :  { %3349 = vmatpush1.bf16.msra.mxu0 %v4560_v41  ;;  %3049 = vmatprep.subr.bf16.mxu1 %v4565_v42 }
 0x191   :  { %3350 = vmatprep.subr.bf16.mxu0 %v4568_v43 }
 0x193   :  { %3050 = vmatpush1.bf16.msra.mxu1 %v4563_v44 }
 0x194   :  { %3351 = vmatpush1.bf16.msra.mxu0 %v4566_v45  ;;  %3051 = vmatprep.subr.bf16.mxu1 %v4571_v46 }
 0x195   :  { %3352 = vmatprep.subr.bf16.mxu0 %v4574_v47 }
 0x197   :  { %3052 = vmatpush1.bf16.msra.mxu1 %v4569_v48 }
 0x198   :  { %3353 = vmatpush1.bf16.msra.mxu0 %v4572_v49  ;;  %3053 = vmatprep.subr.bf16.mxu1 %v4577_v50 }
 0x199   :  { %3354 = vmatprep.subr.bf16.mxu0 %v4580_v51 }
 0x19b   :  { %3054 = vmatpush1.bf16.msra.mxu1 %v4575_v52 }
 0x19c   :  { %3355 = vmatpush1.bf16.msra.mxu0 %v4578_v53  ;;  %3055 = vmatprep.subr.bf16.mxu1 %v4583_v54 }
 0x19d   :  { %3356 = vmatprep.subr.bf16.mxu0 %v4586_v55 }
 0x19f   :  { %3056 = vmatpush1.bf16.msra.mxu1 %v4581_v56 }
 0x1a0   :  { %3357 = vmatpush1.bf16.msra.mxu0 %v4584_v57  ;;  %3057 = vmatprep.subr.bf16.mxu1 %v4589_v58 }
 0x1a3   :  { %3375 = vmatmul.mubr.bf16.vlgmr.msra.gmra.mrb[0].mxu0 %v4590_v59  ;;  %3058 = vmatpush1.bf16.msra.mxu1 %v4587_v60 }
 0x1a4   :  { %3059 = vmatprep.subr.bf16.mxu1 %v4593_v61 }
 0x1a7   :  { %3060 = vmatpush1.bf16.msra.mxu1 %v4591_v62 }
 0x1a8   :  { %3061 = vmatprep.subr.bf16.mxu1 %v4596_v63 }
 0x1ab   :  { %3062 = vmatpush1.bf16.msra.mxu1 %v4594_v0 }
 0x1ac   :  { %3063 = vmatprep.subr.bf16.mxu1 %v4599_v1 }
 0x1af   :  { %3064 = vmatpush1.bf16.msra.mxu1 %v4597_v2 }
 0x1b0   :  { %3065 = vmatprep.subr.bf16.mxu1 %v4602_v3 }
 0x1b3   :  { %3066 = vmatpush1.bf16.msra.mxu1 %v4600_v4 }
 0x1b4   :  { %3067 = vmatprep.subr.bf16.mxu1 %v4605_v5 }
 0x1b7   :  { %3068 = vmatpush1.bf16.msra.mxu1 %v4603_v6 }
 0x1b8   :  { %3069 = vmatprep.subr.bf16.mxu1 %v4608_v7 }
 0x1bb   :  { %3070 = vmatpush1.bf16.msra.mxu1 %v4606_v8 }
 0x1bc   :  { %3071 = vmatprep.subr.bf16.mxu1 %v4611_v9 }
 0x1bf   :  { %3072 = vmatpush1.bf16.msra.mxu1 %v4609_v10 }
 0x1c2   :  { %3074 = vmatmul.mubr.bf16.vlgmr.msra.gmra.mrb[0].mxu1 %v4612_v11 }
 0x276   :  { %v3376_v12 = vpop.f32.mrb[0].mxu0 }
 0x277   :  { %v3378_v13 = vpop.f32.mrb[1].mxu0 }
 0x278   :  { %v3380_v14 = vpop.f32.mrb[2].mxu0 }
 0x279   :  { %v3382_v15 = vpop.f32.mrb[3].mxu0 }
 0x295   :  { %v3075_v23 = vpop.f32.mrb[0].mxu1 }
 0x296   :  { %v3870_v24 = vadd.f32 %v3075_v23, %v480_v21  ;;  %v3077_v25 = vpop.f32.mrb[1].mxu1 }
 0x297   :  { %v3872_v26 = vadd.f32 %v3077_v25, %v484_v22  ;;  %v3079_v27 = vpop.f32.mrb[2].mxu1 }
 0x298   :  { %v3871_v28 = vadd.f32 %v3870_v24, %v3376_v12  ;;  %v3874_v29 = vadd.f32 %v3079_v27, %v480_v21  ;;  %v3081_v30 = vpop.f32.mrb[3].mxu1 }
 0x299   :  { %v3873_v31 = vadd.f32 %v3872_v26, %v3378_v13  ;;  %v3876_v32 = vadd.f32 %v3081_v30, %v484_v22 }
 0x29a   :  { %v3385_v33 = vmax.f32 %v3871_v28, 0.0  ;;  %v3875_v34 = vadd.f32 %v3874_v29, %v3380_v14 }
 0x29b   :  { %v3386_v35 = vmax.f32 %v3873_v31, 0.0  ;;  %v3877_v36 = vadd.f32 %v3876_v32, %v3382_v15 }
 0x29c   :  { %v3387_v37 = vmax.f32 %v3875_v34, 0.0 }
 0x29d   :  { %v3868_v38 = vpack.c.bf16 %v3386_v35, %v3385_v33  ;;  %v3388_v39 = vmax.f32 %v3877_v36, 0.0 }
 0x29f   :  { %3401 = vst [vmem:[%s6025_s3] sm:$0xff] %v3868_v38  ;;  %v3869_v40 = vpack.c.bf16 %v3388_v39, %v3387_v37 }
 0x2a1   :  { %3402 = vst [vmem:[%s6025_s3 + $0x8] sm:$0xff] %v3869_v40 }

// kernel: base_model_forward.8
= control target key start
LH: loop header
LB: loop body
LE: loop exit
PB: predicated region body
PF: predicated region fallthrough
CT: control target
= control target key end

     0   :  { %vm9053_vm0 = vmmov 0   ;;  %s11739_s1 = inlined_call_operand.vmem [shape: bf16[3456,384], index: 1, kind: input, shape index: {}]   ;;  %s11740_s0 = inlined_call_operand.vmem [shape: bf16[42,3456], index: 0, kind: input, shape index: {}]   ;;  %s11741_s2 = inlined_call_operand.vmem [shape: f32[1,384], index: 2, kind: input, shape index: {}]   ;;  %s11742_s3 = inlined_call_operand.vmem [shape: bf16[42,384], index: 3, kind: output, shape index: {}]  }
   0x1   :  { %v8023_v0 = vld [vmem:[%s11739_s1 + $0x4] ss:$12 sps:$4 sm:$0xff]   ;;  %v8027_v2 = vld [vmem:[%s11739_s1] ss:$12 sps:$4 sm:$0xff]   ;;  %v8029_v4 = vld [vmem:[%s11739_s1 + $0x1c] ss:$12 sps:$4 sm:$0xff]  }
   0x2   :  { %v8025_v1 = vld [vmem:[%s11739_s1 + $0x484] ss:$12 sps:$4 sm:$0xff]   ;;  %4844 = vmatprep.subr.bf16.mxu1 %v8023_v0  ;;  %v8028_v3 = vld [vmem:[%s11739_s1 + $0x480] ss:$12 sps:$4 sm:$0xff]   ;;  %v8031_v5 = vld [vmem:[%s11739_s1 + $0x49c] ss:$12 sps:$4 sm:$0xff]  }
   0x3   :  { %5033 = vmatprep.subr.bf16.mxu0 %v8025_v1  ;;  %4845 = vmatpush1.bf16.msra.mxu1 %v8027_v2  ;;  %v8033_v6 = vld [vmem:[%s11739_s1 + $0x18] ss:$12 sps:$4 sm:$0xff]   ;;  %v8035_v8 = vld [vmem:[%s11739_s1 + $0x34] ss:$12 sps:$4 sm:$0xff]   ;;  %v8039_v10 = vld [vmem:[%s11739_s1 + $0x30] ss:$12 sps:$4 sm:$0xff]  }
   0x4   :  { %5034 = vmatpush1.bf16.msra.mxu0 %v8028_v3  ;;  %4846 = vmatprep.subr.bf16.mxu1 %v8029_v4  ;;  %v8034_v7 = vld [vmem:[%s11739_s1 + $0x498] ss:$12 sps:$4 sm:$0xff]   ;;  %v8037_v9 = vld [vmem:[%s11739_s1 + $0x4b4] ss:$12 sps:$4 sm:$0xff]   ;;  %v8040_v11 = vld [vmem:[%s11739_s1 + $0x4b0] ss:$12 sps:$4 sm:$0xff]  }
   0x5   :  { %5035 = vmatprep.subr.bf16.mxu0 %v8031_v5  ;;  %v8041_v12 = vld [vmem:[%s11739_s1 + $0x4c] ss:$12 sps:$4 sm:$0xff]   ;;  %v8045_v14 = vld [vmem:[%s11739_s1 + $0x48] ss:$12 sps:$4 sm:$0xff]   ;;  %v8047_v16 = vld [vmem:[%s11739_s1 + $0x64] ss:$12 sps:$4 sm:$0xff]  }
   0x6   :  { %v8043_v13 = vld [vmem:[%s11739_s1 + $0x4cc] ss:$12 sps:$4 sm:$0xff]   ;;  %v8046_v15 = vld [vmem:[%s11739_s1 + $0x4c8] ss:$12 sps:$4 sm:$0xff]   ;;  %v8049_v17 = vld [vmem:[%s11739_s1 + $0x4e4] ss:$12 sps:$4 sm:$0xff]  }
   0x7   :  { %4847 = vmatpush1.bf16.msra.mxu1 %v8033_v6  ;;  %v8051_v18 = vld [vmem:[%s11739_s1 + $0x60] ss:$12 sps:$4 sm:$0xff]   ;;  %v8053_v20 = vld [vmem:[%s11739_s1 + $0x7c] ss:$12 sps:$4 sm:$0xff]   ;;  %v8057_v22 = vld [vmem:[%s11739_s1 + $0x78] ss:$12 sps:$4 sm:$0xff]  }
   0x8   :  { %5036 = vmatpush1.bf16.msra.mxu0 %v8034_v7  ;;  %4848 = vmatprep.subr.bf16.mxu1 %v8035_v8  ;;  %v8052_v19 = vld [vmem:[%s11739_s1 + $0x4e0] ss:$12 sps:$4 sm:$0xff]   ;;  %v8055_v21 = vld [vmem:[%s11739_s1 + $0x4fc] ss:$12 sps:$4 sm:$0xff]   ;;  %v8058_v23 = vld [vmem:[%s11739_s1 + $0x4f8] ss:$12 sps:$4 sm:$0xff]  }
   0x9   :  { %5037 = vmatprep.subr.bf16.mxu0 %v8037_v9  ;;  %v8059_v24 = vld [vmem:[%s11739_s1 + $0x94] ss:$12 sps:$4 sm:$0xff]   ;;  %v8063_v26 = vld [vmem:[%s11739_s1 + $0x90] ss:$12 sps:$4 sm:$0xff]   ;;  %v8065_v28 = vld [vmem:[%s11739_s1 + $0xac] ss:$12 sps:$4 sm:$0xff]  }
   0xa   :  { %v8061_v25 = vld [vmem:[%s11739_s1 + $0x514] ss:$12 sps:$4 sm:$0xff]   ;;  %v8064_v27 = vld [vmem:[%s11739_s1 + $0x510] ss:$12 sps:$4 sm:$0xff]   ;;  %v8067_v29 = vld [vmem:[%s11739_s1 + $0x52c] ss:$12 sps:$4 sm:$0xff]  }
   0xb   :  { %4849 = vmatpush1.bf16.msra.mxu1 %v8039_v10  ;;  %v8069_v30 = vld [vmem:[%s11739_s1 + $0xa8] ss:$12 sps:$4 sm:$0xff]   ;;  %v8071_v32 = vld [vmem:[%s11739_s1 + $0xc4] ss:$12 sps:$4 sm:$0xff]   ;;  %v8075_v34 = vld [vmem:[%s11739_s1 + $0xc0] ss:$12 sps:$4 sm:$0xff]  }
   0xc   :  { %5038 = vmatpush1.bf16.msra.mxu0 %v8040_v11  ;;  %4850 = vmatprep.subr.bf16.mxu1 %v8041_v12  ;;  %v8070_v31 = vld [vmem:[%s11739_s1 + $0x528] ss:$12 sps:$4 sm:$0xff]   ;;  %v8073_v33 = vld [vmem:[%s11739_s1 + $0x544] ss:$12 sps:$4 sm:$0xff]   ;;  %v8076_v35 = vld [vmem:[%s11739_s1 + $0x540] ss:$12 sps:$4 sm:$0xff]  }
   0xd   :  { %5039 = vmatprep.subr.bf16.mxu0 %v8043_v13  ;;  %v8077_v36 = vld [vmem:[%s11739_s1 + $0xdc] ss:$12 sps:$4 sm:$0xff]   ;;  %v8081_v38 = vld [vmem:[%s11739_s1 + $0xd8] ss:$12 sps:$4 sm:$0xff]   ;;  %v8083_v40 = vld [vmem:[%s11739_s1 + $0xf4] ss:$12 sps:$4 sm:$0xff]  }
   0xe   :  { %v8079_v37 = vld [vmem:[%s11739_s1 + $0x55c] ss:$12 sps:$4 sm:$0xff]   ;;  %v8082_v39 = vld [vmem:[%s11739_s1 + $0x558] ss:$12 sps:$4 sm:$0xff]   ;;  %v8085_v41 = vld [vmem:[%s11739_s1 + $0x574] ss:$12 sps:$4 sm:$0xff]  }
   0xf   :  { %4851 = vmatpush1.bf16.msra.mxu1 %v8045_v14  ;;  %v8087_v42 = vld [vmem:[%s11739_s1 + $0xf0] ss:$12 sps:$4 sm:$0xff]   ;;  %v8089_v44 = vld [vmem:[%s11739_s1 + $0x10c] ss:$12 sps:$4 sm:$0xff]   ;;  %v8093_v46 = vld [vmem:[%s11739_s1 + $0x108] ss:$12 sps:$4 sm:$0xff]  }
  0x10   :  { %5040 = vmatpush1.bf16.msra.mxu0 %v8046_v15  ;;  %4852 = vmatprep.subr.bf16.mxu1 %v8047_v16  ;;  %v8088_v43 = vld [vmem:[%s11739_s1 + $0x570] ss:$12 sps:$4 sm:$0xff]   ;;  %v8091_v45 = vld [vmem:[%s11739_s1 + $0x58c] ss:$12 sps:$4 sm:$0xff]   ;;  %v8094_v47 = vld [vmem:[%s11739_s1 + $0x588] ss:$12 sps:$4 sm:$0xff]  }
  0x11   :  { %5041 = vmatprep.subr.bf16.mxu0 %v8049_v17  ;;  %v8121_v48 = vld [vmem:[%s11740_s0 + $0x4] ss:$108 sps:$4 sm:$0xff]   ;;  %v8127_v51 = vld [vmem:[%s11740_s0 + $0x1c] ss:$108 sps:$4 sm:$0xff]   ;;  %v8099_v52 = vld [vmem:[%s11739_s1 + $0x120] ss:$12 sps:$4 sm:$0xff]  }
  0x12   :  { %v8095_v49 = vld [vmem:[%s11739_s1 + $0x124] ss:$12 sps:$4 sm:$0xff]   ;;  %4876 = vmatprep.mubr.bf16.mxu1 %v8121_v48  ;;  %v8100_v53 = vld [vmem:[%s11739_s1 + $0x5a0] ss:$12 sps:$4 sm:$0xff]   ;;  %v8101_v54 = vld [vmem:[%s11739_s1 + $0x13c] ss:$12 sps:$4 sm:$0xff]   ;;  %5065 = vmatprep.mubr.bf16.mxu0 %v8127_v51 }
  0x13   :  { %4853 = vmatpush1.bf16.msra.mxu1 %v8051_v18  ;;  %v8097_v50 = vld [vmem:[%s11739_s1 + $0x5a4] ss:$12 sps:$4 sm:$0xff]   ;;  %v8103_v55 = vld [vmem:[%s11739_s1 + $0x5bc] ss:$12 sps:$4 sm:$0xff]   ;;  %v8107_v58 = vld [vmem:[%s11739_s1 + $0x154] ss:$12 sps:$4 sm:$0xff]  }
  0x14   :  { %5042 = vmatpush1.bf16.msra.mxu0 %v8052_v19  ;;  %4854 = vmatprep.subr.bf16.mxu1 %v8053_v20  ;;  %v8105_v56 = vld [vmem:[%s11739_s1 + $0x138] ss:$12 sps:$4 sm:$0xff]   ;;  %v8109_v59 = vld [vmem:[%s11739_s1 + $0x5d4] ss:$12 sps:$4 sm:$0xff]   ;;  %v8111_v60 = vld [vmem:[%s11739_s1 + $0x150] ss:$12 sps:$4 sm:$0xff]  }
  0x15   :  { %5043 = vmatprep.subr.bf16.mxu0 %v8055_v21  ;;  %v8106_v57 = vld [vmem:[%s11739_s1 + $0x5b8] ss:$12 sps:$4 sm:$0xff]   ;;  %v8112_v61 = vld [vmem:[%s11739_s1 + $0x5d0] ss:$12 sps:$4 sm:$0xff]   ;;  %v8117_v0 = vld [vmem:[%s11739_s1 + $0x168] ss:$12 sps:$4 sm:$0xff]  }
  0x16   :  { %v8113_v62 = vld [vmem:[%s11739_s1 + $0x16c] ss:$12 sps:$4 sm:$0xff]   ;;  %v8118_v1 = vld [vmem:[%s11739_s1 + $0x5e8] ss:$12 sps:$4 sm:$0xff]   ;;  %v8124_v2 = vld [vmem:[%s11739_s1 + $0x184] ss:$12 sps:$4 sm:$0xff]  }
  0x17   :  { %4855 = vmatpush1.bf16.msra.mxu1 %v8057_v22  ;;  %v8115_v63 = vld [vmem:[%s11739_s1 + $0x5ec] ss:$12 sps:$4 sm:$0xff]   ;;  %v8130_v3 = vld [vmem:[%s11739_s1 + $0x604] ss:$12 sps:$4 sm:$0xff]   ;;  %v8133_v8 = vld [vmem:[%s11739_s1 + $0x19c] ss:$12 sps:$4 sm:$0xff]  }
  0x18   :  { %5044 = vmatpush1.bf16.msra.mxu0 %v8058_v23  ;;  %4856 = vmatprep.subr.bf16.mxu1 %v8059_v24  ;;  %v8119_v4 = vld [vmem:[%s11740_s0] ss:$108 sps:$4 sm:$0xff]   ;;  %v8125_v6 = vld [vmem:[%s11740_s0 + $0x18] ss:$108 sps:$4 sm:$0xff]   ;;  %v8136_v9 = vld [vmem:[%s11739_s1 + $0x61c] ss:$12 sps:$4 sm:$0xff]  }
  0x19   :  { %5045 = vmatprep.subr.bf16.mxu0 %v8061_v25  ;;  %v8122_v5 = vld [vmem:[%s11739_s1 + $0x180] ss:$12 sps:$4 sm:$0xff]   ;;  %v8131_v10 = vld [vmem:[%s11739_s1 + $0x198] ss:$12 sps:$4 sm:$0xff]   ;;  %v8137_v14 = vld [vmem:[%s11739_s1 + $0x1b0] ss:$12 sps:$4 sm:$0xff]  }
  0x1a   :  { %v8128_v7 = vld [vmem:[%s11739_s1 + $0x600] ss:$12 sps:$4 sm:$0xff]   ;;  %v8134_v11 = vld [vmem:[%s11739_s1 + $0x618] ss:$12 sps:$4 sm:$0xff]   ;;  %v8140_v15 = vld [vmem:[%s11739_s1 + $0x630] ss:$12 sps:$4 sm:$0xff]  }
  0x1b   :  { %4857 = vmatpush1.bf16.msra.mxu1 %v8063_v26  ;;  %v8139_v12 = vld [vmem:[%s11739_s1 + $0x1b4] ss:$12 sps:$4 sm:$0xff]   ;;  %v8145_v16 = vld [vmem:[%s11739_s1 + $0x1cc] ss:$12 sps:$4 sm:$0xff]   ;;  %v8151_v20 = vld [vmem:[%s11739_s1 + $0x1e4] ss:$12 sps:$4 sm:$0xff]  }
  0x1c   :  { %5046 = vmatpush1.bf16.msra.mxu0 %v8064_v27  ;;  %4858 = vmatprep.subr.bf16.mxu1 %v8065_v28  ;;  %v8142_v13 = vld [vmem:[%s11739_s1 + $0x634] ss:$12 sps:$4 sm:$0xff]   ;;  %v8148_v17 = vld [vmem:[%s11739_s1 + $0x64c] ss:$12 sps:$4 sm:$0xff]   ;;  %v8154_v21 = vld [vmem:[%s11739_s1 + $0x664] ss:$12 sps:$4 sm:$0xff]  }
  0x1d   :  { %5047 = vmatprep.subr.bf16.mxu0 %v8067_v29  ;;  %v8143_v18 = vld [vmem:[%s11739_s1 + $0x1c8] ss:$12 sps:$4 sm:$0xff]   ;;  %v8149_v23 = vld [vmem:[%s11739_s1 + $0x1e0] ss:$12 sps:$4 sm:$0xff]   ;;  %v8207_v28 = vld [vmem:[%s11740_s0 + $0xd8] ss:$108 sps:$4 sm:$0xff]  }
  0x1e   :  { %v8146_v19 = vld [vmem:[%s11739_s1 + $0x648] ss:$12 sps:$4 sm:$0xff]   ;;  %v8152_v24 = vld [vmem:[%s11739_s1 + $0x660] ss:$12 sps:$4 sm:$0xff]   ;;  %v8208_v29 = vld [vmem:[%s11740_s0 + $0xf0] ss:$108 sps:$4 sm:$0xff]  }
  0x1f   :  { %4859 = vmatpush1.bf16.msra.mxu1 %v8069_v30  ;;  %v8197_v22 = vld [vmem:[%s11740_s0 + $0xdc] ss:$108 sps:$4 sm:$0xff]   ;;  %v8202_v25 = vld [vmem:[%s11740_s0 + $0xf4] ss:$108 sps:$4 sm:$0xff]   ;;  %v8155_v30 = vld [vmem:[%s11739_s1 + $0x1f8] ss:$12 sps:$4 sm:$0xff]  }
  0x20   :  { %5048 = vmatpush1.bf16.msra.mxu0 %v8070_v31  ;;  %4860 = vmatprep.subr.bf16.mxu1 %v8071_v32  ;;  %v8157_v26 = vld [vmem:[%s11739_s1 + $0x1fc] ss:$12 sps:$4 sm:$0xff]   ;;  %v8158_v31 = vld [vmem:[%s11739_s1 + $0x678] ss:$12 sps:$4 sm:$0xff]   ;;  %v8163_v32 = vld [vmem:[%s11739_s1 + $0x214] ss:$12 sps:$4 sm:$0xff]  }
  0x21   :  { %5049 = vmatprep.subr.bf16.mxu0 %v8073_v33  ;;  %v8160_v27 = vld [vmem:[%s11739_s1 + $0x67c] ss:$12 sps:$4 sm:$0xff]   ;;  %v8166_v33 = vld [vmem:[%s11739_s1 + $0x694] ss:$12 sps:$4 sm:$0xff]   ;;  %v8241_v51 = vld [vmem:[%s11740_s0 + $0x24] ss:$108 sps:$4 sm:$0xff]  }
  0x22   :  { %v8176_v48 = vld [vmem:[%s11739_s1 + $0x6c0] ss:$12 sps:$4 sm:$0xff]  }
  0x23   :  { %4861 = vmatpush1.bf16.msra.mxu1 %v8075_v34  ;;  %v8215_v34 = vld [vmem:[%s11740_s0 + $0x1b4] ss:$108 sps:$4 sm:$0xff]  }
  0x24   :  { %5050 = vmatpush1.bf16.msra.mxu0 %v8076_v35  ;;  %4862 = vmatprep.subr.bf16.mxu1 %v8077_v36  ;;  %v8161_v35 = vld [vmem:[%s11739_s1 + $0x210] ss:$12 sps:$4 sm:$0xff]  }
  0x25   :  { %5051 = vmatprep.subr.bf16.mxu0 %v8079_v37  ;;  %v8164_v36 = vld [vmem:[%s11739_s1 + $0x690] ss:$12 sps:$4 sm:$0xff]   ;;  %v8220_v37 = vld [vmem:[%s11740_s0 + $0x1cc] ss:$108 sps:$4 sm:$0xff]  }
  0x27   :  { %4863 = vmatpush1.bf16.msra.mxu1 %v8081_v38  ;;  %v8169_v38 = vld [vmem:[%s11739_s1 + $0x22c] ss:$12 sps:$4 sm:$0xff]  }
  0x28   :  { %5052 = vmatpush1.bf16.msra.mxu0 %v8082_v39  ;;  %4864 = vmatprep.subr.bf16.mxu1 %v8083_v40  ;;  %v8172_v39 = vld [vmem:[%s11739_s1 + $0x6ac] ss:$12 sps:$4 sm:$0xff]   ;;  %v8225_v40 = vld [vmem:[%s11740_s0 + $0x1b0] ss:$108 sps:$4 sm:$0xff]  }
  0x29   :  { %5053 = vmatprep.subr.bf16.mxu0 %v8085_v41  ;;  %v8226_v41 = vld [vmem:[%s11740_s0 + $0x1c8] ss:$108 sps:$4 sm:$0xff]  }
  0x2b   :  { %4865 = vmatpush1.bf16.msra.mxu1 %v8087_v42  ;;  %v8167_v42 = vld [vmem:[%s11739_s1 + $0x228] ss:$12 sps:$4 sm:$0xff]  }
  0x2c   :  { %5054 = vmatpush1.bf16.msra.mxu0 %v8088_v43  ;;  %4866 = vmatprep.subr.bf16.mxu1 %v8089_v44  ;;  %v8170_v43 = vld [vmem:[%s11739_s1 + $0x6a8] ss:$12 sps:$4 sm:$0xff]   ;;  %v8175_v44 = vld [vmem:[%s11739_s1 + $0x244] ss:$12 sps:$4 sm:$0xff]  }
  0x2d   :  { %5055 = vmatprep.subr.bf16.mxu0 %v8091_v45  ;;  %v8178_v45 = vld [vmem:[%s11739_s1 + $0x6c4] ss:$12 sps:$4 sm:$0xff]  }
  0x2f   :  { %4867 = vmatpush1.bf16.msra.mxu1 %v8093_v46  ;;  %v8173_v46 = vld [vmem:[%s11739_s1 + $0x240] ss:$12 sps:$4 sm:$0xff]  }
  0x30   :  { %5056 = vmatpush1.bf16.msra.mxu0 %v8094_v47  ;;  %4868 = vmatprep.subr.bf16.mxu1 %v8095_v49  ;;  %v8235_v47 = vld [vmem:[%s11740_s0 + $0xc] ss:$108 sps:$4 sm:$0xff]   ;;  %v8181_v49 = vld [vmem:[%s11739_s1 + $0x25c] ss:$12 sps:$4 sm:$0xff]  }
  0x31   :  { %5057 = vmatprep.subr.bf16.mxu0 %v8097_v50  ;;  %v8184_v50 = vld [vmem:[%s11739_s1 + $0x6dc] ss:$12 sps:$4 sm:$0xff]  }
  0x33   :  { %4869 = vmatpush1.bf16.msra.mxu1 %v8099_v52  ;;  %v8179_v52 = vld [vmem:[%s11739_s1 + $0x258] ss:$12 sps:$4 sm:$0xff]  }
  0x34   :  { %5058 = vmatpush1.bf16.msra.mxu0 %v8100_v53  ;;  %4870 = vmatprep.subr.bf16.mxu1 %v8101_v54  ;;  %v8182_v53 = vld [vmem:[%s11739_s1 + $0x6d8] ss:$12 sps:$4 sm:$0xff]   ;;  %v8187_v54 = vld [vmem:[%s11739_s1 + $0x274] ss:$12 sps:$4 sm:$0xff]  }
  0x35   :  { %5059 = vmatprep.subr.bf16.mxu0 %v8103_v55  ;;  %v8190_v55 = vld [vmem:[%s11739_s1 + $0x6f4] ss:$12 sps:$4 sm:$0xff]  }
  0x37   :  { %4871 = vmatpush1.bf16.msra.mxu1 %v8105_v56  ;;  %v8185_v56 = vld [vmem:[%s11739_s1 + $0x270] ss:$12 sps:$4 sm:$0xff]  }
  0x38   :  { %5060 = vmatpush1.bf16.msra.mxu0 %v8106_v57  ;;  %4872 = vmatprep.subr.bf16.mxu1 %v8107_v58  ;;  %v8188_v57 = vld [vmem:[%s11739_s1 + $0x6f0] ss:$12 sps:$4 sm:$0xff]   ;;  %v8193_v58 = vld [vmem:[%s11739_s1 + $0x28c] ss:$12 sps:$4 sm:$0xff]  }
  0x39   :  { %5061 = vmatprep.subr.bf16.mxu0 %v8109_v59  ;;  %v8196_v59 = vld [vmem:[%s11739_s1 + $0x70c] ss:$12 sps:$4 sm:$0xff]  }
  0x3b   :  { %4873 = vmatpush1.bf16.msra.mxu1 %v8111_v60  ;;  %v8191_v60 = vld [vmem:[%s11739_s1 + $0x288] ss:$12 sps:$4 sm:$0xff]  }
  0x3c   :  { %5062 = vmatpush1.bf16.msra.mxu0 %v8112_v61  ;;  %4874 = vmatprep.subr.bf16.mxu1 %v8113_v62  ;;  %v8194_v61 = vld [vmem:[%s11739_s1 + $0x708] ss:$12 sps:$4 sm:$0xff]   ;;  %v8201_v62 = vld [vmem:[%s11739_s1 + $0x2a4] ss:$12 sps:$4 sm:$0xff]  }
  0x3d   :  { %5063 = vmatprep.subr.bf16.mxu0 %v8115_v63  ;;  %v8206_v63 = vld [vmem:[%s11739_s1 + $0x724] ss:$12 sps:$4 sm:$0xff]  }
  0x3f   :  { %4875 = vmatpush1.bf16.msra.mxu1 %v8117_v0  ;;  %v8199_v0 = vld [vmem:[%s11739_s1 + $0x2a0] ss:$12 sps:$4 sm:$0xff]  }
  0x40   :  { %5064 = vmatpush1.bf16.msra.mxu0 %v8118_v1  ;;  %4907 = vmatprep.subr.bf16.mxu1 %v8124_v2  ;;  %v8204_v1 = vld [vmem:[%s11739_s1 + $0x720] ss:$12 sps:$4 sm:$0xff]   ;;  %v8211_v2 = vld [vmem:[%s11739_s1 + $0x2bc] ss:$12 sps:$4 sm:$0xff]  }
  0x41   :  { %5096 = vmatprep.subr.bf16.mxu0 %v8130_v3  ;;  %v8214_v3 = vld [vmem:[%s11739_s1 + $0x73c] ss:$12 sps:$4 sm:$0xff]  }
  0x42   :  { %4877 = vmatmul.mubr.bf16.vlgmr.msra.gmra.mrb[0].mxu1 %v8119_v4  ;;  %v8209_v4 = vld [vmem:[%s11739_s1 + $0x2b8] ss:$12 sps:$4 sm:$0xff]  }
  0x43   :  { %5066 = vmatmul.mubr.bf16.vlgmr.msra.gmra.mrb[0].mxu0 %v8125_v6  ;;  %4908 = vmatpush1.bf16.msra.mxu1 %v8122_v5  ;;  %v8212_v5 = vld [vmem:[%s11739_s1 + $0x738] ss:$12 sps:$4 sm:$0xff]   ;;  %v8219_v6 = vld [vmem:[%s11739_s1 + $0x2d4] ss:$12 sps:$4 sm:$0xff]  }
  0x44   :  { %5097 = vmatpush1.bf16.msra.mxu0 %v8128_v7  ;;  %4909 = vmatprep.subr.bf16.mxu1 %v8133_v8  ;;  %v8224_v7 = vld [vmem:[%s11739_s1 + $0x754] ss:$12 sps:$4 sm:$0xff]   ;;  %v8217_v8 = vld [vmem:[%s11739_s1 + $0x2d0] ss:$12 sps:$4 sm:$0xff]  }
  0x45   :  { %5098 = vmatprep.subr.bf16.mxu0 %v8136_v9  ;;  %4886 = vmatprep.mubr.bf16.mxu1 %v8197_v22  ;;  %v8222_v9 = vld [vmem:[%s11739_s1 + $0x750] ss:$12 sps:$4 sm:$0xff]   ;;  %v8245_v22 = vld [vmem:[%s11739_s1 + $0x318] ss:$12 sps:$4 sm:$0xff]  }
  0x46   :  { %5075 = vmatprep.mubr.bf16.mxu0 %v8202_v25  ;;  %v8248_v25 = vld [vmem:[%s11739_s1 + $0x798] ss:$12 sps:$4 sm:$0xff]  }
  0x47   :  { %4910 = vmatpush1.bf16.msra.mxu1 %v8131_v10  ;;  %v8229_v10 = vld [vmem:[%s11739_s1 + $0x2ec] ss:$12 sps:$4 sm:$0xff]  }
  0x48   :  { %5099 = vmatpush1.bf16.msra.mxu0 %v8134_v11  ;;  %4911 = vmatprep.subr.bf16.mxu1 %v8139_v12  ;;  %v8232_v11 = vld [vmem:[%s11739_s1 + $0x76c] ss:$12 sps:$4 sm:$0xff]   ;;  %v8227_v12 = vld [vmem:[%s11739_s1 + $0x2e8] ss:$12 sps:$4 sm:$0xff]  }
  0x49   :  { %5100 = vmatprep.subr.bf16.mxu0 %v8142_v13  ;;  %v8230_v13 = vld [vmem:[%s11739_s1 + $0x768] ss:$12 sps:$4 sm:$0xff]  }
  0x4a   :  { %4887 = vmatmul.mubr.bf16.gmra.mrb[4].mxu1 %v8207_v28  ;;  %v8251_v28 = vld [vmem:[%s11739_s1 + $0x330] ss:$12 sps:$4 sm:$0xff]  }
  0x4b   :  { %4912 = vmatpush1.bf16.msra.mxu1 %v8137_v14  ;;  %5076 = vmatmul.mubr.bf16.gmra.mrb[4].mxu0 %v8208_v29  ;;  %v8238_v14 = vld [vmem:[%s11739_s1 + $0x304] ss:$12 sps:$4 sm:$0xff]  }
  0x4c   :  { %5101 = vmatpush1.bf16.msra.mxu0 %v8140_v15  ;;  %4913 = vmatprep.subr.bf16.mxu1 %v8145_v16  ;;  %v8244_v15 = vld [vmem:[%s11739_s1 + $0x784] ss:$12 sps:$4 sm:$0xff]   ;;  %v8233_v16 = vld [vmem:[%s11740_s0 + $0x8] ss:$108 sps:$4 sm:$0xff]  }
  0x4d   :  { %5102 = vmatprep.subr.bf16.mxu0 %v8148_v17  ;;  %4896 = vmatprep.mubr.bf16.mxu1 %v8215_v34  ;;  %v8236_v17 = vld [vmem:[%s11739_s1 + $0x300] ss:$12 sps:$4 sm:$0xff]   ;;  %v8254_v29 = vld [vmem:[%s11739_s1 + $0x7b0] ss:$12 sps:$4 sm:$0xff]   ;;  %v8257_v34 = vld [vmem:[%s11739_s1 + $0x348] ss:$12 sps:$4 sm:$0xff]  }
  0x4e   :  { %5085 = vmatprep.mubr.bf16.mxu0 %v8220_v37  ;;  %v8260_v37 = vld [vmem:[%s11739_s1 + $0x7c8] ss:$12 sps:$4 sm:$0xff]  }
  0x4f   :  { %4914 = vmatpush1.bf16.msra.mxu1 %v8143_v18  ;;  %v8239_v18 = vld [vmem:[%s11740_s0 + $0x20] ss:$108 sps:$4 sm:$0xff]  }
  0x50   :  { %5103 = vmatpush1.bf16.msra.mxu0 %v8146_v19  ;;  %4915 = vmatprep.subr.bf16.mxu1 %v8151_v20  ;;  %v8242_v19 = vld [vmem:[%s11739_s1 + $0x780] ss:$12 sps:$4 sm:$0xff]   ;;  %v8247_v20 = vld [vmem:[%s11739_s1 + $0x31c] ss:$12 sps:$4 sm:$0xff]  }
  0x51   :  { %5104 = vmatprep.subr.bf16.mxu0 %v8154_v21  ;;  %v8250_v21 = vld [vmem:[%s11739_s1 + $0x79c] ss:$12 sps:$4 sm:$0xff]  }
  0x52   :  { %4897 = vmatmul.mubr.bf16.gmra.mrb[8].mxu1 %v8225_v40  ;;  %v8263_v40 = vld [vmem:[%s11739_s1 + $0x360] ss:$12 sps:$4 sm:$0xff]  }
  0x53   :  { %4916 = vmatpush1.bf16.msra.mxu1 %v8149_v23  ;;  %5086 = vmatmul.mubr.bf16.gmra.mrb[8].mxu0 %v8226_v41  ;;  %v8311_v23 = vld [vmem:[%s11740_s0 + $0xe4] ss:$108 sps:$4 sm:$0xff]   ;;  %v8266_v41 = vld [vmem:[%s11739_s1 + $0x7e0] ss:$12 sps:$4 sm:$0xff]  }
  0x54   :  { %5105 = vmatpush1.bf16.msra.mxu0 %v8152_v24  ;;  %4917 = vmatprep.subr.bf16.mxu1 %v8157_v26  ;;  %v8317_v24 = vld [vmem:[%s11740_s0 + $0xfc] ss:$108 sps:$4 sm:$0xff]   ;;  %v8253_v26 = vld [vmem:[%s11739_s1 + $0x334] ss:$12 sps:$4 sm:$0xff]  }
  0x55   :  { %5106 = vmatprep.subr.bf16.mxu0 %v8160_v27  ;;  %4939 = vmatprep.mubr.bf16.mxu1 %v8235_v47  ;;  %v8256_v27 = vld [vmem:[%s11739_s1 + $0x7b4] ss:$12 sps:$4 sm:$0xff]   ;;  %v8352_v47 = vld [vmem:[%s11740_s0 + $0x2c] ss:$108 sps:$4 sm:$0xff]  }
  0x56   :  { %5128 = vmatprep.mubr.bf16.mxu0 %v8241_v51  ;;  %v8280_v51 = vld [vmem:[%s11739_s1 + $0x814] ss:$12 sps:$4 sm:$0xff]  }
  0x57   :  { %4918 = vmatpush1.bf16.msra.mxu1 %v8155_v30  ;;  %v8313_v30 = vld [vmem:[%s11740_s0 + $0xe0] ss:$108 sps:$4 sm:$0xff]  }
  0x58   :  { %5107 = vmatpush1.bf16.msra.mxu0 %v8158_v31  ;;  %4919 = vmatprep.subr.bf16.mxu1 %v8163_v32  ;;  %v8322_v31 = vld [vmem:[%s11740_s0 + $0xf8] ss:$108 sps:$4 sm:$0xff]  }
  0x59   :  { %5108 = vmatprep.subr.bf16.mxu0 %v8166_v33  ;;  %v8259_v32 = vld [vmem:[%s11739_s1 + $0x34c] ss:$12 sps:$4 sm:$0xff]  }
  0x5a   :  { %v8262_v33 = vld [vmem:[%s11739_s1 + $0x7cc] ss:$12 sps:$4 sm:$0xff]  }
  0x5b   :  { %4920 = vmatpush1.bf16.msra.mxu1 %v8161_v35  ;;  %v8329_v35 = vld [vmem:[%s11740_s0 + $0x1bc] ss:$108 sps:$4 sm:$0xff]  }
  0x5c   :  { %5109 = vmatpush1.bf16.msra.mxu0 %v8164_v36  ;;  %4921 = vmatprep.subr.bf16.mxu1 %v8169_v38  ;;  %v8335_v36 = vld [vmem:[%s11740_s0 + $0x1d4] ss:$108 sps:$4 sm:$0xff]   ;;  %v8265_v38 = vld [vmem:[%s11739_s1 + $0x364] ss:$12 sps:$4 sm:$0xff]  }
  0x5d   :  { %5110 = vmatprep.subr.bf16.mxu0 %v8172_v39  ;;  %v8268_v39 = vld [vmem:[%s11739_s1 + $0x7e4] ss:$12 sps:$4 sm:$0xff]  }
  0x5f   :  { %4922 = vmatpush1.bf16.msra.mxu1 %v8167_v42  ;;  %v8331_v42 = vld [vmem:[%s11740_s0 + $0x1b8] ss:$108 sps:$4 sm:$0xff]  }
  0x60   :  { %5111 = vmatpush1.bf16.msra.mxu0 %v8170_v43  ;;  %4923 = vmatprep.subr.bf16.mxu1 %v8175_v44  ;;  %v8340_v43 = vld [vmem:[%s11740_s0 + $0x1d0] ss:$108 sps:$4 sm:$0xff]  }
  0x61   :  { %5112 = vmatprep.subr.bf16.mxu0 %v8178_v45  ;;  %v8271_v44 = vld [vmem:[%s11739_s1 + $0x37c] ss:$12 sps:$4 sm:$0xff]  }
  0x62   :  { %v8274_v45 = vld [vmem:[%s11739_s1 + $0x7fc] ss:$12 sps:$4 sm:$0xff]  }
  0x63   :  { %4924 = vmatpush1.bf16.msra.mxu1 %v8173_v46  ;;  %v8349_v46 = vld [vmem:[%s11740_s0 + $0x14] ss:$108 sps:$4 sm:$0xff]  }
  0x64   :  { %5113 = vmatpush1.bf16.msra.mxu0 %v8176_v48  ;;  %4925 = vmatprep.subr.bf16.mxu1 %v8181_v49  ;;  %v8269_v48 = vld [vmem:[%s11739_s1 + $0x378] ss:$12 sps:$4 sm:$0xff]  }
  0x65   :  { %5114 = vmatprep.subr.bf16.mxu0 %v8184_v50  ;;  %v8272_v49 = vld [vmem:[%s11739_s1 + $0x7f8] ss:$12 sps:$4 sm:$0xff]   ;;  %v8277_v50 = vld [vmem:[%s11739_s1 + $0x394] ss:$12 sps:$4 sm:$0xff]  }
  0x67   :  { %4926 = vmatpush1.bf16.msra.mxu1 %v8179_v52  ;;  %v8275_v52 = vld [vmem:[%s11739_s1 + $0x390] ss:$12 sps:$4 sm:$0xff]  }
  0x68   :  { %5115 = vmatpush1.bf16.msra.mxu0 %v8182_v53  ;;  %4927 = vmatprep.subr.bf16.mxu1 %v8187_v54  ;;  %v8278_v53 = vld [vmem:[%s11739_s1 + $0x810] ss:$12 sps:$4 sm:$0xff]   ;;  %v8283_v54 = vld [vmem:[%s11739_s1 + $0x3ac] ss:$12 sps:$4 sm:$0xff]  }
  0x69   :  { %5116 = vmatprep.subr.bf16.mxu0 %v8190_v55  ;;  %v8286_v55 = vld [vmem:[%s11739_s1 + $0x82c] ss:$12 sps:$4 sm:$0xff]  }
  0x6b   :  { %4928 = vmatpush1.bf16.msra.mxu1 %v8185_v56  ;;  %v8281_v56 = vld [vmem:[%s11739_s1 + $0x3a8] ss:$12 sps:$4 sm:$0xff]  }
  0x6c   :  { %5117 = vmatpush1.bf16.msra.mxu0 %v8188_v57  ;;  %4929 = vmatprep.subr.bf16.mxu1 %v8193_v58  ;;  %v8284_v57 = vld [vmem:[%s11739_s1 + $0x828] ss:$12 sps:$4 sm:$0xff]   ;;  %v8289_v58 = vld [vmem:[%s11739_s1 + $0x3c4] ss:$12 sps:$4 sm:$0xff]  }
  0x6d   :  { %5118 = vmatprep.subr.bf16.mxu0 %v8196_v59  ;;  %v8292_v59 = vld [vmem:[%s11739_s1 + $0x844] ss:$12 sps:$4 sm:$0xff]  }
  0x6f   :  { %4930 = vmatpush1.bf16.msra.mxu1 %v8191_v60  ;;  %v8287_v60 = vld [vmem:[%s11739_s1 + $0x3c0] ss:$12 sps:$4 sm:$0xff]  }
  0x70   :  { %5119 = vmatpush1.bf16.msra.mxu0 %v8194_v61  ;;  %4931 = vmatprep.subr.bf16.mxu1 %v8201_v62  ;;  %v8290_v61 = vld [vmem:[%s11739_s1 + $0x840] ss:$12 sps:$4 sm:$0xff]   ;;  %v8295_v62 = vld [vmem:[%s11739_s1 + $0x3dc] ss:$12 sps:$4 sm:$0xff]  }
  0x71   :  { %5120 = vmatprep.subr.bf16.mxu0 %v8206_v63  ;;  %v8298_v63 = vld [vmem:[%s11739_s1 + $0x85c] ss:$12 sps:$4 sm:$0xff]  }
  0x73   :  { %4932 = vmatpush1.bf16.msra.mxu1 %v8199_v0  ;;  %v8293_v0 = vld [vmem:[%s11739_s1 + $0x3d8] ss:$12 sps:$4 sm:$0xff]  }
  0x74   :  { %5121 = vmatpush1.bf16.msra.mxu0 %v8204_v1  ;;  %4933 = vmatprep.subr.bf16.mxu1 %v8211_v2  ;;  %v8296_v1 = vld [vmem:[%s11739_s1 + $0x858] ss:$12 sps:$4 sm:$0xff]   ;;  %v8301_v2 = vld [vmem:[%s11739_s1 + $0x3f4] ss:$12 sps:$4 sm:$0xff]  }
  0x75   :  { %5122 = vmatprep.subr.bf16.mxu0 %v8214_v3  ;;  %v8304_v3 = vld [vmem:[%s11739_s1 + $0x874] ss:$12 sps:$4 sm:$0xff]  }
  0x77   :  { %4934 = vmatpush1.bf16.msra.mxu1 %v8209_v4  ;;  %v8299_v4 = vld [vmem:[%s11739_s1 + $0x3f0] ss:$12 sps:$4 sm:$0xff]  }
  0x78   :  { %5123 = vmatpush1.bf16.msra.mxu0 %v8212_v5  ;;  %4935 = vmatprep.subr.bf16.mxu1 %v8219_v6  ;;  %v8302_v5 = vld [vmem:[%s11739_s1 + $0x870] ss:$12 sps:$4 sm:$0xff]   ;;  %v8307_v6 = vld [vmem:[%s11739_s1 + $0x40c] ss:$12 sps:$4 sm:$0xff]  }
  0x79   :  { %5124 = vmatprep.subr.bf16.mxu0 %v8224_v7  ;;  %v8310_v7 = vld [vmem:[%s11739_s1 + $0x88c] ss:$12 sps:$4 sm:$0xff]  }
  0x7b   :  { %4936 = vmatpush1.bf16.msra.mxu1 %v8217_v8  ;;  %v8305_v8 = vld [vmem:[%s11739_s1 + $0x408] ss:$12 sps:$4 sm:$0xff]  }
  0x7c   :  { %5125 = vmatpush1.bf16.msra.mxu0 %v8222_v9  ;;  %4937 = vmatprep.subr.bf16.mxu1 %v8229_v10  ;;  %v8308_v9 = vld [vmem:[%s11739_s1 + $0x888] ss:$12 sps:$4 sm:$0xff]   ;;  %v8316_v10 = vld [vmem:[%s11739_s1 + $0x424] ss:$12 sps:$4 sm:$0xff]  }
  0x7d   :  { %5126 = vmatprep.subr.bf16.mxu0 %v8232_v11  ;;  %v8321_v11 = vld [vmem:[%s11739_s1 + $0x8a4] ss:$12 sps:$4 sm:$0xff]  }
  0x7f   :  { %4938 = vmatpush1.bf16.msra.mxu1 %v8227_v12  ;;  %v8314_v12 = vld [vmem:[%s11739_s1 + $0x420] ss:$12 sps:$4 sm:$0xff]  }
  0x80   :  { %5127 = vmatpush1.bf16.msra.mxu0 %v8230_v13  ;;  %4970 = vmatprep.subr.bf16.mxu1 %v8238_v14  ;;  %v8319_v13 = vld [vmem:[%s11739_s1 + $0x8a0] ss:$12 sps:$4 sm:$0xff]   ;;  %v8325_v14 = vld [vmem:[%s11739_s1 + $0x43c] ss:$12 sps:$4 sm:$0xff]  }
  0x81   :  { %5159 = vmatprep.subr.bf16.mxu0 %v8244_v15  ;;  %v8328_v15 = vld [vmem:[%s11739_s1 + $0x8bc] ss:$12 sps:$4 sm:$0xff]  }
  0x82   :  { %4940 = vmatmul.mubr.bf16.vlgmr.msra.gmra.mrb[0].mxu1 %v8233_v16  ;;  %v8323_v16 = vld [vmem:[%s11739_s1 + $0x438] ss:$12 sps:$4 sm:$0xff]  }
  0x83   :  { %5129 = vmatmul.mubr.bf16.vlgmr.msra.gmra.mrb[0].mxu0 %v8239_v18  ;;  %4971 = vmatpush1.bf16.msra.mxu1 %v8236_v17  ;;  %v8326_v17 = vld [vmem:[%s11739_s1 + $0x8b8] ss:$12 sps:$4 sm:$0xff]   ;;  %v8334_v18 = vld [vmem:[%s11739_s1 + $0x454] ss:$12 sps:$4 sm:$0xff]  }
  0x84   :  { %5160 = vmatpush1.bf16.msra.mxu0 %v8242_v19  ;;  %4972 = vmatprep.subr.bf16.mxu1 %v8247_v20  ;;  %v8339_v19 = vld [vmem:[%s11739_s1 + $0x8d4] ss:$12 sps:$4 sm:$0xff]   ;;  %v8332_v20 = vld [vmem:[%s11739_s1 + $0x450] ss:$12 sps:$4 sm:$0xff]  }
  0x85   :  { %5161 = vmatprep.subr.bf16.mxu0 %v8250_v21  ;;  %4949 = vmatprep.mubr.bf16.mxu1 %v8311_v23  ;;  %v8337_v21 = vld [vmem:[%s11739_s1 + $0x8d0] ss:$12 sps:$4 sm:$0xff]   ;;  %v8346_v23 = vld [vmem:[%s11739_s1 + $0x8ec] ss:$12 sps:$4 sm:$0xff]  }
  0x86   :  { %5138 = vmatprep.mubr.bf16.mxu0 %v8317_v24  ;;  %v8341_v24 = vld [vmem:[%s11739_s1 + $0x468] ss:$12 sps:$4 sm:$0xff]  }
  0x87   :  { %4973 = vmatpush1.bf16.msra.mxu1 %v8245_v22  ;;  %v8343_v22 = vld [vmem:[%s11739_s1 + $0x46c] ss:$12 sps:$4 sm:$0xff]  }
  0x88   :  { %5162 = vmatpush1.bf16.msra.mxu0 %v8248_v25  ;;  %4974 = vmatprep.subr.bf16.mxu1 %v8253_v26  ;;  %v8344_v25 = vld [vmem:[%s11739_s1 + $0x8e8] ss:$12 sps:$4 sm:$0xff]   ;;  %v8355_v26 = vld [vmem:[%s11739_s1 + $0x904] ss:$12 sps:$4 sm:$0xff]  }
  0x89   :  { %5163 = vmatprep.subr.bf16.mxu0 %v8256_v27  ;;  %v9735_v27 = vld [vmem:[%s11740_s0 + $0x10] ss:$108 sps:$4 sm:$0xff]  }
  0x8a   :  { %4950 = vmatmul.mubr.bf16.gmra.mrb[4].mxu1 %v8313_v30  ;;  %v8353_v30 = vld [vmem:[%s11739_s1 + $0x900] ss:$12 sps:$4 sm:$0xff]  }
  0x8b   :  { %5139 = vmatmul.mubr.bf16.gmra.mrb[4].mxu0 %v8322_v31  ;;  %4975 = vmatpush1.bf16.msra.mxu1 %v8251_v28  ;;  %v8356_v28 = vld [vmem:[%s11739_s1 + $0xc8] ss:$12 sps:$4 sm:$0xff]  }
  0x8c   :  { %5164 = vmatpush1.bf16.msra.mxu0 %v8254_v29  ;;  %4976 = vmatprep.subr.bf16.mxu1 %v8259_v32  ;;  %v8350_v29 = vld [vmem:[%s11740_s0 + $0x28] ss:$108 sps:$4 sm:$0xff]  }
  0x8d   :  { %5165 = vmatprep.subr.bf16.mxu0 %v8262_v33  ;;  %4959 = vmatprep.mubr.bf16.mxu1 %v8329_v35  ;;  %v8357_v31 = vld [vmem:[%s11739_s1 + $0x8] ss:$12 sps:$4 sm:$0xff]   ;;  %v8361_v33 = vld [vmem:[%s11739_s1 + $0xe0] ss:$12 sps:$4 sm:$0xff]   ;;  %v8358_v35 = vld [vmem:[%s11739_s1 + $0x918] ss:$12 sps:$4 sm:$0xff]  }
  0x8e   :  { %5148 = vmatprep.mubr.bf16.mxu0 %v8335_v36  ;;  %v8360_v32 = vld [vmem:[%s11739_s1 + $0x91c] ss:$12 sps:$4 sm:$0xff]   ;;  %v8419_v36 = vld [vmem:[%s11740_s0 + $0x104] ss:$108 sps:$4 sm:$0xff]  }
  0x8f   :  { %4977 = vmatpush1.bf16.msra.mxu1 %v8257_v34  ;;  %v9758_v34 = vld [vmem:[%s11740_s0 + $0xec] ss:$108 sps:$4 sm:$0xff]  }
  0x90   :  { %5166 = vmatpush1.bf16.msra.mxu0 %v8260_v37  ;;  %4978 = vmatprep.subr.bf16.mxu1 %v8265_v38  ;;  %v8362_v37 = vld [vmem:[%s11739_s1 + $0x20] ss:$12 sps:$4 sm:$0xff]  }
  0x91   :  { %5167 = vmatprep.subr.bf16.mxu0 %v8268_v39  ;;  %v8368_v38 = vld [vmem:[%s11739_s1 + $0x934] ss:$12 sps:$4 sm:$0xff]  }
  0x92   :  { %4960 = vmatmul.mubr.bf16.gmra.mrb[8].mxu1 %v8331_v42  ;;  %v9776_v39 = vld [vmem:[%s11740_s0 + $0xe8] ss:$108 sps:$4 sm:$0xff]   ;;  %v8370_v42 = vld [vmem:[%s11739_s1 + $0x38] ss:$12 sps:$4 sm:$0xff]  }
  0x93   :  { %5149 = vmatmul.mubr.bf16.gmra.mrb[8].mxu0 %v8340_v43  ;;  %4979 = vmatpush1.bf16.msra.mxu1 %v8263_v40  ;;  %v8369_v40 = vld [vmem:[%s11739_s1 + $0xf8] ss:$12 sps:$4 sm:$0xff]   ;;  %v8425_v43 = vld [vmem:[%s11740_s0 + $0x100] ss:$108 sps:$4 sm:$0xff]  }
  0x94   :  { %5168 = vmatpush1.bf16.msra.mxu0 %v8266_v41  ;;  %4980 = vmatprep.subr.bf16.mxu1 %v8271_v44  ;;  %v8366_v41 = vld [vmem:[%s11739_s1 + $0x930] ss:$12 sps:$4 sm:$0xff]   ;;  %v8373_v44 = vld [vmem:[%s11739_s1 + $0x94c] ss:$12 sps:$4 sm:$0xff]  }
  0x95   :  { %5169 = vmatprep.subr.bf16.mxu0 %v8274_v45  ;;  %5002 = vmatprep.mubr.bf16.mxu1 %v8349_v46  ;;  %v8374_v45 = vld [vmem:[%s11739_s1 + $0x110] ss:$12 sps:$4 sm:$0xff]  }
  0x96   :  { %5191 = vmatprep.mubr.bf16.mxu0 %v8352_v47  ;;  %v9800_v46 = vld [vmem:[%s11740_s0 + $0x1c4] ss:$108 sps:$4 sm:$0xff]   ;;  %v8371_v47 = vld [vmem:[%s11739_s1 + $0x948] ss:$12 sps:$4 sm:$0xff]  }
  0x97   :  { %4981 = vmatpush1.bf16.msra.mxu1 %v8269_v48  ;;  %v8432_v48 = vld [vmem:[%s11740_s0 + $0x1dc] ss:$108 sps:$4 sm:$0xff]  }
  0x98   :  { %5170 = vmatpush1.bf16.msra.mxu0 %v8272_v49  ;;  %4982 = vmatprep.subr.bf16.mxu1 %v8277_v50  ;;  %v8375_v49 = vld [vmem:[%s11739_s1 + $0x50] ss:$12 sps:$4 sm:$0xff]  }
  0x99   :  { %5171 = vmatprep.subr.bf16.mxu0 %v8280_v51  ;;  %v8381_v50 = vld [vmem:[%s11739_s1 + $0x964] ss:$12 sps:$4 sm:$0xff]   ;;  %v8382_v51 = vld [vmem:[%s11739_s1 + $0x128] ss:$12 sps:$4 sm:$0xff]  }
  0x9b   :  { %4983 = vmatpush1.bf16.msra.mxu1 %v8275_v52  ;;  %v9822_v52 = vld [vmem:[%s11740_s0 + $0x1c0] ss:$108 sps:$4 sm:$0xff]  }
  0x9c   :  { %5172 = vmatpush1.bf16.msra.mxu0 %v8278_v53  ;;  %4984 = vmatprep.subr.bf16.mxu1 %v8283_v54  ;;  %v8379_v53 = vld [vmem:[%s11739_s1 + $0x960] ss:$12 sps:$4 sm:$0xff]   ;;  %v8383_v54 = vld [vmem:[%s11739_s1 + $0x68] ss:$12 sps:$4 sm:$0xff]  }
  0x9d   :  { %5173 = vmatprep.subr.bf16.mxu0 %v8286_v55  ;;  %v8438_v55 = vld [vmem:[%s11740_s0 + $0x1d8] ss:$108 sps:$4 sm:$0xff]  }
  0x9f   :  { %4985 = vmatpush1.bf16.msra.mxu1 %v8281_v56  ;;  %v8386_v56 = vld [vmem:[%s11739_s1 + $0x97c] ss:$12 sps:$4 sm:$0xff]  }
  0xa0   :  { %5174 = vmatpush1.bf16.msra.mxu0 %v8284_v57  ;;  %4986 = vmatprep.subr.bf16.mxu1 %v8289_v58  ;;  %v8387_v57 = vld [vmem:[%s11739_s1 + $0x140] ss:$12 sps:$4 sm:$0xff]   ;;  %v8384_v58 = vld [vmem:[%s11739_s1 + $0x978] ss:$12 sps:$4 sm:$0xff]  }
  0xa1   :  { %5175 = vmatprep.subr.bf16.mxu0 %v8292_v59  ;;  %v8447_v59 = vld [vmem:[%s11740_s0 + $0x34] ss:$108 sps:$4 sm:$0xff]  }
  0xa3   :  { %4987 = vmatpush1.bf16.msra.mxu1 %v8287_v60  ;;  %v8388_v60 = vld [vmem:[%s11739_s1 + $0x80] ss:$12 sps:$4 sm:$0xff]  }
  0xa4   :  { %5176 = vmatpush1.bf16.msra.mxu0 %v8290_v61  ;;  %4988 = vmatprep.subr.bf16.mxu1 %v8295_v62  ;;  %v8391_v61 = vld [vmem:[%s11739_s1 + $0x994] ss:$12 sps:$4 sm:$0xff]   ;;  %v8392_v62 = vld [vmem:[%s11739_s1 + $0x158] ss:$12 sps:$4 sm:$0xff]  }
  0xa5   :  { %5177 = vmatprep.subr.bf16.mxu0 %v8298_v63  ;;  %v9007_v63 = vld [vmem:[%s11740_s0 + $0x4] ss:$108 sps:$4 sm:$0xff]  }
  0xa7   :  { %4989 = vmatpush1.bf16.msra.mxu1 %v8293_v0  ;;  %v8389_v0 = vld [vmem:[%s11739_s1 + $0x990] ss:$12 sps:$4 sm:$0xff]  }
  0xa8   :  { %5178 = vmatpush1.bf16.msra.mxu0 %v8296_v1  ;;  %4990 = vmatprep.subr.bf16.mxu1 %v8301_v2  ;;  %v8393_v1 = vld [vmem:[%s11739_s1 + $0x98] ss:$12 sps:$4 sm:$0xff]  }
  0xa9   :  { %5179 = vmatprep.subr.bf16.mxu0 %v8304_v3  ;;  %v8396_v2 = vld [vmem:[%s11739_s1 + $0x9ac] ss:$12 sps:$4 sm:$0xff]   ;;  %v8397_v3 = vld [vmem:[%s11739_s1 + $0x170] ss:$12 sps:$4 sm:$0xff]  }
  0xab   :  { %4991 = vmatpush1.bf16.msra.mxu1 %v8299_v4  ;;  %v8394_v4 = vld [vmem:[%s11739_s1 + $0x9a8] ss:$12 sps:$4 sm:$0xff]  }
  0xac   :  { %5180 = vmatpush1.bf16.msra.mxu0 %v8302_v5  ;;  %4992 = vmatprep.subr.bf16.mxu1 %v8307_v6  ;;  %v8398_v5 = vld [vmem:[%s11739_s1 + $0xb0] ss:$12 sps:$4 sm:$0xff]  }
  0xad   :  { %5181 = vmatprep.subr.bf16.mxu0 %v8310_v7  ;;  %v8401_v6 = vld [vmem:[%s11739_s1 + $0x9c4] ss:$12 sps:$4 sm:$0xff]   ;;  %v8402_v7 = vld [vmem:[%s11739_s1 + $0x248] ss:$12 sps:$4 sm:$0xff]  }
  0xaf   :  { %4993 = vmatpush1.bf16.msra.mxu1 %v8305_v8  ;;  %v8399_v8 = vld [vmem:[%s11739_s1 + $0x9c0] ss:$12 sps:$4 sm:$0xff]  }
  0xb0   :  { %5182 = vmatpush1.bf16.msra.mxu0 %v8308_v9  ;;  %4994 = vmatprep.subr.bf16.mxu1 %v8316_v10  ;;  %v8403_v9 = vld [vmem:[%s11739_s1 + $0x188] ss:$12 sps:$4 sm:$0xff]  }
  0xb1   :  { %5183 = vmatprep.subr.bf16.mxu0 %v8321_v11  ;;  %v8406_v10 = vld [vmem:[%s11739_s1 + $0x9dc] ss:$12 sps:$4 sm:$0xff]   ;;  %v8407_v11 = vld [vmem:[%s11739_s1 + $0x260] ss:$12 sps:$4 sm:$0xff]  }
  0xb3   :  { %4995 = vmatpush1.bf16.msra.mxu1 %v8314_v12  ;;  %v9008_v12 = vld [vmem:[%s11740_s0] ss:$108 sps:$4 sm:$0xff]  }
  0xb4   :  { %5184 = vmatpush1.bf16.msra.mxu0 %v8319_v13  ;;  %4996 = vmatprep.subr.bf16.mxu1 %v8325_v14  ;;  %v8404_v13 = vld [vmem:[%s11739_s1 + $0x9d8] ss:$12 sps:$4 sm:$0xff]   ;;  %v8408_v14 = vld [vmem:[%s11739_s1 + $0x1a0] ss:$12 sps:$4 sm:$0xff]  }
  0xb5   :  { %5185 = vmatprep.subr.bf16.mxu0 %v8328_v15  ;;  %v8411_v15 = vld [vmem:[%s11739_s1 + $0x9f4] ss:$12 sps:$4 sm:$0xff]  }
  0xb7   :  { %4997 = vmatpush1.bf16.msra.mxu1 %v8323_v16  ;;  %v8412_v16 = vld [vmem:[%s11739_s1 + $0x278] ss:$12 sps:$4 sm:$0xff]  }
  0xb8   :  { %5186 = vmatpush1.bf16.msra.mxu0 %v8326_v17  ;;  %4998 = vmatprep.subr.bf16.mxu1 %v8334_v18  ;;  %v8409_v17 = vld [vmem:[%s11739_s1 + $0x9f0] ss:$12 sps:$4 sm:$0xff]  }
  0xb9   :  { %5187 = vmatprep.subr.bf16.mxu0 %v8339_v19  ;;  %v9009_v18 = vld [vmem:[%s11740_s0 + $0xdc] ss:$108 sps:$4 sm:$0xff]   ;;  %v8413_v19 = vld [vmem:[%s11739_s1 + $0x1b8] ss:$12 sps:$4 sm:$0xff]  }
  0xbb   :  { %4999 = vmatpush1.bf16.msra.mxu1 %v8332_v20  ;;  %v8416_v20 = vld [vmem:[%s11739_s1 + $0xa0c] ss:$12 sps:$4 sm:$0xff]  }
  0xbc   :  { %5188 = vmatpush1.bf16.msra.mxu0 %v8337_v21  ;;  %5000 = vmatprep.subr.bf16.mxu1 %v8343_v22  ;;  %v8417_v21 = vld [vmem:[%s11739_s1 + $0x290] ss:$12 sps:$4 sm:$0xff]   ;;  %v8414_v22 = vld [vmem:[%s11739_s1 + $0xa08] ss:$12 sps:$4 sm:$0xff]  }
  0xbd   :  { %5189 = vmatprep.subr.bf16.mxu0 %v8346_v23  ;;  %v9010_v23 = vld [vmem:[%s11740_s0 + $0xd8] ss:$108 sps:$4 sm:$0xff]  }
  0xbf   :  { %5001 = vmatpush1.bf16.msra.mxu1 %v8341_v24  ;;  %v8418_v24 = vld [vmem:[%s11739_s1 + $0x1d0] ss:$12 sps:$4 sm:$0xff]  }
  0xc0   :  { %5190 = vmatpush1.bf16.msra.mxu0 %v8344_v25  ;;  %7371 = vmatprep.subr.bf16.mxu1 %v8356_v28  ;;  %v8423_v25 = vld [vmem:[%s11739_s1 + $0xa24] ss:$12 sps:$4 sm:$0xff]   ;;  %v8421_v28 = vld [vmem:[%s11739_s1 + $0xa20] ss:$12 sps:$4 sm:$0xff]  }
  0xc1   :  { %5222 = vmatprep.subr.bf16.mxu0 %v8355_v26  ;;  %v8424_v26 = vld [vmem:[%s11739_s1 + $0x2a8] ss:$12 sps:$4 sm:$0xff]  }
  0xc2   :  { %5003 = vmatmul.mubr.bf16.vlgmr.msra.gmra.mrb[0].mxu1 %v9735_v27 }
  0xc3   :  { %5192 = vmatmul.mubr.bf16.vlgmr.msra.gmra.mrb[0].mxu0 %v8350_v29  ;;  %7372 = vmatpush3.bf16.msra.mxu1 %v8357_v31  ;;  %v9011_v29 = vld [vmem:[%s11740_s0 + $0x1b4] ss:$108 sps:$4 sm:$0xff]   ;;  %v8429_v31 = vld [vmem:[%s11739_s1 + $0xa3c] ss:$12 sps:$4 sm:$0xff]  }
  0xc4   :  { %5223 = vmatpush1.bf16.msra.mxu0 %v8353_v30  ;;  %7373 = vmatprep.subr.bf16.mxu1 %v8361_v33  ;;  %v8426_v30 = vld [vmem:[%s11739_s1 + $0x1e8] ss:$12 sps:$4 sm:$0xff]   ;;  %v8427_v33 = vld [vmem:[%s11739_s1 + $0xa38] ss:$12 sps:$4 sm:$0xff]  }
  0xc5   :  { %5224 = vmatprep.subr.bf16.mxu0 %v8360_v32  ;;  %5012 = vmatprep.mubr.bf16.mxu1 %v9758_v34  ;;  %v8430_v32 = vld [vmem:[%s11739_s1 + $0x2c0] ss:$12 sps:$4 sm:$0xff]  }
  0xc6   :  { %5201 = vmatprep.mubr.bf16.mxu0 %v8419_v36  ;;  %v8431_v36 = vld [vmem:[%s11739_s1 + $0x200] ss:$12 sps:$4 sm:$0xff]  }
  0xc7   :  { %7374 = vmatpush3.bf16.msra.mxu1 %v8362_v37  ;;  %v8436_v37 = vld [vmem:[%s11739_s1 + $0xa54] ss:$12 sps:$4 sm:$0xff]  }
  0xc8   :  { %5225 = vmatpush1.bf16.msra.mxu0 %v8358_v35  ;;  %7375 = vmatprep.subr.bf16.mxu1 %v8369_v40  ;;  %v9012_v35 = vld [vmem:[%s11740_s0 + $0x1b0] ss:$108 sps:$4 sm:$0xff]   ;;  %v9013_v40 = vld [vmem:[%s11740_s0 + $0xc] ss:$108 sps:$4 sm:$0xff]  }
  0xc9   :  { %5226 = vmatprep.subr.bf16.mxu0 %v8368_v38  ;;  %v8437_v38 = vld [vmem:[%s11739_s1 + $0x2d8] ss:$12 sps:$4 sm:$0xff]  }
  0xca   :  { %5013 = vmatmul.mubr.bf16.gmra.mrb[4].mxu1 %v9776_v39 }
  0xcb   :  { %5202 = vmatmul.mubr.bf16.gmra.mrb[4].mxu0 %v8425_v43  ;;  %7376 = vmatpush3.bf16.msra.mxu1 %v8370_v42  ;;  %v8439_v42 = vld [vmem:[%s11739_s1 + $0x218] ss:$12 sps:$4 sm:$0xff]  }
  0xcc   :  { %5227 = vmatpush1.bf16.msra.mxu0 %v8366_v41  ;;  %7377 = vmatprep.subr.bf16.mxu1 %v8374_v45  ;;  %v8434_v41 = vld [vmem:[%s11739_s1 + $0xa50] ss:$12 sps:$4 sm:$0xff]   ;;  %v8442_v43 = vld [vmem:[%s11739_s1 + $0xa6c] ss:$12 sps:$4 sm:$0xff]   ;;  %v8440_v45 = vld [vmem:[%s11739_s1 + $0xa68] ss:$12 sps:$4 sm:$0xff]  }
  0xcd   :  { %5228 = vmatprep.subr.bf16.mxu0 %v8373_v44  ;;  %5022 = vmatprep.mubr.bf16.mxu1 %v9800_v46  ;;  %v8443_v44 = vld [vmem:[%s11739_s1 + $0x2f0] ss:$12 sps:$4 sm:$0xff]  }
  0xce   :  { %5211 = vmatprep.mubr.bf16.mxu0 %v8432_v48  ;;  %v8450_v48 = vld [vmem:[%s11739_s1 + $0xa84] ss:$12 sps:$4 sm:$0xff]  }
  0xcf   :  { %7378 = vmatpush3.bf16.msra.mxu1 %v8375_v49  ;;  %v8451_v49 = vld [vmem:[%s11739_s1 + $0x3c8] ss:$12 sps:$4 sm:$0xff]  }
  0xd0   :  { %5229 = vmatpush1.bf16.msra.mxu0 %v8371_v47  ;;  %7379 = vmatprep.subr.bf16.mxu1 %v8382_v51  ;;  %v8444_v47 = vld [vmem:[%s11739_s1 + $0x230] ss:$12 sps:$4 sm:$0xff]   ;;  %v8448_v51 = vld [vmem:[%s11739_s1 + $0xa80] ss:$12 sps:$4 sm:$0xff]  }
  0xd1   :  { %5230 = vmatprep.subr.bf16.mxu0 %v8381_v50  ;;  %v8445_v50 = vld [vmem:[%s11740_s0 + $0x30] ss:$108 sps:$4 sm:$0xff]  }
  0xd2   :  { %5023 = vmatmul.mubr.bf16.gmra.mrb[8].mxu1 %v9822_v52 }
  0xd3   :  { %5212 = vmatmul.mubr.bf16.gmra.mrb[8].mxu0 %v8438_v55  ;;  %7380 = vmatpush3.bf16.msra.mxu1 %v8383_v54  ;;  %v8455_v54 = vld [vmem:[%s11739_s1 + $0xa9c] ss:$12 sps:$4 sm:$0xff]   ;;  %v8456_v55 = vld [vmem:[%s11739_s1 + $0x3e0] ss:$12 sps:$4 sm:$0xff]  }
  0xd4   :  { %5231 = vmatpush1.bf16.msra.mxu0 %v8379_v53  ;;  %7381 = vmatprep.subr.bf16.mxu1 %v8387_v57  ;;  %v8452_v53 = vld [vmem:[%s11739_s1 + $0x308] ss:$12 sps:$4 sm:$0xff]  }
  0xd5   :  { %5232 = vmatprep.subr.bf16.mxu0 %v8386_v56  ;;  %5758 = vmatprep.mubr.bf16.mxu1 %v9007_v63  ;;  %v8508_v56 = vld [vmem:[%s11740_s0 + $0x10c] ss:$108 sps:$4 sm:$0xff]   ;;  %v9014_v57 = vld [vmem:[%s11740_s0 + $0x8] ss:$108 sps:$4 sm:$0xff]   ;;  %v9015_v63 = vld [vmem:[%s11740_s0 + $0xe4] ss:$108 sps:$4 sm:$0xff]  }
  0xd6   :  { %5254 = vmatprep.mubr.bf16.mxu0 %v8447_v59  ;;  %v8457_v59 = vld [vmem:[%s11739_s1 + $0x320] ss:$12 sps:$4 sm:$0xff]  }
  0xd7   :  { %7382 = vmatpush3.bf16.msra.mxu1 %v8388_v60  ;;  %v8460_v60 = vld [vmem:[%s11739_s1 + $0xab4] ss:$12 sps:$4 sm:$0xff]  }
  0xd8   :  { %5233 = vmatpush1.bf16.msra.mxu0 %v8384_v58  ;;  %7383 = vmatprep.subr.bf16.mxu1 %v8392_v62  ;;  %v8453_v58 = vld [vmem:[%s11739_s1 + $0xa98] ss:$12 sps:$4 sm:$0xff]   ;;  %v8458_v62 = vld [vmem:[%s11739_s1 + $0xab0] ss:$12 sps:$4 sm:$0xff]  }
  0xd9   :  { %5234 = vmatprep.subr.bf16.mxu0 %v8391_v61  ;;  %v8461_v61 = vld [vmem:[%s11739_s1 + $0x3f8] ss:$12 sps:$4 sm:$0xff]  }
  0xdb   :  { %7384 = vmatpush3.bf16.msra.mxu1 %v8393_v1  ;;  %v8514_v1 = vld [vmem:[%s11740_s0 + $0x108] ss:$108 sps:$4 sm:$0xff]  }
  0xdc   :  { %5235 = vmatpush1.bf16.msra.mxu0 %v8389_v0  ;;  %7385 = vmatprep.subr.bf16.mxu1 %v8397_v3  ;;  %v8462_v0 = vld [vmem:[%s11739_s1 + $0x338] ss:$12 sps:$4 sm:$0xff]   ;;  %v8466_v3 = vld [vmem:[%s11739_s1 + $0x410] ss:$12 sps:$4 sm:$0xff]  }
  0xdd   :  { %5236 = vmatprep.subr.bf16.mxu0 %v8396_v2  ;;  %v8465_v2 = vld [vmem:[%s11739_s1 + $0xacc] ss:$12 sps:$4 sm:$0xff]  }
  0xdf   :  { %7386 = vmatpush3.bf16.msra.mxu1 %v8398_v5  ;;  %v8463_v5 = vld [vmem:[%s11739_s1 + $0xac8] ss:$12 sps:$4 sm:$0xff]  }
  0xe0   :  { %5237 = vmatpush1.bf16.msra.mxu0 %v8394_v4  ;;  %7405 = vmatprep.subr.bf16.mxu1 %v8402_v7  ;;  %v8521_v4 = vld [vmem:[%s11740_s0 + $0x1e4] ss:$108 sps:$4 sm:$0xff]  }
  0xe1   :  { %5238 = vmatprep.subr.bf16.mxu0 %v8401_v6  ;;  %v9016_v6 = vld [vmem:[%s11740_s0 + $0xe0] ss:$108 sps:$4 sm:$0xff]   ;;  %v8467_v7 = vld [vmem:[%s11739_s1 + $0x350] ss:$12 sps:$4 sm:$0xff]  }
  0xe2   :  { %5759 = vmatmul.mubr.bf16.vlgmr.msra.gmra.mrb[12].mxu1 %v9008_v12  ;;  %v8472_v12 = vld [vmem:[%s11739_s1 + $0x368] ss:$12 sps:$4 sm:$0xff]  }
  0xe3   :  { %7406 = vmatpush3.bf16.msra.mxu1 %v8403_v9  ;;  %5766 = vmatprep.mubr.bf16.mxu1 %v9009_v18  ;;  %v8471_v9 = vld [vmem:[%s11739_s1 + $0x428] ss:$12 sps:$4 sm:$0xff]   ;;  %v8477_v18 = vld [vmem:[%s11739_s1 + $0x380] ss:$12 sps:$4 sm:$0xff]  }
  0xe4   :  { %5239 = vmatpush1.bf16.msra.mxu0 %v8399_v8  ;;  %7407 = vmatprep.subr.bf16.mxu1 %v8407_v11  ;;  %v8470_v8 = vld [vmem:[%s11739_s1 + $0xae4] ss:$12 sps:$4 sm:$0xff]   ;;  %v9017_v11 = vld [vmem:[%s11740_s0 + $0x1bc] ss:$108 sps:$4 sm:$0xff]  }
  0xe5   :  { %5240 = vmatprep.subr.bf16.mxu0 %v8406_v10  ;;  %v8468_v10 = vld [vmem:[%s11739_s1 + $0xae0] ss:$12 sps:$4 sm:$0xff]  }
  0xe7   :  { %7408 = vmatpush3.bf16.msra.mxu1 %v8408_v14  ;;  %v8475_v14 = vld [vmem:[%s11739_s1 + $0xafc] ss:$12 sps:$4 sm:$0xff]  }
  0xe8   :  { %5241 = vmatpush1.bf16.msra.mxu0 %v8404_v13  ;;  %7409 = vmatprep.subr.bf16.mxu1 %v8412_v16  ;;  %v8527_v13 = vld [vmem:[%s11740_s0 + $0x1e0] ss:$108 sps:$4 sm:$0xff]   ;;  %v8473_v16 = vld [vmem:[%s11739_s1 + $0xaf8] ss:$12 sps:$4 sm:$0xff]  }
  0xe9   :  { %5242 = vmatprep.subr.bf16.mxu0 %v8411_v15  ;;  %v8476_v15 = vld [vmem:[%s11739_s1 + $0x440] ss:$12 sps:$4 sm:$0xff]  }
  0xea   :  { %5767 = vmatmul.mubr.bf16.gmra.mrb[16].mxu1 %v9010_v23  ;;  %v8478_v23 = vld [vmem:[%s11739_s1 + $0xb10] ss:$12 sps:$4 sm:$0xff]  }
  0xeb   :  { %7410 = vmatpush3.bf16.msra.mxu1 %v8413_v19  ;;  %5774 = vmatprep.mubr.bf16.mxu1 %v9011_v29  ;;  %v9018_v19 = vld [vmem:[%s11740_s0 + $0x1b8] ss:$108 sps:$4 sm:$0xff]   ;;  %v8487_v29 = vld [vmem:[%s11739_s1 + $0x3b0] ss:$12 sps:$4 sm:$0xff]  }
  0xec   :  { %5243 = vmatpush1.bf16.msra.mxu0 %v8409_v17  ;;  %7411 = vmatprep.subr.bf16.mxu1 %v8417_v21  ;;  %v8536_v17 = vld [vmem:[%s11740_s0 + $0x3c] ss:$108 sps:$4 sm:$0xff]   ;;  %v8481_v21 = vld [vmem:[%s11739_s1 + $0x458] ss:$12 sps:$4 sm:$0xff]  }
  0xed   :  { %5244 = vmatprep.subr.bf16.mxu0 %v8416_v20  ;;  %v8480_v20 = vld [vmem:[%s11739_s1 + $0xb14] ss:$12 sps:$4 sm:$0xff]  }
  0xef   :  { %7412 = vmatpush3.bf16.msra.mxu1 %v8418_v24  ;;  %v8482_v24 = vld [vmem:[%s11739_s1 + $0x398] ss:$12 sps:$4 sm:$0xff]  }
  0xf0   :  { %5245 = vmatpush1.bf16.msra.mxu0 %v8414_v22  ;;  %7413 = vmatprep.subr.bf16.mxu1 %v8424_v26  ;;  %v9019_v22 = vld [vmem:[%s11740_s0 + $0x14] ss:$108 sps:$4 sm:$0xff]   ;;  %v8486_v26 = vld [vmem:[%s11739_s1 + $0x470] ss:$12 sps:$4 sm:$0xff]  }
  0xf1   :  { %5246 = vmatprep.subr.bf16.mxu0 %v8423_v25  ;;  %v8485_v25 = vld [vmem:[%s11739_s1 + $0xb2c] ss:$12 sps:$4 sm:$0xff]  }
  0xf2   :  { %5775 = vmatmul.mubr.bf16.gmra.mrb[20].mxu1 %v9012_v35  ;;  %v8495_v35 = vld [vmem:[%s11739_s1 + $0xb5c] ss:$12 sps:$4 sm:$0xff]  }
  0xf3   :  { %7414 = vmatpush3.bf16.msra.mxu1 %v8426_v30  ;;  %5815 = vmatprep.mubr.bf16.mxu1 %v9013_v40  ;;  %v8490_v30 = vld [vmem:[%s11739_s1 + $0xb44] ss:$12 sps:$4 sm:$0xff]   ;;  %v8500_v40 = vld [vmem:[%s11739_s1 + $0xb74] ss:$12 sps:$4 sm:$0xff]  }
  0xf4   :  { %5247 = vmatpush1.bf16.msra.mxu0 %v8421_v28  ;;  %7415 = vmatprep.subr.bf16.mxu1 %v8430_v32  ;;  %v8483_v28 = vld [vmem:[%s11739_s1 + $0xb28] ss:$12 sps:$4 sm:$0xff]   ;;  %v8488_v32 = vld [vmem:[%s11739_s1 + $0xb40] ss:$12 sps:$4 sm:$0xff]  }
  0xf5   :  { %5248 = vmatprep.subr.bf16.mxu0 %v8429_v31  ;;  %v8491_v31 = vld [vmem:[%s11739_s1 + $0x548] ss:$12 sps:$4 sm:$0xff]  }
  0xf7   :  { %7416 = vmatpush3.bf16.msra.mxu1 %v8431_v36  ;;  %v8496_v36 = vld [vmem:[%s11739_s1 + $0x560] ss:$12 sps:$4 sm:$0xff]  }
  0xf8   :  { %5249 = vmatpush1.bf16.msra.mxu0 %v8427_v33  ;;  %7417 = vmatprep.subr.bf16.mxu1 %v8437_v38  ;;  %v8492_v33 = vld [vmem:[%s11739_s1 + $0x488] ss:$12 sps:$4 sm:$0xff]   ;;  %v8497_v38 = vld [vmem:[%s11739_s1 + $0x4a0] ss:$12 sps:$4 sm:$0xff]  }
  0xf9   :  { %5250 = vmatprep.subr.bf16.mxu0 %v8436_v37  ;;  %v8493_v37 = vld [vmem:[%s11739_s1 + $0xb58] ss:$12 sps:$4 sm:$0xff]  }
  0xfb   :  { %7418 = vmatpush3.bf16.msra.mxu1 %v8439_v42  ;;  %v8502_v42 = vld [vmem:[%s11739_s1 + $0x4b8] ss:$12 sps:$4 sm:$0xff]  }
  0xfc   :  { %5251 = vmatpush1.bf16.msra.mxu0 %v8434_v41  ;;  %7419 = vmatprep.subr.bf16.mxu1 %v8443_v44  ;;  %v8498_v41 = vld [vmem:[%s11739_s1 + $0xb70] ss:$12 sps:$4 sm:$0xff]   ;;  %v8503_v44 = vld [vmem:[%s11739_s1 + $0xb88] ss:$12 sps:$4 sm:$0xff]  }
  0xfd   :  { %5252 = vmatprep.subr.bf16.mxu0 %v8442_v43  ;;  %v8505_v43 = vld [vmem:[%s11739_s1 + $0xb8c] ss:$12 sps:$4 sm:$0xff]  }
  0xff   :  { %7420 = vmatpush3.bf16.msra.mxu1 %v8444_v47  ;;  %v8512_v47 = vld [vmem:[%s11739_s1 + $0xba4] ss:$12 sps:$4 sm:$0xff]  }
 0x100   :  { %5253 = vmatpush1.bf16.msra.mxu0 %v8440_v45  ;;  %7439 = vmatprep.subr.bf16.mxu1 %v8451_v49  ;;  %v8507_v45 = vld [vmem:[%s11739_s1 + $0x4d0] ss:$12 sps:$4 sm:$0xff]   ;;  %v8515_v49 = vld [vmem:[%s11739_s1 + $0x4e8] ss:$12 sps:$4 sm:$0xff]  }
 0x101   :  { %5285 = vmatprep.subr.bf16.mxu0 %v8450_v48  ;;  %v8510_v48 = vld [vmem:[%s11739_s1 + $0xba0] ss:$12 sps:$4 sm:$0xff]  }
 0x102   :  { %5816 = vmatmul.mubr.bf16.vlgmr.msra.gmra.mrb[24].mxu1 %v9014_v57  ;;  %v8528_v57 = vld [vmem:[%s11739_s1 + $0x518] ss:$12 sps:$4 sm:$0xff]  }
 0x103   :  { %5255 = vmatmul.mubr.bf16.vlgmr.msra.gmra.mrb[0].mxu0 %v8445_v50  ;;  %7440 = vmatpush3.bf16.msra.mxu1 %v8452_v53  ;;  %v8518_v50 = vld [vmem:[%s11739_s1 + $0xbbc] ss:$12 sps:$4 sm:$0xff]   ;;  %v8520_v53 = vld [vmem:[%s11739_s1 + $0x500] ss:$12 sps:$4 sm:$0xff]  }
 0x104   :  { %5286 = vmatpush1.bf16.msra.mxu0 %v8448_v51  ;;  %7441 = vmatprep.subr.bf16.mxu1 %v8456_v55  ;;  %v8516_v51 = vld [vmem:[%s11739_s1 + $0xbb8] ss:$12 sps:$4 sm:$0xff]   ;;  %v8523_v55 = vld [vmem:[%s11739_s1 + $0xbd0] ss:$12 sps:$4 sm:$0xff]  }
 0x105   :  { %5287 = vmatprep.subr.bf16.mxu0 %v8455_v54  ;;  %5823 = vmatprep.mubr.bf16.mxu1 %v9015_v63  ;;  %v8525_v54 = vld [vmem:[%s11739_s1 + $0xbd4] ss:$12 sps:$4 sm:$0xff]   ;;  %v8539_v63 = vld [vmem:[%s11739_s1 + $0xc04] ss:$12 sps:$4 sm:$0xff]  }
 0x106   :  { %5264 = vmatprep.mubr.bf16.mxu0 %v8508_v56  ;;  %v9020_v56 = vld [vmem:[%s11740_s0 + $0x1c] ss:$108 sps:$4 sm:$0xff]  }
 0x107   :  { %7442 = vmatpush3.bf16.msra.mxu1 %v8457_v59  ;;  %v8532_v59 = vld [vmem:[%s11739_s1 + $0x5f0] ss:$12 sps:$4 sm:$0xff]  }
 0x108   :  { %5288 = vmatpush1.bf16.msra.mxu0 %v8453_v58  ;;  %7443 = vmatprep.subr.bf16.mxu1 %v8461_v61  ;;  %v8531_v58 = vld [vmem:[%s11739_s1 + $0xbec] ss:$12 sps:$4 sm:$0xff]   ;;  %v8533_v61 = vld [vmem:[%s11739_s1 + $0x530] ss:$12 sps:$4 sm:$0xff]  }
 0x109   :  { %5289 = vmatprep.subr.bf16.mxu0 %v8460_v60  ;;  %v8529_v60 = vld [vmem:[%s11739_s1 + $0xbe8] ss:$12 sps:$4 sm:$0xff]  }
 0x10a   :  { %5824 = vmatmul.mubr.bf16.gmra.mrb[28].mxu1 %v9016_v6  ;;  %v9021_v6 = vld [vmem:[%s11740_s0 + $0x18] ss:$108 sps:$4 sm:$0xff]  }
 0x10b   :  { %5265 = vmatmul.mubr.bf16.gmra.mrb[4].mxu0 %v8514_v1  ;;  %7444 = vmatpush3.bf16.msra.mxu1 %v8462_v0  ;;  %v8540_v0 = vld [vmem:[%s11739_s1 + $0x6c8] ss:$12 sps:$4 sm:$0xff]   ;;  %v8537_v1 = vld [vmem:[%s11739_s1 + $0xc00] ss:$12 sps:$4 sm:$0xff]  }
 0x10c   :  { %5290 = vmatpush1.bf16.msra.mxu0 %v8458_v62  ;;  %7445 = vmatprep.subr.bf16.mxu1 %v8466_v3  ;;  %v8534_v62 = vld [vmem:[%s11740_s0 + $0x38] ss:$108 sps:$4 sm:$0xff]   ;;  %v8544_v3 = vld [vmem:[%s11739_s1 + $0xc1c] ss:$12 sps:$4 sm:$0xff]  }
 0x10d   :  { %5291 = vmatprep.subr.bf16.mxu0 %v8465_v2  ;;  %5831 = vmatprep.mubr.bf16.mxu1 %v9017_v11  ;;  %v8541_v2 = vld [vmem:[%s11739_s1 + $0x608] ss:$12 sps:$4 sm:$0xff]  }
 0x10e   :  { %5274 = vmatprep.mubr.bf16.mxu0 %v8521_v4  ;;  %v8545_v4 = vld [vmem:[%s11739_s1 + $0x6e0] ss:$12 sps:$4 sm:$0xff]  }
 0x10f   :  { %7446 = vmatpush3.bf16.msra.mxu1 %v8467_v7  ;;  %v8542_v7 = vld [vmem:[%s11739_s1 + $0xc18] ss:$12 sps:$4 sm:$0xff]   ;;  %v9022_v11 = vld [vmem:[%s11740_s0 + $0xf4] ss:$108 sps:$4 sm:$0xff]  }
 0x110   :  { %5292 = vmatpush1.bf16.msra.mxu0 %v8463_v5  ;;  %7447 = vmatprep.subr.bf16.mxu1 %v8471_v9  ;;  %v8597_v5 = vld [vmem:[%s11740_s0 + $0x114] ss:$108 sps:$4 sm:$0xff]  }
 0x111   :  { %5293 = vmatprep.subr.bf16.mxu0 %v8470_v8  ;;  %v8546_v8 = vld [vmem:[%s11739_s1 + $0x620] ss:$12 sps:$4 sm:$0xff]  }
 0x112   :  { %5832 = vmatmul.mubr.bf16.gmra.mrb[32].mxu1 %v9018_v19  ;;  %v8549_v9 = vld [vmem:[%s11739_s1 + $0xc34] ss:$12 sps:$4 sm:$0xff]  }
 0x113   :  { %5275 = vmatmul.mubr.bf16.gmra.mrb[8].mxu0 %v8527_v13  ;;  %7448 = vmatpush3.bf16.msra.mxu1 %v8472_v12  ;;  %v8547_v12 = vld [vmem:[%s11739_s1 + $0xc30] ss:$12 sps:$4 sm:$0xff]   ;;  %v8551_v13 = vld [vmem:[%s11739_s1 + $0x638] ss:$12 sps:$4 sm:$0xff]   ;;  %v8552_v19 = vld [vmem:[%s11739_s1 + $0xc48] ss:$12 sps:$4 sm:$0xff]  }
 0x114   :  { %5294 = vmatpush1.bf16.msra.mxu0 %v8468_v10  ;;  %7449 = vmatprep.subr.bf16.mxu1 %v8476_v15  ;;  %v8550_v10 = vld [vmem:[%s11739_s1 + $0x6f8] ss:$12 sps:$4 sm:$0xff]  }
 0x115   :  { %5295 = vmatprep.subr.bf16.mxu0 %v8475_v14  ;;  %5872 = vmatprep.mubr.bf16.mxu1 %v9019_v22  ;;  %v8603_v14 = vld [vmem:[%s11740_s0 + $0x110] ss:$108 sps:$4 sm:$0xff]   ;;  %v8554_v15 = vld [vmem:[%s11739_s1 + $0xc4c] ss:$12 sps:$4 sm:$0xff]   ;;  %v8560_v22 = vld [vmem:[%s11739_s1 + $0x728] ss:$12 sps:$4 sm:$0xff]  }
 0x116   :  { %5317 = vmatprep.mubr.bf16.mxu0 %v8536_v17  ;;  %v8610_v17 = vld [vmem:[%s11740_s0 + $0x1ec] ss:$108 sps:$4 sm:$0xff]  }
 0x117   :  { %7450 = vmatpush3.bf16.msra.mxu1 %v8477_v18  ;;  %v9023_v18 = vld [vmem:[%s11740_s0 + $0xf0] ss:$108 sps:$4 sm:$0xff]  }
 0x118   :  { %5296 = vmatpush1.bf16.msra.mxu0 %v8473_v16  ;;  %7451 = vmatprep.subr.bf16.mxu1 %v8481_v21  ;;  %v8555_v16 = vld [vmem:[%s11739_s1 + $0x710] ss:$12 sps:$4 sm:$0xff]  }
 0x119   :  { %5297 = vmatprep.subr.bf16.mxu0 %v8480_v20  ;;  %v8556_v20 = vld [vmem:[%s11739_s1 + $0x650] ss:$12 sps:$4 sm:$0xff]  }
 0x11a   :  { %v8559_v21 = vld [vmem:[%s11739_s1 + $0xc64] ss:$12 sps:$4 sm:$0xff]  }
 0x11b   :  { %7452 = vmatpush3.bf16.msra.mxu1 %v8482_v24  ;;  %v8557_v24 = vld [vmem:[%s11739_s1 + $0xc60] ss:$12 sps:$4 sm:$0xff]  }
 0x11c   :  { %5298 = vmatpush1.bf16.msra.mxu0 %v8478_v23  ;;  %7453 = vmatprep.subr.bf16.mxu1 %v8486_v26  ;;  %v9024_v23 = vld [vmem:[%s11740_s0 + $0x1cc] ss:$108 sps:$4 sm:$0xff]   ;;  %v8616_v26 = vld [vmem:[%s11740_s0 + $0x1e8] ss:$108 sps:$4 sm:$0xff]  }
 0x11d   :  { %5299 = vmatprep.subr.bf16.mxu0 %v8485_v25  ;;  %v8561_v25 = vld [vmem:[%s11739_s1 + $0x668] ss:$12 sps:$4 sm:$0xff]  }
 0x11f   :  { %7454 = vmatpush3.bf16.msra.mxu1 %v8487_v29  ;;  %v8565_v29 = vld [vmem:[%s11739_s1 + $0x740] ss:$12 sps:$4 sm:$0xff]  }
 0x120   :  { %5300 = vmatpush1.bf16.msra.mxu0 %v8483_v28  ;;  %7473 = vmatprep.subr.bf16.mxu1 %v8491_v31  ;;  %v8564_v28 = vld [vmem:[%s11739_s1 + $0xc7c] ss:$12 sps:$4 sm:$0xff]  }
 0x121   :  { %5301 = vmatprep.subr.bf16.mxu0 %v8490_v30  ;;  %v8625_v30 = vld [vmem:[%s11740_s0 + $0x44] ss:$108 sps:$4 sm:$0xff]   ;;  %v9025_v31 = vld [vmem:[%s11740_s0 + $0x1c8] ss:$108 sps:$4 sm:$0xff]  }
 0x122   :  { %5873 = vmatmul.mubr.bf16.vlgmr.msra.gmra.mrb[36].mxu1 %v9735_v27  ;;  %v8501_v27 = vld [vmem:[%s11739_s1 + $0x578] ss:$12 sps:$4 sm:$0xff]  }
 0x123   :  { %7474 = vmatpush3.bf16.msra.mxu1 %v8492_v33  ;;  %5880 = vmatprep.mubr.bf16.mxu1 %v9758_v34  ;;  %v8506_v34 = vld [vmem:[%s11739_s1 + $0x590] ss:$12 sps:$4 sm:$0xff]   ;;  %v8566_v33 = vld [vmem:[%s11739_s1 + $0x680] ss:$12 sps:$4 sm:$0xff]  }
 0x124   :  { %5302 = vmatpush1.bf16.msra.mxu0 %v8488_v32  ;;  %7475 = vmatprep.subr.bf16.mxu1 %v8496_v36  ;;  %v8562_v32 = vld [vmem:[%s11739_s1 + $0xc78] ss:$12 sps:$4 sm:$0xff]  }
 0x125   :  { %5303 = vmatprep.subr.bf16.mxu0 %v8495_v35  ;;  %v8569_v35 = vld [vmem:[%s11739_s1 + $0xc94] ss:$12 sps:$4 sm:$0xff]   ;;  %v8570_v36 = vld [vmem:[%s11739_s1 + $0x758] ss:$12 sps:$4 sm:$0xff]  }
 0x127   :  { %7476 = vmatpush3.bf16.msra.mxu1 %v8497_v38  ;;  %v9026_v38 = vld [vmem:[%s11740_s0 + $0x24] ss:$108 sps:$4 sm:$0xff]  }
 0x128   :  { %5304 = vmatpush1.bf16.msra.mxu0 %v8493_v37  ;;  %7477 = vmatprep.subr.bf16.mxu1 %v8501_v27  ;;  %v8567_v37 = vld [vmem:[%s11739_s1 + $0xc90] ss:$12 sps:$4 sm:$0xff]   ;;  %v8574_v27 = vld [vmem:[%s11739_s1 + $0xcac] ss:$12 sps:$4 sm:$0xff]  }
 0x129   :  { %5305 = vmatprep.subr.bf16.mxu0 %v8500_v40  ;;  %v8571_v40 = vld [vmem:[%s11739_s1 + $0x698] ss:$12 sps:$4 sm:$0xff]  }
 0x12a   :  { %5881 = vmatmul.mubr.bf16.gmra.mrb[40].mxu1 %v9776_v39  ;;  %v8513_v39 = vld [vmem:[%s11739_s1 + $0x5a8] ss:$12 sps:$4 sm:$0xff]  }
 0x12b   :  { %7478 = vmatpush3.bf16.msra.mxu1 %v8502_v42  ;;  %5888 = vmatprep.mubr.bf16.mxu1 %v9800_v46  ;;  %v8519_v46 = vld [vmem:[%s11739_s1 + $0x5c0] ss:$12 sps:$4 sm:$0xff]   ;;  %v8572_v42 = vld [vmem:[%s11739_s1 + $0xca8] ss:$12 sps:$4 sm:$0xff]  }
 0x12c   :  { %5306 = vmatpush1.bf16.msra.mxu0 %v8498_v41  ;;  %7479 = vmatprep.subr.bf16.mxu1 %v8506_v34  ;;  %v8575_v41 = vld [vmem:[%s11739_s1 + $0x770] ss:$12 sps:$4 sm:$0xff]  }
 0x12d   :  { %5307 = vmatprep.subr.bf16.mxu0 %v8505_v43  ;;  %v8576_v43 = vld [vmem:[%s11739_s1 + $0x6b0] ss:$12 sps:$4 sm:$0xff]  }
 0x12e   :  { %v8579_v34 = vld [vmem:[%s11739_s1 + $0xcc4] ss:$12 sps:$4 sm:$0xff]  }
 0x12f   :  { %7480 = vmatpush3.bf16.msra.mxu1 %v8507_v45  ;;  %v8577_v45 = vld [vmem:[%s11739_s1 + $0xcc0] ss:$12 sps:$4 sm:$0xff]  }
 0x130   :  { %5308 = vmatpush1.bf16.msra.mxu0 %v8503_v44  ;;  %7481 = vmatprep.subr.bf16.mxu1 %v8513_v39  ;;  %v8580_v44 = vld [vmem:[%s11739_s1 + $0x848] ss:$12 sps:$4 sm:$0xff]  }
 0x131   :  { %5309 = vmatprep.subr.bf16.mxu0 %v8512_v47  ;;  %v8581_v47 = vld [vmem:[%s11739_s1 + $0x788] ss:$12 sps:$4 sm:$0xff]  }
 0x132   :  { %5889 = vmatmul.mubr.bf16.gmra.mrb[44].mxu1 %v9822_v52  ;;  %v8526_v52 = vld [vmem:[%s11739_s1 + $0x5d8] ss:$12 sps:$4 sm:$0xff]   ;;  %v8584_v39 = vld [vmem:[%s11739_s1 + $0xcdc] ss:$12 sps:$4 sm:$0xff]  }
 0x133   :  { %7482 = vmatpush3.bf16.msra.mxu1 %v8515_v49  ;;  %5929 = vmatprep.mubr.bf16.mxu1 %v9020_v56  ;;  %v8582_v49 = vld [vmem:[%s11739_s1 + $0xcd8] ss:$12 sps:$4 sm:$0xff]  }
 0x134   :  { %5310 = vmatpush1.bf16.msra.mxu0 %v8510_v48  ;;  %7483 = vmatprep.subr.bf16.mxu1 %v8519_v46  ;;  %v8585_v48 = vld [vmem:[%s11739_s1 + $0x860] ss:$12 sps:$4 sm:$0xff]  }
 0x135   :  { %5311 = vmatprep.subr.bf16.mxu0 %v8518_v50  ;;  %v9027_v50 = vld [vmem:[%s11740_s0 + $0x20] ss:$108 sps:$4 sm:$0xff]  }
 0x136   :  { %v8586_v46 = vld [vmem:[%s11739_s1 + $0x7a0] ss:$12 sps:$4 sm:$0xff]  }
 0x137   :  { %7484 = vmatpush3.bf16.msra.mxu1 %v8520_v53  ;;  %v8590_v53 = vld [vmem:[%s11739_s1 + $0x878] ss:$12 sps:$4 sm:$0xff]  }
 0x138   :  { %5312 = vmatpush1.bf16.msra.mxu0 %v8516_v51  ;;  %7485 = vmatprep.subr.bf16.mxu1 %v8526_v52  ;;  %v8589_v51 = vld [vmem:[%s11739_s1 + $0xcf4] ss:$12 sps:$4 sm:$0xff]   ;;  %v8587_v52 = vld [vmem:[%s11739_s1 + $0xcf0] ss:$12 sps:$4 sm:$0xff]   ;;  %v8594_v56 = vld [vmem:[%s11739_s1 + $0xd0c] ss:$12 sps:$4 sm:$0xff]  }
 0x139   :  { %5313 = vmatprep.subr.bf16.mxu0 %v8525_v54  ;;  %v9028_v54 = vld [vmem:[%s11740_s0 + $0xfc] ss:$108 sps:$4 sm:$0xff]  }
 0x13b   :  { %7486 = vmatpush3.bf16.msra.mxu1 %v8528_v57  ;;  %v8595_v57 = vld [vmem:[%s11739_s1 + $0x890] ss:$12 sps:$4 sm:$0xff]  }
 0x13c   :  { %5314 = vmatpush1.bf16.msra.mxu0 %v8523_v55  ;;  %7487 = vmatprep.subr.bf16.mxu1 %v8532_v59  ;;  %v8591_v55 = vld [vmem:[%s11739_s1 + $0x7b8] ss:$12 sps:$4 sm:$0xff]   ;;  %v8592_v59 = vld [vmem:[%s11739_s1 + $0xd08] ss:$12 sps:$4 sm:$0xff]  }
 0x13d   :  { %5315 = vmatprep.subr.bf16.mxu0 %v8531_v58  ;;  %v9029_v58 = vld [vmem:[%s11740_s0 + $0xf8] ss:$108 sps:$4 sm:$0xff]  }
 0x13f   :  { %7488 = vmatpush3.bf16.msra.mxu1 %v8533_v61  ;;  %v8601_v61 = vld [vmem:[%s11739_s1 + $0xd24] ss:$12 sps:$4 sm:$0xff]  }
 0x140   :  { %5316 = vmatpush1.bf16.msra.mxu0 %v8529_v60  ;;  %7507 = vmatprep.subr.bf16.mxu1 %v8540_v0  ;;  %v8596_v60 = vld [vmem:[%s11739_s1 + $0x7d0] ss:$12 sps:$4 sm:$0xff]   ;;  %v8599_v0 = vld [vmem:[%s11739_s1 + $0xd20] ss:$12 sps:$4 sm:$0xff]  }
 0x141   :  { %5348 = vmatprep.subr.bf16.mxu0 %v8539_v63  ;;  %v9030_v63 = vld [vmem:[%s11740_s0 + $0x1d4] ss:$108 sps:$4 sm:$0xff]  }
 0x142   :  { %5930 = vmatmul.mubr.bf16.vlgmr.msra.gmra.mrb[48].mxu1 %v9021_v6  ;;  %v8609_v6 = vld [vmem:[%s11739_s1 + $0x800] ss:$12 sps:$4 sm:$0xff]  }
 0x143   :  { %5318 = vmatmul.mubr.bf16.vlgmr.msra.gmra.mrb[0].mxu0 %v8534_v62  ;;  %7508 = vmatpush3.bf16.msra.mxu1 %v8541_v2  ;;  %v8602_v62 = vld [vmem:[%s11739_s1 + $0x8a8] ss:$12 sps:$4 sm:$0xff]  }
 0x144   :  { %5349 = vmatpush1.bf16.msra.mxu0 %v8537_v1  ;;  %7509 = vmatprep.subr.bf16.mxu1 %v8545_v4  ;;  %v8604_v1 = vld [vmem:[%s11739_s1 + $0x7e8] ss:$12 sps:$4 sm:$0xff]   ;;  %v9031_v4 = vld [vmem:[%s11740_s0 + $0x1d0] ss:$108 sps:$4 sm:$0xff]  }
 0x145   :  { %5350 = vmatprep.subr.bf16.mxu0 %v8544_v3  ;;  %5937 = vmatprep.mubr.bf16.mxu1 %v9022_v11  ;;  %v8607_v2 = vld [vmem:[%s11739_s1 + $0xd3c] ss:$12 sps:$4 sm:$0xff]   ;;  %v8608_v3 = vld [vmem:[%s11739_s1 + $0x8c0] ss:$12 sps:$4 sm:$0xff]   ;;  %v8617_v11 = vld [vmem:[%s11739_s1 + $0x818] ss:$12 sps:$4 sm:$0xff]  }
 0x146   :  { %5327 = vmatprep.mubr.bf16.mxu0 %v8597_v5  ;;  %v8605_v5 = vld [vmem:[%s11739_s1 + $0xd38] ss:$12 sps:$4 sm:$0xff]  }
 0x147   :  { %7510 = vmatpush3.bf16.msra.mxu1 %v8546_v8  ;;  %v8615_v8 = vld [vmem:[%s11739_s1 + $0x8d8] ss:$12 sps:$4 sm:$0xff]  }
 0x148   :  { %5351 = vmatpush1.bf16.msra.mxu0 %v8542_v7  ;;  %7511 = vmatprep.subr.bf16.mxu1 %v8550_v10  ;;  %v8614_v7 = vld [vmem:[%s11739_s1 + $0xd54] ss:$12 sps:$4 sm:$0xff]   ;;  %v8612_v10 = vld [vmem:[%s11739_s1 + $0xd50] ss:$12 sps:$4 sm:$0xff]  }
 0x149   :  { %5352 = vmatprep.subr.bf16.mxu0 %v8549_v9  ;;  %v9032_v9 = vld [vmem:[%s11740_s0 + $0x2c] ss:$108 sps:$4 sm:$0xff]  }
 0x14a   :  { %5938 = vmatmul.mubr.bf16.gmra.mrb[52].mxu1 %v9023_v18  ;;  %v10481_v18 = vld [vmem:[%s11740_s0 + $0x40] ss:$108 sps:$4 sm:$0xff]  }
 0x14b   :  { %5328 = vmatmul.mubr.bf16.gmra.mrb[4].mxu0 %v8603_v14  ;;  %7512 = vmatpush3.bf16.msra.mxu1 %v8551_v13  ;;  %v8621_v13 = vld [vmem:[%s11739_s1 + $0x8f0] ss:$12 sps:$4 sm:$0xff]   ;;  %v8618_v14 = vld [vmem:[%s11739_s1 + $0xd68] ss:$12 sps:$4 sm:$0xff]  }
 0x14c   :  { %5353 = vmatpush1.bf16.msra.mxu0 %v8547_v12  ;;  %7513 = vmatprep.subr.bf16.mxu1 %v8555_v16  ;;  %v8620_v12 = vld [vmem:[%s11739_s1 + $0xd6c] ss:$12 sps:$4 sm:$0xff]   ;;  %v8628_v16 = vld [vmem:[%s11739_s1 + $0xd84] ss:$12 sps:$4 sm:$0xff]  }
 0x14d   :  { %5354 = vmatprep.subr.bf16.mxu0 %v8554_v15  ;;  %5945 = vmatprep.mubr.bf16.mxu1 %v9024_v23  ;;  %v8622_v15 = vld [vmem:[%s11739_s1 + $0x830] ss:$12 sps:$4 sm:$0xff]   ;;  %v8631_v23 = vld [vmem:[%s11739_s1 + $0xd98] ss:$12 sps:$4 sm:$0xff]  }
 0x14e   :  { %5337 = vmatprep.mubr.bf16.mxu0 %v8610_v17  ;;  %v8629_v17 = vld [vmem:[%s11739_s1 + $0x9c8] ss:$12 sps:$4 sm:$0xff]  }
 0x14f   :  { %7514 = vmatpush3.bf16.msra.mxu1 %v8556_v20  ;;  %v8630_v20 = vld [vmem:[%s11739_s1 + $0x908] ss:$12 sps:$4 sm:$0xff]  }
 0x150   :  { %5355 = vmatpush1.bf16.msra.mxu0 %v8552_v19  ;;  %7515 = vmatprep.subr.bf16.mxu1 %v8560_v22  ;;  %v8626_v19 = vld [vmem:[%s11739_s1 + $0xd80] ss:$12 sps:$4 sm:$0xff]  }
 0x151   :  { %5356 = vmatprep.subr.bf16.mxu0 %v8559_v21  ;;  %v8633_v21 = vld [vmem:[%s11739_s1 + $0xd9c] ss:$12 sps:$4 sm:$0xff]   ;;  %v8634_v22 = vld [vmem:[%s11739_s1 + $0x9e0] ss:$12 sps:$4 sm:$0xff]  }
 0x152   :  { %5946 = vmatmul.mubr.bf16.gmra.mrb[56].mxu1 %v9025_v31  ;;  %v8636_v31 = vld [vmem:[%s11739_s1 + $0xdb0] ss:$12 sps:$4 sm:$0xff]  }
 0x153   :  { %5338 = vmatmul.mubr.bf16.gmra.mrb[8].mxu0 %v8616_v26  ;;  %7516 = vmatpush3.bf16.msra.mxu1 %v8561_v25  ;;  %v9033_v25 = vld [vmem:[%s11740_s0 + $0x28] ss:$108 sps:$4 sm:$0xff]   ;;  %v8635_v26 = vld [vmem:[%s11739_s1 + $0x920] ss:$12 sps:$4 sm:$0xff]  }
 0x154   :  { %5357 = vmatpush1.bf16.msra.mxu0 %v8557_v24  ;;  %7517 = vmatprep.subr.bf16.mxu1 %v8565_v29  ;;  %v10501_v24 = vld [vmem:[%s11740_s0 + $0x11c] ss:$108 sps:$4 sm:$0xff]   ;;  %v8639_v29 = vld [vmem:[%s11739_s1 + $0x9f8] ss:$12 sps:$4 sm:$0xff]  }
 0x155   :  { %5358 = vmatprep.subr.bf16.mxu0 %v8564_v28  ;;  %5986 = vmatprep.mubr.bf16.mxu1 %v9026_v38  ;;  %v8638_v28 = vld [vmem:[%s11739_s1 + $0xdb4] ss:$12 sps:$4 sm:$0xff]  }
 0x156   :  { %5380 = vmatprep.mubr.bf16.mxu0 %v8625_v30  ;;  %v9034_v30 = vld [vmem:[%s11740_s0 + $0x104] ss:$108 sps:$4 sm:$0xff]   ;;  %v9035_v38 = vld [vmem:[%s11740_s0 + $0x100] ss:$108 sps:$4 sm:$0xff]  }
 0x157   :  { %7518 = vmatpush3.bf16.msra.mxu1 %v8566_v33  ;;  %v8640_v33 = vld [vmem:[%s11739_s1 + $0x938] ss:$12 sps:$4 sm:$0xff]  }
 0x158   :  { %5359 = vmatpush1.bf16.msra.mxu0 %v8562_v32  ;;  %7519 = vmatprep.subr.bf16.mxu1 %v8570_v36  ;;  %v10526_v32 = vld [vmem:[%s11740_s0 + $0x118] ss:$108 sps:$4 sm:$0xff]   ;;  %v8644_v36 = vld [vmem:[%s11739_s1 + $0xa10] ss:$12 sps:$4 sm:$0xff]  }
 0x159   :  { %5360 = vmatprep.subr.bf16.mxu0 %v8569_v35  ;;  %v8643_v35 = vld [vmem:[%s11739_s1 + $0xdcc] ss:$12 sps:$4 sm:$0xff]  }
 0x15b   :  { %7520 = vmatpush3.bf16.msra.mxu1 %v8571_v40  ;;  %v8641_v40 = vld [vmem:[%s11739_s1 + $0xdc8] ss:$12 sps:$4 sm:$0xff]  }
 0x15c   :  { %5361 = vmatpush1.bf16.msra.mxu0 %v8567_v37  ;;  %7521 = vmatprep.subr.bf16.mxu1 %v8575_v41  ;;  %v10540_v37 = vld [vmem:[%s11740_s0 + $0x1f4] ss:$108 sps:$4 sm:$0xff]   ;;  %v8648_v41 = vld [vmem:[%s11739_s1 + $0xde4] ss:$12 sps:$4 sm:$0xff]  }
 0x15d   :  { %5362 = vmatprep.subr.bf16.mxu0 %v8574_v27  ;;  %v8645_v27 = vld [vmem:[%s11739_s1 + $0x950] ss:$12 sps:$4 sm:$0xff]  }
 0x15f   :  { %7522 = vmatpush3.bf16.msra.mxu1 %v8576_v43  ;;  %v9036_v43 = vld [vmem:[%s11740_s0 + $0x1dc] ss:$108 sps:$4 sm:$0xff]  }
 0x160   :  { %5363 = vmatpush1.bf16.msra.mxu0 %v8572_v42  ;;  %7541 = vmatprep.subr.bf16.mxu1 %v8580_v44  ;;  %v8649_v42 = vld [vmem:[%s11739_s1 + $0xa28] ss:$12 sps:$4 sm:$0xff]  }
 0x161   :  { %5364 = vmatprep.subr.bf16.mxu0 %v8579_v34  ;;  %v8646_v34 = vld [vmem:[%s11739_s1 + $0xde0] ss:$12 sps:$4 sm:$0xff]   ;;  %v8650_v44 = vld [vmem:[%s11739_s1 + $0x968] ss:$12 sps:$4 sm:$0xff]  }
 0x162   :  { %5987 = vmatmul.mubr.bf16.vlgmr.msra.gmra.mrb[60].mxu1 %v9027_v50  ;;  %v8651_v50 = vld [vmem:[%s11739_s1 + $0xdf8] ss:$12 sps:$4 sm:$0xff]  }
 0x163   :  { %7542 = vmatpush3.bf16.msra.mxu1 %v8581_v47  ;;  %5994 = vmatprep.mubr.bf16.mxu1 %v9028_v54  ;;  %v8653_v47 = vld [vmem:[%s11739_s1 + $0xdfc] ss:$12 sps:$4 sm:$0xff]  }
 0x164   :  { %5365 = vmatpush1.bf16.msra.mxu0 %v8577_v45  ;;  %7543 = vmatprep.subr.bf16.mxu1 %v8585_v48  ;;  %v10571_v45 = vld [vmem:[%s11740_s0 + $0x1f0] ss:$108 sps:$4 sm:$0xff]   ;;  %v10582_v48 = vld [vmem:[%s11740_s0 + $0x4c] ss:$108 sps:$4 sm:$0xff]  }
 0x165   :  { %5366 = vmatprep.subr.bf16.mxu0 %v8584_v39  ;;  %v8654_v39 = vld [vmem:[%s11739_s1 + $0xa40] ss:$12 sps:$4 sm:$0xff]  }
 0x167   :  { %7544 = vmatpush3.bf16.msra.mxu1 %v8586_v46  ;;  %v8655_v46 = vld [vmem:[%s11739_s1 + $0x980] ss:$12 sps:$4 sm:$0xff]  }
 0x168   :  { %5367 = vmatpush1.bf16.msra.mxu0 %v8582_v49  ;;  %7545 = vmatprep.subr.bf16.mxu1 %v8590_v53  ;;  %v9037_v49 = vld [vmem:[%s11740_s0 + $0x1d8] ss:$108 sps:$4 sm:$0xff]  }
 0x169   :  { %5368 = vmatprep.subr.bf16.mxu0 %v8589_v51  ;;  %v8658_v51 = vld [vmem:[%s11739_s1 + $0xe14] ss:$12 sps:$4 sm:$0xff]   ;;  %v8659_v53 = vld [vmem:[%s11739_s1 + $0xa58] ss:$12 sps:$4 sm:$0xff]  }
 0x16a   :  { %5995 = vmatmul.mubr.bf16.gmra.mrb[64].mxu1 %v9029_v58 }
 0x16b   :  { %7546 = vmatpush3.bf16.msra.mxu1 %v8591_v55  ;;  %6002 = vmatprep.mubr.bf16.mxu1 %v9030_v63  ;;  %v8660_v55 = vld [vmem:[%s11739_s1 + $0x998] ss:$12 sps:$4 sm:$0xff]   ;;  %v8665_v63 = vld [vmem:[%s11739_s1 + $0x9b0] ss:$12 sps:$4 sm:$0xff]  }
 0x16c   :  { %5369 = vmatpush1.bf16.msra.mxu0 %v8587_v52  ;;  %7547 = vmatprep.subr.bf16.mxu1 %v8595_v57  ;;  %v8656_v52 = vld [vmem:[%s11739_s1 + $0xe10] ss:$12 sps:$4 sm:$0xff]  }
 0x16d   :  { %5370 = vmatprep.subr.bf16.mxu0 %v8594_v56  ;;  %v9038_v56 = vld [vmem:[%s11740_s0 + $0x34] ss:$108 sps:$4 sm:$0xff]  }
 0x16f   :  { %7548 = vmatpush3.bf16.msra.mxu1 %v8596_v60 }
 0x170   :  { %5371 = vmatpush1.bf16.msra.mxu0 %v8592_v59  ;;  %7549 = vmatprep.subr.bf16.mxu1 %v8602_v62  ;;  %v8663_v59 = vld [vmem:[%s11739_s1 + $0xe2c] ss:$12 sps:$4 sm:$0xff]   ;;  %v8661_v62 = vld [vmem:[%s11739_s1 + $0xe28] ss:$12 sps:$4 sm:$0xff]  }
 0x171   :  { %5372 = vmatprep.subr.bf16.mxu0 %v8601_v61  ;;  %v8664_v61 = vld [vmem:[%s11739_s1 + $0xa70] ss:$12 sps:$4 sm:$0xff]  }
 0x172   :  { %6003 = vmatmul.mubr.bf16.gmra.mrb[68].mxu1 %v9031_v4 }
 0x173   :  { %7550 = vmatpush3.bf16.msra.mxu1 %v8604_v1  ;;  %6043 = vmatprep.mubr.bf16.mxu1 %v9032_v9  ;;  %v8669_v1 = vld [vmem:[%s11739_s1 + $0xb48] ss:$12 sps:$4 sm:$0xff]   ;;  %v8674_v9 = vld [vmem:[%s11739_s1 + $0xb60] ss:$12 sps:$4 sm:$0xff]  }
 0x174   :  { %5373 = vmatpush1.bf16.msra.mxu0 %v8599_v0  ;;  %7551 = vmatprep.subr.bf16.mxu1 %v8608_v3  ;;  %v8668_v0 = vld [vmem:[%s11739_s1 + $0xe44] ss:$12 sps:$4 sm:$0xff]   ;;  %v8666_v3 = vld [vmem:[%s11739_s1 + $0xe40] ss:$12 sps:$4 sm:$0xff]  }
 0x175   :  { %5374 = vmatprep.subr.bf16.mxu0 %v8607_v2 }
 0x177   :  { %7552 = vmatpush3.bf16.msra.mxu1 %v8609_v6  ;;  %v8670_v6 = vld [vmem:[%s11739_s1 + $0xa88] ss:$12 sps:$4 sm:$0xff]  }
 0x178   :  { %5375 = vmatpush1.bf16.msra.mxu0 %v8605_v5  ;;  %7553 = vmatprep.subr.bf16.mxu1 %v8615_v8 }
 0x179   :  { %5376 = vmatprep.subr.bf16.mxu0 %v8614_v7  ;;  %v8673_v7 = vld [vmem:[%s11739_s1 + $0xe5c] ss:$12 sps:$4 sm:$0xff]  }
 0x17b   :  { %7554 = vmatpush3.bf16.msra.mxu1 %v8617_v11  ;;  %v8671_v11 = vld [vmem:[%s11739_s1 + $0xe58] ss:$12 sps:$4 sm:$0xff]  }
 0x17c   :  { %5377 = vmatpush1.bf16.msra.mxu0 %v8612_v10  ;;  %7555 = vmatprep.subr.bf16.mxu1 %v8621_v13  ;;  %v9039_v10 = vld [vmem:[%s11740_s0 + $0x30] ss:$108 sps:$4 sm:$0xff]   ;;  %v8678_v13 = vld [vmem:[%s11739_s1 + $0xe74] ss:$12 sps:$4 sm:$0xff]  }
 0x17d   :  { %5378 = vmatprep.subr.bf16.mxu0 %v8620_v12  ;;  %v8675_v12 = vld [vmem:[%s11739_s1 + $0xaa0] ss:$12 sps:$4 sm:$0xff]  }
 0x17f   :  { %7556 = vmatpush3.bf16.msra.mxu1 %v8622_v15 }
 0x180   :  { %5379 = vmatpush1.bf16.msra.mxu0 %v8618_v14  ;;  %7575 = vmatprep.subr.bf16.mxu1 %v8629_v17  ;;  %v8679_v14 = vld [vmem:[%s11739_s1 + $0xb78] ss:$12 sps:$4 sm:$0xff]   ;;  %v8676_v17 = vld [vmem:[%s11739_s1 + $0xe70] ss:$12 sps:$4 sm:$0xff]  }
 0x181   :  { %5411 = vmatprep.subr.bf16.mxu0 %v8628_v16  ;;  %v9040_v16 = vld [vmem:[%s11740_s0 + $0x10c] ss:$108 sps:$4 sm:$0xff]  }
 0x182   :  { %6044 = vmatmul.mubr.bf16.vlgmr.msra.gmra.mrb[72].mxu1 %v9033_v25  ;;  %v8684_v25 = vld [vmem:[%s11739_s1 + $0xb90] ss:$12 sps:$4 sm:$0xff]  }
 0x183   :  { %5381 = vmatmul.mubr.bf16.vlgmr.msra.gmra.mrb[0].mxu0 %v10481_v18  ;;  %7576 = vmatpush3.bf16.msra.mxu1 %v8630_v20 }
 0x184   :  { %5412 = vmatpush1.bf16.msra.mxu0 %v8626_v19  ;;  %7577 = vmatprep.subr.bf16.mxu1 %v8634_v22  ;;  %v8683_v22 = vld [vmem:[%s11739_s1 + $0xe8c] ss:$12 sps:$4 sm:$0xff]  }
 0x185   :  { %5413 = vmatprep.subr.bf16.mxu0 %v8633_v21  ;;  %6051 = vmatprep.mubr.bf16.mxu1 %v9034_v30  ;;  %v8680_v21 = vld [vmem:[%s11739_s1 + $0xab8] ss:$12 sps:$4 sm:$0xff]  }
 0x186   :  { %5390 = vmatprep.mubr.bf16.mxu0 %v10501_v24  ;;  %v8690_v30 = vld [vmem:[%s11739_s1 + $0xea4] ss:$12 sps:$4 sm:$0xff]  }
 0x187   :  { %7578 = vmatpush3.bf16.msra.mxu1 %v8635_v26  ;;  %v9041_v26 = vld [vmem:[%s11740_s0 + $0x108] ss:$108 sps:$4 sm:$0xff]  }
 0x188   :  { %5414 = vmatpush1.bf16.msra.mxu0 %v8631_v23  ;;  %7579 = vmatprep.subr.bf16.mxu1 %v8639_v29  ;;  %v8685_v29 = vld [vmem:[%s11739_s1 + $0xad0] ss:$12 sps:$4 sm:$0xff]  }
 0x189   :  { %5415 = vmatprep.subr.bf16.mxu0 %v8638_v28  ;;  %v8681_v28 = vld [vmem:[%s11739_s1 + $0xe88] ss:$12 sps:$4 sm:$0xff]  }
 0x18a   :  { %6052 = vmatmul.mubr.bf16.gmra.mrb[76].mxu1 %v9035_v38  ;;  %v8696_v38 = vld [vmem:[%s11739_s1 + $0xebc] ss:$12 sps:$4 sm:$0xff]  }
 0x18b   :  { %5391 = vmatmul.mubr.bf16.gmra.mrb[4].mxu0 %v10526_v32  ;;  %7580 = vmatpush3.bf16.msra.mxu1 %v8640_v33  ;;  %v9042_v33 = vld [vmem:[%s11740_s0 + $0x1e4] ss:$108 sps:$4 sm:$0xff]  }
 0x18c   :  { %5416 = vmatpush1.bf16.msra.mxu0 %v8636_v31  ;;  %7581 = vmatprep.subr.bf16.mxu1 %v8644_v36  ;;  %v8691_v31 = vld [vmem:[%s11739_s1 + $0xba8] ss:$12 sps:$4 sm:$0xff]  }
 0x18d   :  { %5417 = vmatprep.subr.bf16.mxu0 %v8643_v35  ;;  %6059 = vmatprep.mubr.bf16.mxu1 %v9036_v43  ;;  %v8688_v35 = vld [vmem:[%s11739_s1 + $0xea0] ss:$12 sps:$4 sm:$0xff]   ;;  %v8693_v36 = vld [vmem:[%s11739_s1 + $0xae8] ss:$12 sps:$4 sm:$0xff]  }
 0x18e   :  { %5400 = vmatprep.mubr.bf16.mxu0 %v10540_v37  ;;  %v8703_v43 = vld [vmem:[%s11739_s1 + $0xed4] ss:$12 sps:$4 sm:$0xff]  }
 0x18f   :  { %7582 = vmatpush3.bf16.msra.mxu1 %v8645_v27  ;;  %v9043_v27 = vld [vmem:[%s11740_s0 + $0x1e0] ss:$108 sps:$4 sm:$0xff]  }
 0x190   :  { %5418 = vmatpush1.bf16.msra.mxu0 %v8641_v40  ;;  %7583 = vmatprep.subr.bf16.mxu1 %v8649_v42  ;;  %v8697_v40 = vld [vmem:[%s11739_s1 + $0xbc0] ss:$12 sps:$4 sm:$0xff]  }
 0x191   :  { %5419 = vmatprep.subr.bf16.mxu0 %v8648_v41  ;;  %v8694_v41 = vld [vmem:[%s11739_s1 + $0xeb8] ss:$12 sps:$4 sm:$0xff]   ;;  %v8698_v42 = vld [vmem:[%s11739_s1 + $0xb00] ss:$12 sps:$4 sm:$0xff]  }
 0x192   :  { %6060 = vmatmul.mubr.bf16.gmra.mrb[80].mxu1 %v9037_v49 }
 0x193   :  { %5401 = vmatmul.mubr.bf16.gmra.mrb[8].mxu0 %v10571_v45  ;;  %7584 = vmatpush3.bf16.msra.mxu1 %v8650_v44  ;;  %v8701_v44 = vld [vmem:[%s11739_s1 + $0xed0] ss:$12 sps:$4 sm:$0xff]  }
 0x194   :  { %5420 = vmatpush1.bf16.msra.mxu0 %v8646_v34  ;;  %7585 = vmatprep.subr.bf16.mxu1 %v8654_v39  ;;  %v8704_v34 = vld [vmem:[%s11739_s1 + $0xbd8] ss:$12 sps:$4 sm:$0xff]  }
 0x195   :  { %5421 = vmatprep.subr.bf16.mxu0 %v8653_v47  ;;  %v10600_v54 = vpop.f32.mrb[0].mxu1  ;;  %6100 = vmatprep.mubr.bf16.mxu1 %v9038_v56  ;;  %v9044_v47 = vld [vmem:[%s11740_s0 + $0x3c] ss:$108 sps:$4 sm:$0xff]  }
 0x196   :  { %5443 = vmatprep.mubr.bf16.mxu0 %v10582_v48  ;;  %v10612_v57 = vpop.f32.mrb[1].mxu1 }
 0x197   :  { %v10614_v58 = vpop.f32.mrb[2].mxu1  ;;  %7586 = vmatpush3.bf16.msra.mxu1 %v8655_v46  ;;  %v8709_v46 = vld [vmem:[%s11739_s1 + $0xeec] ss:$12 sps:$4 sm:$0xff]  }
 0x198   :  { %5422 = vmatpush1.bf16.msra.mxu0 %v8651_v50  ;;  %v10619_v60 = vpop.f32.mrb[3].mxu1  ;;  %7587 = vmatprep.subr.bf16.mxu1 %v8659_v53  ;;  %v8706_v50 = vld [vmem:[%s11739_s1 + $0xb18] ss:$12 sps:$4 sm:$0xff]  }
 0x199   :  { %5423 = vmatprep.subr.bf16.mxu0 %v8658_v51 }
 0x19b   :  { %7588 = vmatpush3.bf16.msra.mxu1 %v8660_v55 }
 0x19c   :  { %5424 = vmatpush1.bf16.msra.mxu0 %v8656_v52  ;;  %7589 = vmatprep.subr.bf16.mxu1 %v8664_v61  ;;  %v8710_v52 = vld [vmem:[%s11739_s1 + $0xbf0] ss:$12 sps:$4 sm:$0xff]  }
 0x19d   :  { %5425 = vmatprep.subr.bf16.mxu0 %v8663_v59  ;;  %v10636_v2 = vpop.f32.mrb[4].mxu1  ;;  %v8707_v59 = vld [vmem:[%s11739_s1 + $0xee8] ss:$12 sps:$4 sm:$0xff]   ;;  %v8711_v61 = vld [vmem:[%s11739_s1 + $0xb30] ss:$12 sps:$4 sm:$0xff]  }
 0x19e   :  { %v10641_v4 = vpop.f32.mrb[5].mxu1 }
 0x19f   :  { %v10643_v5 = vpop.f32.mrb[6].mxu1  ;;  %7590 = vmatpush3.bf16.msra.mxu1 %v8665_v63  ;;  %v10770_v63 = vld [vmem:[%s11740_s0 + $0x48] ss:$108 sps:$4 sm:$0xff]  }
 0x1a0   :  { %5426 = vmatpush1.bf16.msra.mxu0 %v8661_v62  ;;  %v10651_v8 = vpop.f32.mrb[7].mxu1  ;;  %7609 = vmatprep.subr.bf16.mxu1 %v8669_v1  ;;  %v8717_v62 = vld [vmem:[%s11739_s1 + $0xf04] ss:$12 sps:$4 sm:$0xff]   ;;  %v8715_v1 = vld [vmem:[%s11739_s1 + $0xf00] ss:$12 sps:$4 sm:$0xff]  }
 0x1a1   :  { %5427 = vmatprep.subr.bf16.mxu0 %v8668_v0  ;;  %v8718_v0 = vld [vmem:[%s11739_s1 + $0xcc8] ss:$12 sps:$4 sm:$0xff]  }
 0x1a2   :  { %6101 = vmatmul.mubr.bf16.vlgmr.msra.gmra.mrb[84].mxu1 %v9039_v10 }
 0x1a3   :  { %7610 = vmatpush3.bf16.msra.mxu1 %v8670_v6  ;;  %6108 = vmatprep.mubr.bf16.mxu1 %v9040_v16  ;;  %v8719_v6 = vld [vmem:[%s11739_s1 + $0xc08] ss:$12 sps:$4 sm:$0xff]  }
 0x1a4   :  { %5428 = vmatpush1.bf16.msra.mxu0 %v8666_v3  ;;  %7611 = vmatprep.subr.bf16.mxu1 %v8674_v9 }
 0x1a5   :  { %5429 = vmatprep.subr.bf16.mxu0 %v8673_v7  ;;  %v10671_v15 = vpop.f32.mrb[8].mxu1  ;;  %v8722_v7 = vld [vmem:[%s11739_s1 + $0xf1c] ss:$12 sps:$4 sm:$0xff]  }
 0x1a6   :  { %v10679_v19 = vpop.f32.mrb[9].mxu1 }
 0x1a7   :  { %v10681_v20 = vpop.f32.mrb[10].mxu1  ;;  %7612 = vmatpush3.bf16.msra.mxu1 %v8675_v12  ;;  %v965_v12 = vlaneseq }
 0x1a8   :  { %5430 = vmatpush1.bf16.msra.mxu0 %v8671_v11  ;;  %v10689_v23 = vpop.f32.mrb[11].mxu1  ;;  %7613 = vmatprep.subr.bf16.mxu1 %v8679_v14 }
 0x1a9   :  { %5431 = vmatprep.subr.bf16.mxu0 %v8678_v13  ;;  %v8723_v13 = vld [vmem:[%s11739_s1 + $0xce0] ss:$12 sps:$4 sm:$0xff]  }
 0x1aa   :  { %6109 = vmatmul.mubr.bf16.gmra.mrb[88].mxu1 %v9041_v26  ;;  %v10806_v26 = vshrl.u32 %v965_v12, 7  ;;  %v8747_v12 = vld [vmem:[%s11739_s1 + $0xf94] ss:$12 sps:$4 sm:$0xff]  }
 0x1ab   :  { %7614 = vmatpush3.bf16.msra.mxu1 %v8680_v21  ;;  %6116 = vmatprep.mubr.bf16.mxu1 %v9042_v33  ;;  %v9045_v21 = vld [vmem:[%s11740_s0 + $0x38] ss:$108 sps:$4 sm:$0xff]  }
 0x1ac   :  { %5432 = vmatpush1.bf16.msra.mxu0 %v8676_v17  ;;  %7615 = vmatprep.subr.bf16.mxu1 %v8684_v25  ;;  %v10794_v17 = vld [vmem:[%s11740_s0 + $0x124] ss:$108 sps:$4 sm:$0xff]   ;;  %v8724_v25 = vld [vmem:[%s11739_s1 + $0xc20] ss:$12 sps:$4 sm:$0xff]  }
 0x1ad   :  { %5433 = vmatprep.subr.bf16.mxu0 %v8683_v22  ;;  %v8720_v22 = vld [vmem:[%s11739_s1 + $0xf18] ss:$12 sps:$4 sm:$0xff]  }
 0x1ae   :  { %v8729_v33 = vld [vmem:[%s11739_s1 + $0xc38] ss:$12 sps:$4 sm:$0xff]  }
 0x1af   :  { %7616 = vmatpush3.bf16.msra.mxu1 %v8685_v29  ;;  %v8728_v29 = vld [vmem:[%s11739_s1 + $0xcf8] ss:$12 sps:$4 sm:$0xff]  }
 0x1b0   :  { %5434 = vmatpush1.bf16.msra.mxu0 %v8681_v28  ;;  %7617 = vmatprep.subr.bf16.mxu1 %v8691_v31  ;;  %v8727_v28 = vld [vmem:[%s11739_s1 + $0xf34] ss:$12 sps:$4 sm:$0xff]   ;;  %v8725_v31 = vld [vmem:[%s11739_s1 + $0xf30] ss:$12 sps:$4 sm:$0xff]  }
 0x1b1   :  { %5435 = vmatprep.subr.bf16.mxu0 %v8690_v30  ;;  %v9046_v30 = vld [vmem:[%s11740_s0 + $0x114] ss:$108 sps:$4 sm:$0xff]  }
 0x1b2   :  { %6117 = vmatmul.mubr.bf16.gmra.mrb[92].mxu1 %v9043_v27 }
 0x1b3   :  { %7618 = vmatpush3.bf16.msra.mxu1 %v8693_v36  ;;  %6157 = vmatprep.mubr.bf16.mxu1 %v9044_v47  ;;  %v9047_v47 = vld [vmem:[%s11740_s0 + $0x110] ss:$108 sps:$4 sm:$0xff]  }
 0x1b4   :  { %5436 = vmatpush1.bf16.msra.mxu0 %v8688_v35  ;;  %7619 = vmatprep.subr.bf16.mxu1 %v8697_v40 }
 0x1b5   :  { %5437 = vmatprep.subr.bf16.mxu0 %v8696_v38  ;;  %v7387_v39 = vpop.f32.mrb[12].mxu1  ;;  %v10827_v38 = vld [vmem:[%s11740_s0 + $0x120] ss:$108 sps:$4 sm:$0xff]  }
 0x1b6   :  { %v7388_v49 = vpop.f32.mrb[13].mxu1 }
 0x1b7   :  { %7620 = vmatpush3.bf16.msra.mxu1 %v8698_v42  ;;  %v10751_v51 = vadd.f32 %v7388_v49, %v7387_v39  ;;  %v7390_v53 = vpop.f32.mrb[14].mxu1  ;;  %v8733_v42 = vld [vmem:[%s11739_s1 + $0xd10] ss:$12 sps:$4 sm:$0xff]   ;;  %v975_v39 = vsub.s32 2, %v10806_v26  ;;  %v8730_v49 = vld [vmem:[%s11739_s1 + $0xf48] ss:$12 sps:$4 sm:$0xff]  }
 0x1b8   :  { %5438 = vmatpush1.bf16.msra.mxu0 %v8694_v41  ;;  %7621 = vmatprep.subr.bf16.mxu1 %v8704_v34  ;;  %v7391_v55 = vpop.f32.mrb[15].mxu1  ;;  %v8732_v41 = vld [vmem:[%s11739_s1 + $0xf4c] ss:$12 sps:$4 sm:$0xff]  }
 0x1b9   :  { %5439 = vmatprep.subr.bf16.mxu0 %v8703_v43  ;;  %v10756_v56 = vadd.f32 %v7391_v55, %v7390_v53  ;;  %v8738_v53 = vld [vmem:[%s11739_s1 + $0xd28] ss:$12 sps:$4 sm:$0xff]   ;;  %v8735_v55 = vld [vmem:[%s11739_s1 + $0xf60] ss:$12 sps:$4 sm:$0xff]  }
 0x1bb   :  { %7622 = vmatpush3.bf16.msra.mxu1 %v8706_v50  ;;  %v8734_v50 = vld [vmem:[%s11739_s1 + $0xc50] ss:$12 sps:$4 sm:$0xff]  }
 0x1bc   :  { %5440 = vmatpush1.bf16.msra.mxu0 %v8701_v44  ;;  %7623 = vmatprep.subr.bf16.mxu1 %v8710_v52  ;;  %v10842_v44 = vld [vmem:[%s11740_s0 + $0x1fc] ss:$108 sps:$4 sm:$0xff]   ;;  %v9048_v52 = vld [vmem:[%s11740_s0 + $0x1ec] ss:$108 sps:$4 sm:$0xff]  }
 0x1bd   :  { %5441 = vmatprep.subr.bf16.mxu0 %v8709_v46  ;;  %v7393_v3 = vpop.f32.mrb[16].mxu1  ;;  %v8737_v46 = vld [vmem:[%s11739_s1 + $0xf64] ss:$12 sps:$4 sm:$0xff]  }
 0x1be   :  { %v7394_v9 = vpop.f32.mrb[17].mxu1 }
 0x1bf   :  { %7624 = vmatpush3.bf16.msra.mxu1 %v8711_v61  ;;  %v10784_v10 = vadd.f32 %v7394_v9, %v7393_v3  ;;  %v7396_v11 = vpop.f32.mrb[18].mxu1  ;;  %v963_v61 = vld [vmem:[%s11741_s2] sm:$0x7]  ;;  %v8740_v9 = vld [vmem:[%s11739_s1 + $0xf78] ss:$12 sps:$4 sm:$0xff]  }
 0x1c0   :  { %5442 = vmatpush1.bf16.msra.mxu0 %v8707_v59  ;;  %7643 = vmatprep.subr.bf16.mxu1 %v8718_v0  ;;  %v7397_v14 = vpop.f32.mrb[19].mxu1  ;;  %v8739_v59 = vld [vmem:[%s11739_s1 + $0xc68] ss:$12 sps:$4 sm:$0xff]   ;;  %v10885_v3 = vrot.slane %v963_v61, %v975_v39 }
 0x1c1   :  { %5474 = vmatprep.subr.bf16.mxu0 %v8717_v62  ;;  %v10789_v16 = vadd.f32 %v7397_v14, %v7396_v11  ;;  %v10877_v62 = vld [vmem:[%s11740_s0 + $0x1f8] ss:$108 sps:$4 sm:$0xff]   ;;  %v8742_v0 = vld [vmem:[%s11739_s1 + $0xf7c] ss:$12 sps:$4 sm:$0xff]   ;;  %v8744_v11 = vld [vmem:[%s11739_s1 + $0xc80] ss:$12 sps:$4 sm:$0xff]  }
 0x1c2   :  { %6158 = vmatmul.mubr.bf16.vlgmr.msra.gmra.mrb[96].mxu1 %v9045_v21  ;;  %v5761_v14 = vadd.f32 %v10751_v51, %v10885_v3  ;;  %v5764_v51 = vadd.f32 %v10756_v56, %v10885_v3  ;;  %v8750_v56 = vld [vmem:[%s11739_s1 + $0xfa8] ss:$12 sps:$4 sm:$0xff]  }
 0x1c3   :  { %5444 = vmatmul.mubr.bf16.vlgmr.msra.gmra.mrb[0].mxu0 %v10770_v63  ;;  %7644 = vmatpush3.bf16.msra.mxu1 %v8719_v6  ;;  %v10890_v6 = vld [vmem:[%s11740_s0 + $0x54] ss:$108 sps:$4 sm:$0xff]  }
 0x1c4   :  { %5475 = vmatpush1.bf16.msra.mxu0 %v8715_v1  ;;  %7645 = vmatprep.subr.bf16.mxu1 %v8723_v13  ;;  %v8743_v1 = vld [vmem:[%s11739_s1 + $0xd40] ss:$12 sps:$4 sm:$0xff]   ;;  %v8748_v13 = vld [vmem:[%s11739_s1 + $0xd58] ss:$12 sps:$4 sm:$0xff]   ;;  %v8758_v39 = vld [vmem:[%s11739_s1 + $0xe48] ss:$12 sps:$4 sm:$0xff]  }
 0x1c5   :  { %5476 = vmatprep.subr.bf16.mxu0 %v8722_v7  ;;  %6165 = vmatprep.mubr.bf16.mxu1 %v9046_v30  ;;  %v7399_v35 = vpop.f32.mrb[20].mxu1  ;;  %v9049_v7 = vld [vmem:[%s11740_s0 + $0x1e8] ss:$108 sps:$4 sm:$0xff]  }
 0x1c6   :  { %5453 = vmatprep.mubr.bf16.mxu0 %v10794_v17  ;;  %v7400_v36 = vpop.f32.mrb[21].mxu1 }
 0x1c7   :  { %7646 = vmatpush3.bf16.msra.mxu1 %v8724_v25  ;;  %v10829_v40 = vadd.f32 %v7400_v36, %v7399_v35  ;;  %v7402_v27 = vpop.f32.mrb[22].mxu1  ;;  %v8753_v36 = vld [vmem:[%s11739_s1 + $0xd70] ss:$12 sps:$4 sm:$0xff]  }
 0x1c8   :  { %5477 = vmatpush1.bf16.msra.mxu0 %v8720_v22  ;;  %7647 = vmatprep.subr.bf16.mxu1 %v8728_v29  ;;  %v7403_v43 = vpop.f32.mrb[23].mxu1  ;;  %v9050_v22 = vld [vmem:[%s11740_s0 + $0x44] ss:$108 sps:$4 sm:$0xff]  }
 0x1c9   :  { %5478 = vmatprep.subr.bf16.mxu0 %v8727_v28  ;;  %v10837_v34 = vadd.f32 %v7403_v43, %v7402_v27  ;;  %v8745_v28 = vld [vmem:[%s11739_s1 + $0xf90] ss:$12 sps:$4 sm:$0xff]   ;;  %v8749_v29 = vld [vmem:[%s11739_s1 + $0xc98] ss:$12 sps:$4 sm:$0xff]  }
 0x1ca   :  { %6166 = vmatmul.mubr.bf16.gmra.mrb[100].mxu1 %v9047_v47  ;;  %v8757_v47 = vld [vmem:[%s11739_s1 + $0xfc4] ss:$12 sps:$4 sm:$0xff]  }
 0x1cb   :  { %5454 = vmatmul.mubr.bf16.gmra.mrb[4].mxu0 %v10827_v38  ;;  %7648 = vmatpush3.bf16.msra.mxu1 %v8729_v33  ;;  %v8752_v33 = vld [vmem:[%s11739_s1 + $0xfac] ss:$12 sps:$4 sm:$0xff]  }
 0x1cc   :  { %5479 = vmatpush1.bf16.msra.mxu0 %v8725_v31  ;;  %7649 = vmatprep.subr.bf16.mxu1 %v8733_v42  ;;  %v8754_v42 = vld [vmem:[%s11739_s1 + $0xcb0] ss:$12 sps:$4 sm:$0xff]  }
 0x1cd   :  { %5480 = vmatprep.subr.bf16.mxu0 %v8732_v41  ;;  %6173 = vmatprep.mubr.bf16.mxu1 %v9048_v52 }
 0x1ce   :  { %5463 = vmatprep.mubr.bf16.mxu0 %v10842_v44 }
 0x1cf   :  { %7650 = vmatpush3.bf16.msra.mxu1 %v8734_v50 }
 0x1d0   :  { %5481 = vmatpush1.bf16.msra.mxu0 %v8730_v49  ;;  %7651 = vmatprep.subr.bf16.mxu1 %v8738_v53  ;;  %v5769_v49 = vadd.f32 %v10784_v10, %v10885_v3  ;;  %v8759_v53 = vld [vmem:[%s11739_s1 + $0xd88] ss:$12 sps:$4 sm:$0xff]  }
 0x1d1   :  { %5482 = vmatprep.subr.bf16.mxu0 %v8737_v46  ;;  %v8755_v46 = vld [vmem:[%s11739_s1 + $0xfc0] ss:$12 sps:$4 sm:$0xff]  }
 0x1d2   :  { %6174 = vmatmul.mubr.bf16.gmra.mrb[104].mxu1 %v9049_v7 }
 0x1d3   :  { %5464 = vmatmul.mubr.bf16.gmra.mrb[8].mxu0 %v10877_v62  ;;  %7652 = vmatpush3.bf16.msra.mxu1 %v8739_v59  ;;  %v8762_v59 = vld [vmem:[%s11739_s1 + $0xfdc] ss:$12 sps:$4 sm:$0xff]  }
 0x1d4   :  { %5483 = vmatpush1.bf16.msra.mxu0 %v8735_v55  ;;  %7653 = vmatprep.subr.bf16.mxu1 %v8743_v1  ;;  %v5772_v55 = vadd.f32 %v10789_v16, %v10885_v3  ;;  %v8760_v16 = vld [vmem:[%s11739_s1 + $0xfd8] ss:$12 sps:$4 sm:$0xff]  }
 0x1d5   :  { %5484 = vmatprep.subr.bf16.mxu0 %v8742_v0  ;;  %v7421_v21 = vpop.f32.mrb[24].mxu1  ;;  %6214 = vmatprep.mubr.bf16.mxu1 %v9050_v22  ;;  %v8763_v0 = vld [vmem:[%s11739_s1 + $0xe60] ss:$12 sps:$4 sm:$0xff]   ;;  %v8769_v22 = vld [vmem:[%s11739_s1 + $0xdb8] ss:$12 sps:$4 sm:$0xff]  }
 0x1d6   :  { %5506 = vmatprep.mubr.bf16.mxu0 %v10890_v6  ;;  %v7422_v25 = vpop.f32.mrb[25].mxu1 }
 0x1d7   :  { %v7423_v30 = vadd.f32 %v7422_v25, %v7421_v21  ;;  %7654 = vmatpush3.bf16.msra.mxu1 %v8744_v11  ;;  %v7424_v31 = vpop.f32.mrb[26].mxu1  ;;  %v8764_v11 = vld [vmem:[%s11739_s1 + $0xda0] ss:$12 sps:$4 sm:$0xff]   ;;  %v8765_v21 = vld [vmem:[%s11739_s1 + $0xff0] ss:$12 sps:$4 sm:$0xff]  }
 0x1d8   :  { %5485 = vmatpush1.bf16.msra.mxu0 %v8740_v9  ;;  %v7425_v35 = vpop.f32.mrb[27].mxu1  ;;  %7655 = vmatprep.subr.bf16.mxu1 %v8748_v13  ;;  %v8767_v13 = vld [vmem:[%s11739_s1 + $0xff4] ss:$12 sps:$4 sm:$0xff]  }
 0x1d9   :  { %5486 = vmatprep.subr.bf16.mxu0 %v8747_v12  ;;  %v10928_v27 = vadd.f32 %v7423_v30, %v5761_v14  ;;  %v7426_v41 = vadd.f32 %v7425_v35, %v7424_v31  ;;  %v5777_v14 = vadd.f32 %v10829_v40, %v10885_v3  ;;  %v8772_v40 = vld [vmem:[%s11739_s1 + $0x100c] ss:$12 sps:$4 sm:$0xff]   ;;  %v8773_v30 = vld [vmem:[%s11739_s1 + $0xe90] ss:$12 sps:$4 sm:$0xff]  }
 0x1db   :  { %v10936_v43 = vadd.f32 %v7426_v41, %v5764_v51  ;;  %7656 = vmatpush3.bf16.msra.mxu1 %v8749_v29  ;;  %v5780_v29 = vadd.f32 %v10837_v34, %v10885_v3  ;;  %v8770_v34 = vld [vmem:[%s11739_s1 + $0x1008] ss:$12 sps:$4 sm:$0xff]   ;;  %v8774_v3 = vld [vmem:[%s11739_s1 + $0xdd0] ss:$12 sps:$4 sm:$0xff]  }
 0x1dc   :  { %5487 = vmatpush1.bf16.msra.mxu0 %v8745_v28  ;;  %7657 = vmatprep.subr.bf16.mxu1 %v8753_v36  ;;  %v8779_v41 = vld [vmem:[%s11739_s1 + $0x1024] ss:$12 sps:$4 sm:$0xff]  }
 0x1dd   :  { %5488 = vmatprep.subr.bf16.mxu0 %v8752_v33  ;;  %v7427_v50 = vpop.f32.mrb[28].mxu1 }
 0x1de   :  { %v7428_v52 = vpop.f32.mrb[29].mxu1 }
 0x1df   :  { %7658 = vmatpush3.bf16.msra.mxu1 %v8754_v42  ;;  %v7429_v10 = vadd.f32 %v7428_v52, %v7427_v50  ;;  %v7430_v61 = vpop.f32.mrb[30].mxu1  ;;  %v8782_v42 = vld [vmem:[%s11739_s1 + $0xde8] ss:$12 sps:$4 sm:$0xff]   ;;  %v8795_v52 = vld [vmem:[%s11739_s1 + $0xe18] ss:$12 sps:$4 sm:$0xff]  }
 0x1e0   :  { %5489 = vmatpush1.bf16.msra.mxu0 %v8750_v56  ;;  %7677 = vmatprep.subr.bf16.mxu1 %v8758_v39  ;;  %v7431_v1 = vpop.f32.mrb[31].mxu1  ;;  %v8777_v56 = vld [vmem:[%s11739_s1 + $0x1020] ss:$12 sps:$4 sm:$0xff]   ;;  %v8783_v39 = vld [vmem:[%s11739_s1 + $0x1038] ss:$12 sps:$4 sm:$0xff]  }
 0x1e1   :  { %5490 = vmatprep.subr.bf16.mxu0 %v8757_v47  ;;  %v10960_v7 = vadd.f32 %v7429_v10, %v5769_v49  ;;  %v7432_v9 = vadd.f32 %v7431_v1, %v7430_v61  ;;  %v8785_v47 = vld [vmem:[%s11739_s1 + $0x103c] ss:$12 sps:$4 sm:$0xff]   ;;  %v8787_v49 = vld [vmem:[%s11739_s1 + $0xe00] ss:$12 sps:$4 sm:$0xff]  }
 0x1e2   :  { %6215 = vmatmul.mubr.bf16.vlgmr.msra.gmra.mrb[108].mxu1 %v10481_v18  ;;  %v8768_v18 = vld [vmem:[%s11739_s1 + $0xe78] ss:$12 sps:$4 sm:$0xff]   ;;  %v8792_v50 = vld [vmem:[%s11739_s1 + $0x1054] ss:$12 sps:$4 sm:$0xff]  }
 0x1e3   :  { %7678 = vmatpush3.bf16.msra.mxu1 %v8759_v53  ;;  %v10969_v12 = vadd.f32 %v7432_v9, %v5772_v55  ;;  %6222 = vmatprep.mubr.bf16.mxu1 %v10501_v24 }
 0x1e4   :  { %5491 = vmatpush1.bf16.msra.mxu0 %v8755_v46  ;;  %7679 = vmatprep.subr.bf16.mxu1 %v8763_v0  ;;  %v8793_v46 = vld [vmem:[%s11739_s1 + $0xed8] ss:$12 sps:$4 sm:$0xff]   ;;  %v8799_v0 = vld [vmem:[%s11739_s1 + $0xef0] ss:$12 sps:$4 sm:$0xff]  }
 0x1e5   :  { %5492 = vmatprep.subr.bf16.mxu0 %v8762_v59  ;;  %v7433_v25 = vpop.f32.mrb[32].mxu1  ;;  %v8798_v59 = vld [vmem:[%s11739_s1 + $0x106c] ss:$12 sps:$4 sm:$0xff]  }
 0x1e6   :  { %v7434_v28 = vpop.f32.mrb[33].mxu1 }
 0x1e7   :  { %7680 = vmatpush3.bf16.msra.mxu1 %v8764_v11  ;;  %v7435_v24 = vadd.f32 %v7434_v28, %v7433_v25  ;;  %v7436_v51 = vpop.f32.mrb[34].mxu1  ;;  %v8800_v11 = vld [vmem:[%s11739_s1 + $0xe30] ss:$12 sps:$4 sm:$0xff]  }
 0x1e8   :  { %5493 = vmatpush1.bf16.msra.mxu0 %v8760_v16  ;;  %7681 = vmatprep.subr.bf16.mxu1 %v8768_v18  ;;  %v7437_v31 = vpop.f32.mrb[35].mxu1  ;;  %v8796_v16 = vld [vmem:[%s11739_s1 + $0x1068] ss:$12 sps:$4 sm:$0xff]   ;;  %v8806_v18 = vld [vmem:[%s11739_s1 + $0x1084] ss:$12 sps:$4 sm:$0xff]  }
 0x1e9   :  { %5494 = vmatprep.subr.bf16.mxu0 %v8767_v13  ;;  %v10994_v33 = vadd.f32 %v7435_v24, %v5777_v14  ;;  %v7438_v35 = vadd.f32 %v7437_v31, %v7436_v51  ;;  %v8807_v14 = vld [vmem:[%s11739_s1 + $0xfc8] ss:$12 sps:$4 sm:$0xff]   ;;  %v8812_v24 = vld [vmem:[%s11739_s1 + $0xfe0] ss:$12 sps:$4 sm:$0xff]  }
 0x1ea   :  { %6223 = vmatmul.mubr.bf16.gmra.mrb[112].mxu1 %v10526_v32  ;;  %v8780_v32 = vld [vmem:[%s11739_s1 + $0xea8] ss:$12 sps:$4 sm:$0xff]  }
 0x1eb   :  { %7682 = vmatpush3.bf16.msra.mxu1 %v8769_v22  ;;  %v11003_v36 = vadd.f32 %v7438_v35, %v5780_v29  ;;  %6230 = vmatprep.mubr.bf16.mxu1 %v10540_v37  ;;  %v8786_v37 = vld [vmem:[%s11739_s1 + $0xec0] ss:$12 sps:$4 sm:$0xff]   ;;  %v8808_v22 = vld [vmem:[%s11739_s1 + $0xf08] ss:$12 sps:$4 sm:$0xff]   ;;  %v8809_v35 = vld [vmem:[%s11739_s1 + $0x1098] ss:$12 sps:$4 sm:$0xff]  }
 0x1ec   :  { %5495 = vmatpush1.bf16.msra.mxu0 %v8765_v21  ;;  %7683 = vmatprep.subr.bf16.mxu1 %v8773_v30  ;;  %v8811_v28 = vld [vmem:[%s11739_s1 + $0x109c] ss:$12 sps:$4 sm:$0xff]  }
 0x1ed   :  { %5496 = vmatprep.subr.bf16.mxu0 %v8772_v40 }
 0x1ef   :  { %7684 = vmatpush3.bf16.msra.mxu1 %v8774_v3 }
 0x1f0   :  { %5497 = vmatpush1.bf16.msra.mxu0 %v8770_v34  ;;  %7685 = vmatprep.subr.bf16.mxu1 %v8780_v32  ;;  %v8813_v34 = vld [vmem:[%s11739_s1 + $0xf20] ss:$12 sps:$4 sm:$0xff]  }
 0x1f1   :  { %5498 = vmatprep.subr.bf16.mxu0 %v8779_v41  ;;  %v8817_v41 = vld [vmem:[%s11739_s1 + $0xff8] ss:$12 sps:$4 sm:$0xff]  }
 0x1f2   :  { %6231 = vmatmul.mubr.bf16.gmra.mrb[116].mxu1 %v10571_v45  ;;  %v8790_v45 = vld [vmem:[%s11739_s1 + $0x1050] ss:$12 sps:$4 sm:$0xff]  }
 0x1f3   :  { %7686 = vmatpush3.bf16.msra.mxu1 %v8782_v42  ;;  %6271 = vmatprep.mubr.bf16.mxu1 %v10582_v48 }
 0x1f4   :  { %5499 = vmatpush1.bf16.msra.mxu0 %v8777_v56  ;;  %7687 = vmatprep.subr.bf16.mxu1 %v8786_v37  ;;  %v8818_v56 = vld [vmem:[%s11739_s1 + $0xf38] ss:$12 sps:$4 sm:$0xff]  }
 0x1f5   :  { %5500 = vmatprep.subr.bf16.mxu0 %v8785_v47  ;;  %v7455_v53 = vpop.f32.mrb[36].mxu1 }
 0x1f6   :  { %v7456_v55 = vpop.f32.mrb[37].mxu1 }
 0x1f7   :  { %v7457_v10 = vadd.f32 %v7456_v55, %v7455_v53  ;;  %v7458_v61 = vpop.f32.mrb[38].mxu1  ;;  %7688 = vmatpush3.bf16.msra.mxu1 %v8787_v49 }
 0x1f8   :  { %5501 = vmatpush1.bf16.msra.mxu0 %v8783_v39  ;;  %v7459_v1 = vpop.f32.mrb[39].mxu1  ;;  %7689 = vmatprep.subr.bf16.mxu1 %v8793_v46  ;;  %v8821_v39 = vld [vmem:[%s11739_s1 + $0x10cc] ss:$12 sps:$4 sm:$0xff]  }
 0x1f9   :  { %5502 = vmatprep.subr.bf16.mxu0 %v8792_v50  ;;  %v11051_v9 = vadd.f32 %v7457_v10, %v10928_v27  ;;  %v7460_v48 = vadd.f32 %v7459_v1, %v7458_v61  ;;  %v11068_v27 = vld [vmem:[%s11740_s0 + $0x50] ss:$108 sps:$4 sm:$0xff]   ;;  %v11127_v50 = vld [vmem:[%s11740_s0 + $0x128] ss:$108 sps:$4 sm:$0xff]  }
 0x1fa   :  { %v8828_v10 = vld [vmem:[%s11739_s1 + $0xf68] ss:$12 sps:$4 sm:$0xff]  }
 0x1fb   :  { %v11060_v13 = vadd.f32 %v7460_v48, %v10936_v43  ;;  %7690 = vmatpush3.bf16.msra.mxu1 %v8795_v52  ;;  %v8804_v43 = vld [vmem:[%s11739_s1 + $0x1080] ss:$12 sps:$4 sm:$0xff]   ;;  %v8823_v52 = vld [vmem:[%s11739_s1 + $0xf50] ss:$12 sps:$4 sm:$0xff]   ;;  %v8829_v48 = vld [vmem:[%s11739_s1 + $0x10f8] ss:$12 sps:$4 sm:$0xff]  }
 0x1fc   :  { %5503 = vmatpush1.bf16.msra.mxu0 %v8790_v45  ;;  %7691 = vmatprep.subr.bf16.mxu1 %v8799_v0  ;;  %v8819_v45 = vld [vmem:[%s11739_s1 + $0x10c8] ss:$12 sps:$4 sm:$0xff]   ;;  %v11171_v0 = vld [vmem:[%s11740_s0 + $0x200] ss:$108 sps:$4 sm:$0xff]  }
 0x1fd   :  { %5504 = vmatprep.subr.bf16.mxu0 %v8798_v59  ;;  %v7461_v21 = vpop.f32.mrb[40].mxu1  ;;  %v8827_v59 = vld [vmem:[%s11739_s1 + $0x1028] ss:$12 sps:$4 sm:$0xff]  }
 0x1fe   :  { %v7462_v25 = vpop.f32.mrb[41].mxu1  ;;  %v8831_v61 = vld [vmem:[%s11739_s1 + $0x10fc] ss:$12 sps:$4 sm:$0xff]  }
 0x1ff   :  { %v7463_v29 = vadd.f32 %v7462_v25, %v7461_v21  ;;  %v7464_v40 = vpop.f32.mrb[42].mxu1  ;;  %7692 = vmatpush3.bf16.msra.mxu1 %v8800_v11  ;;  %v11176_v1 = vld [vmem:[%s11740_s0 + $0x5c] ss:$108 sps:$4 sm:$0xff]   ;;  %v8836_v11 = vld [vmem:[%s11739_s1 + $0x1114] ss:$12 sps:$4 sm:$0xff]  }
 0x200   :  { %5505 = vmatpush1.bf16.msra.mxu0 %v8796_v16  ;;  %v7465_v51 = vpop.f32.mrb[43].mxu1  ;;  %7711 = vmatprep.subr.bf16.mxu1 %v8807_v14  ;;  %v8833_v16 = vld [vmem:[%s11739_s1 + $0xf80] ss:$12 sps:$4 sm:$0xff]   ;;  %v8834_v21 = vld [vmem:[%s11739_s1 + $0x1110] ss:$12 sps:$4 sm:$0xff]  }
 0x201   :  { %5537 = vmatprep.subr.bf16.mxu0 %v8806_v18  ;;  %v11086_v30 = vadd.f32 %v7463_v29, %v10960_v7  ;;  %v7466_v31 = vadd.f32 %v7465_v51, %v7464_v40  ;;  %v11102_v7 = vld [vmem:[%s11740_s0 + $0x12c] ss:$108 sps:$4 sm:$0xff]   ;;  %v8842_v29 = vld [vmem:[%s11739_s1 + $0x1070] ss:$12 sps:$4 sm:$0xff]   ;;  %v8839_v51 = vld [vmem:[%s11739_s1 + $0x1128] ss:$12 sps:$4 sm:$0xff]  }
 0x202   :  { %6272 = vmatmul.mubr.bf16.vlgmr.msra.gmra.mrb[120].mxu1 %v10770_v63  ;;  %v8816_v63 = vld [vmem:[%s11739_s1 + $0x10b4] ss:$12 sps:$4 sm:$0xff]   ;;  %v8838_v25 = vld [vmem:[%s11739_s1 + $0xf98] ss:$12 sps:$4 sm:$0xff]  }
 0x203   :  { %5507 = vmatmul.mubr.bf16.vlgmr.msra.gmra.mrb[0].mxu0 %v11068_v27  ;;  %v11097_v3 = vadd.f32 %v7466_v31, %v10969_v12  ;;  %7712 = vmatpush3.bf16.msra.mxu1 %v8808_v22  ;;  %v8814_v12 = vld [vmem:[%s11739_s1 + $0x10b0] ss:$12 sps:$4 sm:$0xff]  }
 0x204   :  { %5538 = vmatpush1.bf16.msra.mxu0 %v8804_v43  ;;  %7713 = vmatprep.subr.bf16.mxu1 %v8812_v24  ;;  %v8843_v31 = vld [vmem:[%s11739_s1 + $0xfb0] ss:$12 sps:$4 sm:$0xff]  }
 0x205   :  { %5539 = vmatprep.subr.bf16.mxu0 %v8811_v28  ;;  %v7467_v32 = vpop.f32.mrb[44].mxu1  ;;  %6279 = vmatprep.mubr.bf16.mxu1 %v10794_v17  ;;  %v8822_v17 = vld [vmem:[%s11739_s1 + $0x1010] ss:$12 sps:$4 sm:$0xff]  }
 0x206   :  { %5516 = vmatprep.mubr.bf16.mxu0 %v11102_v7  ;;  %v7468_v42 = vpop.f32.mrb[45].mxu1 }
 0x207   :  { %v7469_v47 = vadd.f32 %v7468_v42, %v7467_v32  ;;  %v7470_v37 = vpop.f32.mrb[46].mxu1  ;;  %7714 = vmatpush3.bf16.msra.mxu1 %v8813_v34  ;;  %v8846_v34 = vld [vmem:[%s11739_s1 + $0x1144] ss:$12 sps:$4 sm:$0xff]   ;;  %v8851_v42 = vld [vmem:[%s11739_s1 + $0x115c] ss:$12 sps:$4 sm:$0xff]  }
 0x208   :  { %5540 = vmatpush1.bf16.msra.mxu0 %v8809_v35  ;;  %v7471_v49 = vpop.f32.mrb[47].mxu1  ;;  %7715 = vmatprep.subr.bf16.mxu1 %v8817_v41  ;;  %v8844_v41 = vld [vmem:[%s11739_s1 + $0x1140] ss:$12 sps:$4 sm:$0xff]  }
 0x209   :  { %5541 = vmatprep.subr.bf16.mxu0 %v8816_v63  ;;  %v11130_v46 = vadd.f32 %v7469_v47, %v10994_v33  ;;  %v7472_v53 = vadd.f32 %v7471_v49, %v7470_v37  ;;  %v11146_v33 = vld [vmem:[%s11740_s0 + $0x204] ss:$108 sps:$4 sm:$0xff]   ;;  %v8852_v47 = vld [vmem:[%s11739_s1 + $0x1160] ss:$12 sps:$4 sm:$0xff]  }
 0x20a   :  { %6280 = vmatmul.mubr.bf16.gmra.mrb[124].mxu1 %v10827_v38  ;;  %v8826_v38 = vld [vmem:[%s11739_s1 + $0x10e4] ss:$12 sps:$4 sm:$0xff]  }
 0x20b   :  { %5517 = vmatmul.mubr.bf16.gmra.mrb[4].mxu0 %v11127_v50  ;;  %v11141_v55 = vadd.f32 %v7472_v53, %v11003_v36  ;;  %7716 = vmatpush3.bf16.msra.mxu1 %v8818_v56  ;;  %v8824_v36 = vld [vmem:[%s11739_s1 + $0x10e0] ss:$12 sps:$4 sm:$0xff]   ;;  %v8849_v49 = vld [vmem:[%s11739_s1 + $0x1158] ss:$12 sps:$4 sm:$0xff]  }
 0x20c   :  { %5542 = vmatpush1.bf16.msra.mxu0 %v8814_v12  ;;  %7717 = vmatprep.subr.bf16.mxu1 %v8822_v17  ;;  %v8853_v53 = vld [vmem:[%s11739_s1 + $0x10a0] ss:$12 sps:$4 sm:$0xff]  }
 0x20d   :  { %5543 = vmatprep.subr.bf16.mxu0 %v8821_v39  ;;  %6287 = vmatprep.mubr.bf16.mxu1 %v10842_v44  ;;  %v8832_v44 = vld [vmem:[%s11739_s1 + $0x1040] ss:$12 sps:$4 sm:$0xff]  }
 0x20e   :  { %5526 = vmatprep.mubr.bf16.mxu0 %v11146_v33 }
 0x20f   :  { %7718 = vmatpush3.bf16.msra.mxu1 %v8823_v52  ;;  %v8860_v52 = vld [vmem:[%s11739_s1 + $0x1178] ss:$12 sps:$4 sm:$0xff]  }
 0x210   :  { %5544 = vmatpush1.bf16.msra.mxu0 %v8819_v45  ;;  %7719 = vmatprep.subr.bf16.mxu1 %v8827_v59 }
 0x211   :  { %5545 = vmatprep.subr.bf16.mxu0 %v8826_v38 }
 0x212   :  { %6288 = vmatmul.mubr.bf16.gmra.mrb[128].mxu1 %v10877_v62  ;;  %v8837_v62 = vld [vmem:[%s11739_s1 + $0x1058] ss:$12 sps:$4 sm:$0xff]  }
 0x213   :  { %5527 = vmatmul.mubr.bf16.gmra.mrb[8].mxu0 %v11171_v0  ;;  %7720 = vmatpush3.bf16.msra.mxu1 %v8828_v10  ;;  %v8861_v10 = vld [vmem:[%s11739_s1 + $0x10b8] ss:$12 sps:$4 sm:$0xff]  }
 0x214   :  { %5546 = vmatpush1.bf16.msra.mxu0 %v8824_v36  ;;  %7721 = vmatprep.subr.bf16.mxu1 %v8832_v44  ;;  %v8856_v36 = vld [vmem:[%s11739_s1 + $0x1170] ss:$12 sps:$4 sm:$0xff]  }
 0x215   :  { %5547 = vmatprep.subr.bf16.mxu0 %v8831_v61  ;;  %v7489_v18 = vpop.f32.mrb[48].mxu1  ;;  %6328 = vmatprep.mubr.bf16.mxu1 %v10890_v6  ;;  %v8841_v6 = vld [vmem:[%s11739_s1 + $0x112c] ss:$12 sps:$4 sm:$0xff]   ;;  %v8865_v44 = vld [vmem:[%s11739_s1 + $0x1190] ss:$12 sps:$4 sm:$0xff]  }
 0x216   :  { %5569 = vmatprep.mubr.bf16.mxu0 %v11176_v1  ;;  %v7490_v14 = vpop.f32.mrb[49].mxu1 }
 0x217   :  { %v7491_v43 = vadd.f32 %v7490_v14, %v7489_v18  ;;  %v7492_v22 = vpop.f32.mrb[50].mxu1  ;;  %7722 = vmatpush3.bf16.msra.mxu1 %v8833_v16  ;;  %v8866_v18 = vld [vmem:[%s11739_s1 + $0x10d0] ss:$12 sps:$4 sm:$0xff]   ;;  %v8874_v14 = vld [vmem:[%s11739_s1 + $0x10e8] ss:$12 sps:$4 sm:$0xff]  }
 0x218   :  { %5548 = vmatpush1.bf16.msra.mxu0 %v8829_v48  ;;  %v7493_v28 = vpop.f32.mrb[51].mxu1  ;;  %7723 = vmatprep.subr.bf16.mxu1 %v8837_v62  ;;  %v8862_v62 = vld [vmem:[%s11739_s1 + $0x1188] ss:$12 sps:$4 sm:$0xff]  }
 0x219   :  { %5549 = vmatprep.subr.bf16.mxu0 %v8836_v11  ;;  %v11207_v40 = vadd.f32 %v7491_v43, %v11051_v9  ;;  %v7494_v24 = vadd.f32 %v7493_v28, %v7492_v22  ;;  %v8847_v9 = vld [vmem:[%s11739_s1 + $0x1148] ss:$12 sps:$4 sm:$0xff]   ;;  %v8875_v43 = vld [vmem:[%s11739_s1 + $0x11b8] ss:$12 sps:$4 sm:$0xff]   ;;  %v8879_v22 = vld [vmem:[%s11739_s1 + $0x1100] ss:$12 sps:$4 sm:$0xff]  }
 0x21b   :  { %v11216_v35 = vadd.f32 %v7494_v24, %v11060_v13  ;;  %7724 = vmatpush3.bf16.msra.mxu1 %v8838_v25  ;;  %v8848_v13 = vld [vmem:[%s11739_s1 + $0x1088] ss:$12 sps:$4 sm:$0xff]  }
 0x21c   :  { %5550 = vmatpush1.bf16.msra.mxu0 %v8834_v21  ;;  %7725 = vmatprep.subr.bf16.mxu1 %v8842_v29  ;;  %v8877_v21 = vld [vmem:[%s11739_s1 + $0x11bc] ss:$12 sps:$4 sm:$0xff]   ;;  %v8882_v25 = vld [vmem:[%s11739_s1 + $0x11d4] ss:$12 sps:$4 sm:$0xff]  }
 0x21d   :  { %5551 = vmatprep.subr.bf16.mxu0 %v8841_v6  ;;  %v7495_v63 = vpop.f32.mrb[52].mxu1 }
 0x21e   :  { %v7496_v32 = vpop.f32.mrb[53].mxu1 }
 0x21f   :  { %v7497_v12 = vadd.f32 %v7496_v32, %v7495_v63  ;;  %v7498_v56 = vpop.f32.mrb[54].mxu1  ;;  %7726 = vmatpush3.bf16.msra.mxu1 %v8843_v31  ;;  %v8884_v31 = vld [vmem:[%s11739_s1 + $0x1118] ss:$12 sps:$4 sm:$0xff]  }
 0x220   :  { %5552 = vmatpush1.bf16.msra.mxu0 %v8839_v51  ;;  %v7499_v37 = vpop.f32.mrb[55].mxu1  ;;  %7745 = vmatprep.subr.bf16.mxu1 %v8847_v9  ;;  %v8880_v51 = vld [vmem:[%s11739_s1 + $0x11d0] ss:$12 sps:$4 sm:$0xff]  }
 0x221   :  { %5553 = vmatprep.subr.bf16.mxu0 %v8846_v34  ;;  %v11237_v39 = vadd.f32 %v7497_v12, %v11086_v30  ;;  %v7500_v17 = vadd.f32 %v7499_v37, %v7498_v56  ;;  %v8858_v30 = vld [vmem:[%s11739_s1 + $0x1174] ss:$12 sps:$4 sm:$0xff]   ;;  %v8888_v9 = vld [vmem:[%s11739_s1 + $0x11f0] ss:$12 sps:$4 sm:$0xff]  }
 0x222   :  { %6329 = vmatmul.mubr.bf16.vlgmr.msra.gmra.mrb[132].mxu1 %v11068_v27  ;;  %v8889_v12 = vld [vmem:[%s11739_s1 + $0x1130] ss:$12 sps:$4 sm:$0xff]  }
 0x223   :  { %v11247_v45 = vadd.f32 %v7500_v17, %v11097_v3  ;;  %7746 = vmatpush3.bf16.msra.mxu1 %v8848_v13  ;;  %6336 = vmatprep.mubr.bf16.mxu1 %v11102_v7  ;;  %v8864_v7 = vld [vmem:[%s11739_s1 + $0x118c] ss:$12 sps:$4 sm:$0xff]   ;;  %v8885_v13 = vld [vmem:[%s11739_s1 + $0x11e8] ss:$12 sps:$4 sm:$0xff]  }
 0x224   :  { %5554 = vmatpush1.bf16.msra.mxu0 %v8844_v41  ;;  %7747 = vmatprep.subr.bf16.mxu1 %v8852_v47  ;;  %v8890_v47 = vld [vmem:[%s11740_s0 + $0x58] ss:$108 sps:$4 sm:$0xff]  }
 0x225   :  { %5555 = vmatprep.subr.bf16.mxu0 %v8851_v42  ;;  %v7501_v27 = vpop.f32.mrb[56].mxu1 }
 0x226   :  { %v7502_v38 = vpop.f32.mrb[57].mxu1 }
 0x227   :  { %v7503_v59 = vadd.f32 %v7502_v38, %v7501_v27  ;;  %v7504_v3 = vpop.f32.mrb[58].mxu1  ;;  %7748 = vmatpush3.bf16.msra.mxu1 %v8853_v53  ;;  %v8897_v53 = vld [vmem:[%s11739_s1 + $0x1208] ss:$12 sps:$4 sm:$0xff]   ;;  %v8901_v27 = vld [vmem:[%s11739_s1 + $0x12e0] ss:$12 sps:$4 sm:$0xff]  }
 0x228   :  { %5556 = vmatpush1.bf16.msra.mxu0 %v8849_v49  ;;  %v7505_v61 = vpop.f32.mrb[59].mxu1  ;;  %7749 = vmatprep.subr.bf16.mxu1 %v8860_v52  ;;  %v8893_v49 = vld [vmem:[%s11739_s1 + $0x1200] ss:$12 sps:$4 sm:$0xff]   ;;  %v8900_v52 = vld [vmem:[%s11739_s1 + $0x121c] ss:$12 sps:$4 sm:$0xff]  }
 0x229   :  { %5557 = vmatprep.subr.bf16.mxu0 %v8858_v30  ;;  %v11269_v48 = vadd.f32 %v7503_v59, %v11130_v46  ;;  %v7506_v16 = vadd.f32 %v7505_v61, %v7504_v3  ;;  %v8871_v46 = vld [vmem:[%s11739_s1 + $0x11a4] ss:$12 sps:$4 sm:$0xff]   ;;  %v8903_v3 = vld [vmem:[%s11740_s0 + $0x134] ss:$108 sps:$4 sm:$0xff]  }
 0x22a   :  { %6337 = vmatmul.mubr.bf16.gmra.mrb[136].mxu1 %v11127_v50  ;;  %v8873_v50 = vld [vmem:[%s11739_s1 + $0x11a8] ss:$12 sps:$4 sm:$0xff]  }
 0x22b   :  { %v11273_v11 = vadd.f32 %v7506_v16, %v11141_v55  ;;  %7750 = vmatpush3.bf16.msra.mxu1 %v8861_v10  ;;  %6344 = vmatprep.mubr.bf16.mxu1 %v11146_v33  ;;  %v8869_v55 = vld [vmem:[%s11739_s1 + $0x11a0] ss:$12 sps:$4 sm:$0xff]   ;;  %v8898_v10 = vld [vmem:[%s11739_s1 + $0x1218] ss:$12 sps:$4 sm:$0xff]   ;;  %v8908_v16 = vld [vmem:[%s11740_s0 + $0x130] ss:$108 sps:$4 sm:$0xff]  }
 0x22c   :  { %5558 = vmatpush1.bf16.msra.mxu0 %v8856_v36  ;;  %7751 = vmatprep.subr.bf16.mxu1 %v8865_v44  ;;  %v8878_v33 = vld [vmem:[%s11739_s1 + $0x11c0] ss:$12 sps:$4 sm:$0xff]  }
 0x22d   :  { %5559 = vmatprep.subr.bf16.mxu0 %v8864_v7  ;;  %v8907_v61 = vld [vmem:[%s11739_s1 + $0x1234] ss:$12 sps:$4 sm:$0xff]  }
 0x22f   :  { %7752 = vmatpush3.bf16.msra.mxu1 %v8866_v18 }
 0x230   :  { %5560 = vmatpush1.bf16.msra.mxu0 %v8862_v62  ;;  %7753 = vmatprep.subr.bf16.mxu1 %v8873_v50  ;;  %v8910_v50 = vld [vmem:[%s11739_s1 + $0x1238] ss:$12 sps:$4 sm:$0xff]  }
 0x231   :  { %5561 = vmatprep.subr.bf16.mxu0 %v8871_v46  ;;  %v8905_v46 = vld [vmem:[%s11739_s1 + $0x1230] ss:$12 sps:$4 sm:$0xff]  }
 0x232   :  { %6345 = vmatmul.mubr.bf16.gmra.mrb[140].mxu1 %v11171_v0  ;;  %v8883_v0 = vld [vmem:[%s11739_s1 + $0x11d8] ss:$12 sps:$4 sm:$0xff]  }
 0x233   :  { %7754 = vmatpush3.bf16.msra.mxu1 %v8874_v14  ;;  %6385 = vmatprep.mubr.bf16.mxu1 %v11176_v1  ;;  %v8887_v1 = vld [vmem:[%s11739_s1 + $0x11ec] ss:$12 sps:$4 sm:$0xff]  }
 0x234   :  { %5562 = vmatpush1.bf16.msra.mxu0 %v8869_v55  ;;  %7755 = vmatprep.subr.bf16.mxu1 %v8878_v33  ;;  %v8913_v14 = vld [vmem:[%s11739_s1 + $0x124c] ss:$12 sps:$4 sm:$0xff]  }
 0x235   :  { %5563 = vmatprep.subr.bf16.mxu0 %v8877_v21  ;;  %v7523_v28 = vpop.f32.mrb[60].mxu1  ;;  %v8914_v21 = vld [vmem:[%s11739_s1 + $0x1310] ss:$12 sps:$4 sm:$0xff]  }
 0x236   :  { %v7524_v6 = vpop.f32.mrb[61].mxu1 }
 0x237   :  { %v7525_v29 = vadd.f32 %v7524_v6, %v7523_v28  ;;  %v7526_v24 = vpop.f32.mrb[62].mxu1  ;;  %7756 = vmatpush3.bf16.msra.mxu1 %v8879_v22  ;;  %v8916_v22 = vld [vmem:[%s11740_s0 + $0x20c] ss:$108 sps:$4 sm:$0xff]   ;;  %v8920_v28 = vld [vmem:[%s11739_s1 + $0x1264] ss:$12 sps:$4 sm:$0xff]  }
 0x238   :  { %5564 = vmatpush1.bf16.msra.mxu0 %v8875_v43  ;;  %v7527_v34 = vpop.f32.mrb[63].mxu1  ;;  %7757 = vmatprep.subr.bf16.mxu1 %v8883_v0  ;;  %v8911_v0 = vld [vmem:[%s11739_s1 + $0x1248] ss:$12 sps:$4 sm:$0xff]  }
 0x239   :  { %5565 = vmatprep.subr.bf16.mxu0 %v8882_v25  ;;  %v11327_v63 = vadd.f32 %v7525_v29, %v11207_v40  ;;  %v7528_v41 = vadd.f32 %v7527_v34, %v7526_v24  ;;  %v8895_v40 = vld [vmem:[%s11739_s1 + $0x1204] ss:$12 sps:$4 sm:$0xff]   ;;  %v8921_v6 = vld [vmem:[%s11740_s0 + $0x208] ss:$108 sps:$4 sm:$0xff]   ;;  %v8918_v29 = vld [vmem:[%s11739_s1 + $0x1260] ss:$12 sps:$4 sm:$0xff]  }
 0x23a   :  { %v8923_v24 = vld [vmem:[%s11739_s1 + $0x1268] ss:$12 sps:$4 sm:$0xff]   ;;  %v8941_v34 = vld [vmem:[%s11740_s0 + $0x64] ss:$108 sps:$4 sm:$0xff]  }
 0x23b   :  { %v11330_v32 = vadd.f32 %v7528_v41, %v11216_v35  ;;  %7758 = vmatpush3.bf16.msra.mxu1 %v8884_v31  ;;  %v8896_v35 = vld [vmem:[%s11739_s1 + $0x12c8] ss:$12 sps:$4 sm:$0xff]   ;;  %v8927_v31 = vld [vmem:[%s11739_s1 + $0x1340] ss:$12 sps:$4 sm:$0xff]  }
 0x23c   :  { %5566 = vmatpush1.bf16.msra.mxu0 %v8880_v51  ;;  %7759 = vmatprep.subr.bf16.mxu1 %v8888_v9  ;;  %v8926_v51 = vld [vmem:[%s11739_s1 + $0x127c] ss:$12 sps:$4 sm:$0xff]   ;;  %v8928_v9 = vld [vmem:[%s11739_s1 + $0x1280] ss:$12 sps:$4 sm:$0xff]  }
 0x23d   :  { %5567 = vmatprep.subr.bf16.mxu0 %v8887_v1  ;;  %v7529_v56 = vpop.f32.mrb[64].mxu1  ;;  %v8924_v1 = vld [vmem:[%s11739_s1 + $0x1278] ss:$12 sps:$4 sm:$0xff]   ;;  %v8931_v41 = vld [vmem:[%s11739_s1 + $0x1294] ss:$12 sps:$4 sm:$0xff]  }
 0x23e   :  { %v7530_v42 = vpop.f32.mrb[65].mxu1 }
 0x23f   :  { %v7531_v37 = vadd.f32 %v7530_v42, %v7529_v56  ;;  %v7532_v17 = vpop.f32.mrb[66].mxu1  ;;  %7760 = vmatpush3.bf16.msra.mxu1 %v8889_v12  ;;  %v8929_v42 = vld [vmem:[%s11739_s1 + $0x1290] ss:$12 sps:$4 sm:$0xff]  }
 0x240   :  { %5568 = vmatpush1.bf16.msra.mxu0 %v8885_v13  ;;  %v7533_v30 = vpop.f32.mrb[67].mxu1  ;;  %7779 = vmatprep.subr.bf16.mxu1 %v8896_v35  ;;  %v8932_v13 = vld [vmem:[%s11739_s1 + $0x1358] ss:$12 sps:$4 sm:$0xff]  }
 0x241   :  { %5600 = vmatprep.subr.bf16.mxu0 %v8895_v40  ;;  %v11360_v38 = vadd.f32 %v7531_v37, %v11237_v39  ;;  %v7534_v59 = vadd.f32 %v7533_v30, %v7532_v17  ;;  %v8902_v39 = vld [vmem:[%s11739_s1 + $0x1220] ss:$12 sps:$4 sm:$0xff]  }
 0x242   :  { %6386 = vmatmul.mubr.bf16.vlgmr.msra.gmra.mrb[144].mxu1 %v8890_v47  ;;  %v8936_v17 = vld [vmem:[%s11739_s1 + $0x12ac] ss:$12 sps:$4 sm:$0xff]  }
 0x243   :  { %5570 = vmatmul.mubr.bf16.vlgmr.msra.gmra.mrb[0].mxu0 %v8890_v47  ;;  %v11366_v36 = vadd.f32 %v7534_v59, %v11247_v45  ;;  %7780 = vmatpush3.bf16.msra.mxu1 %v8897_v53  ;;  %v8909_v45 = vld [vmem:[%s11739_s1 + $0x12f8] ss:$12 sps:$4 sm:$0xff]   ;;  %v8938_v59 = vld [vmem:[%s11739_s1 + $0x12b0] ss:$12 sps:$4 sm:$0xff]  }
 0x244   :  { %5601 = vmatpush1.bf16.msra.mxu0 %v8893_v49  ;;  %7781 = vmatprep.subr.bf16.mxu1 %v8901_v27  ;;  %v8933_v47 = vld [vmem:[%s11739_s1 + $0x1298] ss:$12 sps:$4 sm:$0xff]   ;;  %v8937_v49 = vld [vmem:[%s11739_s1 + $0x1370] ss:$12 sps:$4 sm:$0xff]   ;;  %v8934_v27 = vld [vmem:[%s11739_s1 + $0x12a8] ss:$12 sps:$4 sm:$0xff]  }
 0x245   :  { %5602 = vmatprep.subr.bf16.mxu0 %v8900_v52  ;;  %v7535_v7 = vpop.f32.mrb[68].mxu1  ;;  %6393 = vmatprep.mubr.bf16.mxu1 %v8903_v3 }
 0x246   :  { %5579 = vmatprep.mubr.bf16.mxu0 %v8903_v3  ;;  %v7536_v44 = vpop.f32.mrb[69].mxu1 }
 0x247   :  { %v7537_v62 = vadd.f32 %v7536_v44, %v7535_v7  ;;  %v7538_v18 = vpop.f32.mrb[70].mxu1  ;;  %7782 = vmatpush3.bf16.msra.mxu1 %v8902_v39  ;;  %v8945_v7 = vld [vmem:[%s11739_s1 + $0x1388] ss:$12 sps:$4 sm:$0xff]  }
 0x248   :  { %5603 = vmatpush1.bf16.msra.mxu0 %v8898_v10  ;;  %v7539_v55 = vpop.f32.mrb[71].mxu1  ;;  %7783 = vmatprep.subr.bf16.mxu1 %v8909_v45  ;;  %v8942_v45 = vld [vmem:[%s11739_s1 + $0x12c0] ss:$12 sps:$4 sm:$0xff]  }
 0x249   :  { %5604 = vmatprep.subr.bf16.mxu0 %v8907_v61  ;;  %v11396_v33 = vadd.f32 %v7537_v62, %v11269_v48  ;;  %v7540_v43 = vadd.f32 %v7539_v55, %v7538_v18  ;;  %v8915_v48 = vld [vmem:[%s11739_s1 + $0x1250] ss:$12 sps:$4 sm:$0xff]  }
 0x24a   :  { %6394 = vmatmul.mubr.bf16.gmra.mrb[148].mxu1 %v8908_v16  ;;  %v8948_v62 = vld [vmem:[%s11739_s1 + $0x12dc] ss:$12 sps:$4 sm:$0xff]  }
 0x24b   :  { %5580 = vmatmul.mubr.bf16.gmra.mrb[4].mxu0 %v8908_v16  ;;  %v11402_v25 = vadd.f32 %v7540_v43, %v11273_v11  ;;  %7784 = vmatpush3.bf16.msra.mxu1 %v8910_v50  ;;  %v8922_v11 = vld [vmem:[%s11739_s1 + $0x1328] ss:$12 sps:$4 sm:$0xff]   ;;  %v9052_v16 = vmov 0.0  }
 0x24c   :  { %5605 = vmatpush1.bf16.msra.mxu0 %v8905_v46  ;;  %7785 = vmatprep.subr.bf16.mxu1 %v8914_v21  ;;  %v11494_v50 = vld [vmem:[%s11740_s0 + $0x13c] ss:$108 sps:$4 sm:$0xff]   ;;  %v8954_v21 = vld [vmem:[%s11739_s1 + $0x12f4] ss:$12 sps:$4 sm:$0xff]  }
 0x24d   :  { %5606 = vmatprep.subr.bf16.mxu0 %v8913_v14  ;;  %6401 = vmatprep.mubr.bf16.mxu1 %v8916_v22  ;;  %v8946_v14 = vld [vmem:[%s11739_s1 + $0x12d8] ss:$12 sps:$4 sm:$0xff]  }
 0x24e   :  { %5589 = vmatprep.mubr.bf16.mxu0 %v8916_v22  ;;  %v11514_v22 = vld [vmem:[%s11740_s0 + $0x138] ss:$108 sps:$4 sm:$0xff]  }
 0x24f   :  { %7786 = vmatpush3.bf16.msra.mxu1 %v8915_v48 }
 0x250   :  { %5607 = vmatpush1.bf16.msra.mxu0 %v8911_v0  ;;  %7787 = vmatprep.subr.bf16.mxu1 %v8922_v11  ;;  %v8956_v11 = vld [vmem:[%s11739_s1 + $0x13b8] ss:$12 sps:$4 sm:$0xff]  }
 0x251   :  { %5608 = vmatprep.subr.bf16.mxu0 %v8920_v28  ;;  %v8952_v28 = vld [vmem:[%s11739_s1 + $0x12f0] ss:$12 sps:$4 sm:$0xff]  }
 0x252   :  { %6402 = vmatmul.mubr.bf16.gmra.mrb[152].mxu1 %v8921_v6 }
 0x253   :  { %5590 = vmatmul.mubr.bf16.gmra.mrb[8].mxu0 %v8921_v6  ;;  %7788 = vmatpush3.bf16.msra.mxu1 %v8923_v24 }
 0x254   :  { %5609 = vmatpush1.bf16.msra.mxu0 %v8918_v29  ;;  %7789 = vmatprep.subr.bf16.mxu1 %v8927_v31  ;;  %v8959_v29 = vld [vmem:[%s11739_s1 + $0x130c] ss:$12 sps:$4 sm:$0xff]   ;;  %v11532_v31 = vld [vmem:[%s11740_s0 + $0x214] ss:$108 sps:$4 sm:$0xff]  }
 0x255   :  { %5610 = vmatprep.subr.bf16.mxu0 %v8926_v51  ;;  %v7557_v12 = vpop.f32.mrb[72].mxu1  ;;  %6442 = vmatprep.mubr.bf16.mxu1 %v8941_v34 }
 0x256   :  { %5632 = vmatprep.mubr.bf16.mxu0 %v8941_v34  ;;  %v7558_v40 = vpop.f32.mrb[73].mxu1 }
 0x257   :  { %v7559_v35 = vadd.f32 %v7558_v40, %v7557_v12  ;;  %v7560_v56 = vpop.f32.mrb[74].mxu1  ;;  %7790 = vmatpush3.bf16.msra.mxu1 %v8928_v9  ;;  %v8965_v9 = vld [vmem:[%s11739_s1 + $0x1324] ss:$12 sps:$4 sm:$0xff]   ;;  %v8970_v12 = vld [vmem:[%s11739_s1 + $0x133c] ss:$12 sps:$4 sm:$0xff]  }
 0x258   :  { %5611 = vmatpush1.bf16.msra.mxu0 %v8924_v1  ;;  %v7561_v37 = vpop.f32.mrb[75].mxu1  ;;  %7791 = vmatprep.subr.bf16.mxu1 %v8932_v13  ;;  %v8957_v1 = vld [vmem:[%s11739_s1 + $0x1308] ss:$12 sps:$4 sm:$0xff]   ;;  %v8968_v40 = vld [vmem:[%s11739_s1 + $0x1338] ss:$12 sps:$4 sm:$0xff]  }
 0x259   :  { %5612 = vmatprep.subr.bf16.mxu0 %v8931_v41  ;;  %v11459_v53 = vadd.f32 %v7559_v35, %v11327_v63  ;;  %v7562_v30 = vadd.f32 %v7561_v37, %v7560_v56  ;;  %v8944_v63 = vld [vmem:[%s11739_s1 + $0x12c4] ss:$12 sps:$4 sm:$0xff]   ;;  %v8963_v41 = vld [vmem:[%s11739_s1 + $0x1320] ss:$12 sps:$4 sm:$0xff]   ;;  %v8967_v13 = vld [vmem:[%s11739_s1 + $0x13e8] ss:$12 sps:$4 sm:$0xff]  }
 0x25a   :  { %v8971_v35 = vld [vmem:[%s11739_s1 + $0x1400] ss:$12 sps:$4 sm:$0xff]  }
 0x25b   :  { %v11462_v52 = vadd.f32 %v7562_v30, %v11330_v32  ;;  %7792 = vmatpush3.bf16.msra.mxu1 %v8933_v47  ;;  %v11476_v32 = vld [vmem:[%s11740_s0 + $0x60] ss:$108 sps:$4 sm:$0xff]   ;;  %v8975_v30 = vld [vmem:[%s11739_s1 + $0x1418] ss:$12 sps:$4 sm:$0xff]  }
 0x25c   :  { %5613 = vmatpush1.bf16.msra.mxu0 %v8929_v42  ;;  %7793 = vmatprep.subr.bf16.mxu1 %v8937_v49  ;;  %v8974_v56 = vld [vmem:[%s11739_s1 + $0x1354] ss:$12 sps:$4 sm:$0xff]   ;;  %v8972_v49 = vld [vmem:[%s11739_s1 + $0x1350] ss:$12 sps:$4 sm:$0xff]  }
 0x25d   :  { %5614 = vmatprep.subr.bf16.mxu0 %v8936_v17  ;;  %v7563_v3 = vpop.f32.mrb[76].mxu1 }
 0x25e   :  { %v7564_v10 = vpop.f32.mrb[77].mxu1 }
 0x25f   :  { %v7565_v39 = vadd.f32 %v7564_v10, %v7563_v3  ;;  %v7566_v61 = vpop.f32.mrb[78].mxu1  ;;  %7794 = vmatpush3.bf16.msra.mxu1 %v8938_v59  ;;  %v8978_v59 = vld [vmem:[%s11739_s1 + $0x136c] ss:$12 sps:$4 sm:$0xff]  }
 0x260   :  { %5615 = vmatpush1.bf16.msra.mxu0 %v8934_v27  ;;  %v7567_v44 = vpop.f32.mrb[79].mxu1  ;;  %7824 = vmatprep.subr.bf16.mxu1 %v9052_v16 }
 0x261   :  { %5616 = vmatprep.subr.bf16.mxu0 %v8944_v63  ;;  %v11489_v18 = vadd.f32 %v7565_v39, %v11360_v38  ;;  %v7568_v46 = vadd.f32 %v7567_v44, %v7566_v61  ;;  %v8949_v38 = vld [vmem:[%s11739_s1 + $0x13a0] ss:$12 sps:$4 sm:$0xff]   ;;  %v8976_v39 = vld [vmem:[%s11739_s1 + $0x1368] ss:$12 sps:$4 sm:$0xff]   ;;  %v8979_v61 = vld [vmem:[%s11739_s1 + $0x1430] ss:$12 sps:$4 sm:$0xff]  }
 0x262   :  { %6443 = vmatmul.mubr.bf16.vlgmr.msra.gmra.mrb[156].mxu1 %v11476_v32 }
 0x263   :  { %v11498_v55 = vadd.f32 %v7568_v46, %v11366_v36  ;;  %7825 = vmatpush3.bf16.msra.mxu1 %v8945_v7  ;;  %6450 = vmatprep.mubr.bf16.mxu1 %v11494_v50  ;;  %v11606_v7 = vld [vmem:[%s11740_s0 + $0x68] ss:$108 sps:$4 sm:$0xff]   ;;  %v8980_v46 = vld [vmem:[%s11739_s1 + $0x1380] ss:$12 sps:$4 sm:$0xff]  }
 0x264   :  { %5617 = vmatpush1.bf16.msra.mxu0 %v8942_v45  ;;  %7826 = vmatprep.subr.bf16.mxu1 %v9052_v16 }
 0x265   :  { %5618 = vmatprep.subr.bf16.mxu0 %v8948_v62  ;;  %v7569_v43 = vpop.f32.mrb[80].mxu1 }
 0x266   :  { %v7570_v36 = vpop.f32.mrb[81].mxu1 }
 0x267   :  { %v7571_v0 = vadd.f32 %v7570_v36, %v7569_v43  ;;  %v7572_v48 = vpop.f32.mrb[82].mxu1  ;;  %7827 = vmatpush3.bf16.msra.mxu1 %v8949_v38  ;;  %v8986_v38 = vld [vmem:[%s11739_s1 + $0x139c] ss:$12 sps:$4 sm:$0xff]  }
 0x268   :  { %5619 = vmatpush1.bf16.msra.mxu0 %v8946_v14  ;;  %v7573_v6 = vpop.f32.mrb[83].mxu1  ;;  %7828 = vmatprep.subr.bf16.mxu1 %v9052_v16 }
 0x269   :  { %5620 = vmatprep.subr.bf16.mxu0 %v8954_v21  ;;  %v11527_v24 = vadd.f32 %v7571_v0, %v11396_v33  ;;  %v7574_v51 = vadd.f32 %v7573_v6, %v7572_v48  ;;  %v8960_v33 = vld [vmem:[%s11739_s1 + $0x13d0] ss:$12 sps:$4 sm:$0xff]   ;;  %v8984_v0 = vld [vmem:[%s11739_s1 + $0x1398] ss:$12 sps:$4 sm:$0xff]  }
 0x26a   :  { %6451 = vmatmul.mubr.bf16.gmra.mrb[160].mxu1 %v11514_v22  ;;  %v8987_v6 = vld [vmem:[%s11739_s1 + $0x13b0] ss:$12 sps:$4 sm:$0xff]  }
 0x26b   :  { %v11536_v34 = vadd.f32 %v7574_v51, %v11402_v25  ;;  %7829 = vmatpush3.bf16.msra.mxu1 %v8956_v11  ;;  %6458 = vmatprep.mubr.bf16.mxu1 %v11532_v31  ;;  %v11552_v25 = vld [vmem:[%s11740_s0 + $0x210] ss:$108 sps:$4 sm:$0xff]  }
 0x26c   :  { %5621 = vmatpush1.bf16.msra.mxu0 %v8952_v28  ;;  %7830 = vmatprep.subr.bf16.mxu1 %v9052_v16 }
 0x26d   :  { %5622 = vmatprep.subr.bf16.mxu0 %v8959_v29 }
 0x26f   :  { %7831 = vmatpush3.bf16.msra.mxu1 %v8960_v33 }
 0x270   :  { %5623 = vmatpush1.bf16.msra.mxu0 %v8957_v1  ;;  %7832 = vmatprep.subr.bf16.mxu1 %v9052_v16 }
 0x271   :  { %5624 = vmatprep.subr.bf16.mxu0 %v8965_v9  ;;  %v8991_v9 = vld [vmem:[%s11739_s1 + $0x13c8] ss:$12 sps:$4 sm:$0xff]  }
 0x272   :  { %6459 = vmatmul.mubr.bf16.gmra.mrb[164].mxu1 %v11552_v25 }
 0x273   :  { %7833 = vmatpush3.bf16.msra.mxu1 %v8967_v13  ;;  %7840 = vmatprep.mubr.msk.bf16.mxu1 %vm9053_vm0, %v9052_v16  ;;  %v9003_v13 = vld [vmem:[%s11739_s1 + $0x1414] ss:$12 sps:$4 sm:$0xff]  }
 0x274   :  { %5625 = vmatpush1.bf16.msra.mxu0 %v8963_v41  ;;  %7834 = vmatprep.subr.bf16.mxu1 %v9052_v16  ;;  %v9054_v41 = vmov 0  }
 0x275   :  { %5626 = vmatprep.subr.bf16.mxu0 %v8970_v12  ;;  %v7591_v42 = vpop.f32.mrb[84].mxu1 }
 0x276   :  { %v7592_v47 = vpop.f32.mrb[85].mxu1 }
 0x277   :  { %v7593_v37 = vadd.f32 %v7592_v47, %v7591_v42  ;;  %v7594_v17 = vpop.f32.mrb[86].mxu1  ;;  %7835 = vmatpush3.bf16.msra.mxu1 %v8971_v35  ;;  %v9006_v47 = vld [vmem:[%s11739_s1 + $0x142c] ss:$12 sps:$4 sm:$0xff]  }
 0x278   :  { %5627 = vmatpush1.bf16.msra.mxu0 %v8968_v40  ;;  %v7595_v27 = vpop.f32.mrb[87].mxu1  ;;  %7836 = vmatprep.subr.bf16.mxu1 %v9052_v16 }
 0x279   :  { %5628 = vmatprep.subr.bf16.mxu0 %v8974_v56  ;;  %v11588_v63 = vadd.f32 %v7593_v37, %v11459_v53  ;;  %v7596_v3 = vadd.f32 %v7595_v27, %v7594_v17  ;;  %v8982_v53 = vld [vmem:[%s11739_s1 + $0x1384] ss:$12 sps:$4 sm:$0xff]  }
 0x27b   :  { %v11591_v10 = vadd.f32 %v7596_v3, %v11462_v52  ;;  %7837 = vmatpush3.bf16.msra.mxu1 %v8975_v30  ;;  %v9004_v30 = vld [vmem:[%s11739_s1 + $0x1428] ss:$12 sps:$4 sm:$0xff]  }
 0x27c   :  { %5629 = vmatpush1.bf16.msra.mxu0 %v8972_v49  ;;  %7838 = vmatprep.subr.bf16.mxu1 %v9052_v16 }
 0x27d   :  { %5630 = vmatprep.subr.bf16.mxu0 %v8978_v59  ;;  %v7597_v45 = vpop.f32.mrb[88].mxu1 }
 0x27e   :  { %v7598_v52 = vpop.f32.mrb[89].mxu1 }
 0x27f   :  { %v7599_v44 = vadd.f32 %v7598_v52, %v7597_v45  ;;  %v7600_v62 = vpop.f32.mrb[90].mxu1  ;;  %7839 = vmatpush3.bf16.msra.mxu1 %v8979_v61 }
 0x280   :  { %5631 = vmatpush1.bf16.msra.mxu0 %v8976_v39  ;;  %v7601_v14 = vpop.f32.mrb[91].mxu1 }
 0x281   :  { %5663 = vmatprep.subr.bf16.mxu0 %v8982_v53  ;;  %v11615_v21 = vadd.f32 %v7599_v44, %v11489_v18  ;;  %v7602_v43 = vadd.f32 %v7601_v14, %v7600_v62  ;;  %v8989_v18 = vld [vmem:[%s11739_s1 + $0x13b4] ss:$12 sps:$4 sm:$0xff]  }
 0x282   :  { %7841 = vmatmul.mubr.bf16.vlgmr.msra.gmra.mrb[168].mxu1 %v11606_v7 }
 0x283   :  { %5633 = vmatmul.mubr.bf16.vlgmr.msra.gmra.mrb[0].mxu0 %v11476_v32  ;;  %v11620_v36 = vadd.f32 %v7602_v43, %v11498_v55  ;;  %7844 = vmatprep.mubr.msk.bf16.mxu1 %vm9053_vm0, %v9052_v16  ;;  %v11634_v55 = vld [vmem:[%s11740_s0 + $0x140] ss:$108 sps:$4 sm:$0xff]  }
 0x284   :  { %5664 = vmatpush1.bf16.msra.mxu0 %v8980_v46  ;;  %5642 = vmatprep.mubr.bf16.mxu0 %v11494_v50  ;;  %v8993_v50 = vld [vmem:[%s11739_s1 + $0x13cc] ss:$12 sps:$4 sm:$0xff]  }
 0x285   :  { %5665 = vmatprep.subr.bf16.mxu0 %v8986_v38  ;;  %v7603_v48 = vpop.f32.mrb[92].mxu1 }
 0x286   :  { %v7604_v32 = vpop.f32.mrb[93].mxu1 }
 0x287   :  { %v7605_v28 = vadd.f32 %v7604_v32, %v7603_v48  ;;  %v7606_v11 = vpop.f32.mrb[94].mxu1 }
 0x288   :  { %5666 = vmatpush1.bf16.msra.mxu0 %v8984_v0  ;;  %v7607_v29 = vpop.f32.mrb[95].mxu1 }
 0x289   :  { %5667 = vmatprep.subr.bf16.mxu0 %v8989_v18  ;;  %v6119_v51 = vadd.f32 %v7605_v28, %v11527_v24  ;;  %v7608_v1 = vadd.f32 %v7607_v29, %v7606_v11  ;;  %v8996_v24 = vld [vmem:[%s11739_s1 + $0x13e4] ss:$12 sps:$4 sm:$0xff]  }
 0x28a   :  { %7845 = vmatmul.mubr.bf16.gmra.mrb[172].mxu1 %v11634_v55 }
 0x28b   :  { %5643 = vmatmul.mubr.bf16.gmra.mrb[4].mxu0 %v11514_v22  ;;  %v6122_v33 = vadd.f32 %v7608_v1, %v11536_v34  ;;  %7848 = vmatprep.mubr.msk.bf16.mxu1 %vm9053_vm0, %v9052_v16  ;;  %v8997_v22 = vld [vmem:[%s11740_s0 + $0x218] ss:$108 sps:$4 sm:$0xff]   ;;  %v8994_v34 = vld [vmem:[%s11739_s1 + $0x13e0] ss:$12 sps:$4 sm:$0xff]   ;;  %v9000_v16 = vld [vmem:[%s11739_s1 + $0x13fc] ss:$12 sps:$4 sm:$0xff]  }
 0x28c   :  { %5668 = vmatpush1.bf16.msra.mxu0 %v8987_v6  ;;  %5652 = vmatprep.mubr.bf16.mxu0 %v11532_v31  ;;  %v8998_v31 = vld [vmem:[%s11739_s1 + $0x13f8] ss:$12 sps:$4 sm:$0xff]  }
 0x28d   :  { %5669 = vmatprep.subr.bf16.mxu0 %v8993_v50 }
 0x290   :  { %5670 = vmatpush1.bf16.msra.mxu0 %v8991_v9 }
 0x291   :  { %5671 = vmatprep.subr.bf16.mxu0 %v8996_v24 }
 0x292   :  { %7849 = vmatmul.mubr.bf16.gmra.mrb[176].mxu1 %v8997_v22 }
 0x293   :  { %5653 = vmatmul.mubr.bf16.gmra.mrb[8].mxu0 %v11552_v25  ;;  %v9001_v25 = vld [vmem:[%s11739_s1 + $0x1410] ss:$12 sps:$4 sm:$0xff]  }
 0x294   :  { %5672 = vmatpush1.bf16.msra.mxu0 %v8994_v34  ;;  %5695 = vmatprep.mubr.bf16.mxu0 %v9054_v41 }
 0x295   :  { %5673 = vmatprep.subr.bf16.mxu0 %v9000_v16  ;;  %v7625_v12 = vpop.f32.mrb[96].mxu1 }
 0x296   :  { %v7626_v40 = vpop.f32.mrb[97].mxu1 }
 0x297   :  { %v7627_v35 = vadd.f32 %v7626_v40, %v7625_v12  ;;  %v7628_v56 = vpop.f32.mrb[98].mxu1 }
 0x298   :  { %5674 = vmatpush1.bf16.msra.mxu0 %v8998_v31  ;;  %v7629_v42 = vpop.f32.mrb[99].mxu1 }
 0x299   :  { %5675 = vmatprep.subr.bf16.mxu0 %v9003_v13  ;;  %v6160_v37 = vadd.f32 %v7627_v35, %v11588_v63  ;;  %v7630_v17 = vadd.f32 %v7629_v42, %v7628_v56 }
 0x29b   :  { %v6163_v49 = vadd.f32 %v7630_v17, %v11591_v10 }
 0x29c   :  { %5676 = vmatpush1.bf16.msra.mxu0 %v9001_v25 }
 0x29d   :  { %5677 = vmatprep.subr.bf16.mxu0 %v9006_v47  ;;  %v7631_v27 = vpop.f32.mrb[100].mxu1 }
 0x29e   :  { %v7632_v59 = vpop.f32.mrb[101].mxu1 }
 0x29f   :  { %v7633_v3 = vadd.f32 %v7632_v59, %v7631_v27  ;;  %v7634_v39 = vpop.f32.mrb[102].mxu1 }
 0x2a0   :  { %5678 = vmatpush1.bf16.msra.mxu0 %v9004_v30  ;;  %v7635_v61 = vpop.f32.mrb[103].mxu1 }
 0x2a1   :  { %v6168_v53 = vadd.f32 %v7633_v3, %v11615_v21  ;;  %v7636_v45 = vadd.f32 %v7635_v61, %v7634_v39 }
 0x2a3   :  { %5696 = vmatmul.mubr.bf16.vlgmr.msra.gmra.mrb[0].mxu0 %v11606_v7  ;;  %v6171_v63 = vadd.f32 %v7636_v45, %v11620_v36 }
 0x2a4   :  { %5705 = vmatprep.mubr.bf16.mxu0 %v9054_v41 }
 0x2a5   :  { %v7637_v10 = vpop.f32.mrb[104].mxu1 }
 0x2a6   :  { %v7638_v52 = vpop.f32.mrb[105].mxu1 }
 0x2a7   :  { %v7639_v44 = vadd.f32 %v7638_v52, %v7637_v10  ;;  %v7640_v62 = vpop.f32.mrb[106].mxu1 }
 0x2a8   :  { %v7641_v46 = vpop.f32.mrb[107].mxu1 }
 0x2a9   :  { %v6176_v14 = vadd.f32 %v7639_v44, %v6119_v51  ;;  %v7642_v38 = vadd.f32 %v7641_v46, %v7640_v62 }
 0x2ab   :  { %5706 = vmatmul.mubr.bf16.gmra.mrb[4].mxu0 %v11634_v55  ;;  %v6179_v43 = vadd.f32 %v7642_v38, %v6122_v33 }
 0x2ac   :  { %5715 = vmatprep.mubr.bf16.mxu0 %v9054_v41 }
 0x2b3   :  { %5716 = vmatmul.mubr.bf16.gmra.mrb[8].mxu0 %v8997_v22 }
 0x2b5   :  { %v7659_v0 = vpop.f32.mrb[108].mxu1 }
 0x2b6   :  { %v7660_v21 = vpop.f32.mrb[109].mxu1 }
 0x2b7   :  { %v7661_v18 = vadd.f32 %v7660_v21, %v7659_v0  ;;  %v7662_v48 = vpop.f32.mrb[110].mxu1 }
 0x2b8   :  { %v7663_v7 = vpop.f32.mrb[111].mxu1 }
 0x2b9   :  { %v6217_v32 = vadd.f32 %v7661_v18, %v6160_v37  ;;  %v7664_v36 = vadd.f32 %v7663_v7, %v7662_v48 }
 0x2bb   :  { %v6220_v28 = vadd.f32 %v7664_v36, %v6163_v49 }
 0x2bd   :  { %v7665_v11 = vpop.f32.mrb[112].mxu1 }
 0x2be   :  { %v7666_v6 = vpop.f32.mrb[113].mxu1 }
 0x2bf   :  { %v7667_v29 = vadd.f32 %v7666_v6, %v7665_v11  ;;  %v7668_v50 = vpop.f32.mrb[114].mxu1 }
 0x2c0   :  { %v7669_v1 = vpop.f32.mrb[115].mxu1 }
 0x2c1   :  { %v6225_v51 = vadd.f32 %v7667_v29, %v6168_v53  ;;  %v7670_v9 = vadd.f32 %v7669_v1, %v7668_v50 }
 0x2c3   :  { %v6228_v24 = vadd.f32 %v7670_v9, %v6171_v63 }
 0x2c5   :  { %v7671_v55 = vpop.f32.mrb[116].mxu1 }
 0x2c6   :  { %v7672_v33 = vpop.f32.mrb[117].mxu1 }
 0x2c7   :  { %v7673_v34 = vadd.f32 %v7672_v33, %v7671_v55  ;;  %v7674_v22 = vpop.f32.mrb[118].mxu1 }
 0x2c8   :  { %v7675_v16 = vpop.f32.mrb[119].mxu1 }
 0x2c9   :  { %v6233_v31 = vadd.f32 %v7673_v34, %v6176_v14  ;;  %v7676_v41 = vadd.f32 %v7675_v16, %v7674_v22 }
 0x2cb   :  { %v6236_v13 = vadd.f32 %v7676_v41, %v6179_v43 }
 0x2d5   :  { %v7693_v12 = vpop.f32.mrb[120].mxu1 }
 0x2d6   :  { %v7694_v40 = vpop.f32.mrb[121].mxu1 }
 0x2d7   :  { %v7695_v35 = vadd.f32 %v7694_v40, %v7693_v12  ;;  %v7696_v56 = vpop.f32.mrb[122].mxu1 }
 0x2d8   :  { %v7697_v25 = vpop.f32.mrb[123].mxu1 }
 0x2d9   :  { %v6274_v42 = vadd.f32 %v7695_v35, %v6217_v32  ;;  %v7698_v47 = vadd.f32 %v7697_v25, %v7696_v56 }
 0x2db   :  { %v6277_v37 = vadd.f32 %v7698_v47, %v6220_v28 }
 0x2dd   :  { %v7699_v17 = vpop.f32.mrb[124].mxu1 }
 0x2de   :  { %v7700_v49 = vpop.f32.mrb[125].mxu1 }
 0x2df   :  { %v7701_v30 = vadd.f32 %v7700_v49, %v7699_v17  ;;  %v7702_v27 = vpop.f32.mrb[126].mxu1 }
 0x2e0   :  { %v7703_v59 = vpop.f32.mrb[127].mxu1 }
 0x2e1   :  { %v6282_v3 = vadd.f32 %v7701_v30, %v6225_v51  ;;  %v7704_v39 = vadd.f32 %v7703_v59, %v7702_v27 }
 0x2e3   :  { %v6285_v61 = vadd.f32 %v7704_v39, %v6228_v24 }
 0x2e5   :  { %v7705_v53 = vpop.f32.mrb[128].mxu1 }
 0x2e6   :  { %v7706_v45 = vpop.f32.mrb[129].mxu1 }
 0x2e7   :  { %v7707_v63 = vadd.f32 %v7706_v45, %v7705_v53  ;;  %v7708_v10 = vpop.f32.mrb[130].mxu1 }
 0x2e8   :  { %v7709_v52 = vpop.f32.mrb[131].mxu1 }
 0x2e9   :  { %v6290_v44 = vadd.f32 %v7707_v63, %v6233_v31  ;;  %v7710_v62 = vadd.f32 %v7709_v52, %v7708_v10 }
 0x2eb   :  { %v6293_v46 = vadd.f32 %v7710_v62, %v6236_v13 }
 0x2f5   :  { %v7727_v14 = vpop.f32.mrb[132].mxu1 }
 0x2f6   :  { %v7728_v38 = vpop.f32.mrb[133].mxu1 }
 0x2f7   :  { %v7729_v43 = vadd.f32 %v7728_v38, %v7727_v14  ;;  %v7730_v0 = vpop.f32.mrb[134].mxu1 }
 0x2f8   :  { %v7731_v21 = vpop.f32.mrb[135].mxu1 }
 0x2f9   :  { %v6331_v18 = vadd.f32 %v7729_v43, %v6274_v42  ;;  %v7732_v48 = vadd.f32 %v7731_v21, %v7730_v0 }
 0x2fb   :  { %v6334_v7 = vadd.f32 %v7732_v48, %v6277_v37 }
 0x2fd   :  { %v7733_v32 = vpop.f32.mrb[136].mxu1 }
 0x2fe   :  { %v7734_v36 = vpop.f32.mrb[137].mxu1 }
 0x2ff   :  { %v7735_v28 = vadd.f32 %v7734_v36, %v7733_v32  ;;  %v7736_v11 = vpop.f32.mrb[138].mxu1 }
 0x300   :  { %v7737_v6 = vpop.f32.mrb[139].mxu1 }
 0x301   :  { %v6339_v29 = vadd.f32 %v7735_v28, %v6282_v3  ;;  %v7738_v50 = vadd.f32 %v7737_v6, %v7736_v11 }
 0x303   :  { %v6342_v1 = vadd.f32 %v7738_v50, %v6285_v61 }
 0x305   :  { %v7739_v51 = vpop.f32.mrb[140].mxu1 }
 0x306   :  { %v7740_v9 = vpop.f32.mrb[141].mxu1 }
 0x307   :  { %v7741_v24 = vadd.f32 %v7740_v9, %v7739_v51  ;;  %v7742_v55 = vpop.f32.mrb[142].mxu1 }
 0x308   :  { %v7743_v33 = vpop.f32.mrb[143].mxu1 }
 0x309   :  { %v6347_v34 = vadd.f32 %v7741_v24, %v6290_v44  ;;  %v7744_v22 = vadd.f32 %v7743_v33, %v7742_v55 }
 0x30b   :  { %v6350_v16 = vadd.f32 %v7744_v22, %v6293_v46 }
 0x315   :  { %v7761_v31 = vpop.f32.mrb[144].mxu1 }
 0x316   :  { %v7762_v41 = vpop.f32.mrb[145].mxu1 }
 0x317   :  { %v7763_v13 = vadd.f32 %v7762_v41, %v7761_v31  ;;  %v7764_v12 = vpop.f32.mrb[146].mxu1 }
 0x318   :  { %v7765_v40 = vpop.f32.mrb[147].mxu1 }
 0x319   :  { %v6388_v35 = vadd.f32 %v7763_v13, %v6331_v18  ;;  %v7766_v56 = vadd.f32 %v7765_v40, %v7764_v12 }
 0x31b   :  { %v6391_v25 = vadd.f32 %v7766_v56, %v6334_v7 }
 0x31d   :  { %v7767_v42 = vpop.f32.mrb[148].mxu1 }
 0x31e   :  { %v7768_v47 = vpop.f32.mrb[149].mxu1 }
 0x31f   :  { %v7769_v37 = vadd.f32 %v7768_v47, %v7767_v42  ;;  %v7770_v17 = vpop.f32.mrb[150].mxu1 }
 0x320   :  { %v7771_v49 = vpop.f32.mrb[151].mxu1 }
 0x321   :  { %v6396_v30 = vadd.f32 %v7769_v37, %v6339_v29  ;;  %v7772_v27 = vadd.f32 %v7771_v49, %v7770_v17 }
 0x323   :  { %v6399_v59 = vadd.f32 %v7772_v27, %v6342_v1 }
 0x325   :  { %v7773_v3 = vpop.f32.mrb[152].mxu1 }
 0x326   :  { %v7774_v39 = vpop.f32.mrb[153].mxu1 }
 0x327   :  { %v7775_v61 = vadd.f32 %v7774_v39, %v7773_v3  ;;  %v7776_v53 = vpop.f32.mrb[154].mxu1 }
 0x328   :  { %v7777_v45 = vpop.f32.mrb[155].mxu1 }
 0x329   :  { %v6404_v63 = vadd.f32 %v7775_v61, %v6347_v34  ;;  %v7778_v10 = vadd.f32 %v7777_v45, %v7776_v53 }
 0x32b   :  { %v6407_v52 = vadd.f32 %v7778_v10, %v6350_v16 }
 0x335   :  { %v7795_v44 = vpop.f32.mrb[156].mxu1 }
 0x336   :  { %v7796_v62 = vpop.f32.mrb[157].mxu1 }
 0x337   :  { %v7797_v46 = vadd.f32 %v7796_v62, %v7795_v44  ;;  %v7798_v14 = vpop.f32.mrb[158].mxu1 }
 0x338   :  { %v7799_v38 = vpop.f32.mrb[159].mxu1 }
 0x339   :  { %v7800_v43 = vadd.f32 %v7799_v38, %v7798_v14  ;;  %v6445_v0 = vadd.f32 %v7797_v46, %v6388_v35  ;;  %v967_v46 = vsub.s32 0, %v10806_v26  ;;  %v971_v38 = vsub.s32 1, %v10806_v26 }
 0x33b   :  { %v6448_v21 = vadd.f32 %v7800_v43, %v6391_v25  ;;  %v9051_v43 = vld [vmem:[%s11741_s2] sm:$0x7] }
 0x33d   :  { %v7801_v18 = vpop.f32.mrb[160].mxu1 }
 0x33e   :  { %v7802_v48 = vpop.f32.mrb[161].mxu1 }
 0x33f   :  { %v7803_v7 = vadd.f32 %v7802_v48, %v7801_v18  ;;  %v7804_v32 = vpop.f32.mrb[162].mxu1 }
 0x340   :  { %v7805_v36 = vpop.f32.mrb[163].mxu1 }
 0x341   :  { %v7806_v28 = vadd.f32 %v7805_v36, %v7804_v32  ;;  %v6453_v11 = vadd.f32 %v7803_v7, %v6396_v30 }
 0x343   :  { %v6456_v6 = vadd.f32 %v7806_v28, %v6399_v59 }
 0x345   :  { %v7807_v29 = vpop.f32.mrb[164].mxu1 }
 0x346   :  { %v7808_v50 = vpop.f32.mrb[165].mxu1 }
 0x347   :  { %v7809_v1 = vadd.f32 %v7808_v50, %v7807_v29  ;;  %v7810_v51 = vpop.f32.mrb[166].mxu1 }
 0x348   :  { %v7811_v9 = vpop.f32.mrb[167].mxu1 }
 0x349   :  { %v7812_v24 = vadd.f32 %v7811_v9, %v7810_v51  ;;  %v6461_v55 = vadd.f32 %v7809_v1, %v6404_v63 }
 0x34b   :  { %v6464_v33 = vadd.f32 %v7812_v24, %v6407_v52 }
 0x355   :  { %v6501_v34 = vpop.f32.mrb[168].mxu1 }
 0x356   :  { %v6502_v22 = vadd.f32 %v6501_v34, %v6445_v0  ;;  %v7842_v16 = vpop.f32.mrb[169].mxu1  ;;  %v968_v0 = vrot.slane %v9051_v43, %v967_v46 }
 0x357   :  { %v6504_v31 = vpop.f32.mrb[170].mxu1 }
 0x358   :  { %v6526_v41 = vmax.f32 %v6502_v22, 0.0  ;;  %v6505_v13 = vadd.f32 %v6504_v31, %v6448_v21  ;;  %v7843_v12 = vpop.f32.mrb[171].mxu1  ;;  %v972_v21 = vrot.slane %v9051_v43, %v971_v38  ;;  %v7852_v18 = vadd.f32 %v10600_v54, %v968_v0 }
 0x359   :  { %v7856_v32 = vadd.f32 %v10614_v58, %v968_v0  ;;  %v7860_v54 = vadd.f32 %v10636_v2, %v968_v0  ;;  %v7864_v34 = vadd.f32 %v10643_v5, %v968_v0  ;;  %v7868_v5 = vadd.f32 %v10671_v15, %v968_v0 }
 0x35a   :  { %v7360_v40 = vpack.c.bf16 %v6526_v41, %v6526_v41  ;;  %v6529_v35 = vmax.f32 %v6505_v13, 0.0  ;;  %v7854_v48 = vadd.f32 %v10612_v57, %v972_v21  ;;  %v7858_v26 = vadd.f32 %v10619_v60, %v972_v21 }
 0x35b   :  { %v7862_v57 = vadd.f32 %v10641_v4, %v972_v21  ;;  %v7866_v31 = vadd.f32 %v10651_v8, %v972_v21 }
 0x35c   :  { %6603 = vst [vmem:[%s11742_s3 + $0x8] sm:$0xf] %v7360_v40  ;;  %v7362_v56 = vpack.c.bf16 %v6529_v35, %v6529_v35 }
 0x35d   :  { %v6509_v25 = vpop.f32.mrb[172].mxu1 }
 0x35e   :  { %6605 = vst [vmem:[%s11742_s3 + $0x14] sm:$0xf] %v7362_v56  ;;  %v6510_v42 = vadd.f32 %v6509_v25, %v6453_v11  ;;  %v7846_v47 = vpop.f32.mrb[173].mxu1 }
 0x35f   :  { %v6512_v37 = vpop.f32.mrb[174].mxu1  ;;  %v7870_v47 = vadd.f32 %v10679_v19, %v972_v21 }
 0x360   :  { %v6532_v17 = vmax.f32 %v6510_v42, 0.0  ;;  %v6513_v49 = vadd.f32 %v6512_v37, %v6456_v6  ;;  %v7847_v30 = vpop.f32.mrb[175].mxu1 }
 0x362   :  { %v7364_v27 = vpack.c.bf16 %v6532_v17, %v6532_v17  ;;  %v6535_v59 = vmax.f32 %v6513_v49, 0.0  ;;  %v7872_v17 = vadd.f32 %v10681_v20, %v968_v0 }
 0x364   :  { %6607 = vst [vmem:[%s11742_s3 + $0x20] sm:$0xf] %v7364_v27  ;;  %v7366_v3 = vpack.c.bf16 %v6535_v59, %v6535_v59  ;;  %v7874_v27 = vadd.f32 %v10689_v23, %v972_v21 }
 0x365   :  { %v6517_v39 = vpop.f32.mrb[176].mxu1 }
 0x366   :  { %6609 = vst [vmem:[%s11742_s3 + $0x2c] sm:$0xf] %v7366_v3  ;;  %v6518_v61 = vadd.f32 %v6517_v39, %v6461_v55  ;;  %v7850_v53 = vpop.f32.mrb[177].mxu1 }
 0x367   :  { %v6520_v45 = vpop.f32.mrb[178].mxu1 }
 0x368   :  { %v6538_v63 = vmax.f32 %v6518_v61, 0.0  ;;  %v6521_v10 = vadd.f32 %v6520_v45, %v6464_v33  ;;  %v7851_v52 = vpop.f32.mrb[179].mxu1 }
 0x36a   :  { %v7368_v44 = vpack.c.bf16 %v6538_v63, %v6538_v63  ;;  %v6541_v62 = vmax.f32 %v6521_v10, 0.0 }
 0x36c   :  { %6611 = vst [vmem:[%s11742_s3 + $0x38] sm:$0xf] %v7368_v44  ;;  %v7370_v14 = vpack.c.bf16 %v6541_v62, %v6541_v62 }
 0x36e   :  { %6613 = vst [vmem:[%s11742_s3 + $0x44] sm:$0xf] %v7370_v14 }
 0x376   :  { %v5697_v7 = vpop.f32.mrb[0].mxu0 }
 0x377   :  { %v7853_v36 = vadd.f32 %v7852_v18, %v5697_v7  ;;  %v5699_v28 = vpop.f32.mrb[1].mxu0 }
 0x378   :  { %v7855_v11 = vadd.f32 %v7854_v48, %v5699_v28  ;;  %v5701_v6 = vpop.f32.mrb[2].mxu0 }
 0x379   :  { %v6524_v29 = vmax.f32 %v7853_v36, 0.0  ;;  %v7857_v50 = vadd.f32 %v7856_v32, %v5701_v6  ;;  %v5703_v1 = vpop.f32.mrb[3].mxu0 }
 0x37a   :  { %v6525_v51 = vmax.f32 %v7855_v11, 0.0  ;;  %v7859_v9 = vadd.f32 %v7858_v26, %v5703_v1 }
 0x37b   :  { %v6527_v24 = vmax.f32 %v7857_v50, 0.0 }
 0x37c   :  { %v7359_v55 = vpack.c.bf16 %v6525_v51, %v6524_v29  ;;  %v6528_v33 = vmax.f32 %v7859_v9, 0.0 }
 0x37e   :  { %6602 = vst [vmem:[%s11742_s3] sm:$0xff] %v7359_v55  ;;  %v7361_v58 = vpack.c.bf16 %v6528_v33, %v6527_v24  ;;  %v5707_v60 = vpop.f32.mrb[4].mxu0 }
 0x37f   :  { %v7861_v22 = vadd.f32 %v7860_v54, %v5707_v60  ;;  %v5709_v16 = vpop.f32.mrb[5].mxu0 }
 0x380   :  { %6604 = vst [vmem:[%s11742_s3 + $0xc] sm:$0xff] %v7361_v58  ;;  %v7863_v41 = vadd.f32 %v7862_v57, %v5709_v16  ;;  %v5711_v2 = vpop.f32.mrb[6].mxu0 }
 0x381   :  { %v6530_v13 = vmax.f32 %v7861_v22, 0.0  ;;  %v7865_v4 = vadd.f32 %v7864_v34, %v5711_v2  ;;  %v5713_v12 = vpop.f32.mrb[7].mxu0 }
 0x382   :  { %v6531_v40 = vmax.f32 %v7863_v41, 0.0  ;;  %v7867_v35 = vadd.f32 %v7866_v31, %v5713_v12 }
 0x383   :  { %v6533_v56 = vmax.f32 %v7865_v4, 0.0 }
 0x384   :  { %v7363_v25 = vpack.c.bf16 %v6531_v40, %v6530_v13  ;;  %v6534_v42 = vmax.f32 %v7867_v35, 0.0 }
 0x386   :  { %6606 = vst [vmem:[%s11742_s3 + $0x18] sm:$0xff] %v7363_v25  ;;  %v7365_v8 = vpack.c.bf16 %v6534_v42, %v6533_v56  ;;  %v5717_v37 = vpop.f32.mrb[8].mxu0 }
 0x387   :  { %v7869_v49 = vadd.f32 %v7868_v5, %v5717_v37  ;;  %v5719_v30 = vpop.f32.mrb[9].mxu0 }
 0x388   :  { %6608 = vst [vmem:[%s11742_s3 + $0x24] sm:$0xff] %v7365_v8  ;;  %v7871_v59 = vadd.f32 %v7870_v47, %v5719_v30  ;;  %v5721_v15 = vpop.f32.mrb[10].mxu0 }
 0x389   :  { %v6536_v3 = vmax.f32 %v7869_v49, 0.0  ;;  %v7873_v19 = vadd.f32 %v7872_v17, %v5721_v15  ;;  %v5723_v39 = vpop.f32.mrb[11].mxu0 }
 0x38a   :  { %v6537_v61 = vmax.f32 %v7871_v59, 0.0  ;;  %v7875_v53 = vadd.f32 %v7874_v27, %v5723_v39 }
 0x38b   :  { %v6539_v45 = vmax.f32 %v7873_v19, 0.0 }
 0x38c   :  { %v7367_v63 = vpack.c.bf16 %v6537_v61, %v6536_v3  ;;  %v6540_v10 = vmax.f32 %v7875_v53, 0.0 }
 0x38e   :  { %6610 = vst [vmem:[%s11742_s3 + $0x30] sm:$0xff] %v7367_v63  ;;  %v7369_v20 = vpack.c.bf16 %v6540_v10, %v6539_v45 }
 0x390   :  { %6612 = vst [vmem:[%s11742_s3 + $0x3c] sm:$0xff] %v7369_v20 }

</bundles_post_ra>
